<compile_context>
chip_gen: v5e
topology: v5e:2x2
jax: 0.10.0
libtpu: 0.0.40
codegen_flags: <defaults>
</compile_context>

<pallas_src>
import jax
import jax.numpy as jnp
import numpy as np
from jax.experimental import pallas as pl
from jax.experimental.pallas import tpu as pltpu

HIDDEN = 32
INPUT_SIZE = 6
OUTPUT_SIZE = 6
NUM_LAYERS = 2
MAX_DECODER_SEQ_LENGTH = 10
PAD_IN = 32            # feature dims padded 6 -> 32
GATES = 4 * HIDDEN     # 128 (i, f, g, o) -- PyTorch gate order
NUM_CELLS = 4          # flattened encoder stack: enc1.l0, enc1.l1, enc2.l0, enc2.l1

REF_PREC = jax.lax.Precision.HIGHEST   # reference only (≈ exact f32)


def seq2seq_kernel(x_ref, wih0_ref, whh0_ref, wihe_ref, whhe_ref, benc_ref,
                   wihd_ref, whhd_ref, bdec_ref, wfused_ref, bfused_ref,
                   wd_ref, bd_ref, out_ref):
    # x_ref    : (T*B, 32)      time-major, flattened encoder input (cols 6.. zero)
    # wih0_ref : (32, 128)      W_ih^T enc1.l0 (rows 6.. zero, i/f/o cols pre-scaled 0.5)
    # whh0_ref : (32, 128)      W_hh^T enc1.l0 (scaled)
    # wihe_ref : (3, 32, 128)   W_ih^T for enc1.l1, enc2.l0, enc2.l1 (scaled)
    # whhe_ref : (3, 32, 128)   W_hh^T for enc1.l1, enc2.l0, enc2.l1 (scaled)
    # benc_ref : (4, 1, 128)    (b_ih + b_hh) for the 4 encoder cells (scaled)
    # wihd_ref : (4, 32, 128)   W_ih^T for dec1.l0, dec1.l1, dec2.l0, dec2.l1 (scaled)
    # whhd_ref : (4, 32, 128)   W_hh^T for the 4 decoder cells (scaled)
    # bdec_ref : (4, 1, 128)    (b_ih + b_hh) for the 4 decoder cells (scaled)
    # wfused_ref:(32, 128)      wd[:, :6] @ W_ih^T(dec1.l0)[:6, :]  (feedback fusion)
    # bfused_ref:(1, 128)       bd[:, :6] @ W_ih^T(dec1.l0)[:6, :]
    # wd_ref   : (32, 128)      dense weight^T (cols 6.. zero, UNscaled)
    # bd_ref   : (1, 128)       dense bias     (cols 6.. zero, UNscaled)
    # out_ref  : (10*B, 128)    decoder outputs, step-major (cols 6.. zero)
    B = out_ref.shape[0] // MAX_DECODER_SEQ_LENGTH
    T = x_ref.shape[0] // B
    H = HIDDEN
    L = NUM_CELLS

    def gates(z, c):
        # Weights/biases for i/f/o are pre-scaled by 0.5 at pack time, so
        # sigmoid(orig) == 0.5*tanh(z)+0.5; g column is unscaled -> tanh(z).
        # Only 2 serial EUP pushes per cell: tanh(z), tanh(c_new).
        t = jnp.tanh(z)
        i = 0.5 * t[:, 0 * H:1 * H] + 0.5
        f = 0.5 * t[:, 1 * H:2 * H] + 0.5
        g = t[:, 2 * H:3 * H]
        o = 0.5 * t[:, 3 * H:4 * H] + 0.5
        c_new = f * c + i * g
        h_new = o * jnp.tanh(c_new)
        return h_new, c_new

    # ---- loop-invariant weight / bias loads hoisted out of the unrolled loops ----
    whh0 = whh0_ref[...]
    wihe = [wihe_ref[j] for j in range(3)]
    whhe = [whhe_ref[j] for j in range(3)]
    be = [benc_ref[j] for j in range(4)]
    wihd = [wihd_ref[j] for j in range(4)]
    whhd = [whhd_ref[j] for j in range(4)]
    bde = [bdec_ref[j] for j in range(4)]
    wfused = wfused_ref[...]
    bfused = bfused_ref[...]
    wd = wd_ref[...]
    bd = bd_ref[...]

    # Hoisted encoder layer-0 input projection: one (T*B,32)x(32,128) matmul
    # (bias folded in); per-timestep rows bound before the recurrence.
    xw0 = jnp.dot(x_ref[...], wih0_ref[...],
                  preferred_element_type=jnp.float32) + be[0]       # (T*B, 128)
    xw0_t = [xw0[t * B:(t + 1) * B] for t in range(T)]

    zeros = jnp.zeros((B, H), jnp.float32)
    h = [zeros] * L
    c = [zeros] * L

    # ---- encoder: wavefront (anti-diagonal) schedule, fully unrolled ----
    # cell(l, t) depends only on cells of diagonal d-1 (h[l-1]@t and h[l],c[l]@t-1),
    # so the 32 cells serialize into only T+L-1 = 11 diagonal latencies.
    # Layers are processed in DECREASING order within a diagonal so cell(l, t)
    # reads h[l-1] before cell(l-1, t+1) overwrites it.
    for d in range(T + L - 1):
        for l in range(min(L - 1, d), -1, -1):
            t = d - l
            if not (0 <= t < T):
                continue
            if l == 0:
                z = xw0_t[t] + jnp.dot(h[0], whh0,
                                       preferred_element_type=jnp.float32)
            else:
                # concat-free: two independent (B,32)x(32,128) matmuls instead of a
                # lane-concat + (B,64)x(64,128) matmul (no XLU relayout on the chain).
                z = (jnp.dot(h[l - 1], wihe[l - 1],
                             preferred_element_type=jnp.float32)
                     + jnp.dot(h[l], whhe[l - 1],
                               preferred_element_type=jnp.float32)
                     + be[l])
            h[l], c[l] = gates(z, c[l])

    # ---- autoregressive decoder, 10 steps, fully unrolled ----
    # Decoder states are reset to the encoder final states every step (exactly
    # as in the reference), so every hidden-state projection is loop-invariant
    # and hoisted here, as is the step-0 input projection (last encoder step).
    rh = [jnp.dot(h[j], whhd[j], preferred_element_type=jnp.float32) + bde[j]
          for j in range(4)]
    z_first = jnp.dot(x_ref[(T - 1) * B:T * B, :], wihd[0],
                      preferred_element_type=jnp.float32) + rh[0]
    rh0f = rh[0] + bfused     # fused-feedback bias for steps >= 1

    dh3_steps = []
    z0 = z_first
    for s in range(MAX_DECODER_SEQ_LENGTH):
        dh0, _ = gates(z0, c[0])
        dh1, _ = gates(jnp.dot(dh0, wihd[1],
                               preferred_element_type=jnp.float32) + rh[1], c[1])
        dh2, _ = gates(jnp.dot(dh1, wihd[2],
                               preferred_element_type=jnp.float32) + rh[2], c[2])
        dh3, _ = gates(jnp.dot(dh2, wihd[3],
                               preferred_element_type=jnp.float32) + rh[3], c[3])
        dh3_steps.append(dh3)
        if s + 1 < MAX_DECODER_SEQ_LENGTH:
            # Fused feedback: dense(dh3) @ W_ih(dec1.l0) composed into a single
            # matmul (exact: no nonlinearity in between, padded lanes are zero).
            z0 = jnp.dot(dh3, wfused,
                         preferred_element_type=jnp.float32) + rh0f

    # Deferred output projection: one (10*B,32)x(32,128) matmul + a single
    # contiguous (10*B,128) store, all off the serial feedback chain.
    dh3_all = jnp.concatenate(dh3_steps, axis=0)                     # (10*B, 32)
    out_ref[...] = jnp.dot(dh3_all, wd,
                           preferred_element_type=jnp.float32) + bd  # (10*B, 128)


def seq2seq_forward(encoder_input, others_fut_input, params, decoder_input=None):
    # TODO(synk): the `target_user_only == False` branch of the reference
    # (concat with others_fut_input along dim=1 + extra unsqueeze) is
    # shape-inconsistent with the autoregressive feedback and is not
    # implemented; others_fut_input is accepted but unused.
    del others_fut_input
    assert decoder_input is None  # reference path exercised here (last encoder step)
    B, T, F = encoder_input.shape
    assert F == INPUT_SIZE
    x = jnp.transpose(encoder_input, (1, 0, 2)).astype(jnp.float32)   # (T, B, F)
    x = jnp.pad(x, ((0, 0), (0, 0), (0, PAD_IN - F)))                 # (T, B, 32)
    x = x.reshape(T * B, PAD_IN)                                      # (T*B, 32)

    out = pl.pallas_call(
        seq2seq_kernel,
        out_shape=jax.ShapeDtypeStruct(
            (MAX_DECODER_SEQ_LENGTH * B, GATES), jnp.float32),
        in_specs=[pl.BlockSpec(memory_space=pltpu.MemorySpace.VMEM)] * 13,
        out_specs=pl.BlockSpec(memory_space=pltpu.MemorySpace.VMEM),
    )(x, params["wih0"], params["whh0"], params["wihe"], params["whhe"],
      params["benc"], params["wihd"], params["whhd"], params["bdec"],
      params["wfused"], params["bfused"], params["wd"], params["bd"])

    # (10*B, 128) -> (B, 10, 6)
    out = out.reshape(MAX_DECODER_SEQ_LENGTH, B, GATES)[:, :, :OUTPUT_SIZE]
    return jnp.transpose(out, (1, 0, 2))


def init_params(key):
    """Deterministic init mimicking PyTorch's uniform(-1/sqrt(H), 1/sqrt(H))."""
    def uni(k, shape, bound):
        return jax.random.uniform(k, shape, jnp.float32, -bound, bound)

    cell_in_sizes = [INPUT_SIZE, HIDDEN,   # encoder1 l0, l1
                     HIDDEN, HIDDEN,       # encoder2 l0, l1
                     OUTPUT_SIZE, HIDDEN,  # decoder1 l0, l1
                     HIDDEN, HIDDEN]       # decoder2 l0, l1
    bound = 1.0 / np.sqrt(HIDDEN)

    keys = jax.random.split(key, 8 * 4 + 2)
    raw = []
    for idx, in_size in enumerate(cell_in_sizes):
        kw = keys[idx * 4: idx * 4 + 4]
        w_ih = np.asarray(uni(kw[0], (GATES, in_size), bound))   # PyTorch (4H, in)
        w_hh = np.asarray(uni(kw[1], (GATES, HIDDEN), bound))
        b_ih = np.asarray(uni(kw[2], (GATES,), bound))
        b_hh = np.asarray(uni(kw[3], (GATES,), bound))
        raw.append((w_ih, w_hh, b_ih, b_hh))

    w_d = np.asarray(uni(keys[32], (OUTPUT_SIZE, HIDDEN), bound))  # Linear(32, 6)
    b_d = np.asarray(uni(keys[33], (OUTPUT_SIZE,), bound))

    # ---- pack for the kernel ----
    # sigmoid(x) = 0.5*tanh(0.5*x) + 0.5 -> pre-scale i/f/o gate columns by 0.5
    # (PyTorch gate order i,f,g,o); the g columns stay unscaled (plain tanh).
    H = HIDDEN
    gscale = np.ones((GATES,), np.float32)
    gscale[0 * H:2 * H] = 0.5      # i, f
    gscale[3 * H:4 * H] = 0.5      # o

    wih0 = np.zeros((PAD_IN, GATES), np.float32)
    wih0[:INPUT_SIZE, :] = raw[0][0].T * gscale
    whh0 = np.asarray(raw[0][1].T * gscale, np.float32)

    wihe = np.zeros((3, HIDDEN, GATES), np.float32)
    whhe = np.zeros((3, HIDDEN, GATES), np.float32)
    for j, cell in enumerate((1, 2, 3)):
        wihe[j] = raw[cell][0].T * gscale
        whhe[j] = raw[cell][1].T * gscale

    benc = np.zeros((4, 1, GATES), np.float32)
    for j in range(4):
        benc[j, 0, :] = (raw[j][2] + raw[j][3]) * gscale

    wihd = np.zeros((4, PAD_IN, GATES), np.float32)
    whhd = np.zeros((4, HIDDEN, GATES), np.float32)
    bdec = np.zeros((4, 1, GATES), np.float32)
    for j, cell in enumerate((4, 5, 6, 7)):
        in_size = cell_in_sizes[cell]
        wihd[j, :in_size, :] = raw[cell][0].T * gscale
        whhd[j, :, :] = raw[cell][1].T * gscale
        bdec[j, 0, :] = (raw[cell][2] + raw[cell][3]) * gscale

    # dense projection (UNscaled -- it produces the visible outputs)
    wd = np.zeros((HIDDEN, GATES), np.float32)
    wd[:, :OUTPUT_SIZE] = w_d.T
    bd = np.zeros((1, GATES), np.float32)
    bd[0, :OUTPUT_SIZE] = b_d

    # fused decoder feedback: dense(.) composed with W_ih^T(dec1.l0) (already
    # gate-scaled); exact because there is no nonlinearity in between and the
    # zero padding keeps lanes 6.. exactly zero.
    wfused = np.asarray(w_d.T @ wihd[0, :OUTPUT_SIZE, :], np.float32)       # (32, 128)
    bfused = np.asarray(b_d[None, :] @ wihd[0, :OUTPUT_SIZE, :], np.float32)  # (1, 128)

    params = dict(wih0=jnp.asarray(wih0), whh0=jnp.asarray(whh0),
                  wihe=jnp.asarray(wihe), whhe=jnp.asarray(whhe),
                  benc=jnp.asarray(benc), wihd=jnp.asarray(wihd),
                  whhd=jnp.asarray(whhd), bdec=jnp.asarray(bdec),
                  wfused=jnp.asarray(wfused), bfused=jnp.asarray(bfused),
                  wd=jnp.asarray(wd), bd=jnp.asarray(bd))
    return params, raw, (w_d, b_d)


def reference_forward(encoder_input, raw, dense_params):
    """Pure-JAX reference replicating the PyTorch module semantics (f32)."""
    def cell(x, h, c, p):
        w_ih, w_hh, b_ih, b_hh = p
        z = (jnp.dot(x, w_ih.T, precision=REF_PREC) + b_ih
             + jnp.dot(h, w_hh.T, precision=REF_PREC) + b_hh)
        i, f, g, o = jnp.split(z, 4, axis=-1)
        c = jax.nn.sigmoid(f) * c + jax.nn.sigmoid(i) * jnp.tanh(g)
        h = jax.nn.sigmoid(o) * jnp.tanh(c)
        return h, c

    B, T, _ = encoder_input.shape
    zeros = jnp.zeros((B, HIDDEN), jnp.float32)
    h = [zeros] * 4
    c = [zeros] * 4
    for t in range(T):
        x_t = encoder_input[:, t, :]
        h[0], c[0] = cell(x_t, h[0], c[0], raw[0])
        h[1], c[1] = cell(h[0], h[1], c[1], raw[1])
        h[2], c[2] = cell(h[1], h[2], c[2], raw[2])
        h[3], c[3] = cell(h[2], h[3], c[3], raw[3])

    w_d, b_d = dense_params
    inputs = encoder_input[:, -1, :]
    outs = []
    for _ in range(MAX_DECODER_SEQ_LENGTH):
        dh0, _ = cell(inputs, h[0], c[0], raw[4])
        dh1, _ = cell(dh0, h[1], c[1], raw[5])
        dh2, _ = cell(dh1, h[2], c[2], raw[6])
        dh3, _ = cell(dh2, h[3], c[3], raw[7])
        o = jnp.dot(dh3, w_d.T, precision=REF_PREC) + b_d
        outs.append(o[:, None, :])
        inputs = o
    return jnp.concatenate(outs, axis=1)


if __name__ == "__main__":
    key = jax.random.PRNGKey(0)
    kp, kx, ko = jax.random.split(key, 3)
    params, raw, dense_p = init_params(kp)

    B, T = 2, 8
    encoder_input = jax.random.normal(kx, (B, T, INPUT_SIZE), jnp.float32)
    others_fut_input = jax.random.normal(ko, (B, 3, HIDDEN), jnp.float32)  # unused

    out = seq2seq_forward(encoder_input, others_fut_input, params)
    out = jax.block_until_ready(out)

    ref = reference_forward(encoder_input, raw, dense_p)
    assert out.shape == (B, MAX_DECODER_SEQ_LENGTH, OUTPUT_SIZE)
    # Kernel matmuls run at DEFAULT precision (single bf16 MXU pass); the
    # Wfused feedback fusion and tanh-form sigmoid are exact in real arithmetic
    # but follow different bf16/EUP rounding paths, compounded through 18
    # sequential LSTM cells + 10-step autoregressive feedback, so the tolerance
    # is bf16-class with a little extra headroom.
    np.testing.assert_allclose(np.asarray(out), np.asarray(ref),
                               rtol=3e-2, atol=3e-2)
    print("KERNEL_OK")
</pallas_src>

<mosaic_0001>
module attributes {stable_mosaic.version = 11 : i64} {
  func.func @seq2seq_kernel(%arg0: memref<16x32xf32, #tpu.memory_space<vmem>>, %arg1: memref<32x128xf32, #tpu.memory_space<vmem>>, %arg2: memref<32x128xf32, #tpu.memory_space<vmem>>, %arg3: memref<3x32x128xf32, #tpu.memory_space<vmem>>, %arg4: memref<3x32x128xf32, #tpu.memory_space<vmem>>, %arg5: memref<4x1x128xf32, #tpu.memory_space<vmem>>, %arg6: memref<4x32x128xf32, #tpu.memory_space<vmem>>, %arg7: memref<4x32x128xf32, #tpu.memory_space<vmem>>, %arg8: memref<4x1x128xf32, #tpu.memory_space<vmem>>, %arg9: memref<32x128xf32, #tpu.memory_space<vmem>>, %arg10: memref<1x128xf32, #tpu.memory_space<vmem>>, %arg11: memref<32x128xf32, #tpu.memory_space<vmem>>, %arg12: memref<1x128xf32, #tpu.memory_space<vmem>>, %arg13: memref<20x128xf32, #tpu.memory_space<vmem>>) attributes {dimension_semantics = [], scalar_prefetch = 0 : i64, scratch_operands = 0 : i64, tpu.core_type = #tpu.core_type<tc>} {
    %c0 = arith.constant 0 : index
    %c0_0 = arith.constant 0 : index
    %0 = vector.load %arg2[%c0, %c0_0] : memref<32x128xf32, #tpu.memory_space<vmem>>, vector<32x128xf32>
    %c0_1 = arith.constant 0 : index
    %c0_2 = arith.constant 0 : index
    %c0_3 = arith.constant 0 : index
    %1 = vector.load %arg3[%c0_1, %c0_2, %c0_3] : memref<3x32x128xf32, #tpu.memory_space<vmem>>, vector<1x32x128xf32>
    %2 = vector.shape_cast %1 : vector<1x32x128xf32> to vector<32x128xf32>
    %c1 = arith.constant 1 : index
    %c0_4 = arith.constant 0 : index
    %c0_5 = arith.constant 0 : index
    %3 = vector.load %arg3[%c1, %c0_4, %c0_5] : memref<3x32x128xf32, #tpu.memory_space<vmem>>, vector<1x32x128xf32>
    %4 = vector.shape_cast %3 : vector<1x32x128xf32> to vector<32x128xf32>
    %c2 = arith.constant 2 : index
    %c0_6 = arith.constant 0 : index
    %c0_7 = arith.constant 0 : index
    %5 = vector.load %arg3[%c2, %c0_6, %c0_7] : memref<3x32x128xf32, #tpu.memory_space<vmem>>, vector<1x32x128xf32>
    %6 = vector.shape_cast %5 : vector<1x32x128xf32> to vector<32x128xf32>
    %c0_8 = arith.constant 0 : index
    %c0_9 = arith.constant 0 : index
    %c0_10 = arith.constant 0 : index
    %7 = vector.load %arg4[%c0_8, %c0_9, %c0_10] : memref<3x32x128xf32, #tpu.memory_space<vmem>>, vector<1x32x128xf32>
    %8 = vector.shape_cast %7 : vector<1x32x128xf32> to vector<32x128xf32>
    %c1_11 = arith.constant 1 : index
    %c0_12 = arith.constant 0 : index
    %c0_13 = arith.constant 0 : index
    %9 = vector.load %arg4[%c1_11, %c0_12, %c0_13] : memref<3x32x128xf32, #tpu.memory_space<vmem>>, vector<1x32x128xf32>
    %10 = vector.shape_cast %9 : vector<1x32x128xf32> to vector<32x128xf32>
    %c2_14 = arith.constant 2 : index
    %c0_15 = arith.constant 0 : index
    %c0_16 = arith.constant 0 : index
    %11 = vector.load %arg4[%c2_14, %c0_15, %c0_16] : memref<3x32x128xf32, #tpu.memory_space<vmem>>, vector<1x32x128xf32>
    %12 = vector.shape_cast %11 : vector<1x32x128xf32> to vector<32x128xf32>
    %c0_17 = arith.constant 0 : index
    %c0_18 = arith.constant 0 : index
    %c0_19 = arith.constant 0 : index
    %13 = vector.load %arg5[%c0_17, %c0_18, %c0_19] : memref<4x1x128xf32, #tpu.memory_space<vmem>>, vector<1x1x128xf32>
    %14 = vector.shape_cast %13 : vector<1x1x128xf32> to vector<1x128xf32>
    %c1_20 = arith.constant 1 : index
    %c0_21 = arith.constant 0 : index
    %c0_22 = arith.constant 0 : index
    %15 = vector.load %arg5[%c1_20, %c0_21, %c0_22] : memref<4x1x128xf32, #tpu.memory_space<vmem>>, vector<1x1x128xf32>
    %16 = vector.shape_cast %15 : vector<1x1x128xf32> to vector<1x128xf32>
    %c2_23 = arith.constant 2 : index
    %c0_24 = arith.constant 0 : index
    %c0_25 = arith.constant 0 : index
    %17 = vector.load %arg5[%c2_23, %c0_24, %c0_25] : memref<4x1x128xf32, #tpu.memory_space<vmem>>, vector<1x1x128xf32>
    %18 = vector.shape_cast %17 : vector<1x1x128xf32> to vector<1x128xf32>
    %c3 = arith.constant 3 : index
    %c0_26 = arith.constant 0 : index
    %c0_27 = arith.constant 0 : index
    %19 = vector.load %arg5[%c3, %c0_26, %c0_27] : memref<4x1x128xf32, #tpu.memory_space<vmem>>, vector<1x1x128xf32>
    %20 = vector.shape_cast %19 : vector<1x1x128xf32> to vector<1x128xf32>
    %c0_28 = arith.constant 0 : index
    %c0_29 = arith.constant 0 : index
    %c0_30 = arith.constant 0 : index
    %21 = vector.load %arg6[%c0_28, %c0_29, %c0_30] : memref<4x32x128xf32, #tpu.memory_space<vmem>>, vector<1x32x128xf32>
    %22 = vector.shape_cast %21 : vector<1x32x128xf32> to vector<32x128xf32>
    %c1_31 = arith.constant 1 : index
    %c0_32 = arith.constant 0 : index
    %c0_33 = arith.constant 0 : index
    %23 = vector.load %arg6[%c1_31, %c0_32, %c0_33] : memref<4x32x128xf32, #tpu.memory_space<vmem>>, vector<1x32x128xf32>
    %24 = vector.shape_cast %23 : vector<1x32x128xf32> to vector<32x128xf32>
    %c2_34 = arith.constant 2 : index
    %c0_35 = arith.constant 0 : index
    %c0_36 = arith.constant 0 : index
    %25 = vector.load %arg6[%c2_34, %c0_35, %c0_36] : memref<4x32x128xf32, #tpu.memory_space<vmem>>, vector<1x32x128xf32>
    %26 = vector.shape_cast %25 : vector<1x32x128xf32> to vector<32x128xf32>
    %c3_37 = arith.constant 3 : index
    %c0_38 = arith.constant 0 : index
    %c0_39 = arith.constant 0 : index
    %27 = vector.load %arg6[%c3_37, %c0_38, %c0_39] : memref<4x32x128xf32, #tpu.memory_space<vmem>>, vector<1x32x128xf32>
    %28 = vector.shape_cast %27 : vector<1x32x128xf32> to vector<32x128xf32>
    %c0_40 = arith.constant 0 : index
    %c0_41 = arith.constant 0 : index
    %c0_42 = arith.constant 0 : index
    %29 = vector.load %arg7[%c0_40, %c0_41, %c0_42] : memref<4x32x128xf32, #tpu.memory_space<vmem>>, vector<1x32x128xf32>
    %30 = vector.shape_cast %29 : vector<1x32x128xf32> to vector<32x128xf32>
    %c1_43 = arith.constant 1 : index
    %c0_44 = arith.constant 0 : index
    %c0_45 = arith.constant 0 : index
    %31 = vector.load %arg7[%c1_43, %c0_44, %c0_45] : memref<4x32x128xf32, #tpu.memory_space<vmem>>, vector<1x32x128xf32>
    %32 = vector.shape_cast %31 : vector<1x32x128xf32> to vector<32x128xf32>
    %c2_46 = arith.constant 2 : index
    %c0_47 = arith.constant 0 : index
    %c0_48 = arith.constant 0 : index
    %33 = vector.load %arg7[%c2_46, %c0_47, %c0_48] : memref<4x32x128xf32, #tpu.memory_space<vmem>>, vector<1x32x128xf32>
    %34 = vector.shape_cast %33 : vector<1x32x128xf32> to vector<32x128xf32>
    %c3_49 = arith.constant 3 : index
    %c0_50 = arith.constant 0 : index
    %c0_51 = arith.constant 0 : index
    %35 = vector.load %arg7[%c3_49, %c0_50, %c0_51] : memref<4x32x128xf32, #tpu.memory_space<vmem>>, vector<1x32x128xf32>
    %36 = vector.shape_cast %35 : vector<1x32x128xf32> to vector<32x128xf32>
    %c0_52 = arith.constant 0 : index
    %c0_53 = arith.constant 0 : index
    %c0_54 = arith.constant 0 : index
    %37 = vector.load %arg8[%c0_52, %c0_53, %c0_54] : memref<4x1x128xf32, #tpu.memory_space<vmem>>, vector<1x1x128xf32>
    %38 = vector.shape_cast %37 : vector<1x1x128xf32> to vector<1x128xf32>
    %c1_55 = arith.constant 1 : index
    %c0_56 = arith.constant 0 : index
    %c0_57 = arith.constant 0 : index
    %39 = vector.load %arg8[%c1_55, %c0_56, %c0_57] : memref<4x1x128xf32, #tpu.memory_space<vmem>>, vector<1x1x128xf32>
    %40 = vector.shape_cast %39 : vector<1x1x128xf32> to vector<1x128xf32>
    %c2_58 = arith.constant 2 : index
    %c0_59 = arith.constant 0 : index
    %c0_60 = arith.constant 0 : index
    %41 = vector.load %arg8[%c2_58, %c0_59, %c0_60] : memref<4x1x128xf32, #tpu.memory_space<vmem>>, vector<1x1x128xf32>
    %42 = vector.shape_cast %41 : vector<1x1x128xf32> to vector<1x128xf32>
    %c3_61 = arith.constant 3 : index
    %c0_62 = arith.constant 0 : index
    %c0_63 = arith.constant 0 : index
    %43 = vector.load %arg8[%c3_61, %c0_62, %c0_63] : memref<4x1x128xf32, #tpu.memory_space<vmem>>, vector<1x1x128xf32>
    %44 = vector.shape_cast %43 : vector<1x1x128xf32> to vector<1x128xf32>
    %c0_64 = arith.constant 0 : index
    %c0_65 = arith.constant 0 : index
    %45 = vector.load %arg9[%c0_64, %c0_65] : memref<32x128xf32, #tpu.memory_space<vmem>>, vector<32x128xf32>
    %c0_66 = arith.constant 0 : index
    %c0_67 = arith.constant 0 : index
    %46 = vector.load %arg10[%c0_66, %c0_67] : memref<1x128xf32, #tpu.memory_space<vmem>>, vector<1x128xf32>
    %c0_68 = arith.constant 0 : index
    %c0_69 = arith.constant 0 : index
    %47 = vector.load %arg11[%c0_68, %c0_69] : memref<32x128xf32, #tpu.memory_space<vmem>>, vector<32x128xf32>
    %c0_70 = arith.constant 0 : index
    %c0_71 = arith.constant 0 : index
    %48 = vector.load %arg12[%c0_70, %c0_71] : memref<1x128xf32, #tpu.memory_space<vmem>>, vector<1x128xf32>
    %c0_72 = arith.constant 0 : index
    %c0_73 = arith.constant 0 : index
    %49 = vector.load %arg0[%c0_72, %c0_73] : memref<16x32xf32, #tpu.memory_space<vmem>>, vector<16x32xf32>
    %c0_74 = arith.constant 0 : index
    %c0_75 = arith.constant 0 : index
    %50 = vector.load %arg1[%c0_74, %c0_75] : memref<32x128xf32, #tpu.memory_space<vmem>>, vector<32x128xf32>
    %cst = arith.constant dense<0.000000e+00> : vector<16x128xf32>
    %51 = tpu.matmul %49, %50, %cst {dimension_numbers = #tpu.dot_dimension_numbers<[1], [0], [0], [1], [0, 0, 1, 1], [], []>} : vector<16x32xf32>, vector<32x128xf32>, vector<16x128xf32> -> vector<16x128xf32>
    %52 = vector.broadcast %14 : vector<1x128xf32> to vector<16x128xf32>
    %53 = arith.addf %51, %52 : vector<16x128xf32>
    %54 = vector.extract_strided_slice %53 {offsets = [0, 0], sizes = [2, 128], strides = [1, 1]} : vector<16x128xf32> to vector<2x128xf32>
    %55 = vector.extract_strided_slice %53 {offsets = [2, 0], sizes = [2, 128], strides = [1, 1]} : vector<16x128xf32> to vector<2x128xf32>
    %56 = vector.extract_strided_slice %53 {offsets = [4, 0], sizes = [2, 128], strides = [1, 1]} : vector<16x128xf32> to vector<2x128xf32>
    %57 = vector.extract_strided_slice %53 {offsets = [6, 0], sizes = [2, 128], strides = [1, 1]} : vector<16x128xf32> to vector<2x128xf32>
    %58 = vector.extract_strided_slice %53 {offsets = [8, 0], sizes = [2, 128], strides = [1, 1]} : vector<16x128xf32> to vector<2x128xf32>
    %59 = vector.extract_strided_slice %53 {offsets = [10, 0], sizes = [2, 128], strides = [1, 1]} : vector<16x128xf32> to vector<2x128xf32>
    %60 = vector.extract_strided_slice %53 {offsets = [12, 0], sizes = [2, 128], strides = [1, 1]} : vector<16x128xf32> to vector<2x128xf32>
    %61 = vector.extract_strided_slice %53 {offsets = [14, 0], sizes = [2, 128], strides = [1, 1]} : vector<16x128xf32> to vector<2x128xf32>
    %cst_76 = arith.constant 0.000000e+00 : f32
    %62 = vector.broadcast %cst_76 : f32 to vector<2x32xf32>
    %cst_77 = arith.constant dense<0.000000e+00> : vector<2x128xf32>
    %63 = tpu.matmul %62, %0, %cst_77 {dimension_numbers = #tpu.dot_dimension_numbers<[1], [0], [0], [1], [0, 0, 1, 1], [], []>} : vector<2x32xf32>, vector<32x128xf32>, vector<2x128xf32> -> vector<2x128xf32>
    %64 = arith.addf %54, %63 : vector<2x128xf32>
    %65 = math.tanh %64 : vector<2x128xf32>
    %66 = vector.extract_strided_slice %65 {offsets = [0, 0], sizes = [2, 32], strides = [1, 1]} : vector<2x128xf32> to vector<2x32xf32>
    %cst_78 = arith.constant 5.000000e-01 : f32
    %67 = vector.broadcast %cst_78 : f32 to vector<2x32xf32>
    %68 = arith.mulf %67, %66 : vector<2x32xf32>
    %cst_79 = arith.constant 5.000000e-01 : f32
    %69 = vector.broadcast %cst_79 : f32 to vector<2x32xf32>
    %70 = arith.addf %68, %69 : vector<2x32xf32>
    %71 = vector.extract_strided_slice %65 {offsets = [0, 32], sizes = [2, 32], strides = [1, 1]} : vector<2x128xf32> to vector<2x32xf32>
    %cst_80 = arith.constant 5.000000e-01 : f32
    %72 = vector.broadcast %cst_80 : f32 to vector<2x32xf32>
    %73 = arith.mulf %72, %71 : vector<2x32xf32>
    %cst_81 = arith.constant 5.000000e-01 : f32
    %74 = vector.broadcast %cst_81 : f32 to vector<2x32xf32>
    %75 = arith.addf %73, %74 : vector<2x32xf32>
    %76 = vector.extract_strided_slice %65 {offsets = [0, 64], sizes = [2, 32], strides = [1, 1]} : vector<2x128xf32> to vector<2x32xf32>
    %77 = vector.extract_strided_slice %65 {offsets = [0, 96], sizes = [2, 32], strides = [1, 1]} : vector<2x128xf32> to vector<2x32xf32>
    %cst_82 = arith.constant 5.000000e-01 : f32
    %78 = vector.broadcast %cst_82 : f32 to vector<2x32xf32>
    %79 = arith.mulf %78, %77 : vector<2x32xf32>
    %cst_83 = arith.constant 5.000000e-01 : f32
    %80 = vector.broadcast %cst_83 : f32 to vector<2x32xf32>
    %81 = arith.addf %79, %80 : vector<2x32xf32>
    %82 = arith.mulf %75, %62 : vector<2x32xf32>
    %83 = arith.mulf %70, %76 : vector<2x32xf32>
    %84 = arith.addf %82, %83 : vector<2x32xf32>
    %85 = math.tanh %84 : vector<2x32xf32>
    %86 = arith.mulf %81, %85 : vector<2x32xf32>
    %cst_84 = arith.constant dense<0.000000e+00> : vector<2x128xf32>
    %87 = tpu.matmul %86, %2, %cst_84 {dimension_numbers = #tpu.dot_dimension_numbers<[1], [0], [0], [1], [0, 0, 1, 1], [], []>} : vector<2x32xf32>, vector<32x128xf32>, vector<2x128xf32> -> vector<2x128xf32>
    %cst_85 = arith.constant dense<0.000000e+00> : vector<2x128xf32>
    %88 = tpu.matmul %62, %8, %cst_85 {dimension_numbers = #tpu.dot_dimension_numbers<[1], [0], [0], [1], [0, 0, 1, 1], [], []>} : vector<2x32xf32>, vector<32x128xf32>, vector<2x128xf32> -> vector<2x128xf32>
    %89 = arith.addf %87, %88 : vector<2x128xf32>
    %90 = vector.broadcast %16 : vector<1x128xf32> to vector<2x128xf32>
    %91 = arith.addf %89, %90 : vector<2x128xf32>
    %92 = math.tanh %91 : vector<2x128xf32>
    %93 = vector.extract_strided_slice %92 {offsets = [0, 0], sizes = [2, 32], strides = [1, 1]} : vector<2x128xf32> to vector<2x32xf32>
    %cst_86 = arith.constant 5.000000e-01 : f32
    %94 = vector.broadcast %cst_86 : f32 to vector<2x32xf32>
    %95 = arith.mulf %94, %93 : vector<2x32xf32>
    %cst_87 = arith.constant 5.000000e-01 : f32
    %96 = vector.broadcast %cst_87 : f32 to vector<2x32xf32>
    %97 = arith.addf %95, %96 : vector<2x32xf32>
    %98 = vector.extract_strided_slice %92 {offsets = [0, 32], sizes = [2, 32], strides = [1, 1]} : vector<2x128xf32> to vector<2x32xf32>
    %cst_88 = arith.constant 5.000000e-01 : f32
    %99 = vector.broadcast %cst_88 : f32 to vector<2x32xf32>
    %100 = arith.mulf %99, %98 : vector<2x32xf32>
    %cst_89 = arith.constant 5.000000e-01 : f32
    %101 = vector.broadcast %cst_89 : f32 to vector<2x32xf32>
    %102 = arith.addf %100, %101 : vector<2x32xf32>
    %103 = vector.extract_strided_slice %92 {offsets = [0, 64], sizes = [2, 32], strides = [1, 1]} : vector<2x128xf32> to vector<2x32xf32>
    %104 = vector.extract_strided_slice %92 {offsets = [0, 96], sizes = [2, 32], strides = [1, 1]} : vector<2x128xf32> to vector<2x32xf32>
    %cst_90 = arith.constant 5.000000e-01 : f32
    %105 = vector.broadcast %cst_90 : f32 to vector<2x32xf32>
    %106 = arith.mulf %105, %104 : vector<2x32xf32>
    %cst_91 = arith.constant 5.000000e-01 : f32
    %107 = vector.broadcast %cst_91 : f32 to vector<2x32xf32>
    %108 = arith.addf %106, %107 : vector<2x32xf32>
    %109 = arith.mulf %102, %62 : vector<2x32xf32>
    %110 = arith.mulf %97, %103 : vector<2x32xf32>
    %111 = arith.addf %109, %110 : vector<2x32xf32>
    %112 = math.tanh %111 : vector<2x32xf32>
    %113 = arith.mulf %108, %112 : vector<2x32xf32>
    %cst_92 = arith.constant dense<0.000000e+00> : vector<2x128xf32>
    %114 = tpu.matmul %86, %0, %cst_92 {dimension_numbers = #tpu.dot_dimension_numbers<[1], [0], [0], [1], [0, 0, 1, 1], [], []>} : vector<2x32xf32>, vector<32x128xf32>, vector<2x128xf32> -> vector<2x128xf32>
    %115 = arith.addf %55, %114 : vector<2x128xf32>
    %116 = math.tanh %115 : vector<2x128xf32>
    %117 = vector.extract_strided_slice %116 {offsets = [0, 0], sizes = [2, 32], strides = [1, 1]} : vector<2x128xf32> to vector<2x32xf32>
    %cst_93 = arith.constant 5.000000e-01 : f32
    %118 = vector.broadcast %cst_93 : f32 to vector<2x32xf32>
    %119 = arith.mulf %118, %117 : vector<2x32xf32>
    %cst_94 = arith.constant 5.000000e-01 : f32
    %120 = vector.broadcast %cst_94 : f32 to vector<2x32xf32>
    %121 = arith.addf %119, %120 : vector<2x32xf32>
    %122 = vector.extract_strided_slice %116 {offsets = [0, 32], sizes = [2, 32], strides = [1, 1]} : vector<2x128xf32> to vector<2x32xf32>
    %cst_95 = arith.constant 5.000000e-01 : f32
    %123 = vector.broadcast %cst_95 : f32 to vector<2x32xf32>
    %124 = arith.mulf %123, %122 : vector<2x32xf32>
    %cst_96 = arith.constant 5.000000e-01 : f32
    %125 = vector.broadcast %cst_96 : f32 to vector<2x32xf32>
    %126 = arith.addf %124, %125 : vector<2x32xf32>
    %127 = vector.extract_strided_slice %116 {offsets = [0, 64], sizes = [2, 32], strides = [1, 1]} : vector<2x128xf32> to vector<2x32xf32>
    %128 = vector.extract_strided_slice %116 {offsets = [0, 96], sizes = [2, 32], strides = [1, 1]} : vector<2x128xf32> to vector<2x32xf32>
    %cst_97 = arith.constant 5.000000e-01 : f32
    %129 = vector.broadcast %cst_97 : f32 to vector<2x32xf32>
    %130 = arith.mulf %129, %128 : vector<2x32xf32>
    %cst_98 = arith.constant 5.000000e-01 : f32
    %131 = vector.broadcast %cst_98 : f32 to vector<2x32xf32>
    %132 = arith.addf %130, %131 : vector<2x32xf32>
    %133 = arith.mulf %126, %84 : vector<2x32xf32>
    %134 = arith.mulf %121, %127 : vector<2x32xf32>
    %135 = arith.addf %133, %134 : vector<2x32xf32>
    %136 = math.tanh %135 : vector<2x32xf32>
    %137 = arith.mulf %132, %136 : vector<2x32xf32>
    %cst_99 = arith.constant dense<0.000000e+00> : vector<2x128xf32>
    %138 = tpu.matmul %113, %4, %cst_99 {dimension_numbers = #tpu.dot_dimension_numbers<[1], [0], [0], [1], [0, 0, 1, 1], [], []>} : vector<2x32xf32>, vector<32x128xf32>, vector<2x128xf32> -> vector<2x128xf32>
    %cst_100 = arith.constant dense<0.000000e+00> : vector<2x128xf32>
    %139 = tpu.matmul %62, %10, %cst_100 {dimension_numbers = #tpu.dot_dimension_numbers<[1], [0], [0], [1], [0, 0, 1, 1], [], []>} : vector<2x32xf32>, vector<32x128xf32>, vector<2x128xf32> -> vector<2x128xf32>
    %140 = arith.addf %138, %139 : vector<2x128xf32>
    %141 = vector.broadcast %18 : vector<1x128xf32> to vector<2x128xf32>
    %142 = arith.addf %140, %141 : vector<2x128xf32>
    %143 = math.tanh %142 : vector<2x128xf32>
    %144 = vector.extract_strided_slice %143 {offsets = [0, 0], sizes = [2, 32], strides = [1, 1]} : vector<2x128xf32> to vector<2x32xf32>
    %cst_101 = arith.constant 5.000000e-01 : f32
    %145 = vector.broadcast %cst_101 : f32 to vector<2x32xf32>
    %146 = arith.mulf %145, %144 : vector<2x32xf32>
    %cst_102 = arith.constant 5.000000e-01 : f32
    %147 = vector.broadcast %cst_102 : f32 to vector<2x32xf32>
    %148 = arith.addf %146, %147 : vector<2x32xf32>
    %149 = vector.extract_strided_slice %143 {offsets = [0, 32], sizes = [2, 32], strides = [1, 1]} : vector<2x128xf32> to vector<2x32xf32>
    %cst_103 = arith.constant 5.000000e-01 : f32
    %150 = vector.broadcast %cst_103 : f32 to vector<2x32xf32>
    %151 = arith.mulf %150, %149 : vector<2x32xf32>
    %cst_104 = arith.constant 5.000000e-01 : f32
    %152 = vector.broadcast %cst_104 : f32 to vector<2x32xf32>
    %153 = arith.addf %151, %152 : vector<2x32xf32>
    %154 = vector.extract_strided_slice %143 {offsets = [0, 64], sizes = [2, 32], strides = [1, 1]} : vector<2x128xf32> to vector<2x32xf32>
    %155 = vector.extract_strided_slice %143 {offsets = [0, 96], sizes = [2, 32], strides = [1, 1]} : vector<2x128xf32> to vector<2x32xf32>
    %cst_105 = arith.constant 5.000000e-01 : f32
    %156 = vector.broadcast %cst_105 : f32 to vector<2x32xf32>
    %157 = arith.mulf %156, %155 : vector<2x32xf32>
    %cst_106 = arith.constant 5.000000e-01 : f32
    %158 = vector.broadcast %cst_106 : f32 to vector<2x32xf32>
    %159 = arith.addf %157, %158 : vector<2x32xf32>
    %160 = arith.mulf %153, %62 : vector<2x32xf32>
    %161 = arith.mulf %148, %154 : vector<2x32xf32>
    %162 = arith.addf %160, %161 : vector<2x32xf32>
    %163 = math.tanh %162 : vector<2x32xf32>
    %164 = arith.mulf %159, %163 : vector<2x32xf32>
    %cst_107 = arith.constant dense<0.000000e+00> : vector<2x128xf32>
    %165 = tpu.matmul %137, %2, %cst_107 {dimension_numbers = #tpu.dot_dimension_numbers<[1], [0], [0], [1], [0, 0, 1, 1], [], []>} : vector<2x32xf32>, vector<32x128xf32>, vector<2x128xf32> -> vector<2x128xf32>
    %cst_108 = arith.constant dense<0.000000e+00> : vector<2x128xf32>
    %166 = tpu.matmul %113, %8, %cst_108 {dimension_numbers = #tpu.dot_dimension_numbers<[1], [0], [0], [1], [0, 0, 1, 1], [], []>} : vector<2x32xf32>, vector<32x128xf32>, vector<2x128xf32> -> vector<2x128xf32>
    %167 = arith.addf %165, %166 : vector<2x128xf32>
    %168 = vector.broadcast %16 : vector<1x128xf32> to vector<2x128xf32>
    %169 = arith.addf %167, %168 : vector<2x128xf32>
    %170 = math.tanh %169 : vector<2x128xf32>
    %171 = vector.extract_strided_slice %170 {offsets = [0, 0], sizes = [2, 32], strides = [1, 1]} : vector<2x128xf32> to vector<2x32xf32>
    %cst_109 = arith.constant 5.000000e-01 : f32
    %172 = vector.broadcast %cst_109 : f32 to vector<2x32xf32>
    %173 = arith.mulf %172, %171 : vector<2x32xf32>
    %cst_110 = arith.constant 5.000000e-01 : f32
    %174 = vector.broadcast %cst_110 : f32 to vector<2x32xf32>
    %175 = arith.addf %173, %174 : vector<2x32xf32>
    %176 = vector.extract_strided_slice %170 {offsets = [0, 32], sizes = [2, 32], strides = [1, 1]} : vector<2x128xf32> to vector<2x32xf32>
    %cst_111 = arith.constant 5.000000e-01 : f32
    %177 = vector.broadcast %cst_111 : f32 to vector<2x32xf32>
    %178 = arith.mulf %177, %176 : vector<2x32xf32>
    %cst_112 = arith.constant 5.000000e-01 : f32
    %179 = vector.broadcast %cst_112 : f32 to vector<2x32xf32>
    %180 = arith.addf %178, %179 : vector<2x32xf32>
    %181 = vector.extract_strided_slice %170 {offsets = [0, 64], sizes = [2, 32], strides = [1, 1]} : vector<2x128xf32> to vector<2x32xf32>
    %182 = vector.extract_strided_slice %170 {offsets = [0, 96], sizes = [2, 32], strides = [1, 1]} : vector<2x128xf32> to vector<2x32xf32>
    %cst_113 = arith.constant 5.000000e-01 : f32
    %183 = vector.broadcast %cst_113 : f32 to vector<2x32xf32>
    %184 = arith.mulf %183, %182 : vector<2x32xf32>
    %cst_114 = arith.constant 5.000000e-01 : f32
    %185 = vector.broadcast %cst_114 : f32 to vector<2x32xf32>
    %186 = arith.addf %184, %185 : vector<2x32xf32>
    %187 = arith.mulf %180, %111 : vector<2x32xf32>
    %188 = arith.mulf %175, %181 : vector<2x32xf32>
    %189 = arith.addf %187, %188 : vector<2x32xf32>
    %190 = math.tanh %189 : vector<2x32xf32>
    %191 = arith.mulf %186, %190 : vector<2x32xf32>
    %cst_115 = arith.constant dense<0.000000e+00> : vector<2x128xf32>
    %192 = tpu.matmul %137, %0, %cst_115 {dimension_numbers = #tpu.dot_dimension_numbers<[1], [0], [0], [1], [0, 0, 1, 1], [], []>} : vector<2x32xf32>, vector<32x128xf32>, vector<2x128xf32> -> vector<2x128xf32>
    %193 = arith.addf %56, %192 : vector<2x128xf32>
    %194 = math.tanh %193 : vector<2x128xf32>
    %195 = vector.extract_strided_slice %194 {offsets = [0, 0], sizes = [2, 32], strides = [1, 1]} : vector<2x128xf32> to vector<2x32xf32>
    %cst_116 = arith.constant 5.000000e-01 : f32
    %196 = vector.broadcast %cst_116 : f32 to vector<2x32xf32>
    %197 = arith.mulf %196, %195 : vector<2x32xf32>
    %cst_117 = arith.constant 5.000000e-01 : f32
    %198 = vector.broadcast %cst_117 : f32 to vector<2x32xf32>
    %199 = arith.addf %197, %198 : vector<2x32xf32>
    %200 = vector.extract_strided_slice %194 {offsets = [0, 32], sizes = [2, 32], strides = [1, 1]} : vector<2x128xf32> to vector<2x32xf32>
    %cst_118 = arith.constant 5.000000e-01 : f32
    %201 = vector.broadcast %cst_118 : f32 to vector<2x32xf32>
    %202 = arith.mulf %201, %200 : vector<2x32xf32>
    %cst_119 = arith.constant 5.000000e-01 : f32
    %203 = vector.broadcast %cst_119 : f32 to vector<2x32xf32>
    %204 = arith.addf %202, %203 : vector<2x32xf32>
    %205 = vector.extract_strided_slice %194 {offsets = [0, 64], sizes = [2, 32], strides = [1, 1]} : vector<2x128xf32> to vector<2x32xf32>
    %206 = vector.extract_strided_slice %194 {offsets = [0, 96], sizes = [2, 32], strides = [1, 1]} : vector<2x128xf32> to vector<2x32xf32>
    %cst_120 = arith.constant 5.000000e-01 : f32
    %207 = vector.broadcast %cst_120 : f32 to vector<2x32xf32>
    %208 = arith.mulf %207, %206 : vector<2x32xf32>
    %cst_121 = arith.constant 5.000000e-01 : f32
    %209 = vector.broadcast %cst_121 : f32 to vector<2x32xf32>
    %210 = arith.addf %208, %209 : vector<2x32xf32>
    %211 = arith.mulf %204, %135 : vector<2x32xf32>
    %212 = arith.mulf %199, %205 : vector<2x32xf32>
    %213 = arith.addf %211, %212 : vector<2x32xf32>
    %214 = math.tanh %213 : vector<2x32xf32>
    %215 = arith.mulf %210, %214 : vector<2x32xf32>
    %cst_122 = arith.constant dense<0.000000e+00> : vector<2x128xf32>
    %216 = tpu.matmul %164, %6, %cst_122 {dimension_numbers = #tpu.dot_dimension_numbers<[1], [0], [0], [1], [0, 0, 1, 1], [], []>} : vector<2x32xf32>, vector<32x128xf32>, vector<2x128xf32> -> vector<2x128xf32>
    %cst_123 = arith.constant dense<0.000000e+00> : vector<2x128xf32>
    %217 = tpu.matmul %62, %12, %cst_123 {dimension_numbers = #tpu.dot_dimension_numbers<[1], [0], [0], [1], [0, 0, 1, 1], [], []>} : vector<2x32xf32>, vector<32x128xf32>, vector<2x128xf32> -> vector<2x128xf32>
    %218 = arith.addf %216, %217 : vector<2x128xf32>
    %219 = vector.broadcast %20 : vector<1x128xf32> to vector<2x128xf32>
    %220 = arith.addf %218, %219 : vector<2x128xf32>
    %221 = math.tanh %220 : vector<2x128xf32>
    %222 = vector.extract_strided_slice %221 {offsets = [0, 0], sizes = [2, 32], strides = [1, 1]} : vector<2x128xf32> to vector<2x32xf32>
    %cst_124 = arith.constant 5.000000e-01 : f32
    %223 = vector.broadcast %cst_124 : f32 to vector<2x32xf32>
    %224 = arith.mulf %223, %222 : vector<2x32xf32>
    %cst_125 = arith.constant 5.000000e-01 : f32
    %225 = vector.broadcast %cst_125 : f32 to vector<2x32xf32>
    %226 = arith.addf %224, %225 : vector<2x32xf32>
    %227 = vector.extract_strided_slice %221 {offsets = [0, 32], sizes = [2, 32], strides = [1, 1]} : vector<2x128xf32> to vector<2x32xf32>
    %cst_126 = arith.constant 5.000000e-01 : f32
    %228 = vector.broadcast %cst_126 : f32 to vector<2x32xf32>
    %229 = arith.mulf %228, %227 : vector<2x32xf32>
    %cst_127 = arith.constant 5.000000e-01 : f32
    %230 = vector.broadcast %cst_127 : f32 to vector<2x32xf32>
    %231 = arith.addf %229, %230 : vector<2x32xf32>
    %232 = vector.extract_strided_slice %221 {offsets = [0, 64], sizes = [2, 32], strides = [1, 1]} : vector<2x128xf32> to vector<2x32xf32>
    %233 = vector.extract_strided_slice %221 {offsets = [0, 96], sizes = [2, 32], strides = [1, 1]} : vector<2x128xf32> to vector<2x32xf32>
    %cst_128 = arith.constant 5.000000e-01 : f32
    %234 = vector.broadcast %cst_128 : f32 to vector<2x32xf32>
    %235 = arith.mulf %234, %233 : vector<2x32xf32>
    %cst_129 = arith.constant 5.000000e-01 : f32
    %236 = vector.broadcast %cst_129 : f32 to vector<2x32xf32>
    %237 = arith.addf %235, %236 : vector<2x32xf32>
    %238 = arith.mulf %231, %62 : vector<2x32xf32>
    %239 = arith.mulf %226, %232 : vector<2x32xf32>
    %240 = arith.addf %238, %239 : vector<2x32xf32>
    %241 = math.tanh %240 : vector<2x32xf32>
    %242 = arith.mulf %237, %241 : vector<2x32xf32>
    %cst_130 = arith.constant dense<0.000000e+00> : vector<2x128xf32>
    %243 = tpu.matmul %191, %4, %cst_130 {dimension_numbers = #tpu.dot_dimension_numbers<[1], [0], [0], [1], [0, 0, 1, 1], [], []>} : vector<2x32xf32>, vector<32x128xf32>, vector<2x128xf32> -> vector<2x128xf32>
    %cst_131 = arith.constant dense<0.000000e+00> : vector<2x128xf32>
    %244 = tpu.matmul %164, %10, %cst_131 {dimension_numbers = #tpu.dot_dimension_numbers<[1], [0], [0], [1], [0, 0, 1, 1], [], []>} : vector<2x32xf32>, vector<32x128xf32>, vector<2x128xf32> -> vector<2x128xf32>
    %245 = arith.addf %243, %244 : vector<2x128xf32>
    %246 = vector.broadcast %18 : vector<1x128xf32> to vector<2x128xf32>
    %247 = arith.addf %245, %246 : vector<2x128xf32>
    %248 = math.tanh %247 : vector<2x128xf32>
    %249 = vector.extract_strided_slice %248 {offsets = [0, 0], sizes = [2, 32], strides = [1, 1]} : vector<2x128xf32> to vector<2x32xf32>
    %cst_132 = arith.constant 5.000000e-01 : f32
    %250 = vector.broadcast %cst_132 : f32 to vector<2x32xf32>
    %251 = arith.mulf %250, %249 : vector<2x32xf32>
    %cst_133 = arith.constant 5.000000e-01 : f32
    %252 = vector.broadcast %cst_133 : f32 to vector<2x32xf32>
    %253 = arith.addf %251, %252 : vector<2x32xf32>
    %254 = vector.extract_strided_slice %248 {offsets = [0, 32], sizes = [2, 32], strides = [1, 1]} : vector<2x128xf32> to vector<2x32xf32>
    %cst_134 = arith.constant 5.000000e-01 : f32
    %255 = vector.broadcast %cst_134 : f32 to vector<2x32xf32>
    %256 = arith.mulf %255, %254 : vector<2x32xf32>
    %cst_135 = arith.constant 5.000000e-01 : f32
    %257 = vector.broadcast %cst_135 : f32 to vector<2x32xf32>
    %258 = arith.addf %256, %257 : vector<2x32xf32>
    %259 = vector.extract_strided_slice %248 {offsets = [0, 64], sizes = [2, 32], strides = [1, 1]} : vector<2x128xf32> to vector<2x32xf32>
    %260 = vector.extract_strided_slice %248 {offsets = [0, 96], sizes = [2, 32], strides = [1, 1]} : vector<2x128xf32> to vector<2x32xf32>
    %cst_136 = arith.constant 5.000000e-01 : f32
    %261 = vector.broadcast %cst_136 : f32 to vector<2x32xf32>
    %262 = arith.mulf %261, %260 : vector<2x32xf32>
    %cst_137 = arith.constant 5.000000e-01 : f32
    %263 = vector.broadcast %cst_137 : f32 to vector<2x32xf32>
    %264 = arith.addf %262, %263 : vector<2x32xf32>
    %265 = arith.mulf %258, %162 : vector<2x32xf32>
    %266 = arith.mulf %253, %259 : vector<2x32xf32>
    %267 = arith.addf %265, %266 : vector<2x32xf32>
    %268 = math.tanh %267 : vector<2x32xf32>
    %269 = arith.mulf %264, %268 : vector<2x32xf32>
    %cst_138 = arith.constant dense<0.000000e+00> : vector<2x128xf32>
    %270 = tpu.matmul %215, %2, %cst_138 {dimension_numbers = #tpu.dot_dimension_numbers<[1], [0], [0], [1], [0, 0, 1, 1], [], []>} : vector<2x32xf32>, vector<32x128xf32>, vector<2x128xf32> -> vector<2x128xf32>
    %cst_139 = arith.constant dense<0.000000e+00> : vector<2x128xf32>
    %271 = tpu.matmul %191, %8, %cst_139 {dimension_numbers = #tpu.dot_dimension_numbers<[1], [0], [0], [1], [0, 0, 1, 1], [], []>} : vector<2x32xf32>, vector<32x128xf32>, vector<2x128xf32> -> vector<2x128xf32>
    %272 = arith.addf %270, %271 : vector<2x128xf32>
    %273 = vector.broadcast %16 : vector<1x128xf32> to vector<2x128xf32>
    %274 = arith.addf %272, %273 : vector<2x128xf32>
    %275 = math.tanh %274 : vector<2x128xf32>
    %276 = vector.extract_strided_slice %275 {offsets = [0, 0], sizes = [2, 32], strides = [1, 1]} : vector<2x128xf32> to vector<2x32xf32>
    %cst_140 = arith.constant 5.000000e-01 : f32
    %277 = vector.broadcast %cst_140 : f32 to vector<2x32xf32>
    %278 = arith.mulf %277, %276 : vector<2x32xf32>
    %cst_141 = arith.constant 5.000000e-01 : f32
    %279 = vector.broadcast %cst_141 : f32 to vector<2x32xf32>
    %280 = arith.addf %278, %279 : vector<2x32xf32>
    %281 = vector.extract_strided_slice %275 {offsets = [0, 32], sizes = [2, 32], strides = [1, 1]} : vector<2x128xf32> to vector<2x32xf32>
    %cst_142 = arith.constant 5.000000e-01 : f32
    %282 = vector.broadcast %cst_142 : f32 to vector<2x32xf32>
    %283 = arith.mulf %282, %281 : vector<2x32xf32>
    %cst_143 = arith.constant 5.000000e-01 : f32
    %284 = vector.broadcast %cst_143 : f32 to vector<2x32xf32>
    %285 = arith.addf %283, %284 : vector<2x32xf32>
    %286 = vector.extract_strided_slice %275 {offsets = [0, 64], sizes = [2, 32], strides = [1, 1]} : vector<2x128xf32> to vector<2x32xf32>
    %287 = vector.extract_strided_slice %275 {offsets = [0, 96], sizes = [2, 32], strides = [1, 1]} : vector<2x128xf32> to vector<2x32xf32>
    %cst_144 = arith.constant 5.000000e-01 : f32
    %288 = vector.broadcast %cst_144 : f32 to vector<2x32xf32>
    %289 = arith.mulf %288, %287 : vector<2x32xf32>
    %cst_145 = arith.constant 5.000000e-01 : f32
    %290 = vector.broadcast %cst_145 : f32 to vector<2x32xf32>
    %291 = arith.addf %289, %290 : vector<2x32xf32>
    %292 = arith.mulf %285, %189 : vector<2x32xf32>
    %293 = arith.mulf %280, %286 : vector<2x32xf32>
    %294 = arith.addf %292, %293 : vector<2x32xf32>
    %295 = math.tanh %294 : vector<2x32xf32>
    %296 = arith.mulf %291, %295 : vector<2x32xf32>
    %cst_146 = arith.constant dense<0.000000e+00> : vector<2x128xf32>
    %297 = tpu.matmul %215, %0, %cst_146 {dimension_numbers = #tpu.dot_dimension_numbers<[1], [0], [0], [1], [0, 0, 1, 1], [], []>} : vector<2x32xf32>, vector<32x128xf32>, vector<2x128xf32> -> vector<2x128xf32>
    %298 = arith.addf %57, %297 : vector<2x128xf32>
    %299 = math.tanh %298 : vector<2x128xf32>
    %300 = vector.extract_strided_slice %299 {offsets = [0, 0], sizes = [2, 32], strides = [1, 1]} : vector<2x128xf32> to vector<2x32xf32>
    %cst_147 = arith.constant 5.000000e-01 : f32
    %301 = vector.broadcast %cst_147 : f32 to vector<2x32xf32>
    %302 = arith.mulf %301, %300 : vector<2x32xf32>
    %cst_148 = arith.constant 5.000000e-01 : f32
    %303 = vector.broadcast %cst_148 : f32 to vector<2x32xf32>
    %304 = arith.addf %302, %303 : vector<2x32xf32>
    %305 = vector.extract_strided_slice %299 {offsets = [0, 32], sizes = [2, 32], strides = [1, 1]} : vector<2x128xf32> to vector<2x32xf32>
    %cst_149 = arith.constant 5.000000e-01 : f32
    %306 = vector.broadcast %cst_149 : f32 to vector<2x32xf32>
    %307 = arith.mulf %306, %305 : vector<2x32xf32>
    %cst_150 = arith.constant 5.000000e-01 : f32
    %308 = vector.broadcast %cst_150 : f32 to vector<2x32xf32>
    %309 = arith.addf %307, %308 : vector<2x32xf32>
    %310 = vector.extract_strided_slice %299 {offsets = [0, 64], sizes = [2, 32], strides = [1, 1]} : vector<2x128xf32> to vector<2x32xf32>
    %311 = vector.extract_strided_slice %299 {offsets = [0, 96], sizes = [2, 32], strides = [1, 1]} : vector<2x128xf32> to vector<2x32xf32>
    %cst_151 = arith.constant 5.000000e-01 : f32
    %312 = vector.broadcast %cst_151 : f32 to vector<2x32xf32>
    %313 = arith.mulf %312, %311 : vector<2x32xf32>
    %cst_152 = arith.constant 5.000000e-01 : f32
    %314 = vector.broadcast %cst_152 : f32 to vector<2x32xf32>
    %315 = arith.addf %313, %314 : vector<2x32xf32>
    %316 = arith.mulf %309, %213 : vector<2x32xf32>
    %317 = arith.mulf %304, %310 : vector<2x32xf32>
    %318 = arith.addf %316, %317 : vector<2x32xf32>
    %319 = math.tanh %318 : vector<2x32xf32>
    %320 = arith.mulf %315, %319 : vector<2x32xf32>
    %cst_153 = arith.constant dense<0.000000e+00> : vector<2x128xf32>
    %321 = tpu.matmul %269, %6, %cst_153 {dimension_numbers = #tpu.dot_dimension_numbers<[1], [0], [0], [1], [0, 0, 1, 1], [], []>} : vector<2x32xf32>, vector<32x128xf32>, vector<2x128xf32> -> vector<2x128xf32>
    %cst_154 = arith.constant dense<0.000000e+00> : vector<2x128xf32>
    %322 = tpu.matmul %242, %12, %cst_154 {dimension_numbers = #tpu.dot_dimension_numbers<[1], [0], [0], [1], [0, 0, 1, 1], [], []>} : vector<2x32xf32>, vector<32x128xf32>, vector<2x128xf32> -> vector<2x128xf32>
    %323 = arith.addf %321, %322 : vector<2x128xf32>
    %324 = vector.broadcast %20 : vector<1x128xf32> to vector<2x128xf32>
    %325 = arith.addf %323, %324 : vector<2x128xf32>
    %326 = math.tanh %325 : vector<2x128xf32>
    %327 = vector.extract_strided_slice %326 {offsets = [0, 0], sizes = [2, 32], strides = [1, 1]} : vector<2x128xf32> to vector<2x32xf32>
    %cst_155 = arith.constant 5.000000e-01 : f32
    %328 = vector.broadcast %cst_155 : f32 to vector<2x32xf32>
    %329 = arith.mulf %328, %327 : vector<2x32xf32>
    %cst_156 = arith.constant 5.000000e-01 : f32
    %330 = vector.broadcast %cst_156 : f32 to vector<2x32xf32>
    %331 = arith.addf %329, %330 : vector<2x32xf32>
    %332 = vector.extract_strided_slice %326 {offsets = [0, 32], sizes = [2, 32], strides = [1, 1]} : vector<2x128xf32> to vector<2x32xf32>
    %cst_157 = arith.constant 5.000000e-01 : f32
    %333 = vector.broadcast %cst_157 : f32 to vector<2x32xf32>
    %334 = arith.mulf %333, %332 : vector<2x32xf32>
    %cst_158 = arith.constant 5.000000e-01 : f32
    %335 = vector.broadcast %cst_158 : f32 to vector<2x32xf32>
    %336 = arith.addf %334, %335 : vector<2x32xf32>
    %337 = vector.extract_strided_slice %326 {offsets = [0, 64], sizes = [2, 32], strides = [1, 1]} : vector<2x128xf32> to vector<2x32xf32>
    %338 = vector.extract_strided_slice %326 {offsets = [0, 96], sizes = [2, 32], strides = [1, 1]} : vector<2x128xf32> to vector<2x32xf32>
    %cst_159 = arith.constant 5.000000e-01 : f32
    %339 = vector.broadcast %cst_159 : f32 to vector<2x32xf32>
    %340 = arith.mulf %339, %338 : vector<2x32xf32>
    %cst_160 = arith.constant 5.000000e-01 : f32
    %341 = vector.broadcast %cst_160 : f32 to vector<2x32xf32>
    %342 = arith.addf %340, %341 : vector<2x32xf32>
    %343 = arith.mulf %336, %240 : vector<2x32xf32>
    %344 = arith.mulf %331, %337 : vector<2x32xf32>
    %345 = arith.addf %343, %344 : vector<2x32xf32>
    %346 = math.tanh %345 : vector<2x32xf32>
    %347 = arith.mulf %342, %346 : vector<2x32xf32>
    %cst_161 = arith.constant dense<0.000000e+00> : vector<2x128xf32>
    %348 = tpu.matmul %296, %4, %cst_161 {dimension_numbers = #tpu.dot_dimension_numbers<[1], [0], [0], [1], [0, 0, 1, 1], [], []>} : vector<2x32xf32>, vector<32x128xf32>, vector<2x128xf32> -> vector<2x128xf32>
    %cst_162 = arith.constant dense<0.000000e+00> : vector<2x128xf32>
    %349 = tpu.matmul %269, %10, %cst_162 {dimension_numbers = #tpu.dot_dimension_numbers<[1], [0], [0], [1], [0, 0, 1, 1], [], []>} : vector<2x32xf32>, vector<32x128xf32>, vector<2x128xf32> -> vector<2x128xf32>
    %350 = arith.addf %348, %349 : vector<2x128xf32>
    %351 = vector.broadcast %18 : vector<1x128xf32> to vector<2x128xf32>
    %352 = arith.addf %350, %351 : vector<2x128xf32>
    %353 = math.tanh %352 : vector<2x128xf32>
    %354 = vector.extract_strided_slice %353 {offsets = [0, 0], sizes = [2, 32], strides = [1, 1]} : vector<2x128xf32> to vector<2x32xf32>
    %cst_163 = arith.constant 5.000000e-01 : f32
    %355 = vector.broadcast %cst_163 : f32 to vector<2x32xf32>
    %356 = arith.mulf %355, %354 : vector<2x32xf32>
    %cst_164 = arith.constant 5.000000e-01 : f32
    %357 = vector.broadcast %cst_164 : f32 to vector<2x32xf32>
    %358 = arith.addf %356, %357 : vector<2x32xf32>
    %359 = vector.extract_strided_slice %353 {offsets = [0, 32], sizes = [2, 32], strides = [1, 1]} : vector<2x128xf32> to vector<2x32xf32>
    %cst_165 = arith.constant 5.000000e-01 : f32
    %360 = vector.broadcast %cst_165 : f32 to vector<2x32xf32>
    %361 = arith.mulf %360, %359 : vector<2x32xf32>
    %cst_166 = arith.constant 5.000000e-01 : f32
    %362 = vector.broadcast %cst_166 : f32 to vector<2x32xf32>
    %363 = arith.addf %361, %362 : vector<2x32xf32>
    %364 = vector.extract_strided_slice %353 {offsets = [0, 64], sizes = [2, 32], strides = [1, 1]} : vector<2x128xf32> to vector<2x32xf32>
    %365 = vector.extract_strided_slice %353 {offsets = [0, 96], sizes = [2, 32], strides = [1, 1]} : vector<2x128xf32> to vector<2x32xf32>
    %cst_167 = arith.constant 5.000000e-01 : f32
    %366 = vector.broadcast %cst_167 : f32 to vector<2x32xf32>
    %367 = arith.mulf %366, %365 : vector<2x32xf32>
    %cst_168 = arith.constant 5.000000e-01 : f32
    %368 = vector.broadcast %cst_168 : f32 to vector<2x32xf32>
    %369 = arith.addf %367, %368 : vector<2x32xf32>
    %370 = arith.mulf %363, %267 : vector<2x32xf32>
    %371 = arith.mulf %358, %364 : vector<2x32xf32>
    %372 = arith.addf %370, %371 : vector<2x32xf32>
    %373 = math.tanh %372 : vector<2x32xf32>
    %374 = arith.mulf %369, %373 : vector<2x32xf32>
    %cst_169 = arith.constant dense<0.000000e+00> : vector<2x128xf32>
    %375 = tpu.matmul %320, %2, %cst_169 {dimension_numbers = #tpu.dot_dimension_numbers<[1], [0], [0], [1], [0, 0, 1, 1], [], []>} : vector<2x32xf32>, vector<32x128xf32>, vector<2x128xf32> -> vector<2x128xf32>
    %cst_170 = arith.constant dense<0.000000e+00> : vector<2x128xf32>
    %376 = tpu.matmul %296, %8, %cst_170 {dimension_numbers = #tpu.dot_dimension_numbers<[1], [0], [0], [1], [0, 0, 1, 1], [], []>} : vector<2x32xf32>, vector<32x128xf32>, vector<2x128xf32> -> vector<2x128xf32>
    %377 = arith.addf %375, %376 : vector<2x128xf32>
    %378 = vector.broadcast %16 : vector<1x128xf32> to vector<2x128xf32>
    %379 = arith.addf %377, %378 : vector<2x128xf32>
    %380 = math.tanh %379 : vector<2x128xf32>
    %381 = vector.extract_strided_slice %380 {offsets = [0, 0], sizes = [2, 32], strides = [1, 1]} : vector<2x128xf32> to vector<2x32xf32>
    %cst_171 = arith.constant 5.000000e-01 : f32
    %382 = vector.broadcast %cst_171 : f32 to vector<2x32xf32>
    %383 = arith.mulf %382, %381 : vector<2x32xf32>
    %cst_172 = arith.constant 5.000000e-01 : f32
    %384 = vector.broadcast %cst_172 : f32 to vector<2x32xf32>
    %385 = arith.addf %383, %384 : vector<2x32xf32>
    %386 = vector.extract_strided_slice %380 {offsets = [0, 32], sizes = [2, 32], strides = [1, 1]} : vector<2x128xf32> to vector<2x32xf32>
    %cst_173 = arith.constant 5.000000e-01 : f32
    %387 = vector.broadcast %cst_173 : f32 to vector<2x32xf32>
    %388 = arith.mulf %387, %386 : vector<2x32xf32>
    %cst_174 = arith.constant 5.000000e-01 : f32
    %389 = vector.broadcast %cst_174 : f32 to vector<2x32xf32>
    %390 = arith.addf %388, %389 : vector<2x32xf32>
    %391 = vector.extract_strided_slice %380 {offsets = [0, 64], sizes = [2, 32], strides = [1, 1]} : vector<2x128xf32> to vector<2x32xf32>
    %392 = vector.extract_strided_slice %380 {offsets = [0, 96], sizes = [2, 32], strides = [1, 1]} : vector<2x128xf32> to vector<2x32xf32>
    %cst_175 = arith.constant 5.000000e-01 : f32
    %393 = vector.broadcast %cst_175 : f32 to vector<2x32xf32>
    %394 = arith.mulf %393, %392 : vector<2x32xf32>
    %cst_176 = arith.constant 5.000000e-01 : f32
    %395 = vector.broadcast %cst_176 : f32 to vector<2x32xf32>
    %396 = arith.addf %394, %395 : vector<2x32xf32>
    %397 = arith.mulf %390, %294 : vector<2x32xf32>
    %398 = arith.mulf %385, %391 : vector<2x32xf32>
    %399 = arith.addf %397, %398 : vector<2x32xf32>
    %400 = math.tanh %399 : vector<2x32xf32>
    %401 = arith.mulf %396, %400 : vector<2x32xf32>
    %cst_177 = arith.constant dense<0.000000e+00> : vector<2x128xf32>
    %402 = tpu.matmul %320, %0, %cst_177 {dimension_numbers = #tpu.dot_dimension_numbers<[1], [0], [0], [1], [0, 0, 1, 1], [], []>} : vector<2x32xf32>, vector<32x128xf32>, vector<2x128xf32> -> vector<2x128xf32>
    %403 = arith.addf %58, %402 : vector<2x128xf32>
    %404 = math.tanh %403 : vector<2x128xf32>
    %405 = vector.extract_strided_slice %404 {offsets = [0, 0], sizes = [2, 32], strides = [1, 1]} : vector<2x128xf32> to vector<2x32xf32>
    %cst_178 = arith.constant 5.000000e-01 : f32
    %406 = vector.broadcast %cst_178 : f32 to vector<2x32xf32>
    %407 = arith.mulf %406, %405 : vector<2x32xf32>
    %cst_179 = arith.constant 5.000000e-01 : f32
    %408 = vector.broadcast %cst_179 : f32 to vector<2x32xf32>
    %409 = arith.addf %407, %408 : vector<2x32xf32>
    %410 = vector.extract_strided_slice %404 {offsets = [0, 32], sizes = [2, 32], strides = [1, 1]} : vector<2x128xf32> to vector<2x32xf32>
    %cst_180 = arith.constant 5.000000e-01 : f32
    %411 = vector.broadcast %cst_180 : f32 to vector<2x32xf32>
    %412 = arith.mulf %411, %410 : vector<2x32xf32>
    %cst_181 = arith.constant 5.000000e-01 : f32
    %413 = vector.broadcast %cst_181 : f32 to vector<2x32xf32>
    %414 = arith.addf %412, %413 : vector<2x32xf32>
    %415 = vector.extract_strided_slice %404 {offsets = [0, 64], sizes = [2, 32], strides = [1, 1]} : vector<2x128xf32> to vector<2x32xf32>
    %416 = vector.extract_strided_slice %404 {offsets = [0, 96], sizes = [2, 32], strides = [1, 1]} : vector<2x128xf32> to vector<2x32xf32>
    %cst_182 = arith.constant 5.000000e-01 : f32
    %417 = vector.broadcast %cst_182 : f32 to vector<2x32xf32>
    %418 = arith.mulf %417, %416 : vector<2x32xf32>
    %cst_183 = arith.constant 5.000000e-01 : f32
    %419 = vector.broadcast %cst_183 : f32 to vector<2x32xf32>
    %420 = arith.addf %418, %419 : vector<2x32xf32>
    %421 = arith.mulf %414, %318 : vector<2x32xf32>
    %422 = arith.mulf %409, %415 : vector<2x32xf32>
    %423 = arith.addf %421, %422 : vector<2x32xf32>
    %424 = math.tanh %423 : vector<2x32xf32>
    %425 = arith.mulf %420, %424 : vector<2x32xf32>
    %cst_184 = arith.constant dense<0.000000e+00> : vector<2x128xf32>
    %426 = tpu.matmul %374, %6, %cst_184 {dimension_numbers = #tpu.dot_dimension_numbers<[1], [0], [0], [1], [0, 0, 1, 1], [], []>} : vector<2x32xf32>, vector<32x128xf32>, vector<2x128xf32> -> vector<2x128xf32>
    %cst_185 = arith.constant dense<0.000000e+00> : vector<2x128xf32>
    %427 = tpu.matmul %347, %12, %cst_185 {dimension_numbers = #tpu.dot_dimension_numbers<[1], [0], [0], [1], [0, 0, 1, 1], [], []>} : vector<2x32xf32>, vector<32x128xf32>, vector<2x128xf32> -> vector<2x128xf32>
    %428 = arith.addf %426, %427 : vector<2x128xf32>
    %429 = vector.broadcast %20 : vector<1x128xf32> to vector<2x128xf32>
    %430 = arith.addf %428, %429 : vector<2x128xf32>
    %431 = math.tanh %430 : vector<2x128xf32>
    %432 = vector.extract_strided_slice %431 {offsets = [0, 0], sizes = [2, 32], strides = [1, 1]} : vector<2x128xf32> to vector<2x32xf32>
    %cst_186 = arith.constant 5.000000e-01 : f32
    %433 = vector.broadcast %cst_186 : f32 to vector<2x32xf32>
    %434 = arith.mulf %433, %432 : vector<2x32xf32>
    %cst_187 = arith.constant 5.000000e-01 : f32
    %435 = vector.broadcast %cst_187 : f32 to vector<2x32xf32>
    %436 = arith.addf %434, %435 : vector<2x32xf32>
    %437 = vector.extract_strided_slice %431 {offsets = [0, 32], sizes = [2, 32], strides = [1, 1]} : vector<2x128xf32> to vector<2x32xf32>
    %cst_188 = arith.constant 5.000000e-01 : f32
    %438 = vector.broadcast %cst_188 : f32 to vector<2x32xf32>
    %439 = arith.mulf %438, %437 : vector<2x32xf32>
    %cst_189 = arith.constant 5.000000e-01 : f32
    %440 = vector.broadcast %cst_189 : f32 to vector<2x32xf32>
    %441 = arith.addf %439, %440 : vector<2x32xf32>
    %442 = vector.extract_strided_slice %431 {offsets = [0, 64], sizes = [2, 32], strides = [1, 1]} : vector<2x128xf32> to vector<2x32xf32>
    %443 = vector.extract_strided_slice %431 {offsets = [0, 96], sizes = [2, 32], strides = [1, 1]} : vector<2x128xf32> to vector<2x32xf32>
    %cst_190 = arith.constant 5.000000e-01 : f32
    %444 = vector.broadcast %cst_190 : f32 to vector<2x32xf32>
    %445 = arith.mulf %444, %443 : vector<2x32xf32>
    %cst_191 = arith.constant 5.000000e-01 : f32
    %446 = vector.broadcast %cst_191 : f32 to vector<2x32xf32>
    %447 = arith.addf %445, %446 : vector<2x32xf32>
    %448 = arith.mulf %441, %345 : vector<2x32xf32>
    %449 = arith.mulf %436, %442 : vector<2x32xf32>
    %450 = arith.addf %448, %449 : vector<2x32xf32>
    %451 = math.tanh %450 : vector<2x32xf32>
    %452 = arith.mulf %447, %451 : vector<2x32xf32>
    %cst_192 = arith.constant dense<0.000000e+00> : vector<2x128xf32>
    %453 = tpu.matmul %401, %4, %cst_192 {dimension_numbers = #tpu.dot_dimension_numbers<[1], [0], [0], [1], [0, 0, 1, 1], [], []>} : vector<2x32xf32>, vector<32x128xf32>, vector<2x128xf32> -> vector<2x128xf32>
    %cst_193 = arith.constant dense<0.000000e+00> : vector<2x128xf32>
    %454 = tpu.matmul %374, %10, %cst_193 {dimension_numbers = #tpu.dot_dimension_numbers<[1], [0], [0], [1], [0, 0, 1, 1], [], []>} : vector<2x32xf32>, vector<32x128xf32>, vector<2x128xf32> -> vector<2x128xf32>
    %455 = arith.addf %453, %454 : vector<2x128xf32>
    %456 = vector.broadcast %18 : vector<1x128xf32> to vector<2x128xf32>
    %457 = arith.addf %455, %456 : vector<2x128xf32>
    %458 = math.tanh %457 : vector<2x128xf32>
    %459 = vector.extract_strided_slice %458 {offsets = [0, 0], sizes = [2, 32], strides = [1, 1]} : vector<2x128xf32> to vector<2x32xf32>
    %cst_194 = arith.constant 5.000000e-01 : f32
    %460 = vector.broadcast %cst_194 : f32 to vector<2x32xf32>
    %461 = arith.mulf %460, %459 : vector<2x32xf32>
    %cst_195 = arith.constant 5.000000e-01 : f32
    %462 = vector.broadcast %cst_195 : f32 to vector<2x32xf32>
    %463 = arith.addf %461, %462 : vector<2x32xf32>
    %464 = vector.extract_strided_slice %458 {offsets = [0, 32], sizes = [2, 32], strides = [1, 1]} : vector<2x128xf32> to vector<2x32xf32>
    %cst_196 = arith.constant 5.000000e-01 : f32
    %465 = vector.broadcast %cst_196 : f32 to vector<2x32xf32>
    %466 = arith.mulf %465, %464 : vector<2x32xf32>
    %cst_197 = arith.constant 5.000000e-01 : f32
    %467 = vector.broadcast %cst_197 : f32 to vector<2x32xf32>
    %468 = arith.addf %466, %467 : vector<2x32xf32>
    %469 = vector.extract_strided_slice %458 {offsets = [0, 64], sizes = [2, 32], strides = [1, 1]} : vector<2x128xf32> to vector<2x32xf32>
    %470 = vector.extract_strided_slice %458 {offsets = [0, 96], sizes = [2, 32], strides = [1, 1]} : vector<2x128xf32> to vector<2x32xf32>
    %cst_198 = arith.constant 5.000000e-01 : f32
    %471 = vector.broadcast %cst_198 : f32 to vector<2x32xf32>
    %472 = arith.mulf %471, %470 : vector<2x32xf32>
    %cst_199 = arith.constant 5.000000e-01 : f32
    %473 = vector.broadcast %cst_199 : f32 to vector<2x32xf32>
    %474 = arith.addf %472, %473 : vector<2x32xf32>
    %475 = arith.mulf %468, %372 : vector<2x32xf32>
    %476 = arith.mulf %463, %469 : vector<2x32xf32>
    %477 = arith.addf %475, %476 : vector<2x32xf32>
    %478 = math.tanh %477 : vector<2x32xf32>
    %479 = arith.mulf %474, %478 : vector<2x32xf32>
    %cst_200 = arith.constant dense<0.000000e+00> : vector<2x128xf32>
    %480 = tpu.matmul %425, %2, %cst_200 {dimension_numbers = #tpu.dot_dimension_numbers<[1], [0], [0], [1], [0, 0, 1, 1], [], []>} : vector<2x32xf32>, vector<32x128xf32>, vector<2x128xf32> -> vector<2x128xf32>
    %cst_201 = arith.constant dense<0.000000e+00> : vector<2x128xf32>
    %481 = tpu.matmul %401, %8, %cst_201 {dimension_numbers = #tpu.dot_dimension_numbers<[1], [0], [0], [1], [0, 0, 1, 1], [], []>} : vector<2x32xf32>, vector<32x128xf32>, vector<2x128xf32> -> vector<2x128xf32>
    %482 = arith.addf %480, %481 : vector<2x128xf32>
    %483 = vector.broadcast %16 : vector<1x128xf32> to vector<2x128xf32>
    %484 = arith.addf %482, %483 : vector<2x128xf32>
    %485 = math.tanh %484 : vector<2x128xf32>
    %486 = vector.extract_strided_slice %485 {offsets = [0, 0], sizes = [2, 32], strides = [1, 1]} : vector<2x128xf32> to vector<2x32xf32>
    %cst_202 = arith.constant 5.000000e-01 : f32
    %487 = vector.broadcast %cst_202 : f32 to vector<2x32xf32>
    %488 = arith.mulf %487, %486 : vector<2x32xf32>
    %cst_203 = arith.constant 5.000000e-01 : f32
    %489 = vector.broadcast %cst_203 : f32 to vector<2x32xf32>
    %490 = arith.addf %488, %489 : vector<2x32xf32>
    %491 = vector.extract_strided_slice %485 {offsets = [0, 32], sizes = [2, 32], strides = [1, 1]} : vector<2x128xf32> to vector<2x32xf32>
    %cst_204 = arith.constant 5.000000e-01 : f32
    %492 = vector.broadcast %cst_204 : f32 to vector<2x32xf32>
    %493 = arith.mulf %492, %491 : vector<2x32xf32>
    %cst_205 = arith.constant 5.000000e-01 : f32
    %494 = vector.broadcast %cst_205 : f32 to vector<2x32xf32>
    %495 = arith.addf %493, %494 : vector<2x32xf32>
    %496 = vector.extract_strided_slice %485 {offsets = [0, 64], sizes = [2, 32], strides = [1, 1]} : vector<2x128xf32> to vector<2x32xf32>
    %497 = vector.extract_strided_slice %485 {offsets = [0, 96], sizes = [2, 32], strides = [1, 1]} : vector<2x128xf32> to vector<2x32xf32>
    %cst_206 = arith.constant 5.000000e-01 : f32
    %498 = vector.broadcast %cst_206 : f32 to vector<2x32xf32>
    %499 = arith.mulf %498, %497 : vector<2x32xf32>
    %cst_207 = arith.constant 5.000000e-01 : f32
    %500 = vector.broadcast %cst_207 : f32 to vector<2x32xf32>
    %501 = arith.addf %499, %500 : vector<2x32xf32>
    %502 = arith.mulf %495, %399 : vector<2x32xf32>
    %503 = arith.mulf %490, %496 : vector<2x32xf32>
    %504 = arith.addf %502, %503 : vector<2x32xf32>
    %505 = math.tanh %504 : vector<2x32xf32>
    %506 = arith.mulf %501, %505 : vector<2x32xf32>
    %cst_208 = arith.constant dense<0.000000e+00> : vector<2x128xf32>
    %507 = tpu.matmul %425, %0, %cst_208 {dimension_numbers = #tpu.dot_dimension_numbers<[1], [0], [0], [1], [0, 0, 1, 1], [], []>} : vector<2x32xf32>, vector<32x128xf32>, vector<2x128xf32> -> vector<2x128xf32>
    %508 = arith.addf %59, %507 : vector<2x128xf32>
    %509 = math.tanh %508 : vector<2x128xf32>
    %510 = vector.extract_strided_slice %509 {offsets = [0, 0], sizes = [2, 32], strides = [1, 1]} : vector<2x128xf32> to vector<2x32xf32>
    %cst_209 = arith.constant 5.000000e-01 : f32
    %511 = vector.broadcast %cst_209 : f32 to vector<2x32xf32>
    %512 = arith.mulf %511, %510 : vector<2x32xf32>
    %cst_210 = arith.constant 5.000000e-01 : f32
    %513 = vector.broadcast %cst_210 : f32 to vector<2x32xf32>
    %514 = arith.addf %512, %513 : vector<2x32xf32>
    %515 = vector.extract_strided_slice %509 {offsets = [0, 32], sizes = [2, 32], strides = [1, 1]} : vector<2x128xf32> to vector<2x32xf32>
    %cst_211 = arith.constant 5.000000e-01 : f32
    %516 = vector.broadcast %cst_211 : f32 to vector<2x32xf32>
    %517 = arith.mulf %516, %515 : vector<2x32xf32>
    %cst_212 = arith.constant 5.000000e-01 : f32
    %518 = vector.broadcast %cst_212 : f32 to vector<2x32xf32>
    %519 = arith.addf %517, %518 : vector<2x32xf32>
    %520 = vector.extract_strided_slice %509 {offsets = [0, 64], sizes = [2, 32], strides = [1, 1]} : vector<2x128xf32> to vector<2x32xf32>
    %521 = vector.extract_strided_slice %509 {offsets = [0, 96], sizes = [2, 32], strides = [1, 1]} : vector<2x128xf32> to vector<2x32xf32>
    %cst_213 = arith.constant 5.000000e-01 : f32
    %522 = vector.broadcast %cst_213 : f32 to vector<2x32xf32>
    %523 = arith.mulf %522, %521 : vector<2x32xf32>
    %cst_214 = arith.constant 5.000000e-01 : f32
    %524 = vector.broadcast %cst_214 : f32 to vector<2x32xf32>
    %525 = arith.addf %523, %524 : vector<2x32xf32>
    %526 = arith.mulf %519, %423 : vector<2x32xf32>
    %527 = arith.mulf %514, %520 : vector<2x32xf32>
    %528 = arith.addf %526, %527 : vector<2x32xf32>
    %529 = math.tanh %528 : vector<2x32xf32>
    %530 = arith.mulf %525, %529 : vector<2x32xf32>
    %cst_215 = arith.constant dense<0.000000e+00> : vector<2x128xf32>
    %531 = tpu.matmul %479, %6, %cst_215 {dimension_numbers = #tpu.dot_dimension_numbers<[1], [0], [0], [1], [0, 0, 1, 1], [], []>} : vector<2x32xf32>, vector<32x128xf32>, vector<2x128xf32> -> vector<2x128xf32>
    %cst_216 = arith.constant dense<0.000000e+00> : vector<2x128xf32>
    %532 = tpu.matmul %452, %12, %cst_216 {dimension_numbers = #tpu.dot_dimension_numbers<[1], [0], [0], [1], [0, 0, 1, 1], [], []>} : vector<2x32xf32>, vector<32x128xf32>, vector<2x128xf32> -> vector<2x128xf32>
    %533 = arith.addf %531, %532 : vector<2x128xf32>
    %534 = vector.broadcast %20 : vector<1x128xf32> to vector<2x128xf32>
    %535 = arith.addf %533, %534 : vector<2x128xf32>
    %536 = math.tanh %535 : vector<2x128xf32>
    %537 = vector.extract_strided_slice %536 {offsets = [0, 0], sizes = [2, 32], strides = [1, 1]} : vector<2x128xf32> to vector<2x32xf32>
    %cst_217 = arith.constant 5.000000e-01 : f32
    %538 = vector.broadcast %cst_217 : f32 to vector<2x32xf32>
    %539 = arith.mulf %538, %537 : vector<2x32xf32>
    %cst_218 = arith.constant 5.000000e-01 : f32
    %540 = vector.broadcast %cst_218 : f32 to vector<2x32xf32>
    %541 = arith.addf %539, %540 : vector<2x32xf32>
    %542 = vector.extract_strided_slice %536 {offsets = [0, 32], sizes = [2, 32], strides = [1, 1]} : vector<2x128xf32> to vector<2x32xf32>
    %cst_219 = arith.constant 5.000000e-01 : f32
    %543 = vector.broadcast %cst_219 : f32 to vector<2x32xf32>
    %544 = arith.mulf %543, %542 : vector<2x32xf32>
    %cst_220 = arith.constant 5.000000e-01 : f32
    %545 = vector.broadcast %cst_220 : f32 to vector<2x32xf32>
    %546 = arith.addf %544, %545 : vector<2x32xf32>
    %547 = vector.extract_strided_slice %536 {offsets = [0, 64], sizes = [2, 32], strides = [1, 1]} : vector<2x128xf32> to vector<2x32xf32>
    %548 = vector.extract_strided_slice %536 {offsets = [0, 96], sizes = [2, 32], strides = [1, 1]} : vector<2x128xf32> to vector<2x32xf32>
    %cst_221 = arith.constant 5.000000e-01 : f32
    %549 = vector.broadcast %cst_221 : f32 to vector<2x32xf32>
    %550 = arith.mulf %549, %548 : vector<2x32xf32>
    %cst_222 = arith.constant 5.000000e-01 : f32
    %551 = vector.broadcast %cst_222 : f32 to vector<2x32xf32>
    %552 = arith.addf %550, %551 : vector<2x32xf32>
    %553 = arith.mulf %546, %450 : vector<2x32xf32>
    %554 = arith.mulf %541, %547 : vector<2x32xf32>
    %555 = arith.addf %553, %554 : vector<2x32xf32>
    %556 = math.tanh %555 : vector<2x32xf32>
    %557 = arith.mulf %552, %556 : vector<2x32xf32>
    %cst_223 = arith.constant dense<0.000000e+00> : vector<2x128xf32>
    %558 = tpu.matmul %506, %4, %cst_223 {dimension_numbers = #tpu.dot_dimension_numbers<[1], [0], [0], [1], [0, 0, 1, 1], [], []>} : vector<2x32xf32>, vector<32x128xf32>, vector<2x128xf32> -> vector<2x128xf32>
    %cst_224 = arith.constant dense<0.000000e+00> : vector<2x128xf32>
    %559 = tpu.matmul %479, %10, %cst_224 {dimension_numbers = #tpu.dot_dimension_numbers<[1], [0], [0], [1], [0, 0, 1, 1], [], []>} : vector<2x32xf32>, vector<32x128xf32>, vector<2x128xf32> -> vector<2x128xf32>
    %560 = arith.addf %558, %559 : vector<2x128xf32>
    %561 = vector.broadcast %18 : vector<1x128xf32> to vector<2x128xf32>
    %562 = arith.addf %560, %561 : vector<2x128xf32>
    %563 = math.tanh %562 : vector<2x128xf32>
    %564 = vector.extract_strided_slice %563 {offsets = [0, 0], sizes = [2, 32], strides = [1, 1]} : vector<2x128xf32> to vector<2x32xf32>
    %cst_225 = arith.constant 5.000000e-01 : f32
    %565 = vector.broadcast %cst_225 : f32 to vector<2x32xf32>
    %566 = arith.mulf %565, %564 : vector<2x32xf32>
    %cst_226 = arith.constant 5.000000e-01 : f32
    %567 = vector.broadcast %cst_226 : f32 to vector<2x32xf32>
    %568 = arith.addf %566, %567 : vector<2x32xf32>
    %569 = vector.extract_strided_slice %563 {offsets = [0, 32], sizes = [2, 32], strides = [1, 1]} : vector<2x128xf32> to vector<2x32xf32>
    %cst_227 = arith.constant 5.000000e-01 : f32
    %570 = vector.broadcast %cst_227 : f32 to vector<2x32xf32>
    %571 = arith.mulf %570, %569 : vector<2x32xf32>
    %cst_228 = arith.constant 5.000000e-01 : f32
    %572 = vector.broadcast %cst_228 : f32 to vector<2x32xf32>
    %573 = arith.addf %571, %572 : vector<2x32xf32>
    %574 = vector.extract_strided_slice %563 {offsets = [0, 64], sizes = [2, 32], strides = [1, 1]} : vector<2x128xf32> to vector<2x32xf32>
    %575 = vector.extract_strided_slice %563 {offsets = [0, 96], sizes = [2, 32], strides = [1, 1]} : vector<2x128xf32> to vector<2x32xf32>
    %cst_229 = arith.constant 5.000000e-01 : f32
    %576 = vector.broadcast %cst_229 : f32 to vector<2x32xf32>
    %577 = arith.mulf %576, %575 : vector<2x32xf32>
    %cst_230 = arith.constant 5.000000e-01 : f32
    %578 = vector.broadcast %cst_230 : f32 to vector<2x32xf32>
    %579 = arith.addf %577, %578 : vector<2x32xf32>
    %580 = arith.mulf %573, %477 : vector<2x32xf32>
    %581 = arith.mulf %568, %574 : vector<2x32xf32>
    %582 = arith.addf %580, %581 : vector<2x32xf32>
    %583 = math.tanh %582 : vector<2x32xf32>
    %584 = arith.mulf %579, %583 : vector<2x32xf32>
    %cst_231 = arith.constant dense<0.000000e+00> : vector<2x128xf32>
    %585 = tpu.matmul %530, %2, %cst_231 {dimension_numbers = #tpu.dot_dimension_numbers<[1], [0], [0], [1], [0, 0, 1, 1], [], []>} : vector<2x32xf32>, vector<32x128xf32>, vector<2x128xf32> -> vector<2x128xf32>
    %cst_232 = arith.constant dense<0.000000e+00> : vector<2x128xf32>
    %586 = tpu.matmul %506, %8, %cst_232 {dimension_numbers = #tpu.dot_dimension_numbers<[1], [0], [0], [1], [0, 0, 1, 1], [], []>} : vector<2x32xf32>, vector<32x128xf32>, vector<2x128xf32> -> vector<2x128xf32>
    %587 = arith.addf %585, %586 : vector<2x128xf32>
    %588 = vector.broadcast %16 : vector<1x128xf32> to vector<2x128xf32>
    %589 = arith.addf %587, %588 : vector<2x128xf32>
    %590 = math.tanh %589 : vector<2x128xf32>
    %591 = vector.extract_strided_slice %590 {offsets = [0, 0], sizes = [2, 32], strides = [1, 1]} : vector<2x128xf32> to vector<2x32xf32>
    %cst_233 = arith.constant 5.000000e-01 : f32
    %592 = vector.broadcast %cst_233 : f32 to vector<2x32xf32>
    %593 = arith.mulf %592, %591 : vector<2x32xf32>
    %cst_234 = arith.constant 5.000000e-01 : f32
    %594 = vector.broadcast %cst_234 : f32 to vector<2x32xf32>
    %595 = arith.addf %593, %594 : vector<2x32xf32>
    %596 = vector.extract_strided_slice %590 {offsets = [0, 32], sizes = [2, 32], strides = [1, 1]} : vector<2x128xf32> to vector<2x32xf32>
    %cst_235 = arith.constant 5.000000e-01 : f32
    %597 = vector.broadcast %cst_235 : f32 to vector<2x32xf32>
    %598 = arith.mulf %597, %596 : vector<2x32xf32>
    %cst_236 = arith.constant 5.000000e-01 : f32
    %599 = vector.broadcast %cst_236 : f32 to vector<2x32xf32>
    %600 = arith.addf %598, %599 : vector<2x32xf32>
    %601 = vector.extract_strided_slice %590 {offsets = [0, 64], sizes = [2, 32], strides = [1, 1]} : vector<2x128xf32> to vector<2x32xf32>
    %602 = vector.extract_strided_slice %590 {offsets = [0, 96], sizes = [2, 32], strides = [1, 1]} : vector<2x128xf32> to vector<2x32xf32>
    %cst_237 = arith.constant 5.000000e-01 : f32
    %603 = vector.broadcast %cst_237 : f32 to vector<2x32xf32>
    %604 = arith.mulf %603, %602 : vector<2x32xf32>
    %cst_238 = arith.constant 5.000000e-01 : f32
    %605 = vector.broadcast %cst_238 : f32 to vector<2x32xf32>
    %606 = arith.addf %604, %605 : vector<2x32xf32>
    %607 = arith.mulf %600, %504 : vector<2x32xf32>
    %608 = arith.mulf %595, %601 : vector<2x32xf32>
    %609 = arith.addf %607, %608 : vector<2x32xf32>
    %610 = math.tanh %609 : vector<2x32xf32>
    %611 = arith.mulf %606, %610 : vector<2x32xf32>
    %cst_239 = arith.constant dense<0.000000e+00> : vector<2x128xf32>
    %612 = tpu.matmul %530, %0, %cst_239 {dimension_numbers = #tpu.dot_dimension_numbers<[1], [0], [0], [1], [0, 0, 1, 1], [], []>} : vector<2x32xf32>, vector<32x128xf32>, vector<2x128xf32> -> vector<2x128xf32>
    %613 = arith.addf %60, %612 : vector<2x128xf32>
    %614 = math.tanh %613 : vector<2x128xf32>
    %615 = vector.extract_strided_slice %614 {offsets = [0, 0], sizes = [2, 32], strides = [1, 1]} : vector<2x128xf32> to vector<2x32xf32>
    %cst_240 = arith.constant 5.000000e-01 : f32
    %616 = vector.broadcast %cst_240 : f32 to vector<2x32xf32>
    %617 = arith.mulf %616, %615 : vector<2x32xf32>
    %cst_241 = arith.constant 5.000000e-01 : f32
    %618 = vector.broadcast %cst_241 : f32 to vector<2x32xf32>
    %619 = arith.addf %617, %618 : vector<2x32xf32>
    %620 = vector.extract_strided_slice %614 {offsets = [0, 32], sizes = [2, 32], strides = [1, 1]} : vector<2x128xf32> to vector<2x32xf32>
    %cst_242 = arith.constant 5.000000e-01 : f32
    %621 = vector.broadcast %cst_242 : f32 to vector<2x32xf32>
    %622 = arith.mulf %621, %620 : vector<2x32xf32>
    %cst_243 = arith.constant 5.000000e-01 : f32
    %623 = vector.broadcast %cst_243 : f32 to vector<2x32xf32>
    %624 = arith.addf %622, %623 : vector<2x32xf32>
    %625 = vector.extract_strided_slice %614 {offsets = [0, 64], sizes = [2, 32], strides = [1, 1]} : vector<2x128xf32> to vector<2x32xf32>
    %626 = vector.extract_strided_slice %614 {offsets = [0, 96], sizes = [2, 32], strides = [1, 1]} : vector<2x128xf32> to vector<2x32xf32>
    %cst_244 = arith.constant 5.000000e-01 : f32
    %627 = vector.broadcast %cst_244 : f32 to vector<2x32xf32>
    %628 = arith.mulf %627, %626 : vector<2x32xf32>
    %cst_245 = arith.constant 5.000000e-01 : f32
    %629 = vector.broadcast %cst_245 : f32 to vector<2x32xf32>
    %630 = arith.addf %628, %629 : vector<2x32xf32>
    %631 = arith.mulf %624, %528 : vector<2x32xf32>
    %632 = arith.mulf %619, %625 : vector<2x32xf32>
    %633 = arith.addf %631, %632 : vector<2x32xf32>
    %634 = math.tanh %633 : vector<2x32xf32>
    %635 = arith.mulf %630, %634 : vector<2x32xf32>
    %cst_246 = arith.constant dense<0.000000e+00> : vector<2x128xf32>
    %636 = tpu.matmul %584, %6, %cst_246 {dimension_numbers = #tpu.dot_dimension_numbers<[1], [0], [0], [1], [0, 0, 1, 1], [], []>} : vector<2x32xf32>, vector<32x128xf32>, vector<2x128xf32> -> vector<2x128xf32>
    %cst_247 = arith.constant dense<0.000000e+00> : vector<2x128xf32>
    %637 = tpu.matmul %557, %12, %cst_247 {dimension_numbers = #tpu.dot_dimension_numbers<[1], [0], [0], [1], [0, 0, 1, 1], [], []>} : vector<2x32xf32>, vector<32x128xf32>, vector<2x128xf32> -> vector<2x128xf32>
    %638 = arith.addf %636, %637 : vector<2x128xf32>
    %639 = vector.broadcast %20 : vector<1x128xf32> to vector<2x128xf32>
    %640 = arith.addf %638, %639 : vector<2x128xf32>
    %641 = math.tanh %640 : vector<2x128xf32>
    %642 = vector.extract_strided_slice %641 {offsets = [0, 0], sizes = [2, 32], strides = [1, 1]} : vector<2x128xf32> to vector<2x32xf32>
    %cst_248 = arith.constant 5.000000e-01 : f32
    %643 = vector.broadcast %cst_248 : f32 to vector<2x32xf32>
    %644 = arith.mulf %643, %642 : vector<2x32xf32>
    %cst_249 = arith.constant 5.000000e-01 : f32
    %645 = vector.broadcast %cst_249 : f32 to vector<2x32xf32>
    %646 = arith.addf %644, %645 : vector<2x32xf32>
    %647 = vector.extract_strided_slice %641 {offsets = [0, 32], sizes = [2, 32], strides = [1, 1]} : vector<2x128xf32> to vector<2x32xf32>
    %cst_250 = arith.constant 5.000000e-01 : f32
    %648 = vector.broadcast %cst_250 : f32 to vector<2x32xf32>
    %649 = arith.mulf %648, %647 : vector<2x32xf32>
    %cst_251 = arith.constant 5.000000e-01 : f32
    %650 = vector.broadcast %cst_251 : f32 to vector<2x32xf32>
    %651 = arith.addf %649, %650 : vector<2x32xf32>
    %652 = vector.extract_strided_slice %641 {offsets = [0, 64], sizes = [2, 32], strides = [1, 1]} : vector<2x128xf32> to vector<2x32xf32>
    %653 = vector.extract_strided_slice %641 {offsets = [0, 96], sizes = [2, 32], strides = [1, 1]} : vector<2x128xf32> to vector<2x32xf32>
    %cst_252 = arith.constant 5.000000e-01 : f32
    %654 = vector.broadcast %cst_252 : f32 to vector<2x32xf32>
    %655 = arith.mulf %654, %653 : vector<2x32xf32>
    %cst_253 = arith.constant 5.000000e-01 : f32
    %656 = vector.broadcast %cst_253 : f32 to vector<2x32xf32>
    %657 = arith.addf %655, %656 : vector<2x32xf32>
    %658 = arith.mulf %651, %555 : vector<2x32xf32>
    %659 = arith.mulf %646, %652 : vector<2x32xf32>
    %660 = arith.addf %658, %659 : vector<2x32xf32>
    %661 = math.tanh %660 : vector<2x32xf32>
    %662 = arith.mulf %657, %661 : vector<2x32xf32>
    %cst_254 = arith.constant dense<0.000000e+00> : vector<2x128xf32>
    %663 = tpu.matmul %611, %4, %cst_254 {dimension_numbers = #tpu.dot_dimension_numbers<[1], [0], [0], [1], [0, 0, 1, 1], [], []>} : vector<2x32xf32>, vector<32x128xf32>, vector<2x128xf32> -> vector<2x128xf32>
    %cst_255 = arith.constant dense<0.000000e+00> : vector<2x128xf32>
    %664 = tpu.matmul %584, %10, %cst_255 {dimension_numbers = #tpu.dot_dimension_numbers<[1], [0], [0], [1], [0, 0, 1, 1], [], []>} : vector<2x32xf32>, vector<32x128xf32>, vector<2x128xf32> -> vector<2x128xf32>
    %665 = arith.addf %663, %664 : vector<2x128xf32>
    %666 = vector.broadcast %18 : vector<1x128xf32> to vector<2x128xf32>
    %667 = arith.addf %665, %666 : vector<2x128xf32>
    %668 = math.tanh %667 : vector<2x128xf32>
    %669 = vector.extract_strided_slice %668 {offsets = [0, 0], sizes = [2, 32], strides = [1, 1]} : vector<2x128xf32> to vector<2x32xf32>
    %cst_256 = arith.constant 5.000000e-01 : f32
    %670 = vector.broadcast %cst_256 : f32 to vector<2x32xf32>
    %671 = arith.mulf %670, %669 : vector<2x32xf32>
    %cst_257 = arith.constant 5.000000e-01 : f32
    %672 = vector.broadcast %cst_257 : f32 to vector<2x32xf32>
    %673 = arith.addf %671, %672 : vector<2x32xf32>
    %674 = vector.extract_strided_slice %668 {offsets = [0, 32], sizes = [2, 32], strides = [1, 1]} : vector<2x128xf32> to vector<2x32xf32>
    %cst_258 = arith.constant 5.000000e-01 : f32
    %675 = vector.broadcast %cst_258 : f32 to vector<2x32xf32>
    %676 = arith.mulf %675, %674 : vector<2x32xf32>
    %cst_259 = arith.constant 5.000000e-01 : f32
    %677 = vector.broadcast %cst_259 : f32 to vector<2x32xf32>
    %678 = arith.addf %676, %677 : vector<2x32xf32>
    %679 = vector.extract_strided_slice %668 {offsets = [0, 64], sizes = [2, 32], strides = [1, 1]} : vector<2x128xf32> to vector<2x32xf32>
    %680 = vector.extract_strided_slice %668 {offsets = [0, 96], sizes = [2, 32], strides = [1, 1]} : vector<2x128xf32> to vector<2x32xf32>
    %cst_260 = arith.constant 5.000000e-01 : f32
    %681 = vector.broadcast %cst_260 : f32 to vector<2x32xf32>
    %682 = arith.mulf %681, %680 : vector<2x32xf32>
    %cst_261 = arith.constant 5.000000e-01 : f32
    %683 = vector.broadcast %cst_261 : f32 to vector<2x32xf32>
    %684 = arith.addf %682, %683 : vector<2x32xf32>
    %685 = arith.mulf %678, %582 : vector<2x32xf32>
    %686 = arith.mulf %673, %679 : vector<2x32xf32>
    %687 = arith.addf %685, %686 : vector<2x32xf32>
    %688 = math.tanh %687 : vector<2x32xf32>
    %689 = arith.mulf %684, %688 : vector<2x32xf32>
    %cst_262 = arith.constant dense<0.000000e+00> : vector<2x128xf32>
    %690 = tpu.matmul %635, %2, %cst_262 {dimension_numbers = #tpu.dot_dimension_numbers<[1], [0], [0], [1], [0, 0, 1, 1], [], []>} : vector<2x32xf32>, vector<32x128xf32>, vector<2x128xf32> -> vector<2x128xf32>
    %cst_263 = arith.constant dense<0.000000e+00> : vector<2x128xf32>
    %691 = tpu.matmul %611, %8, %cst_263 {dimension_numbers = #tpu.dot_dimension_numbers<[1], [0], [0], [1], [0, 0, 1, 1], [], []>} : vector<2x32xf32>, vector<32x128xf32>, vector<2x128xf32> -> vector<2x128xf32>
    %692 = arith.addf %690, %691 : vector<2x128xf32>
    %693 = vector.broadcast %16 : vector<1x128xf32> to vector<2x128xf32>
    %694 = arith.addf %692, %693 : vector<2x128xf32>
    %695 = math.tanh %694 : vector<2x128xf32>
    %696 = vector.extract_strided_slice %695 {offsets = [0, 0], sizes = [2, 32], strides = [1, 1]} : vector<2x128xf32> to vector<2x32xf32>
    %cst_264 = arith.constant 5.000000e-01 : f32
    %697 = vector.broadcast %cst_264 : f32 to vector<2x32xf32>
    %698 = arith.mulf %697, %696 : vector<2x32xf32>
    %cst_265 = arith.constant 5.000000e-01 : f32
    %699 = vector.broadcast %cst_265 : f32 to vector<2x32xf32>
    %700 = arith.addf %698, %699 : vector<2x32xf32>
    %701 = vector.extract_strided_slice %695 {offsets = [0, 32], sizes = [2, 32], strides = [1, 1]} : vector<2x128xf32> to vector<2x32xf32>
    %cst_266 = arith.constant 5.000000e-01 : f32
    %702 = vector.broadcast %cst_266 : f32 to vector<2x32xf32>
    %703 = arith.mulf %702, %701 : vector<2x32xf32>
    %cst_267 = arith.constant 5.000000e-01 : f32
    %704 = vector.broadcast %cst_267 : f32 to vector<2x32xf32>
    %705 = arith.addf %703, %704 : vector<2x32xf32>
    %706 = vector.extract_strided_slice %695 {offsets = [0, 64], sizes = [2, 32], strides = [1, 1]} : vector<2x128xf32> to vector<2x32xf32>
    %707 = vector.extract_strided_slice %695 {offsets = [0, 96], sizes = [2, 32], strides = [1, 1]} : vector<2x128xf32> to vector<2x32xf32>
    %cst_268 = arith.constant 5.000000e-01 : f32
    %708 = vector.broadcast %cst_268 : f32 to vector<2x32xf32>
    %709 = arith.mulf %708, %707 : vector<2x32xf32>
    %cst_269 = arith.constant 5.000000e-01 : f32
    %710 = vector.broadcast %cst_269 : f32 to vector<2x32xf32>
    %711 = arith.addf %709, %710 : vector<2x32xf32>
    %712 = arith.mulf %705, %609 : vector<2x32xf32>
    %713 = arith.mulf %700, %706 : vector<2x32xf32>
    %714 = arith.addf %712, %713 : vector<2x32xf32>
    %715 = math.tanh %714 : vector<2x32xf32>
    %716 = arith.mulf %711, %715 : vector<2x32xf32>
    %cst_270 = arith.constant dense<0.000000e+00> : vector<2x128xf32>
    %717 = tpu.matmul %635, %0, %cst_270 {dimension_numbers = #tpu.dot_dimension_numbers<[1], [0], [0], [1], [0, 0, 1, 1], [], []>} : vector<2x32xf32>, vector<32x128xf32>, vector<2x128xf32> -> vector<2x128xf32>
    %718 = arith.addf %61, %717 : vector<2x128xf32>
    %719 = math.tanh %718 : vector<2x128xf32>
    %720 = vector.extract_strided_slice %719 {offsets = [0, 0], sizes = [2, 32], strides = [1, 1]} : vector<2x128xf32> to vector<2x32xf32>
    %cst_271 = arith.constant 5.000000e-01 : f32
    %721 = vector.broadcast %cst_271 : f32 to vector<2x32xf32>
    %722 = arith.mulf %721, %720 : vector<2x32xf32>
    %cst_272 = arith.constant 5.000000e-01 : f32
    %723 = vector.broadcast %cst_272 : f32 to vector<2x32xf32>
    %724 = arith.addf %722, %723 : vector<2x32xf32>
    %725 = vector.extract_strided_slice %719 {offsets = [0, 32], sizes = [2, 32], strides = [1, 1]} : vector<2x128xf32> to vector<2x32xf32>
    %cst_273 = arith.constant 5.000000e-01 : f32
    %726 = vector.broadcast %cst_273 : f32 to vector<2x32xf32>
    %727 = arith.mulf %726, %725 : vector<2x32xf32>
    %cst_274 = arith.constant 5.000000e-01 : f32
    %728 = vector.broadcast %cst_274 : f32 to vector<2x32xf32>
    %729 = arith.addf %727, %728 : vector<2x32xf32>
    %730 = vector.extract_strided_slice %719 {offsets = [0, 64], sizes = [2, 32], strides = [1, 1]} : vector<2x128xf32> to vector<2x32xf32>
    %731 = vector.extract_strided_slice %719 {offsets = [0, 96], sizes = [2, 32], strides = [1, 1]} : vector<2x128xf32> to vector<2x32xf32>
    %cst_275 = arith.constant 5.000000e-01 : f32
    %732 = vector.broadcast %cst_275 : f32 to vector<2x32xf32>
    %733 = arith.mulf %732, %731 : vector<2x32xf32>
    %cst_276 = arith.constant 5.000000e-01 : f32
    %734 = vector.broadcast %cst_276 : f32 to vector<2x32xf32>
    %735 = arith.addf %733, %734 : vector<2x32xf32>
    %736 = arith.mulf %729, %633 : vector<2x32xf32>
    %737 = arith.mulf %724, %730 : vector<2x32xf32>
    %738 = arith.addf %736, %737 : vector<2x32xf32>
    %739 = math.tanh %738 : vector<2x32xf32>
    %740 = arith.mulf %735, %739 : vector<2x32xf32>
    %cst_277 = arith.constant dense<0.000000e+00> : vector<2x128xf32>
    %741 = tpu.matmul %689, %6, %cst_277 {dimension_numbers = #tpu.dot_dimension_numbers<[1], [0], [0], [1], [0, 0, 1, 1], [], []>} : vector<2x32xf32>, vector<32x128xf32>, vector<2x128xf32> -> vector<2x128xf32>
    %cst_278 = arith.constant dense<0.000000e+00> : vector<2x128xf32>
    %742 = tpu.matmul %662, %12, %cst_278 {dimension_numbers = #tpu.dot_dimension_numbers<[1], [0], [0], [1], [0, 0, 1, 1], [], []>} : vector<2x32xf32>, vector<32x128xf32>, vector<2x128xf32> -> vector<2x128xf32>
    %743 = arith.addf %741, %742 : vector<2x128xf32>
    %744 = vector.broadcast %20 : vector<1x128xf32> to vector<2x128xf32>
    %745 = arith.addf %743, %744 : vector<2x128xf32>
    %746 = math.tanh %745 : vector<2x128xf32>
    %747 = vector.extract_strided_slice %746 {offsets = [0, 0], sizes = [2, 32], strides = [1, 1]} : vector<2x128xf32> to vector<2x32xf32>
    %cst_279 = arith.constant 5.000000e-01 : f32
    %748 = vector.broadcast %cst_279 : f32 to vector<2x32xf32>
    %749 = arith.mulf %748, %747 : vector<2x32xf32>
    %cst_280 = arith.constant 5.000000e-01 : f32
    %750 = vector.broadcast %cst_280 : f32 to vector<2x32xf32>
    %751 = arith.addf %749, %750 : vector<2x32xf32>
    %752 = vector.extract_strided_slice %746 {offsets = [0, 32], sizes = [2, 32], strides = [1, 1]} : vector<2x128xf32> to vector<2x32xf32>
    %cst_281 = arith.constant 5.000000e-01 : f32
    %753 = vector.broadcast %cst_281 : f32 to vector<2x32xf32>
    %754 = arith.mulf %753, %752 : vector<2x32xf32>
    %cst_282 = arith.constant 5.000000e-01 : f32
    %755 = vector.broadcast %cst_282 : f32 to vector<2x32xf32>
    %756 = arith.addf %754, %755 : vector<2x32xf32>
    %757 = vector.extract_strided_slice %746 {offsets = [0, 64], sizes = [2, 32], strides = [1, 1]} : vector<2x128xf32> to vector<2x32xf32>
    %758 = vector.extract_strided_slice %746 {offsets = [0, 96], sizes = [2, 32], strides = [1, 1]} : vector<2x128xf32> to vector<2x32xf32>
    %cst_283 = arith.constant 5.000000e-01 : f32
    %759 = vector.broadcast %cst_283 : f32 to vector<2x32xf32>
    %760 = arith.mulf %759, %758 : vector<2x32xf32>
    %cst_284 = arith.constant 5.000000e-01 : f32
    %761 = vector.broadcast %cst_284 : f32 to vector<2x32xf32>
    %762 = arith.addf %760, %761 : vector<2x32xf32>
    %763 = arith.mulf %756, %660 : vector<2x32xf32>
    %764 = arith.mulf %751, %757 : vector<2x32xf32>
    %765 = arith.addf %763, %764 : vector<2x32xf32>
    %766 = math.tanh %765 : vector<2x32xf32>
    %767 = arith.mulf %762, %766 : vector<2x32xf32>
    %cst_285 = arith.constant dense<0.000000e+00> : vector<2x128xf32>
    %768 = tpu.matmul %716, %4, %cst_285 {dimension_numbers = #tpu.dot_dimension_numbers<[1], [0], [0], [1], [0, 0, 1, 1], [], []>} : vector<2x32xf32>, vector<32x128xf32>, vector<2x128xf32> -> vector<2x128xf32>
    %cst_286 = arith.constant dense<0.000000e+00> : vector<2x128xf32>
    %769 = tpu.matmul %689, %10, %cst_286 {dimension_numbers = #tpu.dot_dimension_numbers<[1], [0], [0], [1], [0, 0, 1, 1], [], []>} : vector<2x32xf32>, vector<32x128xf32>, vector<2x128xf32> -> vector<2x128xf32>
    %770 = arith.addf %768, %769 : vector<2x128xf32>
    %771 = vector.broadcast %18 : vector<1x128xf32> to vector<2x128xf32>
    %772 = arith.addf %770, %771 : vector<2x128xf32>
    %773 = math.tanh %772 : vector<2x128xf32>
    %774 = vector.extract_strided_slice %773 {offsets = [0, 0], sizes = [2, 32], strides = [1, 1]} : vector<2x128xf32> to vector<2x32xf32>
    %cst_287 = arith.constant 5.000000e-01 : f32
    %775 = vector.broadcast %cst_287 : f32 to vector<2x32xf32>
    %776 = arith.mulf %775, %774 : vector<2x32xf32>
    %cst_288 = arith.constant 5.000000e-01 : f32
    %777 = vector.broadcast %cst_288 : f32 to vector<2x32xf32>
    %778 = arith.addf %776, %777 : vector<2x32xf32>
    %779 = vector.extract_strided_slice %773 {offsets = [0, 32], sizes = [2, 32], strides = [1, 1]} : vector<2x128xf32> to vector<2x32xf32>
    %cst_289 = arith.constant 5.000000e-01 : f32
    %780 = vector.broadcast %cst_289 : f32 to vector<2x32xf32>
    %781 = arith.mulf %780, %779 : vector<2x32xf32>
    %cst_290 = arith.constant 5.000000e-01 : f32
    %782 = vector.broadcast %cst_290 : f32 to vector<2x32xf32>
    %783 = arith.addf %781, %782 : vector<2x32xf32>
    %784 = vector.extract_strided_slice %773 {offsets = [0, 64], sizes = [2, 32], strides = [1, 1]} : vector<2x128xf32> to vector<2x32xf32>
    %785 = vector.extract_strided_slice %773 {offsets = [0, 96], sizes = [2, 32], strides = [1, 1]} : vector<2x128xf32> to vector<2x32xf32>
    %cst_291 = arith.constant 5.000000e-01 : f32
    %786 = vector.broadcast %cst_291 : f32 to vector<2x32xf32>
    %787 = arith.mulf %786, %785 : vector<2x32xf32>
    %cst_292 = arith.constant 5.000000e-01 : f32
    %788 = vector.broadcast %cst_292 : f32 to vector<2x32xf32>
    %789 = arith.addf %787, %788 : vector<2x32xf32>
    %790 = arith.mulf %783, %687 : vector<2x32xf32>
    %791 = arith.mulf %778, %784 : vector<2x32xf32>
    %792 = arith.addf %790, %791 : vector<2x32xf32>
    %793 = math.tanh %792 : vector<2x32xf32>
    %794 = arith.mulf %789, %793 : vector<2x32xf32>
    %cst_293 = arith.constant dense<0.000000e+00> : vector<2x128xf32>
    %795 = tpu.matmul %740, %2, %cst_293 {dimension_numbers = #tpu.dot_dimension_numbers<[1], [0], [0], [1], [0, 0, 1, 1], [], []>} : vector<2x32xf32>, vector<32x128xf32>, vector<2x128xf32> -> vector<2x128xf32>
    %cst_294 = arith.constant dense<0.000000e+00> : vector<2x128xf32>
    %796 = tpu.matmul %716, %8, %cst_294 {dimension_numbers = #tpu.dot_dimension_numbers<[1], [0], [0], [1], [0, 0, 1, 1], [], []>} : vector<2x32xf32>, vector<32x128xf32>, vector<2x128xf32> -> vector<2x128xf32>
    %797 = arith.addf %795, %796 : vector<2x128xf32>
    %798 = vector.broadcast %16 : vector<1x128xf32> to vector<2x128xf32>
    %799 = arith.addf %797, %798 : vector<2x128xf32>
    %800 = math.tanh %799 : vector<2x128xf32>
    %801 = vector.extract_strided_slice %800 {offsets = [0, 0], sizes = [2, 32], strides = [1, 1]} : vector<2x128xf32> to vector<2x32xf32>
    %cst_295 = arith.constant 5.000000e-01 : f32
    %802 = vector.broadcast %cst_295 : f32 to vector<2x32xf32>
    %803 = arith.mulf %802, %801 : vector<2x32xf32>
    %cst_296 = arith.constant 5.000000e-01 : f32
    %804 = vector.broadcast %cst_296 : f32 to vector<2x32xf32>
    %805 = arith.addf %803, %804 : vector<2x32xf32>
    %806 = vector.extract_strided_slice %800 {offsets = [0, 32], sizes = [2, 32], strides = [1, 1]} : vector<2x128xf32> to vector<2x32xf32>
    %cst_297 = arith.constant 5.000000e-01 : f32
    %807 = vector.broadcast %cst_297 : f32 to vector<2x32xf32>
    %808 = arith.mulf %807, %806 : vector<2x32xf32>
    %cst_298 = arith.constant 5.000000e-01 : f32
    %809 = vector.broadcast %cst_298 : f32 to vector<2x32xf32>
    %810 = arith.addf %808, %809 : vector<2x32xf32>
    %811 = vector.extract_strided_slice %800 {offsets = [0, 64], sizes = [2, 32], strides = [1, 1]} : vector<2x128xf32> to vector<2x32xf32>
    %812 = vector.extract_strided_slice %800 {offsets = [0, 96], sizes = [2, 32], strides = [1, 1]} : vector<2x128xf32> to vector<2x32xf32>
    %cst_299 = arith.constant 5.000000e-01 : f32
    %813 = vector.broadcast %cst_299 : f32 to vector<2x32xf32>
    %814 = arith.mulf %813, %812 : vector<2x32xf32>
    %cst_300 = arith.constant 5.000000e-01 : f32
    %815 = vector.broadcast %cst_300 : f32 to vector<2x32xf32>
    %816 = arith.addf %814, %815 : vector<2x32xf32>
    %817 = arith.mulf %810, %714 : vector<2x32xf32>
    %818 = arith.mulf %805, %811 : vector<2x32xf32>
    %819 = arith.addf %817, %818 : vector<2x32xf32>
    %820 = math.tanh %819 : vector<2x32xf32>
    %821 = arith.mulf %816, %820 : vector<2x32xf32>
    %cst_301 = arith.constant dense<0.000000e+00> : vector<2x128xf32>
    %822 = tpu.matmul %794, %6, %cst_301 {dimension_numbers = #tpu.dot_dimension_numbers<[1], [0], [0], [1], [0, 0, 1, 1], [], []>} : vector<2x32xf32>, vector<32x128xf32>, vector<2x128xf32> -> vector<2x128xf32>
    %cst_302 = arith.constant dense<0.000000e+00> : vector<2x128xf32>
    %823 = tpu.matmul %767, %12, %cst_302 {dimension_numbers = #tpu.dot_dimension_numbers<[1], [0], [0], [1], [0, 0, 1, 1], [], []>} : vector<2x32xf32>, vector<32x128xf32>, vector<2x128xf32> -> vector<2x128xf32>
    %824 = arith.addf %822, %823 : vector<2x128xf32>
    %825 = vector.broadcast %20 : vector<1x128xf32> to vector<2x128xf32>
    %826 = arith.addf %824, %825 : vector<2x128xf32>
    %827 = math.tanh %826 : vector<2x128xf32>
    %828 = vector.extract_strided_slice %827 {offsets = [0, 0], sizes = [2, 32], strides = [1, 1]} : vector<2x128xf32> to vector<2x32xf32>
    %cst_303 = arith.constant 5.000000e-01 : f32
    %829 = vector.broadcast %cst_303 : f32 to vector<2x32xf32>
    %830 = arith.mulf %829, %828 : vector<2x32xf32>
    %cst_304 = arith.constant 5.000000e-01 : f32
    %831 = vector.broadcast %cst_304 : f32 to vector<2x32xf32>
    %832 = arith.addf %830, %831 : vector<2x32xf32>
    %833 = vector.extract_strided_slice %827 {offsets = [0, 32], sizes = [2, 32], strides = [1, 1]} : vector<2x128xf32> to vector<2x32xf32>
    %cst_305 = arith.constant 5.000000e-01 : f32
    %834 = vector.broadcast %cst_305 : f32 to vector<2x32xf32>
    %835 = arith.mulf %834, %833 : vector<2x32xf32>
    %cst_306 = arith.constant 5.000000e-01 : f32
    %836 = vector.broadcast %cst_306 : f32 to vector<2x32xf32>
    %837 = arith.addf %835, %836 : vector<2x32xf32>
    %838 = vector.extract_strided_slice %827 {offsets = [0, 64], sizes = [2, 32], strides = [1, 1]} : vector<2x128xf32> to vector<2x32xf32>
    %839 = vector.extract_strided_slice %827 {offsets = [0, 96], sizes = [2, 32], strides = [1, 1]} : vector<2x128xf32> to vector<2x32xf32>
    %cst_307 = arith.constant 5.000000e-01 : f32
    %840 = vector.broadcast %cst_307 : f32 to vector<2x32xf32>
    %841 = arith.mulf %840, %839 : vector<2x32xf32>
    %cst_308 = arith.constant 5.000000e-01 : f32
    %842 = vector.broadcast %cst_308 : f32 to vector<2x32xf32>
    %843 = arith.addf %841, %842 : vector<2x32xf32>
    %844 = arith.mulf %837, %765 : vector<2x32xf32>
    %845 = arith.mulf %832, %838 : vector<2x32xf32>
    %846 = arith.addf %844, %845 : vector<2x32xf32>
    %847 = math.tanh %846 : vector<2x32xf32>
    %848 = arith.mulf %843, %847 : vector<2x32xf32>
    %cst_309 = arith.constant dense<0.000000e+00> : vector<2x128xf32>
    %849 = tpu.matmul %821, %4, %cst_309 {dimension_numbers = #tpu.dot_dimension_numbers<[1], [0], [0], [1], [0, 0, 1, 1], [], []>} : vector<2x32xf32>, vector<32x128xf32>, vector<2x128xf32> -> vector<2x128xf32>
    %cst_310 = arith.constant dense<0.000000e+00> : vector<2x128xf32>
    %850 = tpu.matmul %794, %10, %cst_310 {dimension_numbers = #tpu.dot_dimension_numbers<[1], [0], [0], [1], [0, 0, 1, 1], [], []>} : vector<2x32xf32>, vector<32x128xf32>, vector<2x128xf32> -> vector<2x128xf32>
    %851 = arith.addf %849, %850 : vector<2x128xf32>
    %852 = vector.broadcast %18 : vector<1x128xf32> to vector<2x128xf32>
    %853 = arith.addf %851, %852 : vector<2x128xf32>
    %854 = math.tanh %853 : vector<2x128xf32>
    %855 = vector.extract_strided_slice %854 {offsets = [0, 0], sizes = [2, 32], strides = [1, 1]} : vector<2x128xf32> to vector<2x32xf32>
    %cst_311 = arith.constant 5.000000e-01 : f32
    %856 = vector.broadcast %cst_311 : f32 to vector<2x32xf32>
    %857 = arith.mulf %856, %855 : vector<2x32xf32>
    %cst_312 = arith.constant 5.000000e-01 : f32
    %858 = vector.broadcast %cst_312 : f32 to vector<2x32xf32>
    %859 = arith.addf %857, %858 : vector<2x32xf32>
    %860 = vector.extract_strided_slice %854 {offsets = [0, 32], sizes = [2, 32], strides = [1, 1]} : vector<2x128xf32> to vector<2x32xf32>
    %cst_313 = arith.constant 5.000000e-01 : f32
    %861 = vector.broadcast %cst_313 : f32 to vector<2x32xf32>
    %862 = arith.mulf %861, %860 : vector<2x32xf32>
    %cst_314 = arith.constant 5.000000e-01 : f32
    %863 = vector.broadcast %cst_314 : f32 to vector<2x32xf32>
    %864 = arith.addf %862, %863 : vector<2x32xf32>
    %865 = vector.extract_strided_slice %854 {offsets = [0, 64], sizes = [2, 32], strides = [1, 1]} : vector<2x128xf32> to vector<2x32xf32>
    %866 = vector.extract_strided_slice %854 {offsets = [0, 96], sizes = [2, 32], strides = [1, 1]} : vector<2x128xf32> to vector<2x32xf32>
    %cst_315 = arith.constant 5.000000e-01 : f32
    %867 = vector.broadcast %cst_315 : f32 to vector<2x32xf32>
    %868 = arith.mulf %867, %866 : vector<2x32xf32>
    %cst_316 = arith.constant 5.000000e-01 : f32
    %869 = vector.broadcast %cst_316 : f32 to vector<2x32xf32>
    %870 = arith.addf %868, %869 : vector<2x32xf32>
    %871 = arith.mulf %864, %792 : vector<2x32xf32>
    %872 = arith.mulf %859, %865 : vector<2x32xf32>
    %873 = arith.addf %871, %872 : vector<2x32xf32>
    %874 = math.tanh %873 : vector<2x32xf32>
    %875 = arith.mulf %870, %874 : vector<2x32xf32>
    %cst_317 = arith.constant dense<0.000000e+00> : vector<2x128xf32>
    %876 = tpu.matmul %875, %6, %cst_317 {dimension_numbers = #tpu.dot_dimension_numbers<[1], [0], [0], [1], [0, 0, 1, 1], [], []>} : vector<2x32xf32>, vector<32x128xf32>, vector<2x128xf32> -> vector<2x128xf32>
    %cst_318 = arith.constant dense<0.000000e+00> : vector<2x128xf32>
    %877 = tpu.matmul %848, %12, %cst_318 {dimension_numbers = #tpu.dot_dimension_numbers<[1], [0], [0], [1], [0, 0, 1, 1], [], []>} : vector<2x32xf32>, vector<32x128xf32>, vector<2x128xf32> -> vector<2x128xf32>
    %878 = arith.addf %876, %877 : vector<2x128xf32>
    %879 = vector.broadcast %20 : vector<1x128xf32> to vector<2x128xf32>
    %880 = arith.addf %878, %879 : vector<2x128xf32>
    %881 = math.tanh %880 : vector<2x128xf32>
    %882 = vector.extract_strided_slice %881 {offsets = [0, 0], sizes = [2, 32], strides = [1, 1]} : vector<2x128xf32> to vector<2x32xf32>
    %cst_319 = arith.constant 5.000000e-01 : f32
    %883 = vector.broadcast %cst_319 : f32 to vector<2x32xf32>
    %884 = arith.mulf %883, %882 : vector<2x32xf32>
    %cst_320 = arith.constant 5.000000e-01 : f32
    %885 = vector.broadcast %cst_320 : f32 to vector<2x32xf32>
    %886 = arith.addf %884, %885 : vector<2x32xf32>
    %887 = vector.extract_strided_slice %881 {offsets = [0, 32], sizes = [2, 32], strides = [1, 1]} : vector<2x128xf32> to vector<2x32xf32>
    %cst_321 = arith.constant 5.000000e-01 : f32
    %888 = vector.broadcast %cst_321 : f32 to vector<2x32xf32>
    %889 = arith.mulf %888, %887 : vector<2x32xf32>
    %cst_322 = arith.constant 5.000000e-01 : f32
    %890 = vector.broadcast %cst_322 : f32 to vector<2x32xf32>
    %891 = arith.addf %889, %890 : vector<2x32xf32>
    %892 = vector.extract_strided_slice %881 {offsets = [0, 64], sizes = [2, 32], strides = [1, 1]} : vector<2x128xf32> to vector<2x32xf32>
    %893 = vector.extract_strided_slice %881 {offsets = [0, 96], sizes = [2, 32], strides = [1, 1]} : vector<2x128xf32> to vector<2x32xf32>
    %cst_323 = arith.constant 5.000000e-01 : f32
    %894 = vector.broadcast %cst_323 : f32 to vector<2x32xf32>
    %895 = arith.mulf %894, %893 : vector<2x32xf32>
    %cst_324 = arith.constant 5.000000e-01 : f32
    %896 = vector.broadcast %cst_324 : f32 to vector<2x32xf32>
    %897 = arith.addf %895, %896 : vector<2x32xf32>
    %898 = arith.mulf %891, %846 : vector<2x32xf32>
    %899 = arith.mulf %886, %892 : vector<2x32xf32>
    %900 = arith.addf %898, %899 : vector<2x32xf32>
    %901 = math.tanh %900 : vector<2x32xf32>
    %902 = arith.mulf %897, %901 : vector<2x32xf32>
    %cst_325 = arith.constant dense<0.000000e+00> : vector<2x128xf32>
    %903 = tpu.matmul %740, %30, %cst_325 {dimension_numbers = #tpu.dot_dimension_numbers<[1], [0], [0], [1], [0, 0, 1, 1], [], []>} : vector<2x32xf32>, vector<32x128xf32>, vector<2x128xf32> -> vector<2x128xf32>
    %904 = vector.broadcast %38 : vector<1x128xf32> to vector<2x128xf32>
    %905 = arith.addf %903, %904 : vector<2x128xf32>
    %cst_326 = arith.constant dense<0.000000e+00> : vector<2x128xf32>
    %906 = tpu.matmul %821, %32, %cst_326 {dimension_numbers = #tpu.dot_dimension_numbers<[1], [0], [0], [1], [0, 0, 1, 1], [], []>} : vector<2x32xf32>, vector<32x128xf32>, vector<2x128xf32> -> vector<2x128xf32>
    %907 = vector.broadcast %40 : vector<1x128xf32> to vector<2x128xf32>
    %908 = arith.addf %906, %907 : vector<2x128xf32>
    %cst_327 = arith.constant dense<0.000000e+00> : vector<2x128xf32>
    %909 = tpu.matmul %875, %34, %cst_327 {dimension_numbers = #tpu.dot_dimension_numbers<[1], [0], [0], [1], [0, 0, 1, 1], [], []>} : vector<2x32xf32>, vector<32x128xf32>, vector<2x128xf32> -> vector<2x128xf32>
    %910 = vector.broadcast %42 : vector<1x128xf32> to vector<2x128xf32>
    %911 = arith.addf %909, %910 : vector<2x128xf32>
    %cst_328 = arith.constant dense<0.000000e+00> : vector<2x128xf32>
    %912 = tpu.matmul %902, %36, %cst_328 {dimension_numbers = #tpu.dot_dimension_numbers<[1], [0], [0], [1], [0, 0, 1, 1], [], []>} : vector<2x32xf32>, vector<32x128xf32>, vector<2x128xf32> -> vector<2x128xf32>
    %913 = vector.broadcast %44 : vector<1x128xf32> to vector<2x128xf32>
    %914 = arith.addf %912, %913 : vector<2x128xf32>
    %c14 = arith.constant 14 : index
    %c0_329 = arith.constant 0 : index
    %915 = vector.load %arg0[%c14, %c0_329] : memref<16x32xf32, #tpu.memory_space<vmem>>, vector<2x32xf32>
    %cst_330 = arith.constant dense<0.000000e+00> : vector<2x128xf32>
    %916 = tpu.matmul %915, %22, %cst_330 {dimension_numbers = #tpu.dot_dimension_numbers<[1], [0], [0], [1], [0, 0, 1, 1], [], []>} : vector<2x32xf32>, vector<32x128xf32>, vector<2x128xf32> -> vector<2x128xf32>
    %917 = arith.addf %916, %905 : vector<2x128xf32>
    %918 = vector.broadcast %46 : vector<1x128xf32> to vector<2x128xf32>
    %919 = arith.addf %905, %918 : vector<2x128xf32>
    %920 = math.tanh %917 : vector<2x128xf32>
    %921 = vector.extract_strided_slice %920 {offsets = [0, 0], sizes = [2, 32], strides = [1, 1]} : vector<2x128xf32> to vector<2x32xf32>
    %cst_331 = arith.constant 5.000000e-01 : f32
    %922 = vector.broadcast %cst_331 : f32 to vector<2x32xf32>
    %923 = arith.mulf %922, %921 : vector<2x32xf32>
    %cst_332 = arith.constant 5.000000e-01 : f32
    %924 = vector.broadcast %cst_332 : f32 to vector<2x32xf32>
    %925 = arith.addf %923, %924 : vector<2x32xf32>
    %926 = vector.extract_strided_slice %920 {offsets = [0, 32], sizes = [2, 32], strides = [1, 1]} : vector<2x128xf32> to vector<2x32xf32>
    %cst_333 = arith.constant 5.000000e-01 : f32
    %927 = vector.broadcast %cst_333 : f32 to vector<2x32xf32>
    %928 = arith.mulf %927, %926 : vector<2x32xf32>
    %cst_334 = arith.constant 5.000000e-01 : f32
    %929 = vector.broadcast %cst_334 : f32 to vector<2x32xf32>
    %930 = arith.addf %928, %929 : vector<2x32xf32>
    %931 = vector.extract_strided_slice %920 {offsets = [0, 64], sizes = [2, 32], strides = [1, 1]} : vector<2x128xf32> to vector<2x32xf32>
    %932 = vector.extract_strided_slice %920 {offsets = [0, 96], sizes = [2, 32], strides = [1, 1]} : vector<2x128xf32> to vector<2x32xf32>
    %cst_335 = arith.constant 5.000000e-01 : f32
    %933 = vector.broadcast %cst_335 : f32 to vector<2x32xf32>
    %934 = arith.mulf %933, %932 : vector<2x32xf32>
    %cst_336 = arith.constant 5.000000e-01 : f32
    %935 = vector.broadcast %cst_336 : f32 to vector<2x32xf32>
    %936 = arith.addf %934, %935 : vector<2x32xf32>
    %937 = arith.mulf %930, %738 : vector<2x32xf32>
    %938 = arith.mulf %925, %931 : vector<2x32xf32>
    %939 = arith.addf %937, %938 : vector<2x32xf32>
    %940 = math.tanh %939 : vector<2x32xf32>
    %941 = arith.mulf %936, %940 : vector<2x32xf32>
    %cst_337 = arith.constant dense<0.000000e+00> : vector<2x128xf32>
    %942 = tpu.matmul %941, %24, %cst_337 {dimension_numbers = #tpu.dot_dimension_numbers<[1], [0], [0], [1], [0, 0, 1, 1], [], []>} : vector<2x32xf32>, vector<32x128xf32>, vector<2x128xf32> -> vector<2x128xf32>
    %943 = arith.addf %942, %908 : vector<2x128xf32>
    %944 = math.tanh %943 : vector<2x128xf32>
    %945 = vector.extract_strided_slice %944 {offsets = [0, 0], sizes = [2, 32], strides = [1, 1]} : vector<2x128xf32> to vector<2x32xf32>
    %cst_338 = arith.constant 5.000000e-01 : f32
    %946 = vector.broadcast %cst_338 : f32 to vector<2x32xf32>
    %947 = arith.mulf %946, %945 : vector<2x32xf32>
    %cst_339 = arith.constant 5.000000e-01 : f32
    %948 = vector.broadcast %cst_339 : f32 to vector<2x32xf32>
    %949 = arith.addf %947, %948 : vector<2x32xf32>
    %950 = vector.extract_strided_slice %944 {offsets = [0, 32], sizes = [2, 32], strides = [1, 1]} : vector<2x128xf32> to vector<2x32xf32>
    %cst_340 = arith.constant 5.000000e-01 : f32
    %951 = vector.broadcast %cst_340 : f32 to vector<2x32xf32>
    %952 = arith.mulf %951, %950 : vector<2x32xf32>
    %cst_341 = arith.constant 5.000000e-01 : f32
    %953 = vector.broadcast %cst_341 : f32 to vector<2x32xf32>
    %954 = arith.addf %952, %953 : vector<2x32xf32>
    %955 = vector.extract_strided_slice %944 {offsets = [0, 64], sizes = [2, 32], strides = [1, 1]} : vector<2x128xf32> to vector<2x32xf32>
    %956 = vector.extract_strided_slice %944 {offsets = [0, 96], sizes = [2, 32], strides = [1, 1]} : vector<2x128xf32> to vector<2x32xf32>
    %cst_342 = arith.constant 5.000000e-01 : f32
    %957 = vector.broadcast %cst_342 : f32 to vector<2x32xf32>
    %958 = arith.mulf %957, %956 : vector<2x32xf32>
    %cst_343 = arith.constant 5.000000e-01 : f32
    %959 = vector.broadcast %cst_343 : f32 to vector<2x32xf32>
    %960 = arith.addf %958, %959 : vector<2x32xf32>
    %961 = arith.mulf %954, %819 : vector<2x32xf32>
    %962 = arith.mulf %949, %955 : vector<2x32xf32>
    %963 = arith.addf %961, %962 : vector<2x32xf32>
    %964 = math.tanh %963 : vector<2x32xf32>
    %965 = arith.mulf %960, %964 : vector<2x32xf32>
    %cst_344 = arith.constant dense<0.000000e+00> : vector<2x128xf32>
    %966 = tpu.matmul %965, %26, %cst_344 {dimension_numbers = #tpu.dot_dimension_numbers<[1], [0], [0], [1], [0, 0, 1, 1], [], []>} : vector<2x32xf32>, vector<32x128xf32>, vector<2x128xf32> -> vector<2x128xf32>
    %967 = arith.addf %966, %911 : vector<2x128xf32>
    %968 = math.tanh %967 : vector<2x128xf32>
    %969 = vector.extract_strided_slice %968 {offsets = [0, 0], sizes = [2, 32], strides = [1, 1]} : vector<2x128xf32> to vector<2x32xf32>
    %cst_345 = arith.constant 5.000000e-01 : f32
    %970 = vector.broadcast %cst_345 : f32 to vector<2x32xf32>
    %971 = arith.mulf %970, %969 : vector<2x32xf32>
    %cst_346 = arith.constant 5.000000e-01 : f32
    %972 = vector.broadcast %cst_346 : f32 to vector<2x32xf32>
    %973 = arith.addf %971, %972 : vector<2x32xf32>
    %974 = vector.extract_strided_slice %968 {offsets = [0, 32], sizes = [2, 32], strides = [1, 1]} : vector<2x128xf32> to vector<2x32xf32>
    %cst_347 = arith.constant 5.000000e-01 : f32
    %975 = vector.broadcast %cst_347 : f32 to vector<2x32xf32>
    %976 = arith.mulf %975, %974 : vector<2x32xf32>
    %cst_348 = arith.constant 5.000000e-01 : f32
    %977 = vector.broadcast %cst_348 : f32 to vector<2x32xf32>
    %978 = arith.addf %976, %977 : vector<2x32xf32>
    %979 = vector.extract_strided_slice %968 {offsets = [0, 64], sizes = [2, 32], strides = [1, 1]} : vector<2x128xf32> to vector<2x32xf32>
    %980 = vector.extract_strided_slice %968 {offsets = [0, 96], sizes = [2, 32], strides = [1, 1]} : vector<2x128xf32> to vector<2x32xf32>
    %cst_349 = arith.constant 5.000000e-01 : f32
    %981 = vector.broadcast %cst_349 : f32 to vector<2x32xf32>
    %982 = arith.mulf %981, %980 : vector<2x32xf32>
    %cst_350 = arith.constant 5.000000e-01 : f32
    %983 = vector.broadcast %cst_350 : f32 to vector<2x32xf32>
    %984 = arith.addf %982, %983 : vector<2x32xf32>
    %985 = arith.mulf %978, %873 : vector<2x32xf32>
    %986 = arith.mulf %973, %979 : vector<2x32xf32>
    %987 = arith.addf %985, %986 : vector<2x32xf32>
    %988 = math.tanh %987 : vector<2x32xf32>
    %989 = arith.mulf %984, %988 : vector<2x32xf32>
    %cst_351 = arith.constant dense<0.000000e+00> : vector<2x128xf32>
    %990 = tpu.matmul %989, %28, %cst_351 {dimension_numbers = #tpu.dot_dimension_numbers<[1], [0], [0], [1], [0, 0, 1, 1], [], []>} : vector<2x32xf32>, vector<32x128xf32>, vector<2x128xf32> -> vector<2x128xf32>
    %991 = arith.addf %990, %914 : vector<2x128xf32>
    %992 = math.tanh %991 : vector<2x128xf32>
    %993 = vector.extract_strided_slice %992 {offsets = [0, 0], sizes = [2, 32], strides = [1, 1]} : vector<2x128xf32> to vector<2x32xf32>
    %cst_352 = arith.constant 5.000000e-01 : f32
    %994 = vector.broadcast %cst_352 : f32 to vector<2x32xf32>
    %995 = arith.mulf %994, %993 : vector<2x32xf32>
    %cst_353 = arith.constant 5.000000e-01 : f32
    %996 = vector.broadcast %cst_353 : f32 to vector<2x32xf32>
    %997 = arith.addf %995, %996 : vector<2x32xf32>
    %998 = vector.extract_strided_slice %992 {offsets = [0, 32], sizes = [2, 32], strides = [1, 1]} : vector<2x128xf32> to vector<2x32xf32>
    %cst_354 = arith.constant 5.000000e-01 : f32
    %999 = vector.broadcast %cst_354 : f32 to vector<2x32xf32>
    %1000 = arith.mulf %999, %998 : vector<2x32xf32>
    %cst_355 = arith.constant 5.000000e-01 : f32
    %1001 = vector.broadcast %cst_355 : f32 to vector<2x32xf32>
    %1002 = arith.addf %1000, %1001 : vector<2x32xf32>
    %1003 = vector.extract_strided_slice %992 {offsets = [0, 64], sizes = [2, 32], strides = [1, 1]} : vector<2x128xf32> to vector<2x32xf32>
    %1004 = vector.extract_strided_slice %992 {offsets = [0, 96], sizes = [2, 32], strides = [1, 1]} : vector<2x128xf32> to vector<2x32xf32>
    %cst_356 = arith.constant 5.000000e-01 : f32
    %1005 = vector.broadcast %cst_356 : f32 to vector<2x32xf32>
    %1006 = arith.mulf %1005, %1004 : vector<2x32xf32>
    %cst_357 = arith.constant 5.000000e-01 : f32
    %1007 = vector.broadcast %cst_357 : f32 to vector<2x32xf32>
    %1008 = arith.addf %1006, %1007 : vector<2x32xf32>
    %1009 = arith.mulf %1002, %900 : vector<2x32xf32>
    %1010 = arith.mulf %997, %1003 : vector<2x32xf32>
    %1011 = arith.addf %1009, %1010 : vector<2x32xf32>
    %1012 = math.tanh %1011 : vector<2x32xf32>
    %1013 = arith.mulf %1008, %1012 : vector<2x32xf32>
    %cst_358 = arith.constant dense<0.000000e+00> : vector<2x128xf32>
    %1014 = tpu.matmul %1013, %45, %cst_358 {dimension_numbers = #tpu.dot_dimension_numbers<[1], [0], [0], [1], [0, 0, 1, 1], [], []>} : vector<2x32xf32>, vector<32x128xf32>, vector<2x128xf32> -> vector<2x128xf32>
    %1015 = arith.addf %1014, %919 : vector<2x128xf32>
    %1016 = math.tanh %1015 : vector<2x128xf32>
    %1017 = vector.extract_strided_slice %1016 {offsets = [0, 0], sizes = [2, 32], strides = [1, 1]} : vector<2x128xf32> to vector<2x32xf32>
    %cst_359 = arith.constant 5.000000e-01 : f32
    %1018 = vector.broadcast %cst_359 : f32 to vector<2x32xf32>
    %1019 = arith.mulf %1018, %1017 : vector<2x32xf32>
    %cst_360 = arith.constant 5.000000e-01 : f32
    %1020 = vector.broadcast %cst_360 : f32 to vector<2x32xf32>
    %1021 = arith.addf %1019, %1020 : vector<2x32xf32>
    %1022 = vector.extract_strided_slice %1016 {offsets = [0, 32], sizes = [2, 32], strides = [1, 1]} : vector<2x128xf32> to vector<2x32xf32>
    %cst_361 = arith.constant 5.000000e-01 : f32
    %1023 = vector.broadcast %cst_361 : f32 to vector<2x32xf32>
    %1024 = arith.mulf %1023, %1022 : vector<2x32xf32>
    %cst_362 = arith.constant 5.000000e-01 : f32
    %1025 = vector.broadcast %cst_362 : f32 to vector<2x32xf32>
    %1026 = arith.addf %1024, %1025 : vector<2x32xf32>
    %1027 = vector.extract_strided_slice %1016 {offsets = [0, 64], sizes = [2, 32], strides = [1, 1]} : vector<2x128xf32> to vector<2x32xf32>
    %1028 = vector.extract_strided_slice %1016 {offsets = [0, 96], sizes = [2, 32], strides = [1, 1]} : vector<2x128xf32> to vector<2x32xf32>
    %cst_363 = arith.constant 5.000000e-01 : f32
    %1029 = vector.broadcast %cst_363 : f32 to vector<2x32xf32>
    %1030 = arith.mulf %1029, %1028 : vector<2x32xf32>
    %cst_364 = arith.constant 5.000000e-01 : f32
    %1031 = vector.broadcast %cst_364 : f32 to vector<2x32xf32>
    %1032 = arith.addf %1030, %1031 : vector<2x32xf32>
    %1033 = arith.mulf %1026, %738 : vector<2x32xf32>
    %1034 = arith.mulf %1021, %1027 : vector<2x32xf32>
    %1035 = arith.addf %1033, %1034 : vector<2x32xf32>
    %1036 = math.tanh %1035 : vector<2x32xf32>
    %1037 = arith.mulf %1032, %1036 : vector<2x32xf32>
    %cst_365 = arith.constant dense<0.000000e+00> : vector<2x128xf32>
    %1038 = tpu.matmul %1037, %24, %cst_365 {dimension_numbers = #tpu.dot_dimension_numbers<[1], [0], [0], [1], [0, 0, 1, 1], [], []>} : vector<2x32xf32>, vector<32x128xf32>, vector<2x128xf32> -> vector<2x128xf32>
    %1039 = arith.addf %1038, %908 : vector<2x128xf32>
    %1040 = math.tanh %1039 : vector<2x128xf32>
    %1041 = vector.extract_strided_slice %1040 {offsets = [0, 0], sizes = [2, 32], strides = [1, 1]} : vector<2x128xf32> to vector<2x32xf32>
    %cst_366 = arith.constant 5.000000e-01 : f32
    %1042 = vector.broadcast %cst_366 : f32 to vector<2x32xf32>
    %1043 = arith.mulf %1042, %1041 : vector<2x32xf32>
    %cst_367 = arith.constant 5.000000e-01 : f32
    %1044 = vector.broadcast %cst_367 : f32 to vector<2x32xf32>
    %1045 = arith.addf %1043, %1044 : vector<2x32xf32>
    %1046 = vector.extract_strided_slice %1040 {offsets = [0, 32], sizes = [2, 32], strides = [1, 1]} : vector<2x128xf32> to vector<2x32xf32>
    %cst_368 = arith.constant 5.000000e-01 : f32
    %1047 = vector.broadcast %cst_368 : f32 to vector<2x32xf32>
    %1048 = arith.mulf %1047, %1046 : vector<2x32xf32>
    %cst_369 = arith.constant 5.000000e-01 : f32
    %1049 = vector.broadcast %cst_369 : f32 to vector<2x32xf32>
    %1050 = arith.addf %1048, %1049 : vector<2x32xf32>
    %1051 = vector.extract_strided_slice %1040 {offsets = [0, 64], sizes = [2, 32], strides = [1, 1]} : vector<2x128xf32> to vector<2x32xf32>
    %1052 = vector.extract_strided_slice %1040 {offsets = [0, 96], sizes = [2, 32], strides = [1, 1]} : vector<2x128xf32> to vector<2x32xf32>
    %cst_370 = arith.constant 5.000000e-01 : f32
    %1053 = vector.broadcast %cst_370 : f32 to vector<2x32xf32>
    %1054 = arith.mulf %1053, %1052 : vector<2x32xf32>
    %cst_371 = arith.constant 5.000000e-01 : f32
    %1055 = vector.broadcast %cst_371 : f32 to vector<2x32xf32>
    %1056 = arith.addf %1054, %1055 : vector<2x32xf32>
    %1057 = arith.mulf %1050, %819 : vector<2x32xf32>
    %1058 = arith.mulf %1045, %1051 : vector<2x32xf32>
    %1059 = arith.addf %1057, %1058 : vector<2x32xf32>
    %1060 = math.tanh %1059 : vector<2x32xf32>
    %1061 = arith.mulf %1056, %1060 : vector<2x32xf32>
    %cst_372 = arith.constant dense<0.000000e+00> : vector<2x128xf32>
    %1062 = tpu.matmul %1061, %26, %cst_372 {dimension_numbers = #tpu.dot_dimension_numbers<[1], [0], [0], [1], [0, 0, 1, 1], [], []>} : vector<2x32xf32>, vector<32x128xf32>, vector<2x128xf32> -> vector<2x128xf32>
    %1063 = arith.addf %1062, %911 : vector<2x128xf32>
    %1064 = math.tanh %1063 : vector<2x128xf32>
    %1065 = vector.extract_strided_slice %1064 {offsets = [0, 0], sizes = [2, 32], strides = [1, 1]} : vector<2x128xf32> to vector<2x32xf32>
    %cst_373 = arith.constant 5.000000e-01 : f32
    %1066 = vector.broadcast %cst_373 : f32 to vector<2x32xf32>
    %1067 = arith.mulf %1066, %1065 : vector<2x32xf32>
    %cst_374 = arith.constant 5.000000e-01 : f32
    %1068 = vector.broadcast %cst_374 : f32 to vector<2x32xf32>
    %1069 = arith.addf %1067, %1068 : vector<2x32xf32>
    %1070 = vector.extract_strided_slice %1064 {offsets = [0, 32], sizes = [2, 32], strides = [1, 1]} : vector<2x128xf32> to vector<2x32xf32>
    %cst_375 = arith.constant 5.000000e-01 : f32
    %1071 = vector.broadcast %cst_375 : f32 to vector<2x32xf32>
    %1072 = arith.mulf %1071, %1070 : vector<2x32xf32>
    %cst_376 = arith.constant 5.000000e-01 : f32
    %1073 = vector.broadcast %cst_376 : f32 to vector<2x32xf32>
    %1074 = arith.addf %1072, %1073 : vector<2x32xf32>
    %1075 = vector.extract_strided_slice %1064 {offsets = [0, 64], sizes = [2, 32], strides = [1, 1]} : vector<2x128xf32> to vector<2x32xf32>
    %1076 = vector.extract_strided_slice %1064 {offsets = [0, 96], sizes = [2, 32], strides = [1, 1]} : vector<2x128xf32> to vector<2x32xf32>
    %cst_377 = arith.constant 5.000000e-01 : f32
    %1077 = vector.broadcast %cst_377 : f32 to vector<2x32xf32>
    %1078 = arith.mulf %1077, %1076 : vector<2x32xf32>
    %cst_378 = arith.constant 5.000000e-01 : f32
    %1079 = vector.broadcast %cst_378 : f32 to vector<2x32xf32>
    %1080 = arith.addf %1078, %1079 : vector<2x32xf32>
    %1081 = arith.mulf %1074, %873 : vector<2x32xf32>
    %1082 = arith.mulf %1069, %1075 : vector<2x32xf32>
    %1083 = arith.addf %1081, %1082 : vector<2x32xf32>
    %1084 = math.tanh %1083 : vector<2x32xf32>
    %1085 = arith.mulf %1080, %1084 : vector<2x32xf32>
    %cst_379 = arith.constant dense<0.000000e+00> : vector<2x128xf32>
    %1086 = tpu.matmul %1085, %28, %cst_379 {dimension_numbers = #tpu.dot_dimension_numbers<[1], [0], [0], [1], [0, 0, 1, 1], [], []>} : vector<2x32xf32>, vector<32x128xf32>, vector<2x128xf32> -> vector<2x128xf32>
    %1087 = arith.addf %1086, %914 : vector<2x128xf32>
    %1088 = math.tanh %1087 : vector<2x128xf32>
    %1089 = vector.extract_strided_slice %1088 {offsets = [0, 0], sizes = [2, 32], strides = [1, 1]} : vector<2x128xf32> to vector<2x32xf32>
    %cst_380 = arith.constant 5.000000e-01 : f32
    %1090 = vector.broadcast %cst_380 : f32 to vector<2x32xf32>
    %1091 = arith.mulf %1090, %1089 : vector<2x32xf32>
    %cst_381 = arith.constant 5.000000e-01 : f32
    %1092 = vector.broadcast %cst_381 : f32 to vector<2x32xf32>
    %1093 = arith.addf %1091, %1092 : vector<2x32xf32>
    %1094 = vector.extract_strided_slice %1088 {offsets = [0, 32], sizes = [2, 32], strides = [1, 1]} : vector<2x128xf32> to vector<2x32xf32>
    %cst_382 = arith.constant 5.000000e-01 : f32
    %1095 = vector.broadcast %cst_382 : f32 to vector<2x32xf32>
    %1096 = arith.mulf %1095, %1094 : vector<2x32xf32>
    %cst_383 = arith.constant 5.000000e-01 : f32
    %1097 = vector.broadcast %cst_383 : f32 to vector<2x32xf32>
    %1098 = arith.addf %1096, %1097 : vector<2x32xf32>
    %1099 = vector.extract_strided_slice %1088 {offsets = [0, 64], sizes = [2, 32], strides = [1, 1]} : vector<2x128xf32> to vector<2x32xf32>
    %1100 = vector.extract_strided_slice %1088 {offsets = [0, 96], sizes = [2, 32], strides = [1, 1]} : vector<2x128xf32> to vector<2x32xf32>
    %cst_384 = arith.constant 5.000000e-01 : f32
    %1101 = vector.broadcast %cst_384 : f32 to vector<2x32xf32>
    %1102 = arith.mulf %1101, %1100 : vector<2x32xf32>
    %cst_385 = arith.constant 5.000000e-01 : f32
    %1103 = vector.broadcast %cst_385 : f32 to vector<2x32xf32>
    %1104 = arith.addf %1102, %1103 : vector<2x32xf32>
    %1105 = arith.mulf %1098, %900 : vector<2x32xf32>
    %1106 = arith.mulf %1093, %1099 : vector<2x32xf32>
    %1107 = arith.addf %1105, %1106 : vector<2x32xf32>
    %1108 = math.tanh %1107 : vector<2x32xf32>
    %1109 = arith.mulf %1104, %1108 : vector<2x32xf32>
    %cst_386 = arith.constant dense<0.000000e+00> : vector<2x128xf32>
    %1110 = tpu.matmul %1109, %45, %cst_386 {dimension_numbers = #tpu.dot_dimension_numbers<[1], [0], [0], [1], [0, 0, 1, 1], [], []>} : vector<2x32xf32>, vector<32x128xf32>, vector<2x128xf32> -> vector<2x128xf32>
    %1111 = arith.addf %1110, %919 : vector<2x128xf32>
    %1112 = math.tanh %1111 : vector<2x128xf32>
    %1113 = vector.extract_strided_slice %1112 {offsets = [0, 0], sizes = [2, 32], strides = [1, 1]} : vector<2x128xf32> to vector<2x32xf32>
    %cst_387 = arith.constant 5.000000e-01 : f32
    %1114 = vector.broadcast %cst_387 : f32 to vector<2x32xf32>
    %1115 = arith.mulf %1114, %1113 : vector<2x32xf32>
    %cst_388 = arith.constant 5.000000e-01 : f32
    %1116 = vector.broadcast %cst_388 : f32 to vector<2x32xf32>
    %1117 = arith.addf %1115, %1116 : vector<2x32xf32>
    %1118 = vector.extract_strided_slice %1112 {offsets = [0, 32], sizes = [2, 32], strides = [1, 1]} : vector<2x128xf32> to vector<2x32xf32>
    %cst_389 = arith.constant 5.000000e-01 : f32
    %1119 = vector.broadcast %cst_389 : f32 to vector<2x32xf32>
    %1120 = arith.mulf %1119, %1118 : vector<2x32xf32>
    %cst_390 = arith.constant 5.000000e-01 : f32
    %1121 = vector.broadcast %cst_390 : f32 to vector<2x32xf32>
    %1122 = arith.addf %1120, %1121 : vector<2x32xf32>
    %1123 = vector.extract_strided_slice %1112 {offsets = [0, 64], sizes = [2, 32], strides = [1, 1]} : vector<2x128xf32> to vector<2x32xf32>
    %1124 = vector.extract_strided_slice %1112 {offsets = [0, 96], sizes = [2, 32], strides = [1, 1]} : vector<2x128xf32> to vector<2x32xf32>
    %cst_391 = arith.constant 5.000000e-01 : f32
    %1125 = vector.broadcast %cst_391 : f32 to vector<2x32xf32>
    %1126 = arith.mulf %1125, %1124 : vector<2x32xf32>
    %cst_392 = arith.constant 5.000000e-01 : f32
    %1127 = vector.broadcast %cst_392 : f32 to vector<2x32xf32>
    %1128 = arith.addf %1126, %1127 : vector<2x32xf32>
    %1129 = arith.mulf %1122, %738 : vector<2x32xf32>
    %1130 = arith.mulf %1117, %1123 : vector<2x32xf32>
    %1131 = arith.addf %1129, %1130 : vector<2x32xf32>
    %1132 = math.tanh %1131 : vector<2x32xf32>
    %1133 = arith.mulf %1128, %1132 : vector<2x32xf32>
    %cst_393 = arith.constant dense<0.000000e+00> : vector<2x128xf32>
    %1134 = tpu.matmul %1133, %24, %cst_393 {dimension_numbers = #tpu.dot_dimension_numbers<[1], [0], [0], [1], [0, 0, 1, 1], [], []>} : vector<2x32xf32>, vector<32x128xf32>, vector<2x128xf32> -> vector<2x128xf32>
    %1135 = arith.addf %1134, %908 : vector<2x128xf32>
    %1136 = math.tanh %1135 : vector<2x128xf32>
    %1137 = vector.extract_strided_slice %1136 {offsets = [0, 0], sizes = [2, 32], strides = [1, 1]} : vector<2x128xf32> to vector<2x32xf32>
    %cst_394 = arith.constant 5.000000e-01 : f32
    %1138 = vector.broadcast %cst_394 : f32 to vector<2x32xf32>
    %1139 = arith.mulf %1138, %1137 : vector<2x32xf32>
    %cst_395 = arith.constant 5.000000e-01 : f32
    %1140 = vector.broadcast %cst_395 : f32 to vector<2x32xf32>
    %1141 = arith.addf %1139, %1140 : vector<2x32xf32>
    %1142 = vector.extract_strided_slice %1136 {offsets = [0, 32], sizes = [2, 32], strides = [1, 1]} : vector<2x128xf32> to vector<2x32xf32>
    %cst_396 = arith.constant 5.000000e-01 : f32
    %1143 = vector.broadcast %cst_396 : f32 to vector<2x32xf32>
    %1144 = arith.mulf %1143, %1142 : vector<2x32xf32>
    %cst_397 = arith.constant 5.000000e-01 : f32
    %1145 = vector.broadcast %cst_397 : f32 to vector<2x32xf32>
    %1146 = arith.addf %1144, %1145 : vector<2x32xf32>
    %1147 = vector.extract_strided_slice %1136 {offsets = [0, 64], sizes = [2, 32], strides = [1, 1]} : vector<2x128xf32> to vector<2x32xf32>
    %1148 = vector.extract_strided_slice %1136 {offsets = [0, 96], sizes = [2, 32], strides = [1, 1]} : vector<2x128xf32> to vector<2x32xf32>
    %cst_398 = arith.constant 5.000000e-01 : f32
    %1149 = vector.broadcast %cst_398 : f32 to vector<2x32xf32>
    %1150 = arith.mulf %1149, %1148 : vector<2x32xf32>
    %cst_399 = arith.constant 5.000000e-01 : f32
    %1151 = vector.broadcast %cst_399 : f32 to vector<2x32xf32>
    %1152 = arith.addf %1150, %1151 : vector<2x32xf32>
    %1153 = arith.mulf %1146, %819 : vector<2x32xf32>
    %1154 = arith.mulf %1141, %1147 : vector<2x32xf32>
    %1155 = arith.addf %1153, %1154 : vector<2x32xf32>
    %1156 = math.tanh %1155 : vector<2x32xf32>
    %1157 = arith.mulf %1152, %1156 : vector<2x32xf32>
    %cst_400 = arith.constant dense<0.000000e+00> : vector<2x128xf32>
    %1158 = tpu.matmul %1157, %26, %cst_400 {dimension_numbers = #tpu.dot_dimension_numbers<[1], [0], [0], [1], [0, 0, 1, 1], [], []>} : vector<2x32xf32>, vector<32x128xf32>, vector<2x128xf32> -> vector<2x128xf32>
    %1159 = arith.addf %1158, %911 : vector<2x128xf32>
    %1160 = math.tanh %1159 : vector<2x128xf32>
    %1161 = vector.extract_strided_slice %1160 {offsets = [0, 0], sizes = [2, 32], strides = [1, 1]} : vector<2x128xf32> to vector<2x32xf32>
    %cst_401 = arith.constant 5.000000e-01 : f32
    %1162 = vector.broadcast %cst_401 : f32 to vector<2x32xf32>
    %1163 = arith.mulf %1162, %1161 : vector<2x32xf32>
    %cst_402 = arith.constant 5.000000e-01 : f32
    %1164 = vector.broadcast %cst_402 : f32 to vector<2x32xf32>
    %1165 = arith.addf %1163, %1164 : vector<2x32xf32>
    %1166 = vector.extract_strided_slice %1160 {offsets = [0, 32], sizes = [2, 32], strides = [1, 1]} : vector<2x128xf32> to vector<2x32xf32>
    %cst_403 = arith.constant 5.000000e-01 : f32
    %1167 = vector.broadcast %cst_403 : f32 to vector<2x32xf32>
    %1168 = arith.mulf %1167, %1166 : vector<2x32xf32>
    %cst_404 = arith.constant 5.000000e-01 : f32
    %1169 = vector.broadcast %cst_404 : f32 to vector<2x32xf32>
    %1170 = arith.addf %1168, %1169 : vector<2x32xf32>
    %1171 = vector.extract_strided_slice %1160 {offsets = [0, 64], sizes = [2, 32], strides = [1, 1]} : vector<2x128xf32> to vector<2x32xf32>
    %1172 = vector.extract_strided_slice %1160 {offsets = [0, 96], sizes = [2, 32], strides = [1, 1]} : vector<2x128xf32> to vector<2x32xf32>
    %cst_405 = arith.constant 5.000000e-01 : f32
    %1173 = vector.broadcast %cst_405 : f32 to vector<2x32xf32>
    %1174 = arith.mulf %1173, %1172 : vector<2x32xf32>
    %cst_406 = arith.constant 5.000000e-01 : f32
    %1175 = vector.broadcast %cst_406 : f32 to vector<2x32xf32>
    %1176 = arith.addf %1174, %1175 : vector<2x32xf32>
    %1177 = arith.mulf %1170, %873 : vector<2x32xf32>
    %1178 = arith.mulf %1165, %1171 : vector<2x32xf32>
    %1179 = arith.addf %1177, %1178 : vector<2x32xf32>
    %1180 = math.tanh %1179 : vector<2x32xf32>
    %1181 = arith.mulf %1176, %1180 : vector<2x32xf32>
    %cst_407 = arith.constant dense<0.000000e+00> : vector<2x128xf32>
    %1182 = tpu.matmul %1181, %28, %cst_407 {dimension_numbers = #tpu.dot_dimension_numbers<[1], [0], [0], [1], [0, 0, 1, 1], [], []>} : vector<2x32xf32>, vector<32x128xf32>, vector<2x128xf32> -> vector<2x128xf32>
    %1183 = arith.addf %1182, %914 : vector<2x128xf32>
    %1184 = math.tanh %1183 : vector<2x128xf32>
    %1185 = vector.extract_strided_slice %1184 {offsets = [0, 0], sizes = [2, 32], strides = [1, 1]} : vector<2x128xf32> to vector<2x32xf32>
    %cst_408 = arith.constant 5.000000e-01 : f32
    %1186 = vector.broadcast %cst_408 : f32 to vector<2x32xf32>
    %1187 = arith.mulf %1186, %1185 : vector<2x32xf32>
    %cst_409 = arith.constant 5.000000e-01 : f32
    %1188 = vector.broadcast %cst_409 : f32 to vector<2x32xf32>
    %1189 = arith.addf %1187, %1188 : vector<2x32xf32>
    %1190 = vector.extract_strided_slice %1184 {offsets = [0, 32], sizes = [2, 32], strides = [1, 1]} : vector<2x128xf32> to vector<2x32xf32>
    %cst_410 = arith.constant 5.000000e-01 : f32
    %1191 = vector.broadcast %cst_410 : f32 to vector<2x32xf32>
    %1192 = arith.mulf %1191, %1190 : vector<2x32xf32>
    %cst_411 = arith.constant 5.000000e-01 : f32
    %1193 = vector.broadcast %cst_411 : f32 to vector<2x32xf32>
    %1194 = arith.addf %1192, %1193 : vector<2x32xf32>
    %1195 = vector.extract_strided_slice %1184 {offsets = [0, 64], sizes = [2, 32], strides = [1, 1]} : vector<2x128xf32> to vector<2x32xf32>
    %1196 = vector.extract_strided_slice %1184 {offsets = [0, 96], sizes = [2, 32], strides = [1, 1]} : vector<2x128xf32> to vector<2x32xf32>
    %cst_412 = arith.constant 5.000000e-01 : f32
    %1197 = vector.broadcast %cst_412 : f32 to vector<2x32xf32>
    %1198 = arith.mulf %1197, %1196 : vector<2x32xf32>
    %cst_413 = arith.constant 5.000000e-01 : f32
    %1199 = vector.broadcast %cst_413 : f32 to vector<2x32xf32>
    %1200 = arith.addf %1198, %1199 : vector<2x32xf32>
    %1201 = arith.mulf %1194, %900 : vector<2x32xf32>
    %1202 = arith.mulf %1189, %1195 : vector<2x32xf32>
    %1203 = arith.addf %1201, %1202 : vector<2x32xf32>
    %1204 = math.tanh %1203 : vector<2x32xf32>
    %1205 = arith.mulf %1200, %1204 : vector<2x32xf32>
    %cst_414 = arith.constant dense<0.000000e+00> : vector<2x128xf32>
    %1206 = tpu.matmul %1205, %45, %cst_414 {dimension_numbers = #tpu.dot_dimension_numbers<[1], [0], [0], [1], [0, 0, 1, 1], [], []>} : vector<2x32xf32>, vector<32x128xf32>, vector<2x128xf32> -> vector<2x128xf32>
    %1207 = arith.addf %1206, %919 : vector<2x128xf32>
    %1208 = math.tanh %1207 : vector<2x128xf32>
    %1209 = vector.extract_strided_slice %1208 {offsets = [0, 0], sizes = [2, 32], strides = [1, 1]} : vector<2x128xf32> to vector<2x32xf32>
    %cst_415 = arith.constant 5.000000e-01 : f32
    %1210 = vector.broadcast %cst_415 : f32 to vector<2x32xf32>
    %1211 = arith.mulf %1210, %1209 : vector<2x32xf32>
    %cst_416 = arith.constant 5.000000e-01 : f32
    %1212 = vector.broadcast %cst_416 : f32 to vector<2x32xf32>
    %1213 = arith.addf %1211, %1212 : vector<2x32xf32>
    %1214 = vector.extract_strided_slice %1208 {offsets = [0, 32], sizes = [2, 32], strides = [1, 1]} : vector<2x128xf32> to vector<2x32xf32>
    %cst_417 = arith.constant 5.000000e-01 : f32
    %1215 = vector.broadcast %cst_417 : f32 to vector<2x32xf32>
    %1216 = arith.mulf %1215, %1214 : vector<2x32xf32>
    %cst_418 = arith.constant 5.000000e-01 : f32
    %1217 = vector.broadcast %cst_418 : f32 to vector<2x32xf32>
    %1218 = arith.addf %1216, %1217 : vector<2x32xf32>
    %1219 = vector.extract_strided_slice %1208 {offsets = [0, 64], sizes = [2, 32], strides = [1, 1]} : vector<2x128xf32> to vector<2x32xf32>
    %1220 = vector.extract_strided_slice %1208 {offsets = [0, 96], sizes = [2, 32], strides = [1, 1]} : vector<2x128xf32> to vector<2x32xf32>
    %cst_419 = arith.constant 5.000000e-01 : f32
    %1221 = vector.broadcast %cst_419 : f32 to vector<2x32xf32>
    %1222 = arith.mulf %1221, %1220 : vector<2x32xf32>
    %cst_420 = arith.constant 5.000000e-01 : f32
    %1223 = vector.broadcast %cst_420 : f32 to vector<2x32xf32>
    %1224 = arith.addf %1222, %1223 : vector<2x32xf32>
    %1225 = arith.mulf %1218, %738 : vector<2x32xf32>
    %1226 = arith.mulf %1213, %1219 : vector<2x32xf32>
    %1227 = arith.addf %1225, %1226 : vector<2x32xf32>
    %1228 = math.tanh %1227 : vector<2x32xf32>
    %1229 = arith.mulf %1224, %1228 : vector<2x32xf32>
    %cst_421 = arith.constant dense<0.000000e+00> : vector<2x128xf32>
    %1230 = tpu.matmul %1229, %24, %cst_421 {dimension_numbers = #tpu.dot_dimension_numbers<[1], [0], [0], [1], [0, 0, 1, 1], [], []>} : vector<2x32xf32>, vector<32x128xf32>, vector<2x128xf32> -> vector<2x128xf32>
    %1231 = arith.addf %1230, %908 : vector<2x128xf32>
    %1232 = math.tanh %1231 : vector<2x128xf32>
    %1233 = vector.extract_strided_slice %1232 {offsets = [0, 0], sizes = [2, 32], strides = [1, 1]} : vector<2x128xf32> to vector<2x32xf32>
    %cst_422 = arith.constant 5.000000e-01 : f32
    %1234 = vector.broadcast %cst_422 : f32 to vector<2x32xf32>
    %1235 = arith.mulf %1234, %1233 : vector<2x32xf32>
    %cst_423 = arith.constant 5.000000e-01 : f32
    %1236 = vector.broadcast %cst_423 : f32 to vector<2x32xf32>
    %1237 = arith.addf %1235, %1236 : vector<2x32xf32>
    %1238 = vector.extract_strided_slice %1232 {offsets = [0, 32], sizes = [2, 32], strides = [1, 1]} : vector<2x128xf32> to vector<2x32xf32>
    %cst_424 = arith.constant 5.000000e-01 : f32
    %1239 = vector.broadcast %cst_424 : f32 to vector<2x32xf32>
    %1240 = arith.mulf %1239, %1238 : vector<2x32xf32>
    %cst_425 = arith.constant 5.000000e-01 : f32
    %1241 = vector.broadcast %cst_425 : f32 to vector<2x32xf32>
    %1242 = arith.addf %1240, %1241 : vector<2x32xf32>
    %1243 = vector.extract_strided_slice %1232 {offsets = [0, 64], sizes = [2, 32], strides = [1, 1]} : vector<2x128xf32> to vector<2x32xf32>
    %1244 = vector.extract_strided_slice %1232 {offsets = [0, 96], sizes = [2, 32], strides = [1, 1]} : vector<2x128xf32> to vector<2x32xf32>
    %cst_426 = arith.constant 5.000000e-01 : f32
    %1245 = vector.broadcast %cst_426 : f32 to vector<2x32xf32>
    %1246 = arith.mulf %1245, %1244 : vector<2x32xf32>
    %cst_427 = arith.constant 5.000000e-01 : f32
    %1247 = vector.broadcast %cst_427 : f32 to vector<2x32xf32>
    %1248 = arith.addf %1246, %1247 : vector<2x32xf32>
    %1249 = arith.mulf %1242, %819 : vector<2x32xf32>
    %1250 = arith.mulf %1237, %1243 : vector<2x32xf32>
    %1251 = arith.addf %1249, %1250 : vector<2x32xf32>
    %1252 = math.tanh %1251 : vector<2x32xf32>
    %1253 = arith.mulf %1248, %1252 : vector<2x32xf32>
    %cst_428 = arith.constant dense<0.000000e+00> : vector<2x128xf32>
    %1254 = tpu.matmul %1253, %26, %cst_428 {dimension_numbers = #tpu.dot_dimension_numbers<[1], [0], [0], [1], [0, 0, 1, 1], [], []>} : vector<2x32xf32>, vector<32x128xf32>, vector<2x128xf32> -> vector<2x128xf32>
    %1255 = arith.addf %1254, %911 : vector<2x128xf32>
    %1256 = math.tanh %1255 : vector<2x128xf32>
    %1257 = vector.extract_strided_slice %1256 {offsets = [0, 0], sizes = [2, 32], strides = [1, 1]} : vector<2x128xf32> to vector<2x32xf32>
    %cst_429 = arith.constant 5.000000e-01 : f32
    %1258 = vector.broadcast %cst_429 : f32 to vector<2x32xf32>
    %1259 = arith.mulf %1258, %1257 : vector<2x32xf32>
    %cst_430 = arith.constant 5.000000e-01 : f32
    %1260 = vector.broadcast %cst_430 : f32 to vector<2x32xf32>
    %1261 = arith.addf %1259, %1260 : vector<2x32xf32>
    %1262 = vector.extract_strided_slice %1256 {offsets = [0, 32], sizes = [2, 32], strides = [1, 1]} : vector<2x128xf32> to vector<2x32xf32>
    %cst_431 = arith.constant 5.000000e-01 : f32
    %1263 = vector.broadcast %cst_431 : f32 to vector<2x32xf32>
    %1264 = arith.mulf %1263, %1262 : vector<2x32xf32>
    %cst_432 = arith.constant 5.000000e-01 : f32
    %1265 = vector.broadcast %cst_432 : f32 to vector<2x32xf32>
    %1266 = arith.addf %1264, %1265 : vector<2x32xf32>
    %1267 = vector.extract_strided_slice %1256 {offsets = [0, 64], sizes = [2, 32], strides = [1, 1]} : vector<2x128xf32> to vector<2x32xf32>
    %1268 = vector.extract_strided_slice %1256 {offsets = [0, 96], sizes = [2, 32], strides = [1, 1]} : vector<2x128xf32> to vector<2x32xf32>
    %cst_433 = arith.constant 5.000000e-01 : f32
    %1269 = vector.broadcast %cst_433 : f32 to vector<2x32xf32>
    %1270 = arith.mulf %1269, %1268 : vector<2x32xf32>
    %cst_434 = arith.constant 5.000000e-01 : f32
    %1271 = vector.broadcast %cst_434 : f32 to vector<2x32xf32>
    %1272 = arith.addf %1270, %1271 : vector<2x32xf32>
    %1273 = arith.mulf %1266, %873 : vector<2x32xf32>
    %1274 = arith.mulf %1261, %1267 : vector<2x32xf32>
    %1275 = arith.addf %1273, %1274 : vector<2x32xf32>
    %1276 = math.tanh %1275 : vector<2x32xf32>
    %1277 = arith.mulf %1272, %1276 : vector<2x32xf32>
    %cst_435 = arith.constant dense<0.000000e+00> : vector<2x128xf32>
    %1278 = tpu.matmul %1277, %28, %cst_435 {dimension_numbers = #tpu.dot_dimension_numbers<[1], [0], [0], [1], [0, 0, 1, 1], [], []>} : vector<2x32xf32>, vector<32x128xf32>, vector<2x128xf32> -> vector<2x128xf32>
    %1279 = arith.addf %1278, %914 : vector<2x128xf32>
    %1280 = math.tanh %1279 : vector<2x128xf32>
    %1281 = vector.extract_strided_slice %1280 {offsets = [0, 0], sizes = [2, 32], strides = [1, 1]} : vector<2x128xf32> to vector<2x32xf32>
    %cst_436 = arith.constant 5.000000e-01 : f32
    %1282 = vector.broadcast %cst_436 : f32 to vector<2x32xf32>
    %1283 = arith.mulf %1282, %1281 : vector<2x32xf32>
    %cst_437 = arith.constant 5.000000e-01 : f32
    %1284 = vector.broadcast %cst_437 : f32 to vector<2x32xf32>
    %1285 = arith.addf %1283, %1284 : vector<2x32xf32>
    %1286 = vector.extract_strided_slice %1280 {offsets = [0, 32], sizes = [2, 32], strides = [1, 1]} : vector<2x128xf32> to vector<2x32xf32>
    %cst_438 = arith.constant 5.000000e-01 : f32
    %1287 = vector.broadcast %cst_438 : f32 to vector<2x32xf32>
    %1288 = arith.mulf %1287, %1286 : vector<2x32xf32>
    %cst_439 = arith.constant 5.000000e-01 : f32
    %1289 = vector.broadcast %cst_439 : f32 to vector<2x32xf32>
    %1290 = arith.addf %1288, %1289 : vector<2x32xf32>
    %1291 = vector.extract_strided_slice %1280 {offsets = [0, 64], sizes = [2, 32], strides = [1, 1]} : vector<2x128xf32> to vector<2x32xf32>
    %1292 = vector.extract_strided_slice %1280 {offsets = [0, 96], sizes = [2, 32], strides = [1, 1]} : vector<2x128xf32> to vector<2x32xf32>
    %cst_440 = arith.constant 5.000000e-01 : f32
    %1293 = vector.broadcast %cst_440 : f32 to vector<2x32xf32>
    %1294 = arith.mulf %1293, %1292 : vector<2x32xf32>
    %cst_441 = arith.constant 5.000000e-01 : f32
    %1295 = vector.broadcast %cst_441 : f32 to vector<2x32xf32>
    %1296 = arith.addf %1294, %1295 : vector<2x32xf32>
    %1297 = arith.mulf %1290, %900 : vector<2x32xf32>
    %1298 = arith.mulf %1285, %1291 : vector<2x32xf32>
    %1299 = arith.addf %1297, %1298 : vector<2x32xf32>
    %1300 = math.tanh %1299 : vector<2x32xf32>
    %1301 = arith.mulf %1296, %1300 : vector<2x32xf32>
    %cst_442 = arith.constant dense<0.000000e+00> : vector<2x128xf32>
    %1302 = tpu.matmul %1301, %45, %cst_442 {dimension_numbers = #tpu.dot_dimension_numbers<[1], [0], [0], [1], [0, 0, 1, 1], [], []>} : vector<2x32xf32>, vector<32x128xf32>, vector<2x128xf32> -> vector<2x128xf32>
    %1303 = arith.addf %1302, %919 : vector<2x128xf32>
    %1304 = math.tanh %1303 : vector<2x128xf32>
    %1305 = vector.extract_strided_slice %1304 {offsets = [0, 0], sizes = [2, 32], strides = [1, 1]} : vector<2x128xf32> to vector<2x32xf32>
    %cst_443 = arith.constant 5.000000e-01 : f32
    %1306 = vector.broadcast %cst_443 : f32 to vector<2x32xf32>
    %1307 = arith.mulf %1306, %1305 : vector<2x32xf32>
    %cst_444 = arith.constant 5.000000e-01 : f32
    %1308 = vector.broadcast %cst_444 : f32 to vector<2x32xf32>
    %1309 = arith.addf %1307, %1308 : vector<2x32xf32>
    %1310 = vector.extract_strided_slice %1304 {offsets = [0, 32], sizes = [2, 32], strides = [1, 1]} : vector<2x128xf32> to vector<2x32xf32>
    %cst_445 = arith.constant 5.000000e-01 : f32
    %1311 = vector.broadcast %cst_445 : f32 to vector<2x32xf32>
    %1312 = arith.mulf %1311, %1310 : vector<2x32xf32>
    %cst_446 = arith.constant 5.000000e-01 : f32
    %1313 = vector.broadcast %cst_446 : f32 to vector<2x32xf32>
    %1314 = arith.addf %1312, %1313 : vector<2x32xf32>
    %1315 = vector.extract_strided_slice %1304 {offsets = [0, 64], sizes = [2, 32], strides = [1, 1]} : vector<2x128xf32> to vector<2x32xf32>
    %1316 = vector.extract_strided_slice %1304 {offsets = [0, 96], sizes = [2, 32], strides = [1, 1]} : vector<2x128xf32> to vector<2x32xf32>
    %cst_447 = arith.constant 5.000000e-01 : f32
    %1317 = vector.broadcast %cst_447 : f32 to vector<2x32xf32>
    %1318 = arith.mulf %1317, %1316 : vector<2x32xf32>
    %cst_448 = arith.constant 5.000000e-01 : f32
    %1319 = vector.broadcast %cst_448 : f32 to vector<2x32xf32>
    %1320 = arith.addf %1318, %1319 : vector<2x32xf32>
    %1321 = arith.mulf %1314, %738 : vector<2x32xf32>
    %1322 = arith.mulf %1309, %1315 : vector<2x32xf32>
    %1323 = arith.addf %1321, %1322 : vector<2x32xf32>
    %1324 = math.tanh %1323 : vector<2x32xf32>
    %1325 = arith.mulf %1320, %1324 : vector<2x32xf32>
    %cst_449 = arith.constant dense<0.000000e+00> : vector<2x128xf32>
    %1326 = tpu.matmul %1325, %24, %cst_449 {dimension_numbers = #tpu.dot_dimension_numbers<[1], [0], [0], [1], [0, 0, 1, 1], [], []>} : vector<2x32xf32>, vector<32x128xf32>, vector<2x128xf32> -> vector<2x128xf32>
    %1327 = arith.addf %1326, %908 : vector<2x128xf32>
    %1328 = math.tanh %1327 : vector<2x128xf32>
    %1329 = vector.extract_strided_slice %1328 {offsets = [0, 0], sizes = [2, 32], strides = [1, 1]} : vector<2x128xf32> to vector<2x32xf32>
    %cst_450 = arith.constant 5.000000e-01 : f32
    %1330 = vector.broadcast %cst_450 : f32 to vector<2x32xf32>
    %1331 = arith.mulf %1330, %1329 : vector<2x32xf32>
    %cst_451 = arith.constant 5.000000e-01 : f32
    %1332 = vector.broadcast %cst_451 : f32 to vector<2x32xf32>
    %1333 = arith.addf %1331, %1332 : vector<2x32xf32>
    %1334 = vector.extract_strided_slice %1328 {offsets = [0, 32], sizes = [2, 32], strides = [1, 1]} : vector<2x128xf32> to vector<2x32xf32>
    %cst_452 = arith.constant 5.000000e-01 : f32
    %1335 = vector.broadcast %cst_452 : f32 to vector<2x32xf32>
    %1336 = arith.mulf %1335, %1334 : vector<2x32xf32>
    %cst_453 = arith.constant 5.000000e-01 : f32
    %1337 = vector.broadcast %cst_453 : f32 to vector<2x32xf32>
    %1338 = arith.addf %1336, %1337 : vector<2x32xf32>
    %1339 = vector.extract_strided_slice %1328 {offsets = [0, 64], sizes = [2, 32], strides = [1, 1]} : vector<2x128xf32> to vector<2x32xf32>
    %1340 = vector.extract_strided_slice %1328 {offsets = [0, 96], sizes = [2, 32], strides = [1, 1]} : vector<2x128xf32> to vector<2x32xf32>
    %cst_454 = arith.constant 5.000000e-01 : f32
    %1341 = vector.broadcast %cst_454 : f32 to vector<2x32xf32>
    %1342 = arith.mulf %1341, %1340 : vector<2x32xf32>
    %cst_455 = arith.constant 5.000000e-01 : f32
    %1343 = vector.broadcast %cst_455 : f32 to vector<2x32xf32>
    %1344 = arith.addf %1342, %1343 : vector<2x32xf32>
    %1345 = arith.mulf %1338, %819 : vector<2x32xf32>
    %1346 = arith.mulf %1333, %1339 : vector<2x32xf32>
    %1347 = arith.addf %1345, %1346 : vector<2x32xf32>
    %1348 = math.tanh %1347 : vector<2x32xf32>
    %1349 = arith.mulf %1344, %1348 : vector<2x32xf32>
    %cst_456 = arith.constant dense<0.000000e+00> : vector<2x128xf32>
    %1350 = tpu.matmul %1349, %26, %cst_456 {dimension_numbers = #tpu.dot_dimension_numbers<[1], [0], [0], [1], [0, 0, 1, 1], [], []>} : vector<2x32xf32>, vector<32x128xf32>, vector<2x128xf32> -> vector<2x128xf32>
    %1351 = arith.addf %1350, %911 : vector<2x128xf32>
    %1352 = math.tanh %1351 : vector<2x128xf32>
    %1353 = vector.extract_strided_slice %1352 {offsets = [0, 0], sizes = [2, 32], strides = [1, 1]} : vector<2x128xf32> to vector<2x32xf32>
    %cst_457 = arith.constant 5.000000e-01 : f32
    %1354 = vector.broadcast %cst_457 : f32 to vector<2x32xf32>
    %1355 = arith.mulf %1354, %1353 : vector<2x32xf32>
    %cst_458 = arith.constant 5.000000e-01 : f32
    %1356 = vector.broadcast %cst_458 : f32 to vector<2x32xf32>
    %1357 = arith.addf %1355, %1356 : vector<2x32xf32>
    %1358 = vector.extract_strided_slice %1352 {offsets = [0, 32], sizes = [2, 32], strides = [1, 1]} : vector<2x128xf32> to vector<2x32xf32>
    %cst_459 = arith.constant 5.000000e-01 : f32
    %1359 = vector.broadcast %cst_459 : f32 to vector<2x32xf32>
    %1360 = arith.mulf %1359, %1358 : vector<2x32xf32>
    %cst_460 = arith.constant 5.000000e-01 : f32
    %1361 = vector.broadcast %cst_460 : f32 to vector<2x32xf32>
    %1362 = arith.addf %1360, %1361 : vector<2x32xf32>
    %1363 = vector.extract_strided_slice %1352 {offsets = [0, 64], sizes = [2, 32], strides = [1, 1]} : vector<2x128xf32> to vector<2x32xf32>
    %1364 = vector.extract_strided_slice %1352 {offsets = [0, 96], sizes = [2, 32], strides = [1, 1]} : vector<2x128xf32> to vector<2x32xf32>
    %cst_461 = arith.constant 5.000000e-01 : f32
    %1365 = vector.broadcast %cst_461 : f32 to vector<2x32xf32>
    %1366 = arith.mulf %1365, %1364 : vector<2x32xf32>
    %cst_462 = arith.constant 5.000000e-01 : f32
    %1367 = vector.broadcast %cst_462 : f32 to vector<2x32xf32>
    %1368 = arith.addf %1366, %1367 : vector<2x32xf32>
    %1369 = arith.mulf %1362, %873 : vector<2x32xf32>
    %1370 = arith.mulf %1357, %1363 : vector<2x32xf32>
    %1371 = arith.addf %1369, %1370 : vector<2x32xf32>
    %1372 = math.tanh %1371 : vector<2x32xf32>
    %1373 = arith.mulf %1368, %1372 : vector<2x32xf32>
    %cst_463 = arith.constant dense<0.000000e+00> : vector<2x128xf32>
    %1374 = tpu.matmul %1373, %28, %cst_463 {dimension_numbers = #tpu.dot_dimension_numbers<[1], [0], [0], [1], [0, 0, 1, 1], [], []>} : vector<2x32xf32>, vector<32x128xf32>, vector<2x128xf32> -> vector<2x128xf32>
    %1375 = arith.addf %1374, %914 : vector<2x128xf32>
    %1376 = math.tanh %1375 : vector<2x128xf32>
    %1377 = vector.extract_strided_slice %1376 {offsets = [0, 0], sizes = [2, 32], strides = [1, 1]} : vector<2x128xf32> to vector<2x32xf32>
    %cst_464 = arith.constant 5.000000e-01 : f32
    %1378 = vector.broadcast %cst_464 : f32 to vector<2x32xf32>
    %1379 = arith.mulf %1378, %1377 : vector<2x32xf32>
    %cst_465 = arith.constant 5.000000e-01 : f32
    %1380 = vector.broadcast %cst_465 : f32 to vector<2x32xf32>
    %1381 = arith.addf %1379, %1380 : vector<2x32xf32>
    %1382 = vector.extract_strided_slice %1376 {offsets = [0, 32], sizes = [2, 32], strides = [1, 1]} : vector<2x128xf32> to vector<2x32xf32>
    %cst_466 = arith.constant 5.000000e-01 : f32
    %1383 = vector.broadcast %cst_466 : f32 to vector<2x32xf32>
    %1384 = arith.mulf %1383, %1382 : vector<2x32xf32>
    %cst_467 = arith.constant 5.000000e-01 : f32
    %1385 = vector.broadcast %cst_467 : f32 to vector<2x32xf32>
    %1386 = arith.addf %1384, %1385 : vector<2x32xf32>
    %1387 = vector.extract_strided_slice %1376 {offsets = [0, 64], sizes = [2, 32], strides = [1, 1]} : vector<2x128xf32> to vector<2x32xf32>
    %1388 = vector.extract_strided_slice %1376 {offsets = [0, 96], sizes = [2, 32], strides = [1, 1]} : vector<2x128xf32> to vector<2x32xf32>
    %cst_468 = arith.constant 5.000000e-01 : f32
    %1389 = vector.broadcast %cst_468 : f32 to vector<2x32xf32>
    %1390 = arith.mulf %1389, %1388 : vector<2x32xf32>
    %cst_469 = arith.constant 5.000000e-01 : f32
    %1391 = vector.broadcast %cst_469 : f32 to vector<2x32xf32>
    %1392 = arith.addf %1390, %1391 : vector<2x32xf32>
    %1393 = arith.mulf %1386, %900 : vector<2x32xf32>
    %1394 = arith.mulf %1381, %1387 : vector<2x32xf32>
    %1395 = arith.addf %1393, %1394 : vector<2x32xf32>
    %1396 = math.tanh %1395 : vector<2x32xf32>
    %1397 = arith.mulf %1392, %1396 : vector<2x32xf32>
    %cst_470 = arith.constant dense<0.000000e+00> : vector<2x128xf32>
    %1398 = tpu.matmul %1397, %45, %cst_470 {dimension_numbers = #tpu.dot_dimension_numbers<[1], [0], [0], [1], [0, 0, 1, 1], [], []>} : vector<2x32xf32>, vector<32x128xf32>, vector<2x128xf32> -> vector<2x128xf32>
    %1399 = arith.addf %1398, %919 : vector<2x128xf32>
    %1400 = math.tanh %1399 : vector<2x128xf32>
    %1401 = vector.extract_strided_slice %1400 {offsets = [0, 0], sizes = [2, 32], strides = [1, 1]} : vector<2x128xf32> to vector<2x32xf32>
    %cst_471 = arith.constant 5.000000e-01 : f32
    %1402 = vector.broadcast %cst_471 : f32 to vector<2x32xf32>
    %1403 = arith.mulf %1402, %1401 : vector<2x32xf32>
    %cst_472 = arith.constant 5.000000e-01 : f32
    %1404 = vector.broadcast %cst_472 : f32 to vector<2x32xf32>
    %1405 = arith.addf %1403, %1404 : vector<2x32xf32>
    %1406 = vector.extract_strided_slice %1400 {offsets = [0, 32], sizes = [2, 32], strides = [1, 1]} : vector<2x128xf32> to vector<2x32xf32>
    %cst_473 = arith.constant 5.000000e-01 : f32
    %1407 = vector.broadcast %cst_473 : f32 to vector<2x32xf32>
    %1408 = arith.mulf %1407, %1406 : vector<2x32xf32>
    %cst_474 = arith.constant 5.000000e-01 : f32
    %1409 = vector.broadcast %cst_474 : f32 to vector<2x32xf32>
    %1410 = arith.addf %1408, %1409 : vector<2x32xf32>
    %1411 = vector.extract_strided_slice %1400 {offsets = [0, 64], sizes = [2, 32], strides = [1, 1]} : vector<2x128xf32> to vector<2x32xf32>
    %1412 = vector.extract_strided_slice %1400 {offsets = [0, 96], sizes = [2, 32], strides = [1, 1]} : vector<2x128xf32> to vector<2x32xf32>
    %cst_475 = arith.constant 5.000000e-01 : f32
    %1413 = vector.broadcast %cst_475 : f32 to vector<2x32xf32>
    %1414 = arith.mulf %1413, %1412 : vector<2x32xf32>
    %cst_476 = arith.constant 5.000000e-01 : f32
    %1415 = vector.broadcast %cst_476 : f32 to vector<2x32xf32>
    %1416 = arith.addf %1414, %1415 : vector<2x32xf32>
    %1417 = arith.mulf %1410, %738 : vector<2x32xf32>
    %1418 = arith.mulf %1405, %1411 : vector<2x32xf32>
    %1419 = arith.addf %1417, %1418 : vector<2x32xf32>
    %1420 = math.tanh %1419 : vector<2x32xf32>
    %1421 = arith.mulf %1416, %1420 : vector<2x32xf32>
    %cst_477 = arith.constant dense<0.000000e+00> : vector<2x128xf32>
    %1422 = tpu.matmul %1421, %24, %cst_477 {dimension_numbers = #tpu.dot_dimension_numbers<[1], [0], [0], [1], [0, 0, 1, 1], [], []>} : vector<2x32xf32>, vector<32x128xf32>, vector<2x128xf32> -> vector<2x128xf32>
    %1423 = arith.addf %1422, %908 : vector<2x128xf32>
    %1424 = math.tanh %1423 : vector<2x128xf32>
    %1425 = vector.extract_strided_slice %1424 {offsets = [0, 0], sizes = [2, 32], strides = [1, 1]} : vector<2x128xf32> to vector<2x32xf32>
    %cst_478 = arith.constant 5.000000e-01 : f32
    %1426 = vector.broadcast %cst_478 : f32 to vector<2x32xf32>
    %1427 = arith.mulf %1426, %1425 : vector<2x32xf32>
    %cst_479 = arith.constant 5.000000e-01 : f32
    %1428 = vector.broadcast %cst_479 : f32 to vector<2x32xf32>
    %1429 = arith.addf %1427, %1428 : vector<2x32xf32>
    %1430 = vector.extract_strided_slice %1424 {offsets = [0, 32], sizes = [2, 32], strides = [1, 1]} : vector<2x128xf32> to vector<2x32xf32>
    %cst_480 = arith.constant 5.000000e-01 : f32
    %1431 = vector.broadcast %cst_480 : f32 to vector<2x32xf32>
    %1432 = arith.mulf %1431, %1430 : vector<2x32xf32>
    %cst_481 = arith.constant 5.000000e-01 : f32
    %1433 = vector.broadcast %cst_481 : f32 to vector<2x32xf32>
    %1434 = arith.addf %1432, %1433 : vector<2x32xf32>
    %1435 = vector.extract_strided_slice %1424 {offsets = [0, 64], sizes = [2, 32], strides = [1, 1]} : vector<2x128xf32> to vector<2x32xf32>
    %1436 = vector.extract_strided_slice %1424 {offsets = [0, 96], sizes = [2, 32], strides = [1, 1]} : vector<2x128xf32> to vector<2x32xf32>
    %cst_482 = arith.constant 5.000000e-01 : f32
    %1437 = vector.broadcast %cst_482 : f32 to vector<2x32xf32>
    %1438 = arith.mulf %1437, %1436 : vector<2x32xf32>
    %cst_483 = arith.constant 5.000000e-01 : f32
    %1439 = vector.broadcast %cst_483 : f32 to vector<2x32xf32>
    %1440 = arith.addf %1438, %1439 : vector<2x32xf32>
    %1441 = arith.mulf %1434, %819 : vector<2x32xf32>
    %1442 = arith.mulf %1429, %1435 : vector<2x32xf32>
    %1443 = arith.addf %1441, %1442 : vector<2x32xf32>
    %1444 = math.tanh %1443 : vector<2x32xf32>
    %1445 = arith.mulf %1440, %1444 : vector<2x32xf32>
    %cst_484 = arith.constant dense<0.000000e+00> : vector<2x128xf32>
    %1446 = tpu.matmul %1445, %26, %cst_484 {dimension_numbers = #tpu.dot_dimension_numbers<[1], [0], [0], [1], [0, 0, 1, 1], [], []>} : vector<2x32xf32>, vector<32x128xf32>, vector<2x128xf32> -> vector<2x128xf32>
    %1447 = arith.addf %1446, %911 : vector<2x128xf32>
    %1448 = math.tanh %1447 : vector<2x128xf32>
    %1449 = vector.extract_strided_slice %1448 {offsets = [0, 0], sizes = [2, 32], strides = [1, 1]} : vector<2x128xf32> to vector<2x32xf32>
    %cst_485 = arith.constant 5.000000e-01 : f32
    %1450 = vector.broadcast %cst_485 : f32 to vector<2x32xf32>
    %1451 = arith.mulf %1450, %1449 : vector<2x32xf32>
    %cst_486 = arith.constant 5.000000e-01 : f32
    %1452 = vector.broadcast %cst_486 : f32 to vector<2x32xf32>
    %1453 = arith.addf %1451, %1452 : vector<2x32xf32>
    %1454 = vector.extract_strided_slice %1448 {offsets = [0, 32], sizes = [2, 32], strides = [1, 1]} : vector<2x128xf32> to vector<2x32xf32>
    %cst_487 = arith.constant 5.000000e-01 : f32
    %1455 = vector.broadcast %cst_487 : f32 to vector<2x32xf32>
    %1456 = arith.mulf %1455, %1454 : vector<2x32xf32>
    %cst_488 = arith.constant 5.000000e-01 : f32
    %1457 = vector.broadcast %cst_488 : f32 to vector<2x32xf32>
    %1458 = arith.addf %1456, %1457 : vector<2x32xf32>
    %1459 = vector.extract_strided_slice %1448 {offsets = [0, 64], sizes = [2, 32], strides = [1, 1]} : vector<2x128xf32> to vector<2x32xf32>
    %1460 = vector.extract_strided_slice %1448 {offsets = [0, 96], sizes = [2, 32], strides = [1, 1]} : vector<2x128xf32> to vector<2x32xf32>
    %cst_489 = arith.constant 5.000000e-01 : f32
    %1461 = vector.broadcast %cst_489 : f32 to vector<2x32xf32>
    %1462 = arith.mulf %1461, %1460 : vector<2x32xf32>
    %cst_490 = arith.constant 5.000000e-01 : f32
    %1463 = vector.broadcast %cst_490 : f32 to vector<2x32xf32>
    %1464 = arith.addf %1462, %1463 : vector<2x32xf32>
    %1465 = arith.mulf %1458, %873 : vector<2x32xf32>
    %1466 = arith.mulf %1453, %1459 : vector<2x32xf32>
    %1467 = arith.addf %1465, %1466 : vector<2x32xf32>
    %1468 = math.tanh %1467 : vector<2x32xf32>
    %1469 = arith.mulf %1464, %1468 : vector<2x32xf32>
    %cst_491 = arith.constant dense<0.000000e+00> : vector<2x128xf32>
    %1470 = tpu.matmul %1469, %28, %cst_491 {dimension_numbers = #tpu.dot_dimension_numbers<[1], [0], [0], [1], [0, 0, 1, 1], [], []>} : vector<2x32xf32>, vector<32x128xf32>, vector<2x128xf32> -> vector<2x128xf32>
    %1471 = arith.addf %1470, %914 : vector<2x128xf32>
    %1472 = math.tanh %1471 : vector<2x128xf32>
    %1473 = vector.extract_strided_slice %1472 {offsets = [0, 0], sizes = [2, 32], strides = [1, 1]} : vector<2x128xf32> to vector<2x32xf32>
    %cst_492 = arith.constant 5.000000e-01 : f32
    %1474 = vector.broadcast %cst_492 : f32 to vector<2x32xf32>
    %1475 = arith.mulf %1474, %1473 : vector<2x32xf32>
    %cst_493 = arith.constant 5.000000e-01 : f32
    %1476 = vector.broadcast %cst_493 : f32 to vector<2x32xf32>
    %1477 = arith.addf %1475, %1476 : vector<2x32xf32>
    %1478 = vector.extract_strided_slice %1472 {offsets = [0, 32], sizes = [2, 32], strides = [1, 1]} : vector<2x128xf32> to vector<2x32xf32>
    %cst_494 = arith.constant 5.000000e-01 : f32
    %1479 = vector.broadcast %cst_494 : f32 to vector<2x32xf32>
    %1480 = arith.mulf %1479, %1478 : vector<2x32xf32>
    %cst_495 = arith.constant 5.000000e-01 : f32
    %1481 = vector.broadcast %cst_495 : f32 to vector<2x32xf32>
    %1482 = arith.addf %1480, %1481 : vector<2x32xf32>
    %1483 = vector.extract_strided_slice %1472 {offsets = [0, 64], sizes = [2, 32], strides = [1, 1]} : vector<2x128xf32> to vector<2x32xf32>
    %1484 = vector.extract_strided_slice %1472 {offsets = [0, 96], sizes = [2, 32], strides = [1, 1]} : vector<2x128xf32> to vector<2x32xf32>
    %cst_496 = arith.constant 5.000000e-01 : f32
    %1485 = vector.broadcast %cst_496 : f32 to vector<2x32xf32>
    %1486 = arith.mulf %1485, %1484 : vector<2x32xf32>
    %cst_497 = arith.constant 5.000000e-01 : f32
    %1487 = vector.broadcast %cst_497 : f32 to vector<2x32xf32>
    %1488 = arith.addf %1486, %1487 : vector<2x32xf32>
    %1489 = arith.mulf %1482, %900 : vector<2x32xf32>
    %1490 = arith.mulf %1477, %1483 : vector<2x32xf32>
    %1491 = arith.addf %1489, %1490 : vector<2x32xf32>
    %1492 = math.tanh %1491 : vector<2x32xf32>
    %1493 = arith.mulf %1488, %1492 : vector<2x32xf32>
    %cst_498 = arith.constant dense<0.000000e+00> : vector<2x128xf32>
    %1494 = tpu.matmul %1493, %45, %cst_498 {dimension_numbers = #tpu.dot_dimension_numbers<[1], [0], [0], [1], [0, 0, 1, 1], [], []>} : vector<2x32xf32>, vector<32x128xf32>, vector<2x128xf32> -> vector<2x128xf32>
    %1495 = arith.addf %1494, %919 : vector<2x128xf32>
    %1496 = math.tanh %1495 : vector<2x128xf32>
    %1497 = vector.extract_strided_slice %1496 {offsets = [0, 0], sizes = [2, 32], strides = [1, 1]} : vector<2x128xf32> to vector<2x32xf32>
    %cst_499 = arith.constant 5.000000e-01 : f32
    %1498 = vector.broadcast %cst_499 : f32 to vector<2x32xf32>
    %1499 = arith.mulf %1498, %1497 : vector<2x32xf32>
    %cst_500 = arith.constant 5.000000e-01 : f32
    %1500 = vector.broadcast %cst_500 : f32 to vector<2x32xf32>
    %1501 = arith.addf %1499, %1500 : vector<2x32xf32>
    %1502 = vector.extract_strided_slice %1496 {offsets = [0, 32], sizes = [2, 32], strides = [1, 1]} : vector<2x128xf32> to vector<2x32xf32>
    %cst_501 = arith.constant 5.000000e-01 : f32
    %1503 = vector.broadcast %cst_501 : f32 to vector<2x32xf32>
    %1504 = arith.mulf %1503, %1502 : vector<2x32xf32>
    %cst_502 = arith.constant 5.000000e-01 : f32
    %1505 = vector.broadcast %cst_502 : f32 to vector<2x32xf32>
    %1506 = arith.addf %1504, %1505 : vector<2x32xf32>
    %1507 = vector.extract_strided_slice %1496 {offsets = [0, 64], sizes = [2, 32], strides = [1, 1]} : vector<2x128xf32> to vector<2x32xf32>
    %1508 = vector.extract_strided_slice %1496 {offsets = [0, 96], sizes = [2, 32], strides = [1, 1]} : vector<2x128xf32> to vector<2x32xf32>
    %cst_503 = arith.constant 5.000000e-01 : f32
    %1509 = vector.broadcast %cst_503 : f32 to vector<2x32xf32>
    %1510 = arith.mulf %1509, %1508 : vector<2x32xf32>
    %cst_504 = arith.constant 5.000000e-01 : f32
    %1511 = vector.broadcast %cst_504 : f32 to vector<2x32xf32>
    %1512 = arith.addf %1510, %1511 : vector<2x32xf32>
    %1513 = arith.mulf %1506, %738 : vector<2x32xf32>
    %1514 = arith.mulf %1501, %1507 : vector<2x32xf32>
    %1515 = arith.addf %1513, %1514 : vector<2x32xf32>
    %1516 = math.tanh %1515 : vector<2x32xf32>
    %1517 = arith.mulf %1512, %1516 : vector<2x32xf32>
    %cst_505 = arith.constant dense<0.000000e+00> : vector<2x128xf32>
    %1518 = tpu.matmul %1517, %24, %cst_505 {dimension_numbers = #tpu.dot_dimension_numbers<[1], [0], [0], [1], [0, 0, 1, 1], [], []>} : vector<2x32xf32>, vector<32x128xf32>, vector<2x128xf32> -> vector<2x128xf32>
    %1519 = arith.addf %1518, %908 : vector<2x128xf32>
    %1520 = math.tanh %1519 : vector<2x128xf32>
    %1521 = vector.extract_strided_slice %1520 {offsets = [0, 0], sizes = [2, 32], strides = [1, 1]} : vector<2x128xf32> to vector<2x32xf32>
    %cst_506 = arith.constant 5.000000e-01 : f32
    %1522 = vector.broadcast %cst_506 : f32 to vector<2x32xf32>
    %1523 = arith.mulf %1522, %1521 : vector<2x32xf32>
    %cst_507 = arith.constant 5.000000e-01 : f32
    %1524 = vector.broadcast %cst_507 : f32 to vector<2x32xf32>
    %1525 = arith.addf %1523, %1524 : vector<2x32xf32>
    %1526 = vector.extract_strided_slice %1520 {offsets = [0, 32], sizes = [2, 32], strides = [1, 1]} : vector<2x128xf32> to vector<2x32xf32>
    %cst_508 = arith.constant 5.000000e-01 : f32
    %1527 = vector.broadcast %cst_508 : f32 to vector<2x32xf32>
    %1528 = arith.mulf %1527, %1526 : vector<2x32xf32>
    %cst_509 = arith.constant 5.000000e-01 : f32
    %1529 = vector.broadcast %cst_509 : f32 to vector<2x32xf32>
    %1530 = arith.addf %1528, %1529 : vector<2x32xf32>
    %1531 = vector.extract_strided_slice %1520 {offsets = [0, 64], sizes = [2, 32], strides = [1, 1]} : vector<2x128xf32> to vector<2x32xf32>
    %1532 = vector.extract_strided_slice %1520 {offsets = [0, 96], sizes = [2, 32], strides = [1, 1]} : vector<2x128xf32> to vector<2x32xf32>
    %cst_510 = arith.constant 5.000000e-01 : f32
    %1533 = vector.broadcast %cst_510 : f32 to vector<2x32xf32>
    %1534 = arith.mulf %1533, %1532 : vector<2x32xf32>
    %cst_511 = arith.constant 5.000000e-01 : f32
    %1535 = vector.broadcast %cst_511 : f32 to vector<2x32xf32>
    %1536 = arith.addf %1534, %1535 : vector<2x32xf32>
    %1537 = arith.mulf %1530, %819 : vector<2x32xf32>
    %1538 = arith.mulf %1525, %1531 : vector<2x32xf32>
    %1539 = arith.addf %1537, %1538 : vector<2x32xf32>
    %1540 = math.tanh %1539 : vector<2x32xf32>
    %1541 = arith.mulf %1536, %1540 : vector<2x32xf32>
    %cst_512 = arith.constant dense<0.000000e+00> : vector<2x128xf32>
    %1542 = tpu.matmul %1541, %26, %cst_512 {dimension_numbers = #tpu.dot_dimension_numbers<[1], [0], [0], [1], [0, 0, 1, 1], [], []>} : vector<2x32xf32>, vector<32x128xf32>, vector<2x128xf32> -> vector<2x128xf32>
    %1543 = arith.addf %1542, %911 : vector<2x128xf32>
    %1544 = math.tanh %1543 : vector<2x128xf32>
    %1545 = vector.extract_strided_slice %1544 {offsets = [0, 0], sizes = [2, 32], strides = [1, 1]} : vector<2x128xf32> to vector<2x32xf32>
    %cst_513 = arith.constant 5.000000e-01 : f32
    %1546 = vector.broadcast %cst_513 : f32 to vector<2x32xf32>
    %1547 = arith.mulf %1546, %1545 : vector<2x32xf32>
    %cst_514 = arith.constant 5.000000e-01 : f32
    %1548 = vector.broadcast %cst_514 : f32 to vector<2x32xf32>
    %1549 = arith.addf %1547, %1548 : vector<2x32xf32>
    %1550 = vector.extract_strided_slice %1544 {offsets = [0, 32], sizes = [2, 32], strides = [1, 1]} : vector<2x128xf32> to vector<2x32xf32>
    %cst_515 = arith.constant 5.000000e-01 : f32
    %1551 = vector.broadcast %cst_515 : f32 to vector<2x32xf32>
    %1552 = arith.mulf %1551, %1550 : vector<2x32xf32>
    %cst_516 = arith.constant 5.000000e-01 : f32
    %1553 = vector.broadcast %cst_516 : f32 to vector<2x32xf32>
    %1554 = arith.addf %1552, %1553 : vector<2x32xf32>
    %1555 = vector.extract_strided_slice %1544 {offsets = [0, 64], sizes = [2, 32], strides = [1, 1]} : vector<2x128xf32> to vector<2x32xf32>
    %1556 = vector.extract_strided_slice %1544 {offsets = [0, 96], sizes = [2, 32], strides = [1, 1]} : vector<2x128xf32> to vector<2x32xf32>
    %cst_517 = arith.constant 5.000000e-01 : f32
    %1557 = vector.broadcast %cst_517 : f32 to vector<2x32xf32>
    %1558 = arith.mulf %1557, %1556 : vector<2x32xf32>
    %cst_518 = arith.constant 5.000000e-01 : f32
    %1559 = vector.broadcast %cst_518 : f32 to vector<2x32xf32>
    %1560 = arith.addf %1558, %1559 : vector<2x32xf32>
    %1561 = arith.mulf %1554, %873 : vector<2x32xf32>
    %1562 = arith.mulf %1549, %1555 : vector<2x32xf32>
    %1563 = arith.addf %1561, %1562 : vector<2x32xf32>
    %1564 = math.tanh %1563 : vector<2x32xf32>
    %1565 = arith.mulf %1560, %1564 : vector<2x32xf32>
    %cst_519 = arith.constant dense<0.000000e+00> : vector<2x128xf32>
    %1566 = tpu.matmul %1565, %28, %cst_519 {dimension_numbers = #tpu.dot_dimension_numbers<[1], [0], [0], [1], [0, 0, 1, 1], [], []>} : vector<2x32xf32>, vector<32x128xf32>, vector<2x128xf32> -> vector<2x128xf32>
    %1567 = arith.addf %1566, %914 : vector<2x128xf32>
    %1568 = math.tanh %1567 : vector<2x128xf32>
    %1569 = vector.extract_strided_slice %1568 {offsets = [0, 0], sizes = [2, 32], strides = [1, 1]} : vector<2x128xf32> to vector<2x32xf32>
    %cst_520 = arith.constant 5.000000e-01 : f32
    %1570 = vector.broadcast %cst_520 : f32 to vector<2x32xf32>
    %1571 = arith.mulf %1570, %1569 : vector<2x32xf32>
    %cst_521 = arith.constant 5.000000e-01 : f32
    %1572 = vector.broadcast %cst_521 : f32 to vector<2x32xf32>
    %1573 = arith.addf %1571, %1572 : vector<2x32xf32>
    %1574 = vector.extract_strided_slice %1568 {offsets = [0, 32], sizes = [2, 32], strides = [1, 1]} : vector<2x128xf32> to vector<2x32xf32>
    %cst_522 = arith.constant 5.000000e-01 : f32
    %1575 = vector.broadcast %cst_522 : f32 to vector<2x32xf32>
    %1576 = arith.mulf %1575, %1574 : vector<2x32xf32>
    %cst_523 = arith.constant 5.000000e-01 : f32
    %1577 = vector.broadcast %cst_523 : f32 to vector<2x32xf32>
    %1578 = arith.addf %1576, %1577 : vector<2x32xf32>
    %1579 = vector.extract_strided_slice %1568 {offsets = [0, 64], sizes = [2, 32], strides = [1, 1]} : vector<2x128xf32> to vector<2x32xf32>
    %1580 = vector.extract_strided_slice %1568 {offsets = [0, 96], sizes = [2, 32], strides = [1, 1]} : vector<2x128xf32> to vector<2x32xf32>
    %cst_524 = arith.constant 5.000000e-01 : f32
    %1581 = vector.broadcast %cst_524 : f32 to vector<2x32xf32>
    %1582 = arith.mulf %1581, %1580 : vector<2x32xf32>
    %cst_525 = arith.constant 5.000000e-01 : f32
    %1583 = vector.broadcast %cst_525 : f32 to vector<2x32xf32>
    %1584 = arith.addf %1582, %1583 : vector<2x32xf32>
    %1585 = arith.mulf %1578, %900 : vector<2x32xf32>
    %1586 = arith.mulf %1573, %1579 : vector<2x32xf32>
    %1587 = arith.addf %1585, %1586 : vector<2x32xf32>
    %1588 = math.tanh %1587 : vector<2x32xf32>
    %1589 = arith.mulf %1584, %1588 : vector<2x32xf32>
    %cst_526 = arith.constant dense<0.000000e+00> : vector<2x128xf32>
    %1590 = tpu.matmul %1589, %45, %cst_526 {dimension_numbers = #tpu.dot_dimension_numbers<[1], [0], [0], [1], [0, 0, 1, 1], [], []>} : vector<2x32xf32>, vector<32x128xf32>, vector<2x128xf32> -> vector<2x128xf32>
    %1591 = arith.addf %1590, %919 : vector<2x128xf32>
    %1592 = math.tanh %1591 : vector<2x128xf32>
    %1593 = vector.extract_strided_slice %1592 {offsets = [0, 0], sizes = [2, 32], strides = [1, 1]} : vector<2x128xf32> to vector<2x32xf32>
    %cst_527 = arith.constant 5.000000e-01 : f32
    %1594 = vector.broadcast %cst_527 : f32 to vector<2x32xf32>
    %1595 = arith.mulf %1594, %1593 : vector<2x32xf32>
    %cst_528 = arith.constant 5.000000e-01 : f32
    %1596 = vector.broadcast %cst_528 : f32 to vector<2x32xf32>
    %1597 = arith.addf %1595, %1596 : vector<2x32xf32>
    %1598 = vector.extract_strided_slice %1592 {offsets = [0, 32], sizes = [2, 32], strides = [1, 1]} : vector<2x128xf32> to vector<2x32xf32>
    %cst_529 = arith.constant 5.000000e-01 : f32
    %1599 = vector.broadcast %cst_529 : f32 to vector<2x32xf32>
    %1600 = arith.mulf %1599, %1598 : vector<2x32xf32>
    %cst_530 = arith.constant 5.000000e-01 : f32
    %1601 = vector.broadcast %cst_530 : f32 to vector<2x32xf32>
    %1602 = arith.addf %1600, %1601 : vector<2x32xf32>
    %1603 = vector.extract_strided_slice %1592 {offsets = [0, 64], sizes = [2, 32], strides = [1, 1]} : vector<2x128xf32> to vector<2x32xf32>
    %1604 = vector.extract_strided_slice %1592 {offsets = [0, 96], sizes = [2, 32], strides = [1, 1]} : vector<2x128xf32> to vector<2x32xf32>
    %cst_531 = arith.constant 5.000000e-01 : f32
    %1605 = vector.broadcast %cst_531 : f32 to vector<2x32xf32>
    %1606 = arith.mulf %1605, %1604 : vector<2x32xf32>
    %cst_532 = arith.constant 5.000000e-01 : f32
    %1607 = vector.broadcast %cst_532 : f32 to vector<2x32xf32>
    %1608 = arith.addf %1606, %1607 : vector<2x32xf32>
    %1609 = arith.mulf %1602, %738 : vector<2x32xf32>
    %1610 = arith.mulf %1597, %1603 : vector<2x32xf32>
    %1611 = arith.addf %1609, %1610 : vector<2x32xf32>
    %1612 = math.tanh %1611 : vector<2x32xf32>
    %1613 = arith.mulf %1608, %1612 : vector<2x32xf32>
    %cst_533 = arith.constant dense<0.000000e+00> : vector<2x128xf32>
    %1614 = tpu.matmul %1613, %24, %cst_533 {dimension_numbers = #tpu.dot_dimension_numbers<[1], [0], [0], [1], [0, 0, 1, 1], [], []>} : vector<2x32xf32>, vector<32x128xf32>, vector<2x128xf32> -> vector<2x128xf32>
    %1615 = arith.addf %1614, %908 : vector<2x128xf32>
    %1616 = math.tanh %1615 : vector<2x128xf32>
    %1617 = vector.extract_strided_slice %1616 {offsets = [0, 0], sizes = [2, 32], strides = [1, 1]} : vector<2x128xf32> to vector<2x32xf32>
    %cst_534 = arith.constant 5.000000e-01 : f32
    %1618 = vector.broadcast %cst_534 : f32 to vector<2x32xf32>
    %1619 = arith.mulf %1618, %1617 : vector<2x32xf32>
    %cst_535 = arith.constant 5.000000e-01 : f32
    %1620 = vector.broadcast %cst_535 : f32 to vector<2x32xf32>
    %1621 = arith.addf %1619, %1620 : vector<2x32xf32>
    %1622 = vector.extract_strided_slice %1616 {offsets = [0, 32], sizes = [2, 32], strides = [1, 1]} : vector<2x128xf32> to vector<2x32xf32>
    %cst_536 = arith.constant 5.000000e-01 : f32
    %1623 = vector.broadcast %cst_536 : f32 to vector<2x32xf32>
    %1624 = arith.mulf %1623, %1622 : vector<2x32xf32>
    %cst_537 = arith.constant 5.000000e-01 : f32
    %1625 = vector.broadcast %cst_537 : f32 to vector<2x32xf32>
    %1626 = arith.addf %1624, %1625 : vector<2x32xf32>
    %1627 = vector.extract_strided_slice %1616 {offsets = [0, 64], sizes = [2, 32], strides = [1, 1]} : vector<2x128xf32> to vector<2x32xf32>
    %1628 = vector.extract_strided_slice %1616 {offsets = [0, 96], sizes = [2, 32], strides = [1, 1]} : vector<2x128xf32> to vector<2x32xf32>
    %cst_538 = arith.constant 5.000000e-01 : f32
    %1629 = vector.broadcast %cst_538 : f32 to vector<2x32xf32>
    %1630 = arith.mulf %1629, %1628 : vector<2x32xf32>
    %cst_539 = arith.constant 5.000000e-01 : f32
    %1631 = vector.broadcast %cst_539 : f32 to vector<2x32xf32>
    %1632 = arith.addf %1630, %1631 : vector<2x32xf32>
    %1633 = arith.mulf %1626, %819 : vector<2x32xf32>
    %1634 = arith.mulf %1621, %1627 : vector<2x32xf32>
    %1635 = arith.addf %1633, %1634 : vector<2x32xf32>
    %1636 = math.tanh %1635 : vector<2x32xf32>
    %1637 = arith.mulf %1632, %1636 : vector<2x32xf32>
    %cst_540 = arith.constant dense<0.000000e+00> : vector<2x128xf32>
    %1638 = tpu.matmul %1637, %26, %cst_540 {dimension_numbers = #tpu.dot_dimension_numbers<[1], [0], [0], [1], [0, 0, 1, 1], [], []>} : vector<2x32xf32>, vector<32x128xf32>, vector<2x128xf32> -> vector<2x128xf32>
    %1639 = arith.addf %1638, %911 : vector<2x128xf32>
    %1640 = math.tanh %1639 : vector<2x128xf32>
    %1641 = vector.extract_strided_slice %1640 {offsets = [0, 0], sizes = [2, 32], strides = [1, 1]} : vector<2x128xf32> to vector<2x32xf32>
    %cst_541 = arith.constant 5.000000e-01 : f32
    %1642 = vector.broadcast %cst_541 : f32 to vector<2x32xf32>
    %1643 = arith.mulf %1642, %1641 : vector<2x32xf32>
    %cst_542 = arith.constant 5.000000e-01 : f32
    %1644 = vector.broadcast %cst_542 : f32 to vector<2x32xf32>
    %1645 = arith.addf %1643, %1644 : vector<2x32xf32>
    %1646 = vector.extract_strided_slice %1640 {offsets = [0, 32], sizes = [2, 32], strides = [1, 1]} : vector<2x128xf32> to vector<2x32xf32>
    %cst_543 = arith.constant 5.000000e-01 : f32
    %1647 = vector.broadcast %cst_543 : f32 to vector<2x32xf32>
    %1648 = arith.mulf %1647, %1646 : vector<2x32xf32>
    %cst_544 = arith.constant 5.000000e-01 : f32
    %1649 = vector.broadcast %cst_544 : f32 to vector<2x32xf32>
    %1650 = arith.addf %1648, %1649 : vector<2x32xf32>
    %1651 = vector.extract_strided_slice %1640 {offsets = [0, 64], sizes = [2, 32], strides = [1, 1]} : vector<2x128xf32> to vector<2x32xf32>
    %1652 = vector.extract_strided_slice %1640 {offsets = [0, 96], sizes = [2, 32], strides = [1, 1]} : vector<2x128xf32> to vector<2x32xf32>
    %cst_545 = arith.constant 5.000000e-01 : f32
    %1653 = vector.broadcast %cst_545 : f32 to vector<2x32xf32>
    %1654 = arith.mulf %1653, %1652 : vector<2x32xf32>
    %cst_546 = arith.constant 5.000000e-01 : f32
    %1655 = vector.broadcast %cst_546 : f32 to vector<2x32xf32>
    %1656 = arith.addf %1654, %1655 : vector<2x32xf32>
    %1657 = arith.mulf %1650, %873 : vector<2x32xf32>
    %1658 = arith.mulf %1645, %1651 : vector<2x32xf32>
    %1659 = arith.addf %1657, %1658 : vector<2x32xf32>
    %1660 = math.tanh %1659 : vector<2x32xf32>
    %1661 = arith.mulf %1656, %1660 : vector<2x32xf32>
    %cst_547 = arith.constant dense<0.000000e+00> : vector<2x128xf32>
    %1662 = tpu.matmul %1661, %28, %cst_547 {dimension_numbers = #tpu.dot_dimension_numbers<[1], [0], [0], [1], [0, 0, 1, 1], [], []>} : vector<2x32xf32>, vector<32x128xf32>, vector<2x128xf32> -> vector<2x128xf32>
    %1663 = arith.addf %1662, %914 : vector<2x128xf32>
    %1664 = math.tanh %1663 : vector<2x128xf32>
    %1665 = vector.extract_strided_slice %1664 {offsets = [0, 0], sizes = [2, 32], strides = [1, 1]} : vector<2x128xf32> to vector<2x32xf32>
    %cst_548 = arith.constant 5.000000e-01 : f32
    %1666 = vector.broadcast %cst_548 : f32 to vector<2x32xf32>
    %1667 = arith.mulf %1666, %1665 : vector<2x32xf32>
    %cst_549 = arith.constant 5.000000e-01 : f32
    %1668 = vector.broadcast %cst_549 : f32 to vector<2x32xf32>
    %1669 = arith.addf %1667, %1668 : vector<2x32xf32>
    %1670 = vector.extract_strided_slice %1664 {offsets = [0, 32], sizes = [2, 32], strides = [1, 1]} : vector<2x128xf32> to vector<2x32xf32>
    %cst_550 = arith.constant 5.000000e-01 : f32
    %1671 = vector.broadcast %cst_550 : f32 to vector<2x32xf32>
    %1672 = arith.mulf %1671, %1670 : vector<2x32xf32>
    %cst_551 = arith.constant 5.000000e-01 : f32
    %1673 = vector.broadcast %cst_551 : f32 to vector<2x32xf32>
    %1674 = arith.addf %1672, %1673 : vector<2x32xf32>
    %1675 = vector.extract_strided_slice %1664 {offsets = [0, 64], sizes = [2, 32], strides = [1, 1]} : vector<2x128xf32> to vector<2x32xf32>
    %1676 = vector.extract_strided_slice %1664 {offsets = [0, 96], sizes = [2, 32], strides = [1, 1]} : vector<2x128xf32> to vector<2x32xf32>
    %cst_552 = arith.constant 5.000000e-01 : f32
    %1677 = vector.broadcast %cst_552 : f32 to vector<2x32xf32>
    %1678 = arith.mulf %1677, %1676 : vector<2x32xf32>
    %cst_553 = arith.constant 5.000000e-01 : f32
    %1679 = vector.broadcast %cst_553 : f32 to vector<2x32xf32>
    %1680 = arith.addf %1678, %1679 : vector<2x32xf32>
    %1681 = arith.mulf %1674, %900 : vector<2x32xf32>
    %1682 = arith.mulf %1669, %1675 : vector<2x32xf32>
    %1683 = arith.addf %1681, %1682 : vector<2x32xf32>
    %1684 = math.tanh %1683 : vector<2x32xf32>
    %1685 = arith.mulf %1680, %1684 : vector<2x32xf32>
    %cst_554 = arith.constant dense<0.000000e+00> : vector<2x128xf32>
    %1686 = tpu.matmul %1685, %45, %cst_554 {dimension_numbers = #tpu.dot_dimension_numbers<[1], [0], [0], [1], [0, 0, 1, 1], [], []>} : vector<2x32xf32>, vector<32x128xf32>, vector<2x128xf32> -> vector<2x128xf32>
    %1687 = arith.addf %1686, %919 : vector<2x128xf32>
    %1688 = math.tanh %1687 : vector<2x128xf32>
    %1689 = vector.extract_strided_slice %1688 {offsets = [0, 0], sizes = [2, 32], strides = [1, 1]} : vector<2x128xf32> to vector<2x32xf32>
    %cst_555 = arith.constant 5.000000e-01 : f32
    %1690 = vector.broadcast %cst_555 : f32 to vector<2x32xf32>
    %1691 = arith.mulf %1690, %1689 : vector<2x32xf32>
    %cst_556 = arith.constant 5.000000e-01 : f32
    %1692 = vector.broadcast %cst_556 : f32 to vector<2x32xf32>
    %1693 = arith.addf %1691, %1692 : vector<2x32xf32>
    %1694 = vector.extract_strided_slice %1688 {offsets = [0, 32], sizes = [2, 32], strides = [1, 1]} : vector<2x128xf32> to vector<2x32xf32>
    %cst_557 = arith.constant 5.000000e-01 : f32
    %1695 = vector.broadcast %cst_557 : f32 to vector<2x32xf32>
    %1696 = arith.mulf %1695, %1694 : vector<2x32xf32>
    %cst_558 = arith.constant 5.000000e-01 : f32
    %1697 = vector.broadcast %cst_558 : f32 to vector<2x32xf32>
    %1698 = arith.addf %1696, %1697 : vector<2x32xf32>
    %1699 = vector.extract_strided_slice %1688 {offsets = [0, 64], sizes = [2, 32], strides = [1, 1]} : vector<2x128xf32> to vector<2x32xf32>
    %1700 = vector.extract_strided_slice %1688 {offsets = [0, 96], sizes = [2, 32], strides = [1, 1]} : vector<2x128xf32> to vector<2x32xf32>
    %cst_559 = arith.constant 5.000000e-01 : f32
    %1701 = vector.broadcast %cst_559 : f32 to vector<2x32xf32>
    %1702 = arith.mulf %1701, %1700 : vector<2x32xf32>
    %cst_560 = arith.constant 5.000000e-01 : f32
    %1703 = vector.broadcast %cst_560 : f32 to vector<2x32xf32>
    %1704 = arith.addf %1702, %1703 : vector<2x32xf32>
    %1705 = arith.mulf %1698, %738 : vector<2x32xf32>
    %1706 = arith.mulf %1693, %1699 : vector<2x32xf32>
    %1707 = arith.addf %1705, %1706 : vector<2x32xf32>
    %1708 = math.tanh %1707 : vector<2x32xf32>
    %1709 = arith.mulf %1704, %1708 : vector<2x32xf32>
    %cst_561 = arith.constant dense<0.000000e+00> : vector<2x128xf32>
    %1710 = tpu.matmul %1709, %24, %cst_561 {dimension_numbers = #tpu.dot_dimension_numbers<[1], [0], [0], [1], [0, 0, 1, 1], [], []>} : vector<2x32xf32>, vector<32x128xf32>, vector<2x128xf32> -> vector<2x128xf32>
    %1711 = arith.addf %1710, %908 : vector<2x128xf32>
    %1712 = math.tanh %1711 : vector<2x128xf32>
    %1713 = vector.extract_strided_slice %1712 {offsets = [0, 0], sizes = [2, 32], strides = [1, 1]} : vector<2x128xf32> to vector<2x32xf32>
    %cst_562 = arith.constant 5.000000e-01 : f32
    %1714 = vector.broadcast %cst_562 : f32 to vector<2x32xf32>
    %1715 = arith.mulf %1714, %1713 : vector<2x32xf32>
    %cst_563 = arith.constant 5.000000e-01 : f32
    %1716 = vector.broadcast %cst_563 : f32 to vector<2x32xf32>
    %1717 = arith.addf %1715, %1716 : vector<2x32xf32>
    %1718 = vector.extract_strided_slice %1712 {offsets = [0, 32], sizes = [2, 32], strides = [1, 1]} : vector<2x128xf32> to vector<2x32xf32>
    %cst_564 = arith.constant 5.000000e-01 : f32
    %1719 = vector.broadcast %cst_564 : f32 to vector<2x32xf32>
    %1720 = arith.mulf %1719, %1718 : vector<2x32xf32>
    %cst_565 = arith.constant 5.000000e-01 : f32
    %1721 = vector.broadcast %cst_565 : f32 to vector<2x32xf32>
    %1722 = arith.addf %1720, %1721 : vector<2x32xf32>
    %1723 = vector.extract_strided_slice %1712 {offsets = [0, 64], sizes = [2, 32], strides = [1, 1]} : vector<2x128xf32> to vector<2x32xf32>
    %1724 = vector.extract_strided_slice %1712 {offsets = [0, 96], sizes = [2, 32], strides = [1, 1]} : vector<2x128xf32> to vector<2x32xf32>
    %cst_566 = arith.constant 5.000000e-01 : f32
    %1725 = vector.broadcast %cst_566 : f32 to vector<2x32xf32>
    %1726 = arith.mulf %1725, %1724 : vector<2x32xf32>
    %cst_567 = arith.constant 5.000000e-01 : f32
    %1727 = vector.broadcast %cst_567 : f32 to vector<2x32xf32>
    %1728 = arith.addf %1726, %1727 : vector<2x32xf32>
    %1729 = arith.mulf %1722, %819 : vector<2x32xf32>
    %1730 = arith.mulf %1717, %1723 : vector<2x32xf32>
    %1731 = arith.addf %1729, %1730 : vector<2x32xf32>
    %1732 = math.tanh %1731 : vector<2x32xf32>
    %1733 = arith.mulf %1728, %1732 : vector<2x32xf32>
    %cst_568 = arith.constant dense<0.000000e+00> : vector<2x128xf32>
    %1734 = tpu.matmul %1733, %26, %cst_568 {dimension_numbers = #tpu.dot_dimension_numbers<[1], [0], [0], [1], [0, 0, 1, 1], [], []>} : vector<2x32xf32>, vector<32x128xf32>, vector<2x128xf32> -> vector<2x128xf32>
    %1735 = arith.addf %1734, %911 : vector<2x128xf32>
    %1736 = math.tanh %1735 : vector<2x128xf32>
    %1737 = vector.extract_strided_slice %1736 {offsets = [0, 0], sizes = [2, 32], strides = [1, 1]} : vector<2x128xf32> to vector<2x32xf32>
    %cst_569 = arith.constant 5.000000e-01 : f32
    %1738 = vector.broadcast %cst_569 : f32 to vector<2x32xf32>
    %1739 = arith.mulf %1738, %1737 : vector<2x32xf32>
    %cst_570 = arith.constant 5.000000e-01 : f32
    %1740 = vector.broadcast %cst_570 : f32 to vector<2x32xf32>
    %1741 = arith.addf %1739, %1740 : vector<2x32xf32>
    %1742 = vector.extract_strided_slice %1736 {offsets = [0, 32], sizes = [2, 32], strides = [1, 1]} : vector<2x128xf32> to vector<2x32xf32>
    %cst_571 = arith.constant 5.000000e-01 : f32
    %1743 = vector.broadcast %cst_571 : f32 to vector<2x32xf32>
    %1744 = arith.mulf %1743, %1742 : vector<2x32xf32>
    %cst_572 = arith.constant 5.000000e-01 : f32
    %1745 = vector.broadcast %cst_572 : f32 to vector<2x32xf32>
    %1746 = arith.addf %1744, %1745 : vector<2x32xf32>
    %1747 = vector.extract_strided_slice %1736 {offsets = [0, 64], sizes = [2, 32], strides = [1, 1]} : vector<2x128xf32> to vector<2x32xf32>
    %1748 = vector.extract_strided_slice %1736 {offsets = [0, 96], sizes = [2, 32], strides = [1, 1]} : vector<2x128xf32> to vector<2x32xf32>
    %cst_573 = arith.constant 5.000000e-01 : f32
    %1749 = vector.broadcast %cst_573 : f32 to vector<2x32xf32>
    %1750 = arith.mulf %1749, %1748 : vector<2x32xf32>
    %cst_574 = arith.constant 5.000000e-01 : f32
    %1751 = vector.broadcast %cst_574 : f32 to vector<2x32xf32>
    %1752 = arith.addf %1750, %1751 : vector<2x32xf32>
    %1753 = arith.mulf %1746, %873 : vector<2x32xf32>
    %1754 = arith.mulf %1741, %1747 : vector<2x32xf32>
    %1755 = arith.addf %1753, %1754 : vector<2x32xf32>
    %1756 = math.tanh %1755 : vector<2x32xf32>
    %1757 = arith.mulf %1752, %1756 : vector<2x32xf32>
    %cst_575 = arith.constant dense<0.000000e+00> : vector<2x128xf32>
    %1758 = tpu.matmul %1757, %28, %cst_575 {dimension_numbers = #tpu.dot_dimension_numbers<[1], [0], [0], [1], [0, 0, 1, 1], [], []>} : vector<2x32xf32>, vector<32x128xf32>, vector<2x128xf32> -> vector<2x128xf32>
    %1759 = arith.addf %1758, %914 : vector<2x128xf32>
    %1760 = math.tanh %1759 : vector<2x128xf32>
    %1761 = vector.extract_strided_slice %1760 {offsets = [0, 0], sizes = [2, 32], strides = [1, 1]} : vector<2x128xf32> to vector<2x32xf32>
    %cst_576 = arith.constant 5.000000e-01 : f32
    %1762 = vector.broadcast %cst_576 : f32 to vector<2x32xf32>
    %1763 = arith.mulf %1762, %1761 : vector<2x32xf32>
    %cst_577 = arith.constant 5.000000e-01 : f32
    %1764 = vector.broadcast %cst_577 : f32 to vector<2x32xf32>
    %1765 = arith.addf %1763, %1764 : vector<2x32xf32>
    %1766 = vector.extract_strided_slice %1760 {offsets = [0, 32], sizes = [2, 32], strides = [1, 1]} : vector<2x128xf32> to vector<2x32xf32>
    %cst_578 = arith.constant 5.000000e-01 : f32
    %1767 = vector.broadcast %cst_578 : f32 to vector<2x32xf32>
    %1768 = arith.mulf %1767, %1766 : vector<2x32xf32>
    %cst_579 = arith.constant 5.000000e-01 : f32
    %1769 = vector.broadcast %cst_579 : f32 to vector<2x32xf32>
    %1770 = arith.addf %1768, %1769 : vector<2x32xf32>
    %1771 = vector.extract_strided_slice %1760 {offsets = [0, 64], sizes = [2, 32], strides = [1, 1]} : vector<2x128xf32> to vector<2x32xf32>
    %1772 = vector.extract_strided_slice %1760 {offsets = [0, 96], sizes = [2, 32], strides = [1, 1]} : vector<2x128xf32> to vector<2x32xf32>
    %cst_580 = arith.constant 5.000000e-01 : f32
    %1773 = vector.broadcast %cst_580 : f32 to vector<2x32xf32>
    %1774 = arith.mulf %1773, %1772 : vector<2x32xf32>
    %cst_581 = arith.constant 5.000000e-01 : f32
    %1775 = vector.broadcast %cst_581 : f32 to vector<2x32xf32>
    %1776 = arith.addf %1774, %1775 : vector<2x32xf32>
    %1777 = arith.mulf %1770, %900 : vector<2x32xf32>
    %1778 = arith.mulf %1765, %1771 : vector<2x32xf32>
    %1779 = arith.addf %1777, %1778 : vector<2x32xf32>
    %1780 = math.tanh %1779 : vector<2x32xf32>
    %1781 = arith.mulf %1776, %1780 : vector<2x32xf32>
    %cst_582 = arith.constant dense<0.000000e+00> : vector<2x128xf32>
    %1782 = tpu.matmul %1781, %45, %cst_582 {dimension_numbers = #tpu.dot_dimension_numbers<[1], [0], [0], [1], [0, 0, 1, 1], [], []>} : vector<2x32xf32>, vector<32x128xf32>, vector<2x128xf32> -> vector<2x128xf32>
    %1783 = arith.addf %1782, %919 : vector<2x128xf32>
    %1784 = math.tanh %1783 : vector<2x128xf32>
    %1785 = vector.extract_strided_slice %1784 {offsets = [0, 0], sizes = [2, 32], strides = [1, 1]} : vector<2x128xf32> to vector<2x32xf32>
    %cst_583 = arith.constant 5.000000e-01 : f32
    %1786 = vector.broadcast %cst_583 : f32 to vector<2x32xf32>
    %1787 = arith.mulf %1786, %1785 : vector<2x32xf32>
    %cst_584 = arith.constant 5.000000e-01 : f32
    %1788 = vector.broadcast %cst_584 : f32 to vector<2x32xf32>
    %1789 = arith.addf %1787, %1788 : vector<2x32xf32>
    %1790 = vector.extract_strided_slice %1784 {offsets = [0, 32], sizes = [2, 32], strides = [1, 1]} : vector<2x128xf32> to vector<2x32xf32>
    %cst_585 = arith.constant 5.000000e-01 : f32
    %1791 = vector.broadcast %cst_585 : f32 to vector<2x32xf32>
    %1792 = arith.mulf %1791, %1790 : vector<2x32xf32>
    %cst_586 = arith.constant 5.000000e-01 : f32
    %1793 = vector.broadcast %cst_586 : f32 to vector<2x32xf32>
    %1794 = arith.addf %1792, %1793 : vector<2x32xf32>
    %1795 = vector.extract_strided_slice %1784 {offsets = [0, 64], sizes = [2, 32], strides = [1, 1]} : vector<2x128xf32> to vector<2x32xf32>
    %1796 = vector.extract_strided_slice %1784 {offsets = [0, 96], sizes = [2, 32], strides = [1, 1]} : vector<2x128xf32> to vector<2x32xf32>
    %cst_587 = arith.constant 5.000000e-01 : f32
    %1797 = vector.broadcast %cst_587 : f32 to vector<2x32xf32>
    %1798 = arith.mulf %1797, %1796 : vector<2x32xf32>
    %cst_588 = arith.constant 5.000000e-01 : f32
    %1799 = vector.broadcast %cst_588 : f32 to vector<2x32xf32>
    %1800 = arith.addf %1798, %1799 : vector<2x32xf32>
    %1801 = arith.mulf %1794, %738 : vector<2x32xf32>
    %1802 = arith.mulf %1789, %1795 : vector<2x32xf32>
    %1803 = arith.addf %1801, %1802 : vector<2x32xf32>
    %1804 = math.tanh %1803 : vector<2x32xf32>
    %1805 = arith.mulf %1800, %1804 : vector<2x32xf32>
    %cst_589 = arith.constant dense<0.000000e+00> : vector<2x128xf32>
    %1806 = tpu.matmul %1805, %24, %cst_589 {dimension_numbers = #tpu.dot_dimension_numbers<[1], [0], [0], [1], [0, 0, 1, 1], [], []>} : vector<2x32xf32>, vector<32x128xf32>, vector<2x128xf32> -> vector<2x128xf32>
    %1807 = arith.addf %1806, %908 : vector<2x128xf32>
    %1808 = math.tanh %1807 : vector<2x128xf32>
    %1809 = vector.extract_strided_slice %1808 {offsets = [0, 0], sizes = [2, 32], strides = [1, 1]} : vector<2x128xf32> to vector<2x32xf32>
    %cst_590 = arith.constant 5.000000e-01 : f32
    %1810 = vector.broadcast %cst_590 : f32 to vector<2x32xf32>
    %1811 = arith.mulf %1810, %1809 : vector<2x32xf32>
    %cst_591 = arith.constant 5.000000e-01 : f32
    %1812 = vector.broadcast %cst_591 : f32 to vector<2x32xf32>
    %1813 = arith.addf %1811, %1812 : vector<2x32xf32>
    %1814 = vector.extract_strided_slice %1808 {offsets = [0, 32], sizes = [2, 32], strides = [1, 1]} : vector<2x128xf32> to vector<2x32xf32>
    %cst_592 = arith.constant 5.000000e-01 : f32
    %1815 = vector.broadcast %cst_592 : f32 to vector<2x32xf32>
    %1816 = arith.mulf %1815, %1814 : vector<2x32xf32>
    %cst_593 = arith.constant 5.000000e-01 : f32
    %1817 = vector.broadcast %cst_593 : f32 to vector<2x32xf32>
    %1818 = arith.addf %1816, %1817 : vector<2x32xf32>
    %1819 = vector.extract_strided_slice %1808 {offsets = [0, 64], sizes = [2, 32], strides = [1, 1]} : vector<2x128xf32> to vector<2x32xf32>
    %1820 = vector.extract_strided_slice %1808 {offsets = [0, 96], sizes = [2, 32], strides = [1, 1]} : vector<2x128xf32> to vector<2x32xf32>
    %cst_594 = arith.constant 5.000000e-01 : f32
    %1821 = vector.broadcast %cst_594 : f32 to vector<2x32xf32>
    %1822 = arith.mulf %1821, %1820 : vector<2x32xf32>
    %cst_595 = arith.constant 5.000000e-01 : f32
    %1823 = vector.broadcast %cst_595 : f32 to vector<2x32xf32>
    %1824 = arith.addf %1822, %1823 : vector<2x32xf32>
    %1825 = arith.mulf %1818, %819 : vector<2x32xf32>
    %1826 = arith.mulf %1813, %1819 : vector<2x32xf32>
    %1827 = arith.addf %1825, %1826 : vector<2x32xf32>
    %1828 = math.tanh %1827 : vector<2x32xf32>
    %1829 = arith.mulf %1824, %1828 : vector<2x32xf32>
    %cst_596 = arith.constant dense<0.000000e+00> : vector<2x128xf32>
    %1830 = tpu.matmul %1829, %26, %cst_596 {dimension_numbers = #tpu.dot_dimension_numbers<[1], [0], [0], [1], [0, 0, 1, 1], [], []>} : vector<2x32xf32>, vector<32x128xf32>, vector<2x128xf32> -> vector<2x128xf32>
    %1831 = arith.addf %1830, %911 : vector<2x128xf32>
    %1832 = math.tanh %1831 : vector<2x128xf32>
    %1833 = vector.extract_strided_slice %1832 {offsets = [0, 0], sizes = [2, 32], strides = [1, 1]} : vector<2x128xf32> to vector<2x32xf32>
    %cst_597 = arith.constant 5.000000e-01 : f32
    %1834 = vector.broadcast %cst_597 : f32 to vector<2x32xf32>
    %1835 = arith.mulf %1834, %1833 : vector<2x32xf32>
    %cst_598 = arith.constant 5.000000e-01 : f32
    %1836 = vector.broadcast %cst_598 : f32 to vector<2x32xf32>
    %1837 = arith.addf %1835, %1836 : vector<2x32xf32>
    %1838 = vector.extract_strided_slice %1832 {offsets = [0, 32], sizes = [2, 32], strides = [1, 1]} : vector<2x128xf32> to vector<2x32xf32>
    %cst_599 = arith.constant 5.000000e-01 : f32
    %1839 = vector.broadcast %cst_599 : f32 to vector<2x32xf32>
    %1840 = arith.mulf %1839, %1838 : vector<2x32xf32>
    %cst_600 = arith.constant 5.000000e-01 : f32
    %1841 = vector.broadcast %cst_600 : f32 to vector<2x32xf32>
    %1842 = arith.addf %1840, %1841 : vector<2x32xf32>
    %1843 = vector.extract_strided_slice %1832 {offsets = [0, 64], sizes = [2, 32], strides = [1, 1]} : vector<2x128xf32> to vector<2x32xf32>
    %1844 = vector.extract_strided_slice %1832 {offsets = [0, 96], sizes = [2, 32], strides = [1, 1]} : vector<2x128xf32> to vector<2x32xf32>
    %cst_601 = arith.constant 5.000000e-01 : f32
    %1845 = vector.broadcast %cst_601 : f32 to vector<2x32xf32>
    %1846 = arith.mulf %1845, %1844 : vector<2x32xf32>
    %cst_602 = arith.constant 5.000000e-01 : f32
    %1847 = vector.broadcast %cst_602 : f32 to vector<2x32xf32>
    %1848 = arith.addf %1846, %1847 : vector<2x32xf32>
    %1849 = arith.mulf %1842, %873 : vector<2x32xf32>
    %1850 = arith.mulf %1837, %1843 : vector<2x32xf32>
    %1851 = arith.addf %1849, %1850 : vector<2x32xf32>
    %1852 = math.tanh %1851 : vector<2x32xf32>
    %1853 = arith.mulf %1848, %1852 : vector<2x32xf32>
    %cst_603 = arith.constant dense<0.000000e+00> : vector<2x128xf32>
    %1854 = tpu.matmul %1853, %28, %cst_603 {dimension_numbers = #tpu.dot_dimension_numbers<[1], [0], [0], [1], [0, 0, 1, 1], [], []>} : vector<2x32xf32>, vector<32x128xf32>, vector<2x128xf32> -> vector<2x128xf32>
    %1855 = arith.addf %1854, %914 : vector<2x128xf32>
    %1856 = math.tanh %1855 : vector<2x128xf32>
    %1857 = vector.extract_strided_slice %1856 {offsets = [0, 0], sizes = [2, 32], strides = [1, 1]} : vector<2x128xf32> to vector<2x32xf32>
    %cst_604 = arith.constant 5.000000e-01 : f32
    %1858 = vector.broadcast %cst_604 : f32 to vector<2x32xf32>
    %1859 = arith.mulf %1858, %1857 : vector<2x32xf32>
    %cst_605 = arith.constant 5.000000e-01 : f32
    %1860 = vector.broadcast %cst_605 : f32 to vector<2x32xf32>
    %1861 = arith.addf %1859, %1860 : vector<2x32xf32>
    %1862 = vector.extract_strided_slice %1856 {offsets = [0, 32], sizes = [2, 32], strides = [1, 1]} : vector<2x128xf32> to vector<2x32xf32>
    %cst_606 = arith.constant 5.000000e-01 : f32
    %1863 = vector.broadcast %cst_606 : f32 to vector<2x32xf32>
    %1864 = arith.mulf %1863, %1862 : vector<2x32xf32>
    %cst_607 = arith.constant 5.000000e-01 : f32
    %1865 = vector.broadcast %cst_607 : f32 to vector<2x32xf32>
    %1866 = arith.addf %1864, %1865 : vector<2x32xf32>
    %1867 = vector.extract_strided_slice %1856 {offsets = [0, 64], sizes = [2, 32], strides = [1, 1]} : vector<2x128xf32> to vector<2x32xf32>
    %1868 = vector.extract_strided_slice %1856 {offsets = [0, 96], sizes = [2, 32], strides = [1, 1]} : vector<2x128xf32> to vector<2x32xf32>
    %cst_608 = arith.constant 5.000000e-01 : f32
    %1869 = vector.broadcast %cst_608 : f32 to vector<2x32xf32>
    %1870 = arith.mulf %1869, %1868 : vector<2x32xf32>
    %cst_609 = arith.constant 5.000000e-01 : f32
    %1871 = vector.broadcast %cst_609 : f32 to vector<2x32xf32>
    %1872 = arith.addf %1870, %1871 : vector<2x32xf32>
    %1873 = arith.mulf %1866, %900 : vector<2x32xf32>
    %1874 = arith.mulf %1861, %1867 : vector<2x32xf32>
    %1875 = arith.addf %1873, %1874 : vector<2x32xf32>
    %1876 = math.tanh %1875 : vector<2x32xf32>
    %1877 = arith.mulf %1872, %1876 : vector<2x32xf32>
    %1878 = tpu.concatenate %1013, %1109, %1205, %1301, %1397, %1493, %1589, %1685, %1781, %1877 in 0 : vector<2x32xf32>, vector<2x32xf32>, vector<2x32xf32>, vector<2x32xf32>, vector<2x32xf32>, vector<2x32xf32>, vector<2x32xf32>, vector<2x32xf32>, vector<2x32xf32>, vector<2x32xf32> -> vector<20x32xf32>
    %cst_610 = arith.constant dense<0.000000e+00> : vector<20x128xf32>
    %1879 = tpu.matmul %1878, %47, %cst_610 {dimension_numbers = #tpu.dot_dimension_numbers<[1], [0], [0], [1], [0, 0, 1, 1], [], []>} : vector<20x32xf32>, vector<32x128xf32>, vector<20x128xf32> -> vector<20x128xf32>
    %1880 = vector.broadcast %48 : vector<1x128xf32> to vector<20x128xf32>
    %1881 = arith.addf %1879, %1880 : vector<20x128xf32>
    %c0_611 = arith.constant 0 : index
    %c0_612 = arith.constant 0 : index
    %1882 = vector.load %arg13[%c0_611, %c0_612] : memref<20x128xf32, #tpu.memory_space<vmem>>, vector<20x128xf32>
    tpu.vector_store %arg13[%c0_611, %c0_612], %1881 {strides = array<i32>} : memref<20x128xf32, #tpu.memory_space<vmem>>, vector<20x128xf32>,
    return
  }
}

</mosaic_0001>

<bundles_post_ra>
// kernel: tpu_custom_call.1
= control target key start
LH: loop header
LB: loop body
LE: loop exit
PB: predicated region body
PF: predicated region fallthrough
CT: control target
= control target key end

     0   :  { %18 = vsyncpa [#allocation3], 0  ;;  %s6526_s0 = inlined_call_operand.hbm [shape: f32[16,32], index: 0, kind: input, shape index: {}]   ;;  %s6527_s1 = inlined_call_operand.hbm [shape: f32[32,128], index: 1, kind: input, shape index: {}]   ;;  %s6528_s2 = inlined_call_operand.hbm [shape: f32[32,128], index: 2, kind: input, shape index: {}]   ;;  %s6529_s3 = inlined_call_operand.hbm [shape: f32[3,32,128], index: 3, kind: input, shape index: {}]   ;;  %s6530_s4 = inlined_call_operand.hbm [shape: f32[3,32,128], index: 4, kind: input, shape index: {}]   ;;  %s6531_s5 = inlined_call_operand.vmem [shape: f32[4,1,128], index: 5, kind: input, shape index: {}]   ;;  %s6532_s6 = inlined_call_operand.hbm [shape: f32[4,32,128], index: 6, kind: input, shape index: {}]   ;;  %s6533_s7 = inlined_call_operand.hbm [shape: f32[4,32,128], index: 7, kind: input, shape index: {}]   ;;  %s6534_s8 = inlined_call_operand.hbm [shape: f32[4,1,128], index: 8, kind: input, shape index: {}]   ;;  %s6535_s9 = inlined_call_operand.hbm [shape: f32[32,128], index: 9, kind: input, shape index: {}]   ;;  %s6536_s10 = inlined_call_operand.vmem [shape: f32[1,128], index: 10, kind: input, shape index: {}]   ;;  %s6537_s11 = inlined_call_operand.hbm [shape: f32[32,128], index: 11, kind: input, shape index: {}]   ;;  %s6538_s12 = inlined_call_operand.vmem [shape: f32[1,128], index: 12, kind: input, shape index: {}]   ;;  %s6539_s13 = inlined_call_operand.hbm [shape: f32[20,128], index: 13, kind: output, shape index: {}]  }
   0x1   :  { %19 = vsyncpa [#allocation6], 0 }
   0x2   :  { %20 = vsyncpa [#allocation9], 0 }
   0x3   :  { %21 = vsyncpa [#allocation12], 0 }
   0x4   :  { %22 = vsyncpa [#allocation15], 0 }
   0x5   :  { %23 = vsyncpa [#allocation18], 0 }
   0x6   :  { %24 = vsyncpa [#allocation4], 0  ;;  %s42_s27 = sshll.u32 %s6527_s1, 4  ;;  %s5082_s28 = smov [#allocation5]   ;;  %s43_s27 = int_to_ptr.hbm [resolvable:$true] %s42_s27 }
   0x7   :  { %s44_s29 = sshll.u32 %s5082_s28, 4  ;;  %s68_s15 = sshll.u32 %s6529_s3, 4  ;;  %s45_s29 = int_to_ptr.vmem [resolvable:$true] %s44_s29  ;;  %s69_s15 = int_to_ptr.hbm [resolvable:$true] %s68_s15 }
   0x8   :  { %s5083_s16 = smov 128   ;;  %s5084_s17 = smov 8  }
   0x9   :  { %50 = dma.hbm_to_vmem [thread:$0]  %s43_s27, 512, %s45_s29, [#allocation6], %s5083_s16, %s5083_s16, %s5084_s17  }
   0xa   :  { %s5085_s18 = smov [#allocation8]   ;;  %s96_s1 = sshll.u32 %s6532_s6, 4  ;;  %s97_s1 = int_to_ptr.hbm [resolvable:$true] %s96_s1 }
   0xb   :  { %s70_s19 = sshll.u32 %s5085_s18, 4  ;;  %s122_s23 = sshll.u32 %s6534_s8, 4  ;;  %s71_s19 = int_to_ptr.vmem [resolvable:$true] %s70_s19  ;;  %s123_s23 = int_to_ptr.hbm [resolvable:$true] %s122_s23 }
   0xc   :  { %76 = dma.hbm_to_vmem [thread:$0]  %s69_s15, 1536, %s71_s19, [#allocation9], %s5083_s16, %s5083_s16, %s5084_s17  }
   0xd   :  { %s5086_s24 = smov [#allocation11]   ;;  %s5087_s26 = smov [#allocation14]  }
   0xe   :  { %s98_s25 = sshll.u32 %s5086_s24, 4  ;;  %s124_s6 = sshll.u32 %s5087_s26, 4  ;;  %s99_s25 = int_to_ptr.vmem [resolvable:$true] %s98_s25  ;;  %s125_s6 = int_to_ptr.vmem [resolvable:$true] %s124_s6 }
   0xf   :  { %104 = dma.hbm_to_vmem [thread:$0]  %s97_s1, 2048, %s99_s25, [#allocation12], %s5083_s16, %s5083_s16, %s5084_s17  }
  0x10   :  { %s5088_s27 = smov 16   ;;  %s5089_s28 = smov 1  }
  0x11   :  { %130 = dma.hbm_to_vmem [thread:$0]  %s123_s23, 64, %s125_s6, [#allocation15], %s5088_s27, %s5088_s27, %s5089_s28  }
  0x12   :  { %s29_s14 = sshll.u32 %s6526_s0, 4  ;;  %s5090_s8 = smov [#allocation2]   ;;  %s30_s14 = int_to_ptr.hbm [resolvable:$true] %s29_s14 }
  0x13   :  { %s31_s15 = sshll.u32 %s5090_s8, 4  ;;  %s55_s20 = sshll.u32 %s6528_s2, 4  ;;  %s32_s15 = int_to_ptr.vmem [resolvable:$true] %s31_s15  ;;  %s56_s20 = int_to_ptr.hbm [resolvable:$true] %s55_s20 }
  0x14   :  { %37 = dma.hbm_to_vmem [thread:$0]  %s30_s14, 256, %s32_s15, [#allocation3], %s5083_s16, %s5083_s16, %s5084_s17  }
  0x15   :  { %s5091_s21 = smov [#allocation7]   ;;  %s81_s23 = sshll.u32 %s6530_s4, 4  ;;  %s82_s23 = int_to_ptr.hbm [resolvable:$true] %s81_s23 }
  0x16   :  { %s57_s1 = sshll.u32 %s5091_s21, 4  ;;  %s109_s2 = sshll.u32 %s6533_s7, 4  ;;  %s58_s1 = int_to_ptr.vmem [resolvable:$true] %s57_s1  ;;  %s110_s2 = int_to_ptr.hbm [resolvable:$true] %s109_s2 }
  0x17   :  { %63 = dma.hbm_to_vmem [thread:$0]  %s56_s20, 512, %s58_s1, [#allocation6], %s5083_s16, %s5083_s16, %s5084_s17  }
  0x18   :  { %s5092_s25 = smov [#allocation10]   ;;  %s5093_s6 = smov [#allocation13]  }
  0x19   :  { %s83_s26 = sshll.u32 %s5092_s25, 4  ;;  %s111_s4 = sshll.u32 %s5093_s6, 4  ;;  %s84_s26 = int_to_ptr.vmem [resolvable:$true] %s83_s26  ;;  %s112_s4 = int_to_ptr.vmem [resolvable:$true] %s111_s4 }
  0x1a   :  { %89 = dma.hbm_to_vmem [thread:$0]  %s82_s23, 1536, %s84_s26, [#allocation9], %s5083_s16, %s5083_s16, %s5084_s17  }
  0x1b   :  { %s135_s29 = sshll.u32 %s6535_s9, 4  ;;  %s150_s14 = sshll.u32 %s6537_s11, 4  ;;  %s136_s29 = int_to_ptr.hbm [resolvable:$true] %s135_s29  ;;  %s151_s14 = int_to_ptr.hbm [resolvable:$true] %s150_s14 }
  0x1c   :  { %117 = dma.hbm_to_vmem [thread:$0]  %s110_s2, 2048, %s112_s4, [#allocation12], %s5083_s16, %s5083_s16, %s5084_s17  }
  0x1d   :  { %s5094_s8 = smov [#allocation16]   ;;  %s5095_s18 = smov [#allocation17]  }
  0x1e   :  { %s137_s15 = sshll.u32 %s5094_s8, 4  ;;  %s152_s9 = sshll.u32 %s5095_s18, 4  ;;  %s138_s15 = int_to_ptr.vmem [resolvable:$true] %s137_s15  ;;  %s153_s9 = int_to_ptr.vmem [resolvable:$true] %s152_s9 }
  0x1f   :  { %143 = dma.hbm_to_vmem [thread:$0]  %s136_s29, 512, %s138_s15, [#allocation15], %s5083_s16, %s5083_s16, %s5084_s17  }
  0x20   :  { %158 = dma.hbm_to_vmem [thread:$0]  %s151_s14, 512, %s153_s9, [#allocation18], %s5083_s16, %s5083_s16, %s5084_s17  }
  0x21   :  { %5068 = dma.done.wait [#allocation3], 256  }
  0x22   :  { %5069 = vsyncadd [#allocation3], 4294967040 }
  0x23   :  { %5070 = dma.done.wait [#allocation6], 1024  }
  0x24   :  { %5071 = vsyncadd [#allocation6], 4294966272 }
  0x25   :  { %5072 = dma.done.wait [#allocation9], 3072  }
  0x26   :  { %5073 = vsyncadd [#allocation9], 4294964224 }
  0x27   :  { %5074 = dma.done.wait [#allocation12], 4096  }
  0x28   :  { %5075 = vsyncadd [#allocation12], 4294963200 }
  0x29   :  { %5076 = dma.done.wait [#allocation15], 576  }
  0x2a   :  { %5077 = vsyncadd [#allocation15], 4294966720 }
  0x2b   :  { %5078 = dma.done.wait [#allocation18], 512  }
  0x2c   :  { %5079 = vsyncadd [#allocation18], 4294966784  ;;  %v300_v0 = vld [vmem:[#allocation5 + $0x18] sm:$0xff]  ;;  %v299_v1 = vld [vmem:[#allocation5 + $0x10] sm:$0xff]  ;;  %vm304_vm0 = vcmask 261120   ;;  %v5096_v9 = vmov 0.0  }
  0x2d   :  { %v5227_v2 = vld [vmem:[#allocation7 + $0x18] sm:$0xff]  ;;  %323 = vmatpush.msra.mxu0 %v300_v0  ;;  %v5230_v3 = vld [vmem:[#allocation7 + $0x10] sm:$0xff]  ;;  %v298_v4 = vld [vmem:[#allocation5 + $0x8] sm:$0xff]  ;;  %s5097_s20 = smov 64   ;;  %s5098_s21 = smov 32   ;;  %vm4256_vm1 = vcmask 1041408  }
  0x2e   :  { %349 = vmatpush.msra.mxu1 %v5227_v2  ;;  %v297_v5 = vld [vmem:[#allocation5] sm:$0xff]  ;;  %v5232_v6 = vld [vmem:[#allocation7 + $0x8] sm:$0xff]  ;;  %v295_v7 = vld [vmem:[#allocation2] sm:$0xff]  ;;  %vm4258_vm2 = vcmask 1043456   ;;  %vm4260_vm3 = vcmask 1045504   ;;  %s5099_s7 = smov [#allocation19]  }
  0x2f   :  { %324 = vmatpush.msra.mxu0 %v299_v1  ;;  %v5235_v8 = vld [vmem:[#allocation7] sm:$0xff]  ;;  %v5248_v10 = vld [vmem:[%s6531_s5] ss:$0 sm:$0xff]  ;;  %v5260_v24 = vld [vmem:[#allocation10 + $0x18] sm:$0xff]  ;;  %s4317_s30 = sshll.u32 %s5099_s7, 4  ;;  %s4319_s8 = sshll.u32 %s6539_s13, 4  ;;  %s4318_s30 = int_to_ptr.vmem [resolvable:$true] %s4317_s30  ;;  %s4320_s8 = int_to_ptr.hbm [resolvable:$true] %s4319_s8 }
  0x30   :  { %350 = vmatpush.msra.mxu1 %v5230_v3  ;;  %v5262_v25 = vld [vmem:[#allocation10 + $0x10] sm:$0xff]  ;;  %390 = vmatpush.msra.mxu3 %v5260_v24  ;;  %v5265_v26 = vld [vmem:[#allocation8 + $0x18] sm:$0xff]  ;;  %v5268_v27 = vld [vmem:[#allocation10 + $0x8] sm:$0xff] }
  0x31   :  { %325 = vmatpush.msra.mxu0 %v298_v4  ;;  %v5272_v28 = vld [vmem:[#allocation8 + $0x10] sm:$0xff]  ;;  %v5275_v29 = vld [vmem:[#allocation10] sm:$0xff]  ;;  %v5279_v30 = vld [vmem:[#allocation8 + $0x8] sm:$0xff] }
  0x32   :  { %351 = vmatpush.msra.mxu1 %v5232_v6  ;;  %391 = vmatpush.msra.mxu3 %v5262_v25  ;;  %v5284_v31 = vld [vmem:[#allocation8] sm:$0xff]  ;;  %v5299_v36 = vld [vmem:[%s6531_s5 + $0x1] ss:$0 sm:$0xff]  ;;  %v296_v0 = vld [vmem:[#allocation2 + $0x8] sm:$0xff] }
  0x33   :  { %326 = vmatpush.msra.mxu0 %v297_v5  ;;  %v5317_v1 = vld [vmem:[#allocation10 + $0x38] sm:$0xff]  ;;  %v5323_v5 = vld [vmem:[#allocation10 + $0x30] sm:$0xff] }
  0x34   :  { %352 = vmatpush.msra.mxu1 %v5235_v8  ;;  %4340 = vmatmul.msk.f32.vlgmr.msra.gmra.mxu0 %vm304_vm0, %v295_v7  ;;  %v5319_v4 = vld [vmem:[#allocation8 + $0x38] sm:$0xff]  ;;  %v5325_v7 = vld [vmem:[#allocation8 + $0x30] sm:$0xff] }
  0x35   :  { %353 = vmatmul.f32.vlgmr.msra.gmra.mxu1 %v5096_v9  ;;  %575 = vmatpush.msrb.mxu0 %v5260_v24 }
  0x36   :  { %459 = vmatpush.msrb.mxu1 %v5227_v2  ;;  %392 = vmatpush.msra.mxu3 %v5268_v27 }
  0x37   :  { %576 = vmatpush.msrb.mxu0 %v5262_v25  ;;  %506 = vmatpush.msra.mxu2 %v5317_v1 }
  0x38   :  { %460 = vmatpush.msrb.mxu1 %v5230_v3  ;;  %393 = vmatpush.msra.mxu3 %v5275_v29 }
  0x39   :  { %577 = vmatpush.msrb.mxu0 %v5268_v27  ;;  %394 = vmatmul.f32.vlgmr.msra.gmra.mxu3 %v5096_v9 }
  0x3a   :  { %461 = vmatpush.msrb.mxu1 %v5232_v6  ;;  %415 = vmatpush.msrb.mxu3 %v5265_v26 }
  0x3b   :  { %578 = vmatpush.msrb.mxu0 %v5275_v29  ;;  %507 = vmatpush.msra.mxu2 %v5323_v5 }
  0x3c   :  { %462 = vmatpush.msrb.mxu1 %v5235_v8  ;;  %416 = vmatpush.msrb.mxu3 %v5272_v28 }
  0x3d   :  { %4341 = vmatmul.msk.f32.gmra.mxu0 %vm304_vm0, %v296_v0 }
  0x3e   :  { %601 = vmatpush.msra.mxu1 %v5265_v26  ;;  %417 = vmatpush.msrb.mxu3 %v5279_v30 }
  0x40   :  { %602 = vmatpush.msra.mxu1 %v5272_v28  ;;  %418 = vmatpush.msrb.mxu3 %v5284_v31 }
  0x42   :  { %603 = vmatpush.msra.mxu1 %v5279_v30  ;;  %531 = vmatpush.msra.mxu3 %v5319_v4 }
  0x44   :  { %604 = vmatpush.msra.mxu1 %v5284_v31  ;;  %532 = vmatpush.msra.mxu3 %v5325_v7 }
  0xb1   :  { %v328_v11 = vpop.f32.mrf.mxu0 }
  0xb2   :  { %v354_v12 = vpop.f32.mrf.mxu1  ;;  %v5251_v13 = vadd.f32 %v5248_v10, %v328_v11  ;;  %v5328_v11 = vld [vmem:[#allocation10 + $0x28] sm:$0xff] }
  0xb3   :  { %508 = vmatpush.msra.mxu2 %v5328_v11 }
  0xb4   :  { %v357_v14 = vadd.f32 %v354_v12, %v5251_v13  ;;  %v5332_v12 = vld [vmem:[#allocation8 + $0x28] sm:$0xff] }
  0xb5   :  { %533 = vmatpush.msra.mxu3 %v5332_v12 }
  0xb6   :  { %4469 = vtanh.f32 %v357_v14  ;;  %v5335_v14 = vld [vmem:[#allocation10 + $0x20] sm:$0xff] }
  0xb7   :  { %509 = vmatpush.msra.mxu2 %v5335_v14 }
  0xb8   :  { %510 = vmatmul.f32.vlgmr.msra.gmra.mxu2 %v5096_v9 }
  0xb9   :  { %642 = vmatpush.msrb.mxu2 %v5227_v2 }
  0xbb   :  { %643 = vmatpush.msrb.mxu2 %v5230_v3 }
  0xbc   :  { %v4470_v15 = vpop.eup %4469  ;;  %v395_v35 = vpop.f32.mrf.mxu3 }
  0xbd   :  { %363 = vrot.lane.b32.xlu0 %v4470_v15, %s5097_s20  ;;  %v359_v16 = vmul.f32 0.5, %v4470_v15  ;;  %v5339_v15 = vld [vmem:[#allocation8 + $0x20] sm:$0xff]  ;;  %644 = vmatpush.msrb.mxu2 %v5232_v6 }
  0xbe   :  { %534 = vmatpush.msra.mxu3 %v5339_v15 }
  0xbf   :  { %v360_v17 = vadd.f32 0.5, %v359_v16  ;;  %645 = vmatpush.msrb.mxu2 %v5235_v8 }
  0xc1   :  { %v361_v20 = vmul.f32 0.0, %v360_v17  ;;  %783 = vmatpush.msra.mxu2 %v5319_v4 }
  0xc3   :  { %784 = vmatpush.msra.mxu2 %v5325_v7 }
  0xc5   :  { %785 = vmatpush.msra.mxu2 %v5332_v12 }
  0xc7   :  { %786 = vmatpush.msra.mxu2 %v5339_v15 }
 0x12f   :  { %v364_v18 = vpop.permute.xlu0 %363 }
 0x130   :  { %v366_v19 = vmul.f32 %v364_v18, %v360_v17 }
 0x132   :  { %368 = vrot.lane.b32.xlu0 %v366_v19, %s5098_s21 }
 0x1a4   :  { %v369_v21 = vpop.permute.xlu0 %368 }
 0x1a5   :  { %v5256_v22 = vadd.f32 %v369_v21, %v361_v20  ;;  %v5364_v21 = vpop.f32.mrf.mxu0 }
 0x1a7   :  { %4471 = vtanh.f32 %v5256_v22  ;;  %v475_v56 = vrot.slane %v5256_v22, 6  ;;  %v511_v22 = vpop.f32.mrf.mxu2 }
 0x1ad   :  { %v4472_v23 = vpop.eup %4471 }
 0x1ae   :  { %374 = vrot.lane.b32.xlu1 %v4472_v23, %s5097_s20  ;;  %v5369_v23 = vld [vmem:[%s6531_s5 + $0x2] ss:$0 sm:$0xff] }
 0x220   :  { %v375_v32 = vpop.permute.xlu1 %374 }
 0x221   :  { %v377_v33 = vmul.f32 %v375_v32, %v360_v17 }
 0x223   :  { %399 = vrot.lane.b32.xlu1 %v377_v33, %s5098_s21 }
 0x295   :  { %v400_v34 = vpop.permute.xlu1 %399 }
 0x296   :  { %4342 = vmatmul.msk.f32.vlgmr.msrb.gmra.mxu3 %vm304_vm0, %v400_v34  ;;  %4343 = vmatmul.msk.f32.vlgmr.msrb.gmra.mxu1 %vm304_vm0, %v400_v34 }
 0x297   :  { %758 = vmatpush.msrb.mxu1 %v5317_v1 }
 0x299   :  { %759 = vmatpush.msrb.mxu1 %v5323_v5 }
 0x29b   :  { %760 = vmatpush.msrb.mxu1 %v5328_v11 }
 0x29d   :  { %761 = vmatpush.msrb.mxu1 %v5335_v14 }
 0x313   :  { %v464_v39 = vpop.f32.mrf.mxu1 }
 0x314   :  { %v468_v41 = vrot.slane %v464_v39, 6 }
 0x316   :  { %v470_v42 = vadd.f32 %v468_v41, %v5251_v13 }
 0x319   :  { %v420_v37 = vpop.f32.mrf.mxu3 }
 0x31a   :  { %v421_v38 = vadd.f32 %v420_v37, %v395_v35 }
 0x31c   :  { %v426_v40 = vadd.f32 %v5299_v36, %v421_v38 }
 0x31e   :  { %4473 = vtanh.f32 %v426_v40 }
 0x31f   :  { %4475 = vtanh.f32 %v470_v42 }
 0x324   :  { %v4474_v43 = vpop.eup %4473 }
 0x325   :  { %432 = vrot.lane.b32.xlu2 %v4474_v43, %s5097_s20  ;;  %v4476_v44 = vpop.eup %4475  ;;  %v428_v45 = vmul.f32 0.5, %v4474_v43 }
 0x326   :  { %v472_v49 = vmul.f32 0.5, %v4476_v44 }
 0x327   :  { %v429_v46 = vadd.f32 0.5, %v428_v45 }
 0x328   :  { %v473_v50 = vadd.f32 0.5, %v472_v49 }
 0x329   :  { %v430_v53 = vmul.f32 0.0, %v429_v46 }
 0x32a   :  { %v477_v57 = vmul.f32 %v475_v56, %v473_v50 }
 0x32d   :  { %479 = vrot.lane.b32.xlu2 %v4476_v44, %s5097_s20 }
 0x37f   :  { %v433_v47 = vpop.permute.xlu2 %432 }
 0x380   :  { %v435_v48 = vmul.f32 %v433_v47, %v429_v46 }
 0x382   :  { %437 = vrot.lane.b32.xlu0 %v435_v48, %s5098_s21 }
 0x387   :  { %v480_v51 = vpop.permute.xlu2 %479 }
 0x388   :  { %v482_v52 = vmul.f32 %v480_v51, %v473_v50 }
 0x38a   :  { %484 = vrot.lane.b32.xlu1 %v482_v52, %s5098_s21 }
 0x3f4   :  { %v438_v54 = vpop.permute.xlu0 %437 }
 0x3f5   :  { %v5307_v55 = vadd.f32 %v438_v54, %v430_v53 }
 0x3f7   :  { %4477 = vtanh.f32 %v5307_v55 }
 0x3fc   :  { %v485_v58 = vpop.permute.xlu1 %484 }
 0x3fd   :  { %v4478_v59 = vpop.eup %4477  ;;  %v5311_v60 = vadd.f32 %v485_v58, %v477_v57 }
 0x3fe   :  { %443 = vrot.lane.b32.xlu2 %v4478_v59, %s5097_s20 }
 0x3ff   :  { %4479 = vtanh.f32 %v5311_v60  ;;  %v658_v59 = vrot.slane %v5311_v60, 6 }
 0x405   :  { %v4480_v61 = vpop.eup %4479 }
 0x406   :  { %490 = vrot.lane.b32.xlu0 %v4480_v61, %s5097_s20 }
 0x458   :  { %v444_v62 = vpop.permute.xlu2 %443 }
 0x459   :  { %v446_v63 = vmul.f32 %v444_v62, %v429_v46 }
 0x45b   :  { %515 = vrot.lane.b32.xlu1 %v446_v63, %s5098_s21 }
 0x478   :  { %v491_v16 = vpop.permute.xlu0 %490 }
 0x479   :  { %v493_v17 = vmul.f32 %v491_v16, %v473_v50 }
 0x47b   :  { %v584_v18 = vrot.slane %v493_v17, 2 }
 0x47d   :  { %585 = vrot.lane.b32.xlu2 %v584_v18, %s5098_s21 }
 0x4cd   :  { %v516_v19 = vpop.permute.xlu1 %515 }
 0x4ce   :  { %4344 = vmatmul.msk.f32.vlgmr.msra.gmra.mxu3 %vm304_vm0, %v516_v19  ;;  %4345 = vmatmul.msk.f32.vlgmr.msrb.gmra.mxu0 %vm304_vm0, %v516_v19 }
 0x4d7   :  { %v586_v20 = vpop.permute.xlu2 %585 }
 0x4d8   :  { %4346 = vmatmul.msk.f32.vlgmr.msra.gmra.mxu1 %vm304_vm0, %v586_v20  ;;  %4347 = vmatmul.msk.f32.vlgmr.msrb.gmra.mxu2 %vm304_vm0, %v586_v20 }
 0x4d9   :  { %891 = vmatpush.msra.mxu1 %v5227_v2 }
 0x4db   :  { %892 = vmatpush.msra.mxu1 %v5230_v3 }
 0x4dd   :  { %893 = vmatpush.msra.mxu1 %v5232_v6 }
 0x4df   :  { %894 = vmatpush.msra.mxu1 %v5235_v8 }
 0x54b   :  { %v580_v35 = vpop.f32.mrf.mxu0 }
 0x551   :  { %v536_v32 = vpop.f32.mrf.mxu3 }
 0x552   :  { %v537_v33 = vadd.f32 %v536_v32, %v511_v22 }
 0x554   :  { %v542_v34 = vadd.f32 %v5369_v23, %v537_v33 }
 0x555   :  { %v606_v37 = vpop.f32.mrf.mxu1 }
 0x556   :  { %4481 = vtanh.f32 %v542_v34  ;;  %v607_v38 = vadd.f32 %v606_v37, %v580_v35 }
 0x558   :  { %v609_v39 = vadd.f32 %v5299_v36, %v607_v38 }
 0x55a   :  { %4483 = vtanh.f32 %v609_v39  ;;  %v5395_v39 = vld [vmem:[#allocation10 + $0x58] sm:$0xff] }
 0x55b   :  { %v647_v40 = vpop.f32.mrf.mxu2  ;;  %689 = vmatpush.msrb.mxu3 %v5395_v39  ;;  %943 = vmatpush.msrb.mxu2 %v5395_v39 }
 0x55c   :  { %v4482_v41 = vpop.eup %4481  ;;  %v651_v42 = vrot.slane %v647_v40, 4  ;;  %v5400_v40 = vld [vmem:[#allocation8 + $0x58] sm:$0xff] }
 0x55d   :  { %548 = vrot.lane.b32.xlu0 %v4482_v41, %s5097_s20  ;;  %v544_v50 = vmul.f32 0.5, %v4482_v41  ;;  %v5402_v41 = vld [vmem:[#allocation8 + $0x50] sm:$0xff]  ;;  %714 = vmatpush.msra.mxu0 %v5400_v40 }
 0x55e   :  { %v653_v43 = vadd.f32 %v651_v42, %v5251_v13  ;;  %v5406_v42 = vld [vmem:[#allocation10 + $0x48] sm:$0xff] }
 0x55f   :  { %v545_v51 = vadd.f32 0.5, %v544_v50  ;;  %715 = vmatpush.msra.mxu0 %v5402_v41 }
 0x560   :  { %v4484_v44 = vpop.eup %4483  ;;  %4485 = vtanh.f32 %v653_v43 }
 0x561   :  { %615 = vrot.lane.b32.xlu1 %v4484_v44, %s5097_s20  ;;  %v611_v52 = vmul.f32 0.5, %v4484_v44  ;;  %v546_v16 = vmul.f32 0.0, %v545_v51  ;;  %v5410_v44 = vld [vmem:[#allocation8 + $0x48] sm:$0xff] }
 0x562   :  { %716 = vmatpush.msra.mxu0 %v5410_v44 }
 0x563   :  { %v612_v56 = vadd.f32 0.5, %v611_v52 }
 0x565   :  { %v613_v19 = vmul.f32 %v612_v56, %v5307_v55  ;;  %v5397_v55 = vld [vmem:[#allocation10 + $0x50] sm:$0xff] }
 0x566   :  { %v4486_v45 = vpop.eup %4485  ;;  %690 = vmatpush.msrb.mxu3 %v5397_v55  ;;  %944 = vmatpush.msrb.mxu2 %v5397_v55 }
 0x567   :  { %662 = vrot.lane.b32.xlu2 %v4486_v45, %s5097_s20  ;;  %v655_v46 = vmul.f32 0.5, %v4486_v45 }
 0x568   :  { %691 = vmatpush.msrb.mxu3 %v5406_v42  ;;  %945 = vmatpush.msrb.mxu2 %v5406_v42 }
 0x569   :  { %v656_v47 = vadd.f32 0.5, %v655_v46  ;;  %v5413_v46 = vld [vmem:[#allocation10 + $0x40] sm:$0xff] }
 0x56a   :  { %692 = vmatpush.msrb.mxu3 %v5413_v46  ;;  %946 = vmatpush.msrb.mxu2 %v5413_v46 }
 0x56b   :  { %v660_v61 = vmul.f32 %v658_v59, %v656_v47  ;;  %693 = vmatmul.f32.vlgmr.msrb.gmra.mxu3 %v5096_v9 }
 0x56c   :  { %824 = vmatpush.msra.mxu3 %v5260_v24 }
 0x56e   :  { %825 = vmatpush.msra.mxu3 %v5262_v25 }
 0x570   :  { %826 = vmatpush.msra.mxu3 %v5268_v27 }
 0x572   :  { %827 = vmatpush.msra.mxu3 %v5275_v29 }
 0x574   :  { %968 = vmatpush.msrb.mxu3 %v5400_v40 }
 0x576   :  { %969 = vmatpush.msrb.mxu3 %v5402_v41 }
 0x578   :  { %970 = vmatpush.msrb.mxu3 %v5410_v44 }
 0x5c1   :  { %v663_v48 = vpop.permute.xlu2 %662 }
 0x5c2   :  { %v665_v49 = vmul.f32 %v663_v48, %v656_v47 }
 0x5c4   :  { %667 = vrot.lane.b32.xlu2 %v665_v49, %s5098_s21 }
 0x5cf   :  { %v549_v53 = vpop.permute.xlu0 %548 }
 0x5d0   :  { %v551_v54 = vmul.f32 %v549_v53, %v545_v51 }
 0x5d2   :  { %553 = vrot.lane.b32.xlu0 %v551_v54, %s5098_s21 }
 0x5d3   :  { %v616_v57 = vpop.permute.xlu1 %615 }
 0x5d4   :  { %v618_v58 = vmul.f32 %v616_v57, %v612_v56 }
 0x5d6   :  { %620 = vrot.lane.b32.xlu1 %v618_v58, %s5098_s21 }
 0x5ee   :  { %v694_v50 = vpop.f32.mrf.mxu3 }
 0x61e   :  { %v668_v62 = vpop.permute.xlu2 %667 }
 0x61f   :  { %v5381_v63 = vadd.f32 %v668_v62, %v660_v61 }
 0x621   :  { %4487 = vtanh.f32 %v5381_v63 }
 0x627   :  { %v4488_v0 = vpop.eup %4487 }
 0x628   :  { %673 = vrot.lane.b32.xlu2 %v4488_v0, %s5097_s20 }
 0x644   :  { %v554_v17 = vpop.permute.xlu0 %553 }
 0x645   :  { %v5385_v18 = vadd.f32 %v554_v17, %v546_v16 }
 0x647   :  { %4489 = vtanh.f32 %v5385_v18 }
 0x648   :  { %v621_v20 = vpop.permute.xlu1 %620 }
 0x649   :  { %v5389_v22 = vadd.f32 %v621_v20, %v613_v19 }
 0x64b   :  { %4491 = vtanh.f32 %v5389_v22 }
 0x64d   :  { %v4490_v60 = vpop.eup %4489 }
 0x64e   :  { %559 = vrot.lane.b32.xlu0 %v4490_v60, %s5097_s20 }
 0x651   :  { %v4492_v32 = vpop.eup %4491 }
 0x652   :  { %626 = vrot.lane.b32.xlu1 %v4492_v32, %s5097_s20 }
 0x682   :  { %v674_v33 = vpop.permute.xlu2 %673 }
 0x683   :  { %v676_v34 = vmul.f32 %v674_v33, %v656_v47  ;;  %v5417_v47 = vld [vmem:[#allocation8 + $0x40] sm:$0xff] }
 0x684   :  { %717 = vmatpush.msra.mxu0 %v5417_v47  ;;  %971 = vmatpush.msrb.mxu3 %v5417_v47 }
 0x685   :  { %v833_v35 = vrot.slane %v676_v34, 4 }
 0x686   :  { %850 = vmatpush.msrb.mxu0 %v5265_v26 }
 0x687   :  { %834 = vrot.lane.b32.xlu2 %v833_v35, %s5098_s21 }
 0x688   :  { %851 = vmatpush.msrb.mxu0 %v5272_v28 }
 0x68a   :  { %852 = vmatpush.msrb.mxu0 %v5279_v30 }
 0x68c   :  { %853 = vmatpush.msrb.mxu0 %v5284_v31 }
 0x6c0   :  { %v560_v37 = vpop.permute.xlu0 %559 }
 0x6c1   :  { %v562_v38 = vmul.f32 %v560_v37, %v545_v51  ;;  %v5471_v51 = vld [vmem:[%s6531_s5 + $0x3] ss:$0 sm:$0xff] }
 0x6c3   :  { %698 = vrot.lane.b32.xlu0 %v562_v38, %s5098_s21 }
 0x6c4   :  { %v627_v43 = vpop.permute.xlu1 %626 }
 0x6c5   :  { %v629_v45 = vmul.f32 %v627_v43, %v612_v56 }
 0x6c7   :  { %767 = vrot.lane.b32.xlu1 %v629_v45, %s5098_s21 }
 0x6e1   :  { %v835_v49 = vpop.permute.xlu2 %834 }
 0x735   :  { %v699_v9 = vpop.permute.xlu0 %698 }
 0x736   :  { %4348 = vmatmul.msk.f32.vlgmr.msra.gmra.mxu0 %vm304_vm0, %v699_v9  ;;  %4349 = vmatmul.msk.f32.vlgmr.msrb.gmra.mxu1 %vm304_vm0, %v699_v9 }
 0x737   :  { %1034 = vmatpush.msrb.mxu1 %v5319_v4  ;;  %1009 = vmatpush.msra.mxu0 %v5317_v1 }
 0x739   :  { %v768_v48 = vpop.permute.xlu1 %767  ;;  %1035 = vmatpush.msrb.mxu1 %v5325_v7  ;;  %1010 = vmatpush.msra.mxu0 %v5323_v5 }
 0x73a   :  { %4350 = vmatmul.msk.f32.vlgmr.msra.gmra.mxu2 %vm304_vm0, %v768_v48  ;;  %4351 = vmatmul.msk.f32.vlgmr.msra.gmra.mxu3 %vm304_vm0, %v768_v48 }
 0x73b   :  { %1036 = vmatpush.msrb.mxu1 %v5332_v12  ;;  %1075 = vmatpush.msra.mxu2 %v5260_v24 }
 0x73c   :  { %1011 = vmatpush.msra.mxu0 %v5328_v11  ;;  %1101 = vmatpush.msra.mxu3 %v5265_v26 }
 0x73d   :  { %1037 = vmatpush.msrb.mxu1 %v5339_v15  ;;  %1076 = vmatpush.msra.mxu2 %v5262_v25 }
 0x73e   :  { %4352 = vmatmul.msk.f32.vlgmr.msrb.gmra.mxu0 %vm304_vm0, %v835_v49  ;;  %4353 = vmatmul.msk.f32.vlgmr.msra.gmra.mxu1 %vm304_vm0, %v835_v49 }
 0x73f   :  { %1077 = vmatpush.msra.mxu2 %v5268_v27  ;;  %1012 = vmatpush.msra.mxu0 %v5335_v14 }
 0x740   :  { %1102 = vmatpush.msra.mxu3 %v5272_v28  ;;  %1191 = vmatpush.msra.mxu1 %v5395_v39 }
 0x741   :  { %1142 = vmatpush.msrb.mxu0 %v5227_v2  ;;  %1078 = vmatpush.msra.mxu2 %v5275_v29 }
 0x742   :  { %1103 = vmatpush.msra.mxu3 %v5279_v30  ;;  %1192 = vmatpush.msra.mxu1 %v5397_v55 }
 0x743   :  { %1143 = vmatpush.msrb.mxu0 %v5230_v3 }
 0x744   :  { %1104 = vmatpush.msra.mxu3 %v5284_v31  ;;  %1193 = vmatpush.msra.mxu1 %v5406_v42 }
 0x745   :  { %1144 = vmatpush.msrb.mxu0 %v5232_v6 }
 0x746   :  { %1194 = vmatpush.msra.mxu1 %v5413_v46 }
 0x747   :  { %1145 = vmatpush.msrb.mxu0 %v5235_v8 }
 0x7b3   :  { %v719_v52 = vpop.f32.mrf.mxu0  ;;  %v763_v53 = vpop.f32.mrf.mxu1 }
 0x7b4   :  { %v720_v54 = vadd.f32 %v719_v52, %v694_v50 }
 0x7b6   :  { %v725_v56 = vadd.f32 %v5471_v51, %v720_v54 }
 0x7b8   :  { %4493 = vtanh.f32 %v725_v56 }
 0x7bb   :  { %v896_v57 = vpop.f32.mrf.mxu1  ;;  %v855_v58 = vpop.f32.mrf.mxu0 }
 0x7bc   :  { %v900_v59 = vrot.slane %v896_v57, 2 }
 0x7bd   :  { %v788_v61 = vpop.f32.mrf.mxu2  ;;  %v829_v62 = vpop.f32.mrf.mxu3 }
 0x7be   :  { %v4494_v0 = vpop.eup %4493  ;;  %v902_v16 = vadd.f32 %v900_v59, %v5251_v13  ;;  %v789_v17 = vadd.f32 %v788_v61, %v763_v53  ;;  %v856_v19 = vadd.f32 %v855_v58, %v829_v62 }
 0x7bf   :  { %731 = vrot.lane.b32.xlu0 %v4494_v0, %s5097_s20  ;;  %v727_v43 = vmul.f32 0.5, %v4494_v0 }
 0x7c0   :  { %4495 = vtanh.f32 %v902_v16  ;;  %v791_v20 = vadd.f32 %v5369_v23, %v789_v17  ;;  %v858_v60 = vadd.f32 %v5299_v36, %v856_v19 }
 0x7c1   :  { %v728_v45 = vadd.f32 0.5, %v727_v43 }
 0x7c2   :  { %4497 = vtanh.f32 %v791_v20 }
 0x7c3   :  { %4499 = vtanh.f32 %v858_v60  ;;  %v729_v60 = vmul.f32 0.0, %v728_v45 }
 0x7c6   :  { %v4496_v32 = vpop.eup %4495 }
 0x7c7   :  { %911 = vrot.lane.b32.xlu0 %v4496_v32, %s5097_s20  ;;  %v904_v49 = vmul.f32 0.5, %v4496_v32 }
 0x7c8   :  { %v4498_v33 = vpop.eup %4497 }
 0x7c9   :  { %v4500_v34 = vpop.eup %4499  ;;  %797 = vrot.lane.b32.xlu1 %v4498_v33, %s5097_s20  ;;  %v793_v50 = vmul.f32 0.5, %v4498_v33  ;;  %v905_v52 = vadd.f32 0.5, %v904_v49 }
 0x7ca   :  { %864 = vrot.lane.b32.xlu2 %v4500_v34, %s5097_s20  ;;  %v860_v13 = vmul.f32 0.5, %v4500_v34 }
 0x7cb   :  { %v794_v56 = vadd.f32 0.5, %v793_v50 }
 0x7cc   :  { %v861_v35 = vadd.f32 0.5, %v860_v13 }
 0x7cd   :  { %v795_v59 = vmul.f32 %v794_v56, %v5385_v18 }
 0x7ce   :  { %v862_v61 = vmul.f32 %v861_v35, %v5389_v22  ;;  %v907_v22 = vrot.slane %v5381_v63, 6 }
 0x7d0   :  { %v909_v33 = vmul.f32 %v907_v22, %v905_v52 }
 0x824   :  { %v865_v37 = vpop.permute.xlu2 %864 }
 0x825   :  { %v867_v38 = vmul.f32 %v865_v37, %v861_v35 }
 0x827   :  { %869 = vrot.lane.b32.xlu0 %v867_v38, %s5098_s21 }
 0x831   :  { %v732_v9 = vpop.permute.xlu0 %731 }
 0x832   :  { %v734_v48 = vmul.f32 %v732_v9, %v728_v45 }
 0x834   :  { %736 = vrot.lane.b32.xlu1 %v734_v48, %s5098_s21 }
 0x839   :  { %v912_v53 = vpop.permute.xlu0 %911 }
 0x83a   :  { %v914_v54 = vmul.f32 %v912_v53, %v905_v52 }
 0x83b   :  { %v798_v57 = vpop.permute.xlu1 %797 }
 0x83c   :  { %v800_v58 = vmul.f32 %v798_v57, %v794_v56  ;;  %916 = vrot.lane.b32.xlu1 %v914_v54, %s5098_s21 }
 0x83e   :  { %802 = vrot.lane.b32.xlu2 %v800_v58, %s5098_s21 }
 0x898   :  { %v803_v62 = vpop.permute.xlu2 %802 }
 0x899   :  { %v870_v0 = vpop.permute.xlu0 %869  ;;  %v5487_v16 = vadd.f32 %v803_v62, %v795_v59 }
 0x89a   :  { %v5489_v17 = vadd.f32 %v870_v0, %v862_v61 }
 0x89b   :  { %4501 = vtanh.f32 %v5487_v16 }
 0x89c   :  { %4503 = vtanh.f32 %v5489_v17 }
 0x8a1   :  { %v4502_v19 = vpop.eup %4501 }
 0x8a2   :  { %v4504_v20 = vpop.eup %4503  ;;  %808 = vrot.lane.b32.xlu0 %v4502_v19, %s5097_s20 }
 0x8a3   :  { %875 = vrot.lane.b32.xlu1 %v4504_v20, %s5097_s20 }
 0x8a6   :  { %v737_v18 = vpop.permute.xlu1 %736 }
 0x8a7   :  { %v5495_v32 = vadd.f32 %v737_v18, %v729_v60 }
 0x8a9   :  { %4505 = vtanh.f32 %v5495_v32 }
 0x8ae   :  { %v917_v34 = vpop.permute.xlu1 %916 }
 0x8af   :  { %v4506_v13 = vpop.eup %4505  ;;  %v5499_v37 = vadd.f32 %v917_v34, %v909_v33 }
 0x8b0   :  { %742 = vrot.lane.b32.xlu2 %v4506_v13, %s5097_s20 }
 0x8b1   :  { %4507 = vtanh.f32 %v5499_v37 }
 0x8b7   :  { %v4508_v38 = vpop.eup %4507 }
 0x8b8   :  { %922 = vrot.lane.b32.xlu2 %v4508_v38, %s5097_s20 }
 0x90a   :  { %v743_v43 = vpop.permute.xlu2 %742 }
 0x90b   :  { %v745_v9 = vmul.f32 %v743_v43, %v728_v45 }
 0x90d   :  { %927 = vrot.lane.b32.xlu0 %v745_v9, %s5098_s21 }
 0x912   :  { %v923_v48 = vpop.permute.xlu2 %922 }
 0x913   :  { %v925_v49 = vmul.f32 %v923_v48, %v905_v52 }
 0x914   :  { %v809_v50 = vpop.permute.xlu0 %808 }
 0x915   :  { %v1084_v63 = vrot.slane %v925_v49, 6  ;;  %v876_v53 = vpop.permute.xlu1 %875  ;;  %v811_v54 = vmul.f32 %v809_v50, %v794_v56 }
 0x916   :  { %v878_v57 = vmul.f32 %v876_v53, %v861_v35 }
 0x917   :  { %1085 = vrot.lane.b32.xlu0 %v1084_v63, %s5098_s21  ;;  %952 = vrot.lane.b32.xlu1 %v811_v54, %s5098_s21 }
 0x918   :  { %1018 = vrot.lane.b32.xlu2 %v878_v57, %s5098_s21 }
 0x972   :  { %v1019_v58 = vpop.permute.xlu2 %1018 }
 0x973   :  { %4357 = vmatmul.msk.f32.vlgmr.msrb.gmra.mxu1 %vm304_vm0, %v1019_v58 }
 0x974   :  { %1323 = vmatpush.msrb.mxu1 %v5260_v24 }
 0x976   :  { %1324 = vmatpush.msrb.mxu1 %v5262_v25 }
 0x978   :  { %1325 = vmatpush.msrb.mxu1 %v5268_v27 }
 0x97a   :  { %1326 = vmatpush.msrb.mxu1 %v5275_v29 }
 0x97f   :  { %v928_v45 = vpop.permute.xlu0 %927 }
 0x980   :  { %4354 = vmatmul.msk.f32.vlgmr.msrb.gmra.mxu2 %vm304_vm0, %v928_v45 }
 0x981   :  { %1216 = vmatpush.msrb.mxu2 %v5400_v40 }
 0x983   :  { %1217 = vmatpush.msrb.mxu2 %v5402_v41 }
 0x985   :  { %1218 = vmatpush.msrb.mxu2 %v5410_v44 }
 0x987   :  { %1219 = vmatpush.msrb.mxu2 %v5417_v47 }
 0x988   :  { %4358 = vmatmul.msk.f32.vlgmr.msra.gmra.mxu2 %vm304_vm0, %v1019_v58 }
 0x989   :  { %v953_v35 = vpop.permute.xlu1 %952  ;;  %1348 = vmatpush.msra.mxu2 %v5265_v26  ;;  %v1086_v52 = vpop.permute.xlu0 %1085 }
 0x98a   :  { %4355 = vmatmul.msk.f32.vlgmr.msrb.gmra.mxu3 %vm304_vm0, %v953_v35  ;;  %4356 = vmatmul.msk.f32.vlgmr.msra.gmra.mxu0 %vm304_vm0, %v953_v35 }
 0x98b   :  { %1257 = vmatpush.msrb.mxu3 %v5317_v1  ;;  %1349 = vmatpush.msra.mxu2 %v5272_v28 }
 0x98c   :  { %1282 = vmatpush.msra.mxu0 %v5319_v4 }
 0x98d   :  { %1258 = vmatpush.msrb.mxu3 %v5323_v5  ;;  %1350 = vmatpush.msra.mxu2 %v5279_v30 }
 0x98e   :  { %1283 = vmatpush.msra.mxu0 %v5325_v7 }
 0x98f   :  { %1259 = vmatpush.msrb.mxu3 %v5328_v11  ;;  %1351 = vmatpush.msra.mxu2 %v5284_v31 }
 0x990   :  { %1284 = vmatpush.msra.mxu0 %v5332_v12 }
 0x991   :  { %1260 = vmatpush.msrb.mxu3 %v5335_v14 }
 0x992   :  { %4359 = vmatmul.msk.f32.vlgmr.msra.gmra.mxu3 %vm304_vm0, %v1086_v52  ;;  %4360 = vmatmul.msk.f32.vlgmr.msrb.gmra.mxu0 %vm304_vm0, %v1086_v52 }
 0x993   :  { %1389 = vmatpush.msra.mxu3 %v5227_v2  ;;  %1285 = vmatpush.msra.mxu0 %v5339_v15 }
 0x995   :  { %1441 = vmatpush.msrb.mxu0 %v5395_v39  ;;  %1390 = vmatpush.msra.mxu3 %v5230_v3  ;;  %v5546_v3 = vadd.f32 %v5248_v10, %v5364_v21 }
 0x997   :  { %1442 = vmatpush.msrb.mxu0 %v5397_v55  ;;  %1391 = vmatpush.msra.mxu3 %v5232_v6 }
 0x999   :  { %1443 = vmatpush.msrb.mxu0 %v5406_v42  ;;  %1392 = vmatpush.msra.mxu3 %v5235_v8 }
 0x99b   :  { %1444 = vmatpush.msrb.mxu0 %v5413_v46 }
 0x9f0   :  { %v1039_v56 = vpop.f32.mrf.mxu1 }
 0xa03   :  { %v948_v62 = vpop.f32.mrf.mxu2 }
 0xa07   :  { %v1014_v59 = vpop.f32.mrf.mxu0 }
 0xa08   :  { %v1040_v61 = vadd.f32 %v1039_v56, %v1014_v59 }
 0xa0a   :  { %v1042_v2 = vadd.f32 %v5369_v23, %v1040_v61 }
 0xa0b   :  { %v1080_v18 = vpop.f32.mrf.mxu2 }
 0xa0c   :  { %4509 = vtanh.f32 %v1042_v2 }
 0xa0d   :  { %v973_v0 = vpop.f32.mrf.mxu3 }
 0xa0e   :  { %v974_v19 = vadd.f32 %v973_v0, %v948_v62 }
 0xa0f   :  { %v1147_v6 = vpop.f32.mrf.mxu0 }
 0xa10   :  { %v976_v20 = vadd.f32 %v5471_v51, %v974_v19  ;;  %v1150_v8 = vadd.f32 %v1147_v6, %v5546_v3 }
 0xa12   :  { %v4510_v60 = vpop.eup %4509  ;;  %4511 = vtanh.f32 %v976_v20 }
 0xa13   :  { %4513 = vtanh.f32 %v1150_v8  ;;  %1048 = vrot.lane.b32.xlu1 %v4510_v60, %s5097_s20  ;;  %v1044_v49 = vmul.f32 0.5, %v4510_v60 }
 0xa15   :  { %v1106_v22 = vpop.f32.mrf.mxu3  ;;  %v1045_v50 = vadd.f32 0.5, %v1044_v49 }
 0xa16   :  { %v1107_v33 = vadd.f32 %v1106_v22, %v1080_v18 }
 0xa17   :  { %v1046_v61 = vmul.f32 %v1045_v50, %v5487_v16 }
 0xa18   :  { %v4512_v34 = vpop.eup %4511  ;;  %v1109_v13 = vadd.f32 %v5299_v36, %v1107_v33 }
 0xa19   :  { %v4514_v38 = vpop.eup %4513  ;;  %982 = vrot.lane.b32.xlu2 %v4512_v34, %s5097_s20  ;;  %v978_v21 = vmul.f32 0.5, %v4512_v34 }
 0xa1a   :  { %4515 = vtanh.f32 %v1109_v13  ;;  %1159 = vrot.lane.b32.xlu0 %v4514_v38, %s5097_s20  ;;  %v1152_v54 = vmul.f32 0.5, %v4514_v38 }
 0xa1b   :  { %v979_v43 = vadd.f32 0.5, %v978_v21 }
 0xa1c   :  { %v1153_v57 = vadd.f32 0.5, %v1152_v54  ;;  %v5604_v54 = vld [vmem:[#allocation7 + $0x10] sm:$0xff] }
 0xa1d   :  { %v980_v0 = vmul.f32 %v979_v43, %v5495_v32  ;;  %v1155_v32 = vrot.slane %v5499_v37, 6 }
 0xa1f   :  { %v1157_v33 = vmul.f32 %v1155_v32, %v1153_v57 }
 0xa20   :  { %v4516_v10 = vpop.eup %4515 }
 0xa21   :  { %1115 = vrot.lane.b32.xlu1 %v4516_v10, %s5097_s20  ;;  %v1111_v35 = vmul.f32 0.5, %v4516_v10 }
 0xa23   :  { %v1112_v52 = vadd.f32 0.5, %v1111_v35 }
 0xa25   :  { %v1113_v8 = vmul.f32 %v1112_v52, %v5489_v17 }
 0xa73   :  { %v983_v9 = vpop.permute.xlu2 %982 }
 0xa74   :  { %v985_v48 = vmul.f32 %v983_v9, %v979_v43 }
 0xa76   :  { %987 = vrot.lane.b32.xlu0 %v985_v48, %s5098_s21 }
 0xa85   :  { %v1049_v63 = vpop.permute.xlu1 %1048 }
 0xa86   :  { %v1051_v53 = vmul.f32 %v1049_v63, %v1045_v50 }
 0xa88   :  { %1053 = vrot.lane.b32.xlu2 %v1051_v53, %s5098_s21 }
 0xa8c   :  { %v1160_v58 = vpop.permute.xlu0 %1159 }
 0xa8d   :  { %v1162_v45 = vmul.f32 %v1160_v58, %v1153_v57  ;;  %v5608_v58 = vld [vmem:[#allocation7 + $0x8] sm:$0xff] }
 0xa8f   :  { %1164 = vrot.lane.b32.xlu1 %v1162_v45, %s5098_s21  ;;  %v5615_v45 = vld [vmem:[#allocation7] sm:$0xff] }
 0xa93   :  { %v1116_v56 = vpop.permute.xlu1 %1115 }
 0xa94   :  { %v1118_v59 = vmul.f32 %v1116_v56, %v1112_v52 }
 0xa96   :  { %1120 = vrot.lane.b32.xlu2 %v1118_v59, %s5098_s21 }
 0xae2   :  { %v1054_v2 = vpop.permute.xlu2 %1053 }
 0xae3   :  { %v5560_v62 = vadd.f32 %v1054_v2, %v1046_v61 }
 0xae5   :  { %4517 = vtanh.f32 %v5560_v62 }
 0xae8   :  { %v988_v19 = vpop.permute.xlu0 %987 }
 0xae9   :  { %v5564_v6 = vadd.f32 %v988_v19, %v980_v0 }
 0xaeb   :  { %v4518_v20 = vpop.eup %4517  ;;  %4519 = vtanh.f32 %v5564_v6 }
 0xaec   :  { %1059 = vrot.lane.b32.xlu0 %v4518_v20, %s5097_s20 }
 0xaf0   :  { %v1121_v60 = vpop.permute.xlu2 %1120 }
 0xaf1   :  { %v4520_v18 = vpop.eup %4519  ;;  %v5569_v16 = vadd.f32 %v1121_v60, %v1113_v8 }
 0xaf2   :  { %993 = vrot.lane.b32.xlu1 %v4520_v18, %s5097_s20 }
 0xaf3   :  { %4521 = vtanh.f32 %v5569_v16 }
 0xaf9   :  { %v4522_v22 = vpop.eup %4521 }
 0xafa   :  { %1126 = vrot.lane.b32.xlu0 %v4522_v22, %s5097_s20 }
 0xb01   :  { %v1165_v34 = vpop.permute.xlu1 %1164 }
 0xb02   :  { %v5575_v13 = vadd.f32 %v1165_v34, %v1157_v33 }
 0xb04   :  { %4523 = vtanh.f32 %v5575_v13 }
 0xb0a   :  { %v4524_v17 = vpop.eup %4523 }
 0xb0b   :  { %1170 = vrot.lane.b32.xlu2 %v4524_v17, %s5097_s20 }
 0xb5e   :  { %v1060_v38 = vpop.permute.xlu0 %1059 }
 0xb5f   :  { %v1062_v10 = vmul.f32 %v1060_v38, %v1045_v50 }
 0xb61   :  { %1200 = vrot.lane.b32.xlu1 %v1062_v10, %s5098_s21 }
 0xb64   :  { %v994_v21 = vpop.permute.xlu1 %993 }
 0xb65   :  { %v996_v9 = vmul.f32 %v994_v21, %v979_v43  ;;  %v1171_v48 = vpop.permute.xlu2 %1170 }
 0xb66   :  { %v1173_v49 = vmul.f32 %v1171_v48, %v1153_v57 }
 0xb67   :  { %1175 = vrot.lane.b32.xlu2 %v996_v9, %s5098_s21 }
 0xb68   :  { %1332 = vrot.lane.b32.xlu0 %v1173_v49, %s5098_s21 }
 0xb6c   :  { %v1127_v37 = vpop.permute.xlu0 %1126 }
 0xb6d   :  { %v1129_v63 = vmul.f32 %v1127_v37, %v1112_v52 }
 0xb6f   :  { %1266 = vrot.lane.b32.xlu1 %v1129_v63, %s5098_s21 }
 0xbc1   :  { %v1176_v53 = vpop.permute.xlu2 %1175 }
 0xbc2   :  { %4361 = vmatmul.msk.f32.vlgmr.msra.gmra.mxu1 %vm304_vm0, %v1176_v53 }
 0xbc3   :  { %1466 = vmatpush.msra.mxu1 %v5400_v40 }
 0xbc5   :  { %1467 = vmatpush.msra.mxu1 %v5402_v41 }
 0xbc7   :  { %1468 = vmatpush.msra.mxu1 %v5410_v44 }
 0xbc9   :  { %1469 = vmatpush.msra.mxu1 %v5417_v47 }
 0xbd3   :  { %v1201_v43 = vpop.permute.xlu1 %1200 }
 0xbd4   :  { %4362 = vmatmul.msk.f32.vlgmr.msrb.gmra.mxu2 %vm304_vm0, %v1201_v43  ;;  %4363 = vmatmul.msk.f32.vlgmr.msrb.gmra.mxu3 %vm304_vm0, %v1201_v43 }
 0xbd5   :  { %1507 = vmatpush.msrb.mxu2 %v5317_v1  ;;  %1532 = vmatpush.msrb.mxu3 %v5319_v4  ;;  %v5600_v1 = vld [vmem:[#allocation7 + $0x18] sm:$0xff] }
 0xbd7   :  { %1508 = vmatpush.msrb.mxu2 %v5323_v5  ;;  %1533 = vmatpush.msrb.mxu3 %v5325_v7 }
 0xbd9   :  { %1509 = vmatpush.msrb.mxu2 %v5328_v11  ;;  %1534 = vmatpush.msrb.mxu3 %v5332_v12 }
 0xbda   :  { %v1333_v50 = vpop.permute.xlu0 %1332 }
 0xbdb   :  { %1510 = vmatpush.msrb.mxu2 %v5335_v14  ;;  %1535 = vmatpush.msrb.mxu3 %v5339_v15 }
 0xbdc   :  { %4366 = vmatmul.msk.f32.vlgmr.msra.gmra.mxu2 %vm304_vm0, %v1333_v50  ;;  %4367 = vmatmul.msk.f32.vlgmr.msra.gmra.mxu3 %vm304_vm0, %v1333_v50 }
 0xbdd   :  { %1640 = vmatpush.msra.mxu2 %v5600_v1  ;;  %1692 = vmatpush.msra.mxu3 %v5395_v39 }
 0xbdf   :  { %1641 = vmatpush.msra.mxu2 %v5604_v54  ;;  %1693 = vmatpush.msra.mxu3 %v5397_v55 }
 0xbe1   :  { %v1267_v57 = vpop.permute.xlu1 %1266  ;;  %1642 = vmatpush.msra.mxu2 %v5608_v58  ;;  %1694 = vmatpush.msra.mxu3 %v5406_v42 }
 0xbe2   :  { %4364 = vmatmul.msk.f32.vlgmr.msra.gmra.mxu0 %vm304_vm0, %v1267_v57  ;;  %4365 = vmatmul.msk.f32.vlgmr.msrb.gmra.mxu1 %vm304_vm0, %v1267_v57 }
 0xbe3   :  { %1599 = vmatpush.msrb.mxu1 %v5265_v26  ;;  %1643 = vmatpush.msra.mxu2 %v5615_v45 }
 0xbe4   :  { %1573 = vmatpush.msra.mxu0 %v5260_v24  ;;  %1695 = vmatpush.msra.mxu3 %v5413_v46 }
 0xbe5   :  { %1600 = vmatpush.msrb.mxu1 %v5272_v28 }
 0xbe6   :  { %1574 = vmatpush.msra.mxu0 %v5262_v25 }
 0xbe7   :  { %1601 = vmatpush.msrb.mxu1 %v5279_v30 }
 0xbe8   :  { %1575 = vmatpush.msra.mxu0 %v5268_v27 }
 0xbe9   :  { %1602 = vmatpush.msrb.mxu1 %v5284_v31 }
 0xbea   :  { %1576 = vmatpush.msra.mxu0 %v5275_v29 }
 0xc3f   :  { %v1196_v26 = vpop.f32.mrf.mxu1 }
 0xc57   :  { %v1221_v35 = vpop.f32.mrf.mxu2  ;;  %v1262_v52 = vpop.f32.mrf.mxu3 }
 0xc58   :  { %v1222_v56 = vadd.f32 %v1221_v35, %v1196_v26 }
 0xc5a   :  { %v1224_v24 = vadd.f32 %v5471_v51, %v1222_v56 }
 0xc5c   :  { %4525 = vtanh.f32 %v1224_v24 }
 0xc5f   :  { %v1287_v59 = vpop.f32.mrf.mxu0  ;;  %v1328_v61 = vpop.f32.mrf.mxu1 }
 0xc60   :  { %v1288_v28 = vadd.f32 %v1287_v59, %v1262_v52  ;;  %v1353_v2 = vpop.f32.mrf.mxu2  ;;  %v1394_v0 = vpop.f32.mrf.mxu3  ;;  %v1405_v52 = vrot.slane %v5575_v13, 6 }
 0xc61   :  { %v1354_v25 = vadd.f32 %v1353_v2, %v1328_v61  ;;  %v1398_v29 = vrot.slane %v1394_v0, 6 }
 0xc62   :  { %v4526_v30 = vpop.eup %4525  ;;  %v1290_v27 = vadd.f32 %v5369_v23, %v1288_v28 }
 0xc63   :  { %v1356_v31 = vadd.f32 %v5299_v36, %v1354_v25  ;;  %1230 = vrot.lane.b32.xlu0 %v4526_v30, %s5097_s20  ;;  %v1400_v19 = vadd.f32 %v1398_v29, %v5546_v3  ;;  %v1226_v38 = vmul.f32 0.5, %v4526_v30 }
 0xc64   :  { %4527 = vtanh.f32 %v1290_v27 }
 0xc65   :  { %4529 = vtanh.f32 %v1356_v31  ;;  %v1227_v10 = vadd.f32 0.5, %v1226_v38  ;;  %v5727_v38 = vld [vmem:[%s6531_s5 + $0x2] ss:$0 sm:$0xff] }
 0xc66   :  { %4531 = vtanh.f32 %v1400_v19 }
 0xc6a   :  { %v4528_v20 = vpop.eup %4527 }
 0xc6b   :  { %v4530_v8 = vpop.eup %4529  ;;  %1296 = vrot.lane.b32.xlu2 %v4528_v20, %s5097_s20  ;;  %v1292_v23 = vmul.f32 0.5, %v4528_v20 }
 0xc6c   :  { %1362 = vrot.lane.b32.xlu1 %v4530_v8, %s5097_s20  ;;  %v4532_v60 = vpop.eup %4531  ;;  %v1358_v48 = vmul.f32 0.5, %v4530_v8 }
 0xc6d   :  { %v1293_v18 = vadd.f32 0.5, %v1292_v23  ;;  %v1402_v32 = vmul.f32 0.5, %v4532_v60  ;;  %v5665_v23 = vld [vmem:[#allocation10 + $0x38] sm:$0xff] }
 0xc6e   :  { %v1359_v49 = vadd.f32 0.5, %v1358_v48 }
 0xc6f   :  { %v1403_v33 = vadd.f32 0.5, %v1402_v32  ;;  %v1294_v53 = vmul.f32 %v1293_v18, %v5560_v62 }
 0xc70   :  { %v1360_v43 = vmul.f32 %v1359_v49, %v5569_v16  ;;  %v1228_v16 = vmul.f32 %v1227_v10, %v5564_v6 }
 0xc71   :  { %v1407_v56 = vmul.f32 %v1405_v52, %v1403_v33 }
 0xc73   :  { %1409 = vrot.lane.b32.xlu2 %v4532_v60, %s5097_s20 }
 0xcc5   :  { %v1297_v36 = vpop.permute.xlu2 %1296 }
 0xcc6   :  { %v1299_v22 = vmul.f32 %v1297_v36, %v1293_v18 }
 0xcc8   :  { %1301 = vrot.lane.b32.xlu0 %v1299_v22, %s5098_s21 }
 0xccd   :  { %v1410_v34 = vpop.permute.xlu2 %1409 }
 0xcce   :  { %v1412_v17 = vmul.f32 %v1410_v34, %v1403_v33 }
 0xcd0   :  { %1414 = vrot.lane.b32.xlu0 %v1412_v17, %s5098_s21 }
 0xcd5   :  { %v1231_v21 = vpop.permute.xlu0 %1230 }
 0xcd6   :  { %v1233_v9 = vmul.f32 %v1231_v21, %v1227_v10 }
 0xcd8   :  { %1235 = vrot.lane.b32.xlu1 %v1233_v9, %s5098_s21 }
 0xcde   :  { %v1363_v37 = vpop.permute.xlu1 %1362 }
 0xcdf   :  { %v1365_v63 = vmul.f32 %v1363_v37, %v1359_v49 }
 0xce1   :  { %1367 = vrot.lane.b32.xlu2 %v1365_v63, %s5098_s21 }
 0xd3a   :  { %v1302_v50 = vpop.permute.xlu0 %1301 }
 0xd3b   :  { %v1368_v57 = vpop.permute.xlu2 %1367  ;;  %v5640_v26 = vadd.f32 %v1302_v50, %v1294_v53 }
 0xd3c   :  { %v5642_v35 = vadd.f32 %v1368_v57, %v1360_v43 }
 0xd3d   :  { %4533 = vtanh.f32 %v5640_v26 }
 0xd3e   :  { %4535 = vtanh.f32 %v5642_v35 }
 0xd42   :  { %v1415_v24 = vpop.permute.xlu0 %1414 }
 0xd43   :  { %v4534_v59 = vpop.eup %4533  ;;  %v5647_v61 = vadd.f32 %v1415_v24, %v1407_v56 }
 0xd44   :  { %v4536_v62 = vpop.eup %4535  ;;  %1307 = vrot.lane.b32.xlu1 %v4534_v59, %s5097_s20 }
 0xd45   :  { %4537 = vtanh.f32 %v5647_v61  ;;  %1373 = vrot.lane.b32.xlu0 %v4536_v62, %s5097_s20 }
 0xd4a   :  { %v1236_v28 = vpop.permute.xlu1 %1235 }
 0xd4b   :  { %v4538_v2 = vpop.eup %4537  ;;  %v5653_v25 = vadd.f32 %v1236_v28, %v1228_v16 }
 0xd4c   :  { %1420 = vrot.lane.b32.xlu1 %v4538_v2, %s5097_s20 }
 0xd4d   :  { %4539 = vtanh.f32 %v5653_v25 }
 0xd53   :  { %v4540_v13 = vpop.eup %4539 }
 0xd54   :  { %1241 = vrot.lane.b32.xlu2 %v4540_v13, %s5097_s20 }
 0xdae   :  { %v1242_v0 = vpop.permute.xlu2 %1241 }
 0xdaf   :  { %v1244_v30 = vmul.f32 %v1242_v0, %v1227_v10 }
 0xdb1   :  { %1425 = vrot.lane.b32.xlu0 %v1244_v30, %s5098_s21 }
 0xdb6   :  { %v1308_v27 = vpop.permute.xlu1 %1307 }
 0xdb7   :  { %v1310_v31 = vmul.f32 %v1308_v27, %v1293_v18  ;;  %v1374_v29 = vpop.permute.xlu0 %1373 }
 0xdb8   :  { %v1376_v19 = vmul.f32 %v1374_v29, %v1359_v49 }
 0xdb9   :  { %1450 = vrot.lane.b32.xlu2 %v1310_v31, %s5098_s21 }
 0xdba   :  { %1516 = vrot.lane.b32.xlu1 %v1376_v19, %s5098_s21 }
 0xdbe   :  { %v1421_v6 = vpop.permute.xlu1 %1420 }
 0xdbf   :  { %v1423_v20 = vmul.f32 %v1421_v6, %v1403_v33  ;;  %v5720_v33 = vld [vmem:[%s6531_s5 + $0x1] ss:$0 sm:$0xff] }
 0xdc1   :  { %v1582_v8 = vrot.slane %v1423_v20, 2 }
 0xdc3   :  { %1583 = vrot.lane.b32.xlu2 %v1582_v8, %s5098_s21 }
 0xe13   :  { %v1451_v60 = vpop.permute.xlu2 %1450 }
 0xe14   :  { %4369 = vmatmul.msk.f32.vlgmr.msra.gmra.mxu1 %vm304_vm0, %v1451_v60  ;;  %4370 = vmatmul.msk.f32.vlgmr.msrb.gmra.mxu2 %vm304_vm0, %v1451_v60 }
 0xe15   :  { %1783 = vmatpush.msrb.mxu2 %v5319_v4  ;;  %1758 = vmatpush.msra.mxu1 %v5665_v23 }
 0xe17   :  { %1784 = vmatpush.msrb.mxu2 %v5325_v7  ;;  %1759 = vmatpush.msra.mxu1 %v5323_v5  ;;  %v5691_v7 = vld [vmem:[#allocation10 + $0x18] sm:$0xff] }
 0xe19   :  { %1785 = vmatpush.msrb.mxu2 %v5332_v12  ;;  %1760 = vmatpush.msra.mxu1 %v5328_v11  ;;  %v5694_v11 = vld [vmem:[#allocation8 + $0x18] sm:$0xff]  ;;  %v5697_v12 = vld [vmem:[#allocation10 + $0x10] sm:$0xff] }
 0xe1b   :  { %1786 = vmatpush.msrb.mxu2 %v5339_v15  ;;  %1761 = vmatpush.msra.mxu1 %v5335_v14  ;;  %v5700_v14 = vld [vmem:[#allocation8 + $0x10] sm:$0xff]  ;;  %v5703_v15 = vld [vmem:[#allocation10 + $0x8] sm:$0xff] }
 0xe1d   :  { %v1584_v18 = vpop.permute.xlu2 %1583 }
 0xe1e   :  { %4373 = vmatmul.msk.f32.vlgmr.msrb.gmra.mxu1 %vm304_vm0, %v1584_v18  ;;  %4374 = vmatmul.msk.f32.vlgmr.msra.gmra.mxu2 %vm304_vm0, %v1584_v18 }
 0xe1f   :  { %1891 = vmatpush.msrb.mxu1 %v5600_v1  ;;  %1943 = vmatpush.msra.mxu2 %v5395_v39  ;;  %v5706_v39 = vld [vmem:[#allocation8 + $0x8] sm:$0xff] }
 0xe21   :  { %1892 = vmatpush.msrb.mxu1 %v5604_v54  ;;  %1944 = vmatpush.msra.mxu2 %v5397_v55  ;;  %v5709_v55 = vld [vmem:[#allocation10] sm:$0xff] }
 0xe23   :  { %v1426_v4 = vpop.permute.xlu0 %1425  ;;  %1893 = vmatpush.msrb.mxu1 %v5608_v58  ;;  %1945 = vmatpush.msra.mxu2 %v5406_v42 }
 0xe24   :  { %4368 = vmatmul.msk.f32.vlgmr.msrb.gmra.mxu0 %vm304_vm0, %v1426_v4 }
 0xe25   :  { %1717 = vmatpush.msrb.mxu0 %v5400_v40  ;;  %1894 = vmatpush.msrb.mxu1 %v5615_v45  ;;  %v5712_v40 = vld [vmem:[#allocation8] sm:$0xff] }
 0xe26   :  { %1946 = vmatpush.msra.mxu2 %v5413_v46 }
 0xe27   :  { %1718 = vmatpush.msrb.mxu0 %v5402_v41 }
 0xe29   :  { %1719 = vmatpush.msrb.mxu0 %v5410_v44 }
 0xe2b   :  { %1720 = vmatpush.msrb.mxu0 %v5417_v47 }
 0xe2c   :  { %v1517_v5 = vpop.permute.xlu1 %1516 }
 0xe2d   :  { %4371 = vmatmul.msk.f32.vlgmr.msrb.gmra.mxu3 %vm304_vm0, %v1517_v5  ;;  %4372 = vmatmul.msk.f32.vlgmr.msra.gmra.mxu0 %vm304_vm0, %v1517_v5 }
 0xe2e   :  { %1824 = vmatpush.msrb.mxu3 %v5691_v7  ;;  %1850 = vmatpush.msra.mxu0 %v5694_v11 }
 0xe30   :  { %1825 = vmatpush.msrb.mxu3 %v5697_v12  ;;  %1851 = vmatpush.msra.mxu0 %v5700_v14 }
 0xe32   :  { %1826 = vmatpush.msrb.mxu3 %v5703_v15  ;;  %1852 = vmatpush.msra.mxu0 %v5706_v39 }
 0xe34   :  { %1827 = vmatpush.msrb.mxu3 %v5709_v55  ;;  %1853 = vmatpush.msra.mxu0 %v5712_v40 }
 0xe91   :  { %v1471_v42 = vpop.f32.mrf.mxu1 }
 0xe97   :  { %v1512_v41 = vpop.f32.mrf.mxu2 }
 0xe9b   :  { %v1604_v58 = vpop.f32.mrf.mxu1 }
 0xea1   :  { %v1446_v44 = vpop.f32.mrf.mxu0  ;;  %v1645_v47 = vpop.f32.mrf.mxu2 }
 0xea2   :  { %v1472_v46 = vadd.f32 %v1471_v42, %v1446_v44  ;;  %v1649_v54 = vrot.slane %v1645_v47, 4 }
 0xea4   :  { %v1474_v1 = vadd.f32 %v5471_v51, %v1472_v46  ;;  %v1651_v45 = vadd.f32 %v1649_v54, %v5546_v3 }
 0xea6   :  { %4541 = vtanh.f32 %v1474_v1 }
 0xea7   :  { %4543 = vtanh.f32 %v1651_v45 }
 0xeaa   :  { %v1578_v36 = vpop.f32.mrf.mxu0 }
 0xeab   :  { %v1605_v22 = vadd.f32 %v1604_v58, %v1578_v36 }
 0xeac   :  { %v4542_v32 = vpop.eup %4541 }
 0xead   :  { %v1607_v34 = vadd.f32 %v5720_v33, %v1605_v22  ;;  %1480 = vrot.lane.b32.xlu0 %v4542_v32, %s5097_s20  ;;  %v4544_v21 = vpop.eup %4543  ;;  %v1476_v43 = vmul.f32 0.5, %v4542_v32  ;;  %v5767_v32 = vld [vmem:[#allocation8 + $0x58] sm:$0xff] }
 0xeae   :  { %v1653_v56 = vmul.f32 0.5, %v4544_v21 }
 0xeaf   :  { %4545 = vtanh.f32 %v1607_v34  ;;  %v1477_v50 = vadd.f32 0.5, %v1476_v43  ;;  %v5770_v34 = vld [vmem:[#allocation8 + $0x50] sm:$0xff] }
 0xeb0   :  { %v1537_v51 = vpop.f32.mrf.mxu3  ;;  %v1654_v24 = vadd.f32 0.5, %v1653_v56 }
 0xeb1   :  { %v1538_v17 = vadd.f32 %v1537_v51, %v1512_v41  ;;  %v1478_v20 = vmul.f32 %v1477_v50, %v5653_v25  ;;  %v5773_v51 = vld [vmem:[#allocation8 + $0x48] sm:$0xff] }
 0xeb3   :  { %v1540_v10 = vadd.f32 %v5727_v38, %v1538_v17 }
 0xeb5   :  { %v4546_v9 = vpop.eup %4545  ;;  %4547 = vtanh.f32 %v1540_v10  ;;  %1660 = vrot.lane.b32.xlu0 %v4544_v21, %s5097_s20  ;;  %v5802_v10 = vld [vmem:[#allocation8 + $0x20] sm:$0xff]  ;;  %v5811_v21 = vld [vmem:[#allocation10 + $0x58] sm:$0xff] }
 0xeb6   :  { %1613 = vrot.lane.b32.xlu2 %v4546_v9, %s5097_s20  ;;  %v1609_v49 = vmul.f32 0.5, %v4546_v9  ;;  %v5815_v9 = vld [vmem:[#allocation10 + $0x50] sm:$0xff] }
 0xeb8   :  { %v1610_v37 = vadd.f32 0.5, %v1609_v49  ;;  %v5823_v49 = vld [vmem:[#allocation10 + $0x40] sm:$0xff] }
 0xeba   :  { %v1611_v0 = vmul.f32 %v1610_v37, %v5642_v35 }
 0xebb   :  { %v4548_v48 = vpop.eup %4547 }
 0xebc   :  { %1546 = vrot.lane.b32.xlu1 %v4548_v48, %s5097_s20  ;;  %v1542_v16 = vmul.f32 0.5, %v4548_v48  ;;  %v5819_v48 = vld [vmem:[#allocation10 + $0x48] sm:$0xff] }
 0xebe   :  { %v1543_v28 = vadd.f32 0.5, %v1542_v16 }
 0xec0   :  { %v1544_v31 = vmul.f32 %v1543_v28, %v5640_v26  ;;  %v1656_v26 = vrot.slane %v5647_v61, 6 }
 0xec2   :  { %v1658_v18 = vmul.f32 %v1656_v26, %v1654_v24 }
 0xf10   :  { %v1614_v63 = vpop.permute.xlu2 %1613 }
 0xf11   :  { %v1616_v53 = vmul.f32 %v1614_v63, %v1610_v37 }
 0xf13   :  { %1618 = vrot.lane.b32.xlu0 %v1616_v53, %s5098_s21 }
 0xf1f   :  { %v1481_v57 = vpop.permute.xlu0 %1480 }
 0xf20   :  { %v1483_v52 = vmul.f32 %v1481_v57, %v1477_v50 }
 0xf22   :  { %1485 = vrot.lane.b32.xlu1 %v1483_v52, %s5098_s21 }
 0xf27   :  { %v1661_v59 = vpop.permute.xlu0 %1660 }
 0xf28   :  { %v1663_v62 = vmul.f32 %v1661_v59, %v1654_v24 }
 0xf2a   :  { %1665 = vrot.lane.b32.xlu1 %v1663_v62, %s5098_s21 }
 0xf2e   :  { %v1547_v2 = vpop.permute.xlu1 %1546 }
 0xf2f   :  { %v1549_v13 = vmul.f32 %v1547_v2, %v1543_v28 }
 0xf31   :  { %1551 = vrot.lane.b32.xlu2 %v1549_v13, %s5098_s21 }
 0xf85   :  { %v1619_v30 = vpop.permute.xlu0 %1618 }
 0xf86   :  { %v5738_v27 = vadd.f32 %v1619_v30, %v1611_v0 }
 0xf88   :  { %4549 = vtanh.f32 %v5738_v27 }
 0xf8b   :  { %v1552_v29 = vpop.permute.xlu2 %1551 }
 0xf8c   :  { %v5742_v19 = vadd.f32 %v1552_v29, %v1544_v31 }
 0xf8e   :  { %v4550_v6 = vpop.eup %4549  ;;  %4551 = vtanh.f32 %v5742_v19 }
 0xf8f   :  { %1624 = vrot.lane.b32.xlu1 %v4550_v6, %s5097_s20 }
 0xf94   :  { %v4552_v8 = vpop.eup %4551  ;;  %v1486_v60 = vpop.permute.xlu1 %1485 }
 0xf95   :  { %1557 = vrot.lane.b32.xlu0 %v4552_v8, %s5097_s20  ;;  %v5748_v35 = vadd.f32 %v1486_v60, %v1478_v20 }
 0xf97   :  { %4553 = vtanh.f32 %v5748_v35 }
 0xf9c   :  { %v1666_v4 = vpop.permute.xlu1 %1665 }
 0xf9d   :  { %v4554_v5 = vpop.eup %4553  ;;  %v5752_v41 = vadd.f32 %v1666_v4, %v1658_v18  ;;  %v5839_v18 = vld [vmem:[%s6531_s5 + $0x3] ss:$0 sm:$0xff] }
 0xf9e   :  { %1491 = vrot.lane.b32.xlu2 %v4554_v5, %s5097_s20 }
 0xf9f   :  { %4555 = vtanh.f32 %v5752_v41 }
 0xfa5   :  { %v4556_v25 = vpop.eup %4555 }
 0xfa6   :  { %1671 = vrot.lane.b32.xlu2 %v4556_v25, %s5097_s20 }
 0xff8   :  { %v1492_v42 = vpop.permute.xlu2 %1491 }
 0xff9   :  { %v1494_v44 = vmul.f32 %v1492_v42, %v1477_v50 }
 0xffb   :  { %1676 = vrot.lane.b32.xlu0 %v1494_v44, %s5098_s21 }
0x1000   :  { %v1672_v46 = vpop.permute.xlu2 %1671 }
0x1001   :  { %v1625_v47 = vpop.permute.xlu1 %1624  ;;  %v1674_v1 = vmul.f32 %v1672_v46, %v1654_v24 }
0x1002   :  { %v1627_v61 = vmul.f32 %v1625_v47, %v1610_v37 }
0x1003   :  { %v1833_v54 = vrot.slane %v1674_v1, 4 }
0x1004   :  { %1767 = vrot.lane.b32.xlu2 %v1627_v61, %s5098_s21 }
0x1005   :  { %1834 = vrot.lane.b32.xlu0 %v1833_v54, %s5098_s21 }
0x1007   :  { %v1558_v58 = vpop.permute.xlu0 %1557 }
0x1008   :  { %v1560_v45 = vmul.f32 %v1558_v58, %v1543_v28 }
0x100a   :  { %1701 = vrot.lane.b32.xlu1 %v1560_v45, %s5098_s21 }
0x105e   :  { %v1768_v36 = vpop.permute.xlu2 %1767 }
0x105f   :  { %4378 = vmatmul.msk.f32.vlgmr.msrb.gmra.mxu2 %vm304_vm0, %v1768_v36 }
0x1060   :  { %2075 = vmatpush.msrb.mxu2 %v5691_v7  ;;  %v5776_v7 = vld [vmem:[#allocation8 + $0x40] sm:$0xff] }
0x1062   :  { %2076 = vmatpush.msrb.mxu2 %v5697_v12 }
0x1064   :  { %2077 = vmatpush.msrb.mxu2 %v5703_v15  ;;  %v5785_v15 = vld [vmem:[#allocation8 + $0x38] sm:$0xff] }
0x1066   :  { %2078 = vmatpush.msrb.mxu2 %v5709_v55  ;;  %v5790_v55 = vld [vmem:[#allocation8 + $0x30] sm:$0xff] }
0x106d   :  { %v1677_v22 = vpop.permute.xlu0 %1676 }
0x106e   :  { %4375 = vmatmul.msk.f32.vlgmr.msra.gmra.mxu3 %vm304_vm0, %v1677_v22 }
0x106f   :  { %1968 = vmatpush.msra.mxu3 %v5767_v32 }
0x1071   :  { %1969 = vmatpush.msra.mxu3 %v5770_v34 }
0x1073   :  { %1970 = vmatpush.msra.mxu3 %v5773_v51 }
0x1075   :  { %1971 = vmatpush.msra.mxu3 %v5776_v7 }
0x1076   :  { %4379 = vmatmul.msk.f32.vlgmr.msrb.gmra.mxu3 %vm304_vm0, %v1768_v36 }
0x1077   :  { %2101 = vmatpush.msrb.mxu3 %v5694_v11  ;;  %v5793_v11 = vld [vmem:[#allocation10 + $0x30] sm:$0xff]  ;;  %v1835_v17 = vpop.permute.xlu0 %1834 }
0x1079   :  { %2102 = vmatpush.msrb.mxu3 %v5700_v14  ;;  %v5796_v14 = vld [vmem:[#allocation8 + $0x28] sm:$0xff] }
0x107b   :  { %2103 = vmatpush.msrb.mxu3 %v5706_v39  ;;  %v5799_v39 = vld [vmem:[#allocation10 + $0x28] sm:$0xff] }
0x107c   :  { %v1702_v12 = vpop.permute.xlu1 %1701 }
0x107d   :  { %4376 = vmatmul.msk.f32.vlgmr.msrb.gmra.mxu0 %vm304_vm0, %v1702_v12  ;;  %4377 = vmatmul.msk.f32.vlgmr.msra.gmra.mxu1 %vm304_vm0, %v1702_v12 }
0x107e   :  { %2034 = vmatpush.msra.mxu1 %v5785_v15  ;;  %2009 = vmatpush.msrb.mxu0 %v5665_v23 }
0x107f   :  { %2104 = vmatpush.msrb.mxu3 %v5712_v40  ;;  %v5805_v40 = vld [vmem:[#allocation10 + $0x20] sm:$0xff] }
0x1080   :  { %2035 = vmatpush.msra.mxu1 %v5790_v55  ;;  %2010 = vmatpush.msrb.mxu0 %v5793_v11 }
0x1082   :  { %2036 = vmatpush.msra.mxu1 %v5796_v14  ;;  %2011 = vmatpush.msrb.mxu0 %v5799_v39 }
0x1084   :  { %2037 = vmatpush.msra.mxu1 %v5802_v10  ;;  %2012 = vmatpush.msrb.mxu0 %v5805_v40 }
0x1085   :  { %4380 = vmatmul.msk.f32.vlgmr.msra.gmra.mxu0 %vm304_vm0, %v1835_v17  ;;  %4381 = vmatmul.msk.f32.vlgmr.msrb.gmra.mxu1 %vm304_vm0, %v1835_v17 }
0x1086   :  { %2172 = vmatpush.msrb.mxu1 %v5767_v32  ;;  %2147 = vmatpush.msra.mxu0 %v5811_v21 }
0x1088   :  { %2173 = vmatpush.msrb.mxu1 %v5770_v34  ;;  %2148 = vmatpush.msra.mxu0 %v5815_v9 }
0x108a   :  { %2174 = vmatpush.msrb.mxu1 %v5773_v51  ;;  %2149 = vmatpush.msra.mxu0 %v5819_v48 }
0x108c   :  { %2175 = vmatpush.msrb.mxu1 %v5776_v7  ;;  %2150 = vmatpush.msra.mxu0 %v5823_v49 }
0x10e2   :  { %v1788_v63 = vpop.f32.mrf.mxu2 }
0x10f1   :  { %v1697_v37 = vpop.f32.mrf.mxu3 }
0x10f9   :  { %v1829_v56 = vpop.f32.mrf.mxu3 }
0x10fa   :  { %v1722_v53 = vpop.f32.mrf.mxu0  ;;  %v1763_v43 = vpop.f32.mrf.mxu1 }
0x10fb   :  { %v1723_v50 = vadd.f32 %v1722_v53, %v1697_v37  ;;  %v1789_v57 = vadd.f32 %v1788_v63, %v1763_v43 }
0x10fd   :  { %v1791_v52 = vadd.f32 %v5727_v38, %v1789_v57  ;;  %v1725_v4 = vadd.f32 %v5839_v18, %v1723_v50 }
0x10ff   :  { %4557 = vtanh.f32 %v1791_v52 }
0x1102   :  { %v1855_v24 = vpop.f32.mrf.mxu0  ;;  %v1896_v47 = vpop.f32.mrf.mxu1 }
0x1103   :  { %v1856_v59 = vadd.f32 %v1855_v24, %v1829_v56  ;;  %v1900_v1 = vrot.slane %v1896_v47, 2 }
0x1105   :  { %v1858_v62 = vadd.f32 %v5720_v33, %v1856_v59  ;;  %v4558_v16 = vpop.eup %4557  ;;  %v1902_v61 = vadd.f32 %v1900_v1, %v5546_v3 }
0x1106   :  { %1797 = vrot.lane.b32.xlu1 %v4558_v16, %s5097_s20  ;;  %v1793_v31 = vmul.f32 0.5, %v4558_v16 }
0x1107   :  { %4559 = vtanh.f32 %v1858_v62 }
0x1108   :  { %v1794_v29 = vadd.f32 0.5, %v1793_v31 }
0x110a   :  { %v1795_v25 = vmul.f32 %v1794_v29, %v5742_v19 }
0x110d   :  { %v4560_v28 = vpop.eup %4559 }
0x110e   :  { %1864 = vrot.lane.b32.xlu2 %v4560_v28, %s5097_s20  ;;  %v1860_v2 = vmul.f32 0.5, %v4560_v28 }
0x1110   :  { %v1861_v13 = vadd.f32 0.5, %v1860_v2 }
0x1112   :  { %v1862_v8 = vmul.f32 %v1861_v13, %v5738_v27 }
0x1168   :  { %v1865_v0 = vpop.permute.xlu2 %1864 }
0x1169   :  { %v1867_v30 = vmul.f32 %v1865_v0, %v1861_v13 }
0x116b   :  { %1869 = vrot.lane.b32.xlu1 %v1867_v30, %s5098_s21 }
0x1178   :  { %v1798_v6 = vpop.permute.xlu1 %1797 }
0x1179   :  { %v1800_v20 = vmul.f32 %v1798_v6, %v1794_v29 }
0x117b   :  { %1802 = vrot.lane.b32.xlu0 %v1800_v20, %s5098_s21 }
0x11dd   :  { %v1870_v60 = vpop.permute.xlu1 %1869 }
0x11de   :  { %v5833_v26 = vadd.f32 %v1870_v60, %v1862_v8 }
0x11e0   :  { %4561 = vtanh.f32 %v5833_v26 }
0x11e1   :  { %4563 = vtanh.f32 %v1725_v4 }
0x11e6   :  { %v4562_v5 = vpop.eup %4561 }
0x11e7   :  { %1875 = vrot.lane.b32.xlu0 %v4562_v5, %s5097_s20  ;;  %v4564_v42 = vpop.eup %4563  ;;  %v262_v5 = vld [vmem:[#allocation13 + $0x18] sm:$0xff] }
0x11e8   :  { %v1727_v22 = vmul.f32 0.5, %v4564_v42 }
0x11ea   :  { %v1728_v12 = vadd.f32 0.5, %v1727_v22 }
0x11ed   :  { %v1803_v27 = vpop.permute.xlu0 %1802 }
0x11ee   :  { %v5844_v44 = vadd.f32 %v1803_v27, %v1795_v25  ;;  %v261_v25 = vld [vmem:[#allocation13 + $0x10] sm:$0xff]  ;;  %v259_v27 = vld [vmem:[#allocation13] sm:$0xff] }
0x11ef   :  { %1731 = vrot.lane.b32.xlu0 %v4564_v42, %s5097_s20  ;;  %v260_v42 = vld [vmem:[#allocation13 + $0x8] sm:$0xff] }
0x11f0   :  { %4565 = vtanh.f32 %v5844_v44 }
0x11f1   :  { %4567 = vtanh.f32 %v1902_v61 }
0x11f6   :  { %v4566_v46 = vpop.eup %4565 }
0x11f7   :  { %1808 = vrot.lane.b32.xlu2 %v4566_v46, %s5097_s20  ;;  %v4568_v36 = vpop.eup %4567 }
0x11f8   :  { %v1904_v53 = vmul.f32 0.5, %v4568_v36 }
0x1251   :  { %v1809_v54 = vpop.permute.xlu2 %1808 }
0x1252   :  { %v1811_v58 = vmul.f32 %v1809_v54, %v1794_v29 }
0x1254   :  { %1952 = vrot.lane.b32.xlu1 %v1811_v58, %s5098_s21 }
0x1259   :  { %v1876_v19 = vpop.permute.xlu0 %1875 }
0x125a   :  { %v1878_v45 = vmul.f32 %v1876_v19, %v1861_v13  ;;  %v243_v19 = vld [vmem:[#allocation11 + $0x18] sm:$0xff] }
0x125c   :  { %2018 = vrot.lane.b32.xlu2 %v1878_v45, %s5098_s21  ;;  %1911 = vrot.lane.b32.xlu1 %v4568_v36, %s5097_s20 }
0x1261   :  { %v1732_v17 = vpop.permute.xlu0 %1731 }
0x1262   :  { %v1734_v37 = vmul.f32 %v1732_v17, %v1728_v12  ;;  %v241_v17 = vld [vmem:[#allocation11 + $0x8] sm:$0xff] }
0x1264   :  { %1736 = vrot.lane.b32.xlu0 %v1734_v37, %s5098_s21  ;;  %v2435_v37 = vld [vmem:[#allocation2 + $0xe] sm:$0x3] }
0x12b6   :  { %v2019_v63 = vpop.permute.xlu2 %2018 }
0x12b7   :  { %4385 = vmatmul.msk.f32.vlgmr.msra.gmra.mxu1 %vm304_vm0, %v2019_v63 }
0x12b8   :  { %2309 = vmatpush.msra.mxu1 %v5767_v32  ;;  %v1905_v32 = vadd.f32 0.5, %v1904_v53 }
0x12ba   :  { %2310 = vmatpush.msra.mxu1 %v5770_v34 }
0x12bc   :  { %2311 = vmatpush.msra.mxu1 %v5773_v51 }
0x12be   :  { %2312 = vmatpush.msra.mxu1 %v5776_v7  ;;  %v1729_v7 = vmul.f32 %v1728_v12, %v5748_v35 }
0x12c6   :  { %v1953_v3 = vpop.permute.xlu1 %1952 }
0x12c7   :  { %4383 = vmatmul.msk.f32.vlgmr.msra.gmra.mxu3 %vm304_vm0, %v1953_v3  ;;  %4384 = vmatmul.msk.f32.vlgmr.msrb.gmra.mxu0 %vm304_vm0, %v1953_v3 }
0x12c8   :  { %2238 = vmatpush.msra.mxu3 %v5785_v15  ;;  %2284 = vmatpush.msrb.mxu0 %v5811_v21 }
0x12ca   :  { %2239 = vmatpush.msra.mxu3 %v5790_v55  ;;  %2285 = vmatpush.msrb.mxu0 %v5815_v9 }
0x12cc   :  { %2240 = vmatpush.msra.mxu3 %v5796_v14  ;;  %2286 = vmatpush.msrb.mxu0 %v5819_v48  ;;  %v1907_v14 = vrot.slane %v5752_v41, 6 }
0x12ce   :  { %v1912_v34 = vpop.permute.xlu1 %1911  ;;  %2241 = vmatpush.msra.mxu3 %v5802_v10  ;;  %2287 = vmatpush.msrb.mxu0 %v5823_v49  ;;  %v1909_v9 = vmul.f32 %v1907_v14, %v1905_v32 }
0x12cf   :  { %v1914_v51 = vmul.f32 %v1912_v34, %v1905_v32 }
0x12d1   :  { %1916 = vrot.lane.b32.xlu1 %v1914_v51, %s5098_s21 }
0x12d6   :  { %v1737_v15 = vpop.permute.xlu0 %1736 }
0x12d7   :  { %v5871_v21 = vadd.f32 %v1737_v15, %v1729_v7 }
0x12d9   :  { %4569 = vtanh.f32 %v5871_v21 }
0x12df   :  { %v4570_v55 = vpop.eup %4569 }
0x12e0   :  { %1742 = vrot.lane.b32.xlu0 %v4570_v55, %s5097_s20 }
0x1334   :  { %v2039_v10 = vpop.f32.mrf.mxu1 }
0x1343   :  { %v1917_v48 = vpop.permute.xlu1 %1916 }
0x1344   :  { %v5876_v43 = vadd.f32 %v1917_v48, %v1909_v9  ;;  %v2014_v49 = vpop.f32.mrf.mxu0  ;;  %v4463_v9 = vld [vmem:[#allocation14] ss:$0 sm:$0xff] }
0x1345   :  { %v2040_v50 = vadd.f32 %v2039_v10, %v2014_v49 }
0x1346   :  { %4571 = vtanh.f32 %v5876_v43 }
0x1347   :  { %v2042_v35 = vadd.f32 %v5727_v38, %v2040_v50 }
0x1349   :  { %4573 = vtanh.f32 %v2042_v35 }
0x134c   :  { %v4572_v57 = vpop.eup %4571 }
0x134d   :  { %1922 = vrot.lane.b32.xlu1 %v4572_v57, %s5097_s20 }
0x134f   :  { %v4574_v52 = vpop.eup %4573 }
0x1350   :  { %2048 = vrot.lane.b32.xlu2 %v4574_v52, %s5097_s20  ;;  %v2044_v24 = vmul.f32 0.5, %v4574_v52 }
0x1352   :  { %v1743_v56 = vpop.permute.xlu0 %1742  ;;  %v2045_v59 = vadd.f32 0.5, %v2044_v24 }
0x1353   :  { %v1745_v41 = vmul.f32 %v1743_v56, %v1728_v12  ;;  %v242_v12 = vld [vmem:[#allocation11 + $0x10] sm:$0xff] }
0x1354   :  { %v2046_v30 = vmul.f32 %v2045_v59, %v5844_v44 }
0x1355   :  { %1927 = vrot.lane.b32.xlu0 %v1745_v41, %s5098_s21 }
0x13aa   :  { %v2049_v62 = vpop.permute.xlu2 %2048 }
0x13ab   :  { %v2051_v16 = vmul.f32 %v2049_v62, %v2045_v59 }
0x13ad   :  { %2053 = vrot.lane.b32.xlu2 %v2051_v16, %s5098_s21 }
0x13bf   :  { %v1923_v28 = vpop.permute.xlu1 %1922 }
0x13c0   :  { %v1925_v2 = vmul.f32 %v1923_v28, %v1905_v32 }
0x13c2   :  { %v2084_v13 = vrot.slane %v1925_v2, 6 }
0x13c4   :  { %2085 = vrot.lane.b32.xlu1 %v2084_v13, %s5098_s21 }
0x13c7   :  { %v1928_v0 = vpop.permute.xlu0 %1927 }
0x13c8   :  { %4382 = vmatmul.msk.f32.vlgmr.msra.gmra.mxu2 %vm304_vm0, %v1928_v0 }
0x13c9   :  { %2213 = vmatpush.msra.mxu2 %v5665_v23  ;;  %v1973_v23 = vpop.f32.mrf.mxu3 }
0x13cb   :  { %2214 = vmatpush.msra.mxu2 %v5793_v11 }
0x13cd   :  { %2215 = vmatpush.msra.mxu2 %v5799_v39 }
0x13cf   :  { %2216 = vmatpush.msra.mxu2 %v5805_v40 }
0x13d0   :  { %4386 = vmatmul.msk.f32.vlgmr.msrb.gmra.mxu2 %vm304_vm0, %v2019_v63 }
0x13d1   :  { %2353 = vmatpush.msrb.mxu2 %v262_v5  ;;  %v5940_v5 = vld [vmem:[#allocation11 + $0x28] sm:$0xff] }
0x13d3   :  { %2354 = vmatpush.msrb.mxu2 %v261_v25  ;;  %v5943_v25 = vld [vmem:[#allocation11 + $0x20] sm:$0xff] }
0x13d5   :  { %2355 = vmatpush.msrb.mxu2 %v260_v42 }
0x13d7   :  { %2356 = vmatpush.msrb.mxu2 %v259_v27 }
0x1407   :  { %v2054_v31 = vpop.permute.xlu2 %2053 }
0x1408   :  { %v5892_v29 = vadd.f32 %v2054_v31, %v2046_v30 }
0x140a   :  { %4575 = vtanh.f32 %v5892_v29 }
0x1410   :  { %v4576_v6 = vpop.eup %4575 }
0x1411   :  { %2059 = vrot.lane.b32.xlu2 %v4576_v6, %s5097_s20 }
0x1436   :  { %v2086_v20 = vpop.permute.xlu1 %2085 }
0x1437   :  { %4387 = vmatmul.msk.f32.vlgmr.msrb.gmra.mxu3 %vm304_vm0, %v2086_v20 }
0x144b   :  { %v1948_v11 = vpop.f32.mrf.mxu2 }
0x144c   :  { %v1974_v39 = vadd.f32 %v1973_v23, %v1948_v11  ;;  %v266_v23 = vld [vmem:[#allocation13 + $0x30] sm:$0xff]  ;;  %v265_v11 = vld [vmem:[#allocation13 + $0x28] sm:$0xff] }
0x144e   :  { %v1976_v40 = vadd.f32 %v5839_v18, %v1974_v39 }
0x1450   :  { %4577 = vtanh.f32 %v1976_v40  ;;  %v264_v40 = vld [vmem:[#allocation13 + $0x20] sm:$0xff] }
0x1453   :  { %v2080_v44 = vpop.f32.mrf.mxu2 }
0x1456   :  { %v4578_v8 = vpop.eup %4577 }
0x1457   :  { %1982 = vrot.lane.b32.xlu1 %v4578_v8, %s5097_s20  ;;  %v1978_v61 = vmul.f32 0.5, %v4578_v8  ;;  %v5934_v8 = vld [vmem:[#allocation11 + $0x38] sm:$0xff] }
0x1459   :  { %v1979_v58 = vadd.f32 0.5, %v1978_v61 }
0x145b   :  { %v1980_v34 = vmul.f32 %v1979_v58, %v5871_v21 }
0x146b   :  { %v2060_v60 = vpop.permute.xlu2 %2059 }
0x146c   :  { %v2062_v4 = vmul.f32 %v2060_v60, %v2045_v59 }
0x146e   :  { %2156 = vrot.lane.b32.xlu2 %v2062_v4, %s5098_s21  ;;  %v5937_v4 = vld [vmem:[#allocation11 + $0x30] sm:$0xff] }
0x14ba   :  { %v2106_v46 = vpop.f32.mrf.mxu3 }
0x14bb   :  { %v2107_v47 = vadd.f32 %v2106_v46, %v2080_v44 }
0x14bd   :  { %v2109_v1 = vadd.f32 %v5720_v33, %v2107_v47  ;;  %v240_v33 = vld [vmem:[#allocation11] sm:$0xff] }
0x14bf   :  { %4579 = vtanh.f32 %v2109_v1 }
0x14c5   :  { %v4580_v54 = vpop.eup %4579 }
0x14c6   :  { %2115 = vrot.lane.b32.xlu0 %v4580_v54, %s5097_s20  ;;  %v2111_v63 = vmul.f32 0.5, %v4580_v54 }
0x14c8   :  { %v2157_v45 = vpop.permute.xlu2 %2156  ;;  %v2112_v3 = vadd.f32 0.5, %v2111_v63 }
0x14c9   :  { %v1983_v36 = vpop.permute.xlu1 %1982  ;;  %4389 = vmatmul.msk.f32.vlgmr.msrb.gmra.mxu1 %vm304_vm0, %v2157_v45  ;;  %4390 = vmatmul.msk.f32.vlgmr.msra.gmra.mxu2 %vm304_vm0, %v2157_v45 }
0x14ca   :  { %v1985_v22 = vmul.f32 %v1983_v36, %v1979_v58  ;;  %2451 = vmatpush.msra.mxu2 %v243_v19  ;;  %v2113_v21 = vmul.f32 %v2112_v3, %v5833_v26  ;;  %v5927_v26 = vrot.slane %v5876_v43, 6 }
0x14cc   :  { %1987 = vrot.lane.b32.xlu1 %v1985_v22, %s5098_s21  ;;  %2452 = vmatpush.msra.mxu2 %v242_v12 }
0x14ce   :  { %2453 = vmatpush.msra.mxu2 %v241_v17 }
0x14d0   :  { %2454 = vmatpush.msra.mxu2 %v240_v33  ;;  %v4465_v33 = vld [vmem:[#allocation14 + $0x1] ss:$0 sm:$0xff] }
0x14d1   :  { %4394 = vmatmul.msk.f32.vlgmr.msrb.gmra.mxu2 %vm304_vm0, %v2086_v20  ;;  %v267_v20 = vld [vmem:[#allocation13 + $0x38] sm:$0xff] }
0x14d2   :  { %2376 = vmatpush.msrb.mxu3 %v267_v20  ;;  %v270_v20 = vld [vmem:[#allocation13 + $0x48] sm:$0xff] }
0x14d4   :  { %2377 = vmatpush.msrb.mxu3 %v266_v23  ;;  %v269_v23 = vld [vmem:[#allocation13 + $0x40] sm:$0xff] }
0x14d6   :  { %2378 = vmatpush.msrb.mxu3 %v265_v11  ;;  %v5987_v11 = vld [vmem:[#allocation11 + $0x50] sm:$0xff] }
0x14d8   :  { %2379 = vmatpush.msrb.mxu3 %v264_v40  ;;  %v5993_v40 = vld [vmem:[#allocation11 + $0x40] sm:$0xff] }
0x14d9   :  { %4398 = vmatmul.msk.f32.vlgmr.msra.gmra.mxu2 %vm304_vm0, %v2435_v37 }
0x1538   :  { %v2116_v53 = vpop.permute.xlu0 %2115 }
0x1539   :  { %v2118_v32 = vmul.f32 %v2116_v53, %v2112_v3 }
0x153b   :  { %2120 = vrot.lane.b32.xlu0 %v2118_v32, %s5098_s21 }
0x153e   :  { %v1988_v51 = vpop.permute.xlu1 %1987 }
0x153f   :  { %v5909_v7 = vadd.f32 %v1988_v51, %v1980_v34 }
0x1541   :  { %4581 = vtanh.f32 %v5909_v7 }
0x1546   :  { %v2177_v42 = vpop.f32.mrf.mxu1 }
0x1547   :  { %v4582_v15 = vpop.eup %4581 }
0x1548   :  { %1993 = vrot.lane.b32.xlu1 %v4582_v15, %s5097_s20 }
0x154c   :  { %v5913_v55 = vpop.f32.mrf.mxu2 }
0x1554   :  { %v2358_v14 = vpop.f32.mrf.mxu2 }
0x1555   :  { %v5915_v48 = vadd.f32 %v4463_v9, %v2358_v14 }
0x155c   :  { %v2456_v10 = vpop.f32.mrf.mxu2 }
0x155d   :  { %v2457_v49 = vadd.f32 %v2456_v10, %v5915_v48 }
0x155f   :  { %4583 = vtanh.f32 %v2457_v49 }
0x1565   :  { %v4584_v50 = vpop.eup %4583 }
0x1566   :  { %2471 = vrot.lane.b32.xlu2 %v4584_v50, %s5097_s20  ;;  %v2464_v24 = vmul.f32 0.5, %v4584_v50 }
0x1568   :  { %v2465_v59 = vadd.f32 0.5, %v2464_v24 }
0x156a   :  { %v2469_v28 = vmul.f32 %v5927_v26, %v2465_v59 }
0x15ad   :  { %v2121_v35 = vpop.permute.xlu0 %2120 }
0x15ae   :  { %v5920_v57 = vadd.f32 %v2121_v35, %v2113_v21 }
0x15b0   :  { %4585 = vtanh.f32 %v5920_v57 }
0x15b6   :  { %v4586_v52 = vpop.eup %4585 }
0x15b7   :  { %2126 = vrot.lane.b32.xlu0 %v4586_v52, %s5097_s20 }
0x15ba   :  { %v1994_v56 = vpop.permute.xlu1 %1993 }
0x15bb   :  { %v1996_v41 = vmul.f32 %v1994_v56, %v1979_v58 }
0x15bd   :  { %2131 = vrot.lane.b32.xlu1 %v1996_v41, %s5098_s21 }
0x15c0   :  { %v2472_v62 = vpop.permute.xlu2 %2471 }
0x15c1   :  { %v2474_v16 = vmul.f32 %v2472_v62, %v2465_v59 }
0x15c3   :  { %2476 = vrot.lane.b32.xlu2 %v2474_v16, %s5098_s21 }
0x161d   :  { %v2477_v2 = vpop.permute.xlu2 %2476 }
0x161e   :  { %v2479_v13 = vadd.f32 %v2477_v2, %v2469_v28 }
0x1620   :  { %4587 = vtanh.f32 %v2479_v13 }
0x1626   :  { %v4588_v0 = vpop.eup %4587 }
0x1627   :  { %2482 = vrot.lane.b32.xlu2 %v4588_v0, %s5097_s20 }
0x1629   :  { %v2127_v30 = vpop.permute.xlu0 %2126 }
0x162a   :  { %v2129_v31 = vmul.f32 %v2127_v30, %v2112_v3 }
0x162c   :  { %2222 = vrot.lane.b32.xlu0 %v2129_v31, %s5098_s21  ;;  %v272_v31 = vld [vmem:[#allocation13 + $0x58] sm:$0xff] }
0x162f   :  { %v2132_v6 = vpop.permute.xlu1 %2131 }
0x1630   :  { %4388 = vmatmul.msk.f32.vlgmr.msra.gmra.mxu0 %vm304_vm0, %v2132_v6  ;;  %v271_v6 = vld [vmem:[#allocation13 + $0x50] sm:$0xff] }
0x1631   :  { %2399 = vmatpush.msra.mxu0 %v272_v31 }
0x1633   :  { %2400 = vmatpush.msra.mxu0 %v271_v6 }
0x1635   :  { %2401 = vmatpush.msra.mxu0 %v270_v20 }
0x1637   :  { %2402 = vmatpush.msra.mxu0 %v269_v23 }
0x1681   :  { %v2483_v43 = vpop.permute.xlu2 %2482 }
0x1682   :  { %v2485_v39 = vmul.f32 %v2483_v43, %v2465_v59  ;;  %v5985_v43 = vld [vmem:[#allocation11 + $0x58] sm:$0xff] }
0x1684   :  { %2487 = vrot.lane.b32.xlu2 %v2485_v39, %s5098_s21  ;;  %v5990_v39 = vld [vmem:[#allocation11 + $0x48] sm:$0xff] }
0x169e   :  { %v2223_v60 = vpop.permute.xlu0 %2222 }
0x169f   :  { %4391 = vmatmul.msk.f32.vlgmr.msra.gmra.mxu3 %vm304_vm0, %v2223_v60 }
0x16a0   :  { %2503 = vmatpush.msra.mxu3 %v5934_v8 }
0x16a2   :  { %2504 = vmatpush.msra.mxu3 %v5937_v4 }
0x16a4   :  { %2505 = vmatpush.msra.mxu3 %v5940_v5 }
0x16a6   :  { %2506 = vmatpush.msra.mxu3 %v5943_v25 }
0x16a7   :  { %4395 = vmatmul.msk.f32.vlgmr.msrb.gmra.mxu3 %vm304_vm0, %v2223_v60 }
0x16a8   :  { %2683 = vmatpush.msrb.mxu3 %v5934_v8 }
0x16aa   :  { %2684 = vmatpush.msrb.mxu3 %v5937_v4 }
0x16ac   :  { %2685 = vmatpush.msrb.mxu3 %v5940_v5 }
0x16ad   :  { %v2152_v27 = vpop.f32.mrf.mxu0 }
0x16ae   :  { %v2178_v44 = vadd.f32 %v2177_v42, %v2152_v27  ;;  %2686 = vmatpush.msrb.mxu3 %v5943_v25 }
0x16b0   :  { %v2180_v46 = vadd.f32 %v5839_v18, %v2178_v44 }
0x16b2   :  { %4589 = vtanh.f32 %v2180_v46 }
0x16b8   :  { %v4590_v47 = vpop.eup %4589 }
0x16b9   :  { %2186 = vrot.lane.b32.xlu0 %v4590_v47, %s5097_s20  ;;  %v2182_v19 = vmul.f32 0.5, %v4590_v47 }
0x16bb   :  { %v2183_v45 = vadd.f32 0.5, %v2182_v19 }
0x16bd   :  { %v2184_v32 = vmul.f32 %v2183_v45, %v5909_v7 }
0x16de   :  { %v2488_v1 = vpop.permute.xlu2 %2487 }
0x16df   :  { %4399 = vmatmul.msk.f32.vlgmr.msra.gmra.mxu3 %vm304_vm0, %v2488_v1 }
0x16e0   :  { %2863 = vmatpush.msra.mxu3 %v5934_v8 }
0x16e2   :  { %2864 = vmatpush.msra.mxu3 %v5937_v4 }
0x16e4   :  { %2865 = vmatpush.msra.mxu3 %v5940_v5 }
0x16e6   :  { %2866 = vmatpush.msra.mxu3 %v5943_v25 }
0x1722   :  { %v2243_v61 = vpop.f32.mrf.mxu3 }
0x1723   :  { %v2244_v54 = vadd.f32 %v2243_v61, %v5913_v55  ;;  %v4466_v61 = vld [vmem:[#allocation14 + $0x2] ss:$0 sm:$0xff] }
0x1725   :  { %v2246_v58 = vadd.f32 %v5727_v38, %v2244_v54 }
0x1727   :  { %4591 = vtanh.f32 %v2246_v58 }
0x172a   :  { %v2381_v17 = vpop.f32.mrf.mxu3 }
0x172b   :  { %v2187_v36 = vpop.permute.xlu0 %2186  ;;  %v5963_v37 = vadd.f32 %v4465_v33, %v2381_v17 }
0x172c   :  { %v2189_v22 = vmul.f32 %v2187_v36, %v2183_v45 }
0x172d   :  { %v4592_v12 = vpop.eup %4591 }
0x172e   :  { %2191 = vrot.lane.b32.xlu0 %v2189_v22, %s5098_s21  ;;  %2252 = vrot.lane.b32.xlu1 %v4592_v12, %s5097_s20  ;;  %v2248_v38 = vmul.f32 0.5, %v4592_v12 }
0x1730   :  { %v2249_v34 = vadd.f32 0.5, %v2248_v38 }
0x1732   :  { %v2250_v7 = vmul.f32 %v2249_v34, %v5892_v29 }
0x1762   :  { %v2508_v63 = vpop.f32.mrf.mxu3 }
0x1763   :  { %v2509_v3 = vadd.f32 %v2508_v63, %v5963_v37 }
0x1765   :  { %4593 = vtanh.f32 %v2509_v3 }
0x176b   :  { %v4594_v53 = vpop.eup %4593 }
0x176c   :  { %2516 = vrot.lane.b32.xlu2 %v4594_v53, %s5097_s20  ;;  %v2512_v10 = vmul.f32 0.5, %v4594_v53 }
0x176e   :  { %v2513_v49 = vadd.f32 0.5, %v2512_v10 }
0x1770   :  { %v2514_v59 = vmul.f32 %v2513_v49, %v5920_v57 }
0x17a0   :  { %v2192_v51 = vpop.permute.xlu0 %2191  ;;  %v2253_v15 = vpop.permute.xlu1 %2252 }
0x17a1   :  { %v5968_v55 = vadd.f32 %v2192_v51, %v2184_v32  ;;  %v2255_v14 = vmul.f32 %v2253_v15, %v2249_v34 }
0x17a3   :  { %4595 = vtanh.f32 %v5968_v55  ;;  %2257 = vrot.lane.b32.xlu1 %v2255_v14, %s5098_s21 }
0x17a9   :  { %v4596_v9 = vpop.eup %4595 }
0x17aa   :  { %2197 = vrot.lane.b32.xlu0 %v4596_v9, %s5097_s20 }
0x17c6   :  { %v2517_v50 = vpop.permute.xlu2 %2516 }
0x17c7   :  { %v2519_v21 = vmul.f32 %v2517_v50, %v2513_v49  ;;  %v276_v50 = vld [vmem:[#allocation13 + $0x70] sm:$0xff] }
0x17c9   :  { %2521 = vrot.lane.b32.xlu2 %v2519_v21, %s5098_s21  ;;  %v274_v21 = vld [vmem:[#allocation13 + $0x60] sm:$0xff] }
0x1815   :  { %v2258_v35 = vpop.permute.xlu1 %2257 }
0x1816   :  { %v5975_v52 = vadd.f32 %v2258_v35, %v2250_v7 }
0x1818   :  { %4597 = vtanh.f32 %v5975_v52 }
0x181c   :  { %v2198_v56 = vpop.permute.xlu0 %2197 }
0x181d   :  { %v2200_v41 = vmul.f32 %v2198_v56, %v2183_v45 }
0x181e   :  { %v4598_v24 = vpop.eup %4597 }
0x181f   :  { %2268 = vrot.lane.b32.xlu0 %v2200_v41, %s5098_s21  ;;  %2263 = vrot.lane.b32.xlu1 %v4598_v24, %s5097_s20  ;;  %v6025_v24 = vld [vmem:[#allocation11 + $0x78] sm:$0xff] }
0x1823   :  { %v2522_v62 = vpop.permute.xlu2 %2521 }
0x1824   :  { %v2524_v16 = vadd.f32 %v2522_v62, %v2514_v59  ;;  %v6027_v59 = vld [vmem:[#allocation11 + $0x70] sm:$0xff]  ;;  %v6030_v62 = vld [vmem:[#allocation11 + $0x68] sm:$0xff] }
0x1826   :  { %4599 = vtanh.f32 %v2524_v16  ;;  %v6034_v16 = vld [vmem:[#allocation11 + $0x60] sm:$0xff] }
0x182c   :  { %v4600_v28 = vpop.eup %4599 }
0x182d   :  { %2527 = vrot.lane.b32.xlu2 %v4600_v28, %s5097_s20 }
0x1887   :  { %v2528_v29 = vpop.permute.xlu2 %2527 }
0x1888   :  { %v2530_v2 = vmul.f32 %v2528_v29, %v2513_v49  ;;  %v277_v49 = vld [vmem:[#allocation13 + $0x78] sm:$0xff] }
0x1889   :  { %2427 = vmatpush.msrb.mxu1 %v277_v49 }
0x188a   :  { %2532 = vrot.lane.b32.xlu2 %v2530_v2, %s5098_s21 }
0x188b   :  { %2428 = vmatpush.msrb.mxu1 %v276_v50 }
0x1891   :  { %v2269_v13 = vpop.permute.xlu0 %2268  ;;  %v2264_v0 = vpop.permute.xlu1 %2263 }
0x1892   :  { %4392 = vmatmul.msk.f32.vlgmr.msrb.gmra.mxu0 %vm304_vm0, %v2269_v13  ;;  %v2266_v30 = vmul.f32 %v2264_v0, %v2249_v34  ;;  %v4467_v13 = vld [vmem:[#allocation14 + $0x3] ss:$0 sm:$0xff] }
0x1893   :  { %2548 = vmatpush.msrb.mxu0 %v5985_v43 }
0x1894   :  { %2293 = vrot.lane.b32.xlu1 %v2266_v30, %s5098_s21 }
0x1895   :  { %2549 = vmatpush.msrb.mxu0 %v5987_v11 }
0x1897   :  { %2550 = vmatpush.msrb.mxu0 %v5990_v39 }
0x1899   :  { %2551 = vmatpush.msrb.mxu0 %v5993_v40 }
0x18e4   :  { %v2533_v42 = vpop.permute.xlu2 %2532 }
0x1906   :  { %v2294_v60 = vpop.permute.xlu1 %2293 }
0x1907   :  { %4393 = vmatmul.msk.f32.vlgmr.msra.gmra.mxu1 %vm304_vm0, %v2294_v60  ;;  %4396 = vmatmul.msk.f32.vlgmr.msra.gmra.mxu0 %vm304_vm0, %v2294_v60 }
0x1908   :  { %2728 = vmatpush.msra.mxu0 %v5985_v43 }
0x190a   :  { %2729 = vmatpush.msra.mxu0 %v5987_v11 }
0x190c   :  { %2730 = vmatpush.msra.mxu0 %v5990_v39 }
0x190e   :  { %2731 = vmatpush.msra.mxu0 %v5993_v40 }
0x190f   :  { %4400 = vmatmul.msk.f32.vlgmr.msrb.gmra.mxu0 %vm304_vm0, %v2533_v42  ;;  %v2289_v27 = vpop.f32.mrf.mxu0 }
0x1910   :  { %2908 = vmatpush.msrb.mxu0 %v5985_v43 }
0x1912   :  { %2909 = vmatpush.msrb.mxu0 %v5987_v11 }
0x1914   :  { %2910 = vmatpush.msrb.mxu0 %v5990_v39 }
0x1916   :  { %2911 = vmatpush.msrb.mxu0 %v5993_v40 }
0x1984   :  { %v2314_v44 = vpop.f32.mrf.mxu1  ;;  %v2404_v46 = vpop.f32.mrf.mxu0 }
0x1985   :  { %v2315_v47 = vadd.f32 %v2314_v44, %v2289_v27  ;;  %v6009_v54 = vadd.f32 %v4466_v61, %v2404_v46  ;;  %v6056_v61 = vld [vmem:[#allocation16 + $0x10] sm:$0xff] }
0x1987   :  { %v2317_v1 = vadd.f32 %v5839_v18, %v2315_v47 }
0x1989   :  { %4601 = vtanh.f32 %v2317_v1  ;;  %v6054_v1 = vld [vmem:[#allocation16 + $0x18] sm:$0xff] }
0x198a   :  { %2638 = vmatpush.msrb.mxu2 %v6054_v1 }
0x198c   :  { %v2553_v58 = vpop.f32.mrf.mxu0  ;;  %2639 = vmatpush.msrb.mxu2 %v6056_v61 }
0x198d   :  { %v2554_v19 = vadd.f32 %v2553_v58, %v6009_v54  ;;  %v6059_v58 = vld [vmem:[#allocation16 + $0x8] sm:$0xff] }
0x198e   :  { %2640 = vmatpush.msrb.mxu2 %v6059_v58 }
0x198f   :  { %v4602_v45 = vpop.eup %4601  ;;  %4603 = vtanh.f32 %v2554_v19  ;;  %v6062_v19 = vld [vmem:[#allocation16] sm:$0xff] }
0x1990   :  { %2323 = vrot.lane.b32.xlu0 %v4602_v45, %s5097_s20  ;;  %v2319_v22 = vmul.f32 0.5, %v4602_v45  ;;  %2641 = vmatpush.msrb.mxu2 %v6062_v19 }
0x1992   :  { %v2320_v12 = vadd.f32 0.5, %v2319_v22  ;;  %2818 = vmatpush.msra.mxu2 %v6054_v1 }
0x1994   :  { %v2321_v38 = vmul.f32 %v2320_v12, %v5968_v55  ;;  %v275_v55 = vld [vmem:[#allocation13 + $0x68] sm:$0xff]  ;;  %2819 = vmatpush.msra.mxu2 %v6056_v61 }
0x1995   :  { %v4604_v36 = vpop.eup %4603  ;;  %2429 = vmatpush.msrb.mxu1 %v275_v55 }
0x1996   :  { %2561 = vrot.lane.b32.xlu1 %v4604_v36, %s5097_s20  ;;  %v2557_v63 = vmul.f32 0.5, %v4604_v36  ;;  %2820 = vmatpush.msra.mxu2 %v6059_v58 }
0x1997   :  { %2430 = vmatpush.msrb.mxu1 %v274_v21 }
0x1998   :  { %v2558_v18 = vadd.f32 0.5, %v2557_v63  ;;  %2821 = vmatpush.msra.mxu2 %v6062_v19 }
0x1999   :  { %2593 = vmatpush.msra.mxu1 %v6025_v24 }
0x199a   :  { %v2559_v15 = vmul.f32 %v2558_v18, %v5975_v52 }
0x199b   :  { %2594 = vmatpush.msra.mxu1 %v6027_v59 }
0x199d   :  { %2595 = vmatpush.msra.mxu1 %v6030_v62 }
0x199f   :  { %2596 = vmatpush.msra.mxu1 %v6034_v16 }
0x1a02   :  { %v2324_v17 = vpop.permute.xlu0 %2323 }
0x1a03   :  { %v2326_v33 = vmul.f32 %v2324_v17, %v2320_v12 }
0x1a05   :  { %2328 = vrot.lane.b32.xlu2 %v2326_v33, %s5098_s21 }
0x1a08   :  { %v2562_v3 = vpop.permute.xlu1 %2561 }
0x1a09   :  { %v2564_v53 = vmul.f32 %v2562_v3, %v2558_v18 }
0x1a0b   :  { %2566 = vrot.lane.b32.xlu0 %v2564_v53, %s5098_s21 }
0x1a5f   :  { %v2329_v32 = vpop.permute.xlu2 %2328 }
0x1a60   :  { %v6017_v34 = vadd.f32 %v2329_v32, %v2321_v38 }
0x1a62   :  { %4605 = vtanh.f32 %v6017_v34 }
0x1a68   :  { %v4606_v51 = vpop.eup %4605 }
0x1a69   :  { %2334 = vrot.lane.b32.xlu1 %v4606_v51, %s5097_s20 }
0x1a7d   :  { %v2567_v14 = vpop.permute.xlu0 %2566 }
0x1a7e   :  { %v2569_v9 = vadd.f32 %v2567_v14, %v2559_v15 }
0x1a80   :  { %4607 = vtanh.f32 %v2569_v9 }
0x1a86   :  { %v4608_v10 = vpop.eup %4607 }
0x1a87   :  { %2572 = vrot.lane.b32.xlu2 %v4608_v10, %s5097_s20 }
0x1adb   :  { %v2335_v7 = vpop.permute.xlu1 %2334 }
0x1adc   :  { %v2337_v35 = vmul.f32 %v2335_v7, %v2320_v12  ;;  %v4464_v12 = vld [vmem:[%s6536_s10] ss:$0 sm:$0xff] }
0x1add   :  { %v6083_v17 = vadd.f32 %v4464_v12, %v5915_v48 }
0x1ade   :  { %2411 = vrot.lane.b32.xlu0 %v2337_v35, %s5098_s21 }
0x1ae1   :  { %v2573_v56 = vpop.permute.xlu2 %2572 }
0x1ae2   :  { %v2575_v41 = vmul.f32 %v2573_v56, %v2558_v18 }
0x1ae4   :  { %2577 = vrot.lane.b32.xlu1 %v2575_v41, %s5098_s21 }
0x1b50   :  { %v2412_v28 = vpop.permute.xlu0 %2411 }
0x1b51   :  { %4397 = vmatmul.msk.f32.vlgmr.msrb.gmra.mxu1 %vm304_vm0, %v2412_v28 }
0x1b52   :  { %2773 = vmatpush.msrb.mxu1 %v6025_v24 }
0x1b54   :  { %2774 = vmatpush.msrb.mxu1 %v6027_v59 }
0x1b56   :  { %2775 = vmatpush.msrb.mxu1 %v6030_v62  ;;  %v2578_v29 = vpop.permute.xlu1 %2577 }
0x1b58   :  { %2776 = vmatpush.msrb.mxu1 %v6034_v16 }
0x1b59   :  { %4401 = vmatmul.msk.f32.vlgmr.msra.gmra.mxu1 %vm304_vm0, %v2578_v29 }
0x1b5a   :  { %2953 = vmatpush.msra.mxu1 %v6025_v24 }
0x1b5c   :  { %2954 = vmatpush.msra.mxu1 %v6027_v59 }
0x1b5e   :  { %2955 = vmatpush.msra.mxu1 %v6030_v62 }
0x1b60   :  { %2956 = vmatpush.msra.mxu1 %v6034_v16 }
0x1bce   :  { %v2432_v2 = vpop.f32.mrf.mxu1 }
0x1bcf   :  { %v6047_v0 = vadd.f32 %v4467_v13, %v2432_v2 }
0x1bd6   :  { %v2598_v30 = vpop.f32.mrf.mxu1 }
0x1bd7   :  { %v2599_v31 = vadd.f32 %v2598_v30, %v6047_v0 }
0x1bd9   :  { %4609 = vtanh.f32 %v2599_v31 }
0x1bdf   :  { %v4610_v6 = vpop.eup %4609 }
0x1be0   :  { %2606 = vrot.lane.b32.xlu2 %v4610_v6, %s5097_s20  ;;  %v2602_v20 = vmul.f32 0.5, %v4610_v6 }
0x1be2   :  { %v2603_v23 = vadd.f32 0.5, %v2602_v20 }
0x1be4   :  { %v2604_v27 = vmul.f32 %v2603_v23, %v6017_v34 }
0x1c3a   :  { %v2607_v60 = vpop.permute.xlu2 %2606 }
0x1c3b   :  { %v2609_v42 = vmul.f32 %v2607_v60, %v2603_v23 }
0x1c3d   :  { %2611 = vrot.lane.b32.xlu0 %v2609_v42, %s5098_s21 }
0x1caf   :  { %v2612_v44 = vpop.permute.xlu0 %2611 }
0x1cb0   :  { %v2614_v46 = vadd.f32 %v2612_v44, %v2604_v27 }
0x1cb2   :  { %4611 = vtanh.f32 %v2614_v46 }
0x1cb8   :  { %v4612_v47 = vpop.eup %4611 }
0x1cb9   :  { %2617 = vrot.lane.b32.xlu1 %v4612_v47, %s5097_s20 }
0x1d2b   :  { %v2618_v45 = vpop.permute.xlu1 %2617 }
0x1d2c   :  { %v6070_v36 = vmul.f32 %v2618_v45, %v2603_v23 }
0x1d2e   :  { %2622 = vrot.lane.b32.xlu2 %v6070_v36, %s5098_s21 }
0x1d88   :  { %v2623_v22 = vpop.permute.xlu2 %2622 }
0x1d89   :  { %4402 = vmatmul.msk.f32.vlgmr.msrb.gmra.mxu2 %vm304_vm0, %v2623_v22 }
0x1d8a   :  { %2998 = vmatpush.msrb.mxu2 %v6054_v1 }
0x1d8c   :  { %2999 = vmatpush.msrb.mxu2 %v6056_v61 }
0x1d8e   :  { %3000 = vmatpush.msrb.mxu2 %v6059_v58 }
0x1d90   :  { %3001 = vmatpush.msrb.mxu2 %v6062_v19 }
0x1e0c   :  { %v2643_v33 = vpop.f32.mrf.mxu2 }
0x1e0d   :  { %v2644_v63 = vadd.f32 %v2643_v33, %v6083_v17 }
0x1e0f   :  { %4613 = vtanh.f32 %v2644_v63 }
0x1e15   :  { %v4614_v18 = vpop.eup %4613 }
0x1e16   :  { %2651 = vrot.lane.b32.xlu0 %v4614_v18, %s5097_s20  ;;  %v2647_v3 = vmul.f32 0.5, %v4614_v18 }
0x1e18   :  { %v2648_v53 = vadd.f32 0.5, %v2647_v3 }
0x1e1a   :  { %v2649_v51 = vmul.f32 %v2648_v53, %v5927_v26 }
0x1e88   :  { %v2652_v38 = vpop.permute.xlu0 %2651 }
0x1e89   :  { %v2654_v32 = vmul.f32 %v2652_v38, %v2648_v53 }
0x1e8b   :  { %2656 = vrot.lane.b32.xlu1 %v2654_v32, %s5098_s21 }
0x1efd   :  { %v2657_v15 = vpop.permute.xlu1 %2656 }
0x1efe   :  { %v2659_v14 = vadd.f32 %v2657_v15, %v2649_v51 }
0x1f00   :  { %4615 = vtanh.f32 %v2659_v14 }
0x1f06   :  { %v4616_v48 = vpop.eup %4615 }
0x1f07   :  { %2662 = vrot.lane.b32.xlu2 %v4616_v48, %s5097_s20 }
0x1f61   :  { %v2663_v9 = vpop.permute.xlu2 %2662 }
0x1f62   :  { %v2665_v10 = vmul.f32 %v2663_v9, %v2648_v53 }
0x1f64   :  { %2667 = vrot.lane.b32.xlu0 %v2665_v10, %s5098_s21 }
0x1fd6   :  { %v2668_v49 = vpop.permute.xlu0 %2667 }
0x1fd7   :  { %4403 = vmatmul.msk.f32.vlgmr.msrb.gmra.mxu3 %vm304_vm0, %v2668_v49 }
0x1fd8   :  { %3043 = vmatpush.msrb.mxu3 %v5934_v8 }
0x1fda   :  { %3044 = vmatpush.msrb.mxu3 %v5937_v4 }
0x1fdc   :  { %3045 = vmatpush.msrb.mxu3 %v5940_v5 }
0x1fde   :  { %3046 = vmatpush.msrb.mxu3 %v5943_v25 }
0x205a   :  { %v2688_v50 = vpop.f32.mrf.mxu3 }
0x205b   :  { %v2689_v55 = vadd.f32 %v2688_v50, %v5963_v37 }
0x205d   :  { %4617 = vtanh.f32 %v2689_v55 }
0x2063   :  { %v4618_v21 = vpop.eup %4617 }
0x2064   :  { %2696 = vrot.lane.b32.xlu1 %v4618_v21, %s5097_s20  ;;  %v2692_v7 = vmul.f32 0.5, %v4618_v21 }
0x2066   :  { %v2693_v35 = vadd.f32 0.5, %v2692_v7 }
0x2068   :  { %v2694_v28 = vmul.f32 %v2693_v35, %v5920_v57 }
0x20d6   :  { %v2697_v56 = vpop.permute.xlu1 %2696 }
0x20d7   :  { %v2699_v41 = vmul.f32 %v2697_v56, %v2693_v35 }
0x20d9   :  { %2701 = vrot.lane.b32.xlu2 %v2699_v41, %s5098_s21 }
0x2133   :  { %v2702_v29 = vpop.permute.xlu2 %2701 }
0x2134   :  { %v2704_v2 = vadd.f32 %v2702_v29, %v2694_v28 }
0x2136   :  { %4619 = vtanh.f32 %v2704_v2 }
0x213c   :  { %v4620_v13 = vpop.eup %4619 }
0x213d   :  { %2707 = vrot.lane.b32.xlu0 %v4620_v13, %s5097_s20 }
0x21af   :  { %v2708_v30 = vpop.permute.xlu0 %2707 }
0x21b0   :  { %v2710_v31 = vmul.f32 %v2708_v30, %v2693_v35 }
0x21b2   :  { %2712 = vrot.lane.b32.xlu1 %v2710_v31, %s5098_s21 }
0x2224   :  { %v2713_v6 = vpop.permute.xlu1 %2712 }
0x2225   :  { %4404 = vmatmul.msk.f32.vlgmr.msra.gmra.mxu0 %vm304_vm0, %v2713_v6 }
0x2226   :  { %3088 = vmatpush.msra.mxu0 %v5985_v43 }
0x2228   :  { %3089 = vmatpush.msra.mxu0 %v5987_v11 }
0x222a   :  { %3090 = vmatpush.msra.mxu0 %v5990_v39 }
0x222c   :  { %3091 = vmatpush.msra.mxu0 %v5993_v40 }
0x22a2   :  { %v2733_v20 = vpop.f32.mrf.mxu0 }
0x22a3   :  { %v2734_v23 = vadd.f32 %v2733_v20, %v6009_v54 }
0x22a5   :  { %4621 = vtanh.f32 %v2734_v23 }
0x22ab   :  { %v4622_v60 = vpop.eup %4621 }
0x22ac   :  { %2741 = vrot.lane.b32.xlu2 %v4622_v60, %s5097_s20  ;;  %v2737_v42 = vmul.f32 0.5, %v4622_v60 }
0x22ae   :  { %v2738_v27 = vadd.f32 0.5, %v2737_v42 }
0x22b0   :  { %v2739_v47 = vmul.f32 %v2738_v27, %v5975_v52 }
0x2306   :  { %v2742_v44 = vpop.permute.xlu2 %2741 }
0x2307   :  { %v2744_v46 = vmul.f32 %v2742_v44, %v2738_v27 }
0x2309   :  { %2746 = vrot.lane.b32.xlu0 %v2744_v46, %s5098_s21 }
0x237b   :  { %v2747_v45 = vpop.permute.xlu0 %2746 }
0x237c   :  { %v2749_v22 = vadd.f32 %v2747_v45, %v2739_v47 }
0x237e   :  { %4623 = vtanh.f32 %v2749_v22 }
0x2384   :  { %v4624_v12 = vpop.eup %4623 }
0x2385   :  { %2752 = vrot.lane.b32.xlu1 %v4624_v12, %s5097_s20 }
0x23f7   :  { %v2753_v33 = vpop.permute.xlu1 %2752 }
0x23f8   :  { %v2755_v63 = vmul.f32 %v2753_v33, %v2738_v27 }
0x23fa   :  { %2757 = vrot.lane.b32.xlu2 %v2755_v63, %s5098_s21 }
0x2454   :  { %v2758_v18 = vpop.permute.xlu2 %2757 }
0x2455   :  { %4405 = vmatmul.msk.f32.vlgmr.msrb.gmra.mxu1 %vm304_vm0, %v2758_v18 }
0x2456   :  { %3133 = vmatpush.msrb.mxu1 %v6025_v24 }
0x2458   :  { %3134 = vmatpush.msrb.mxu1 %v6027_v59 }
0x245a   :  { %3135 = vmatpush.msrb.mxu1 %v6030_v62 }
0x245c   :  { %3136 = vmatpush.msrb.mxu1 %v6034_v16 }
0x24d2   :  { %v2778_v3 = vpop.f32.mrf.mxu1 }
0x24d3   :  { %v2779_v53 = vadd.f32 %v2778_v3, %v6047_v0 }
0x24d5   :  { %4625 = vtanh.f32 %v2779_v53 }
0x24db   :  { %v4626_v38 = vpop.eup %4625 }
0x24dc   :  { %2786 = vrot.lane.b32.xlu0 %v4626_v38, %s5097_s20  ;;  %v2782_v32 = vmul.f32 0.5, %v4626_v38 }
0x24de   :  { %v2783_v51 = vadd.f32 0.5, %v2782_v32 }
0x24e0   :  { %v2784_v48 = vmul.f32 %v2783_v51, %v6017_v34 }
0x254e   :  { %v2787_v15 = vpop.permute.xlu0 %2786 }
0x254f   :  { %v2789_v14 = vmul.f32 %v2787_v15, %v2783_v51 }
0x2551   :  { %2791 = vrot.lane.b32.xlu1 %v2789_v14, %s5098_s21 }
0x25c3   :  { %v2792_v9 = vpop.permute.xlu1 %2791 }
0x25c4   :  { %v2794_v10 = vadd.f32 %v2792_v9, %v2784_v48 }
0x25c6   :  { %4627 = vtanh.f32 %v2794_v10 }
0x25cc   :  { %v4628_v49 = vpop.eup %4627 }
0x25cd   :  { %2797 = vrot.lane.b32.xlu2 %v4628_v49, %s5097_s20 }
0x2627   :  { %v2798_v50 = vpop.permute.xlu2 %2797 }
0x2628   :  { %v6123_v55 = vmul.f32 %v2798_v50, %v2783_v51 }
0x262a   :  { %2802 = vrot.lane.b32.xlu0 %v6123_v55, %s5098_s21 }
0x269c   :  { %v2803_v21 = vpop.permute.xlu0 %2802 }
0x269d   :  { %4406 = vmatmul.msk.f32.vlgmr.msra.gmra.mxu2 %vm304_vm0, %v2803_v21 }
0x269e   :  { %3178 = vmatpush.msra.mxu2 %v6054_v1 }
0x26a0   :  { %3179 = vmatpush.msra.mxu2 %v6056_v61 }
0x26a2   :  { %3180 = vmatpush.msra.mxu2 %v6059_v58 }
0x26a4   :  { %3181 = vmatpush.msra.mxu2 %v6062_v19 }
0x2720   :  { %v2823_v7 = vpop.f32.mrf.mxu2 }
0x2721   :  { %v2824_v35 = vadd.f32 %v2823_v7, %v6083_v17 }
0x2723   :  { %4629 = vtanh.f32 %v2824_v35 }
0x2729   :  { %v4630_v56 = vpop.eup %4629 }
0x272a   :  { %2831 = vrot.lane.b32.xlu1 %v4630_v56, %s5097_s20  ;;  %v2827_v41 = vmul.f32 0.5, %v4630_v56 }
0x272c   :  { %v2828_v28 = vadd.f32 0.5, %v2827_v41 }
0x272e   :  { %v2829_v13 = vmul.f32 %v2828_v28, %v5927_v26 }
0x279c   :  { %v2832_v29 = vpop.permute.xlu1 %2831 }
0x279d   :  { %v2834_v2 = vmul.f32 %v2832_v29, %v2828_v28 }
0x279f   :  { %2836 = vrot.lane.b32.xlu2 %v2834_v2, %s5098_s21 }
0x27f9   :  { %v2837_v30 = vpop.permute.xlu2 %2836 }
0x27fa   :  { %v2839_v31 = vadd.f32 %v2837_v30, %v2829_v13 }
0x27fc   :  { %4631 = vtanh.f32 %v2839_v31 }
0x2802   :  { %v4632_v6 = vpop.eup %4631 }
0x2803   :  { %2842 = vrot.lane.b32.xlu0 %v4632_v6, %s5097_s20 }
0x2875   :  { %v2843_v20 = vpop.permute.xlu0 %2842 }
0x2876   :  { %v2845_v23 = vmul.f32 %v2843_v20, %v2828_v28 }
0x2878   :  { %2847 = vrot.lane.b32.xlu1 %v2845_v23, %s5098_s21 }
0x28ea   :  { %v2848_v60 = vpop.permute.xlu1 %2847 }
0x28eb   :  { %4407 = vmatmul.msk.f32.vlgmr.msra.gmra.mxu3 %vm304_vm0, %v2848_v60 }
0x28ec   :  { %3223 = vmatpush.msra.mxu3 %v5934_v8 }
0x28ee   :  { %3224 = vmatpush.msra.mxu3 %v5937_v4 }
0x28f0   :  { %3225 = vmatpush.msra.mxu3 %v5940_v5 }
0x28f2   :  { %3226 = vmatpush.msra.mxu3 %v5943_v25 }
0x296e   :  { %v2868_v42 = vpop.f32.mrf.mxu3 }
0x296f   :  { %v2869_v27 = vadd.f32 %v2868_v42, %v5963_v37 }
0x2971   :  { %4633 = vtanh.f32 %v2869_v27  ;;  %v4241_v27 = vrot.slane %v6123_v55, 6 }
0x2977   :  { %v4634_v44 = vpop.eup %4633 }
0x2978   :  { %2876 = vrot.lane.b32.xlu2 %v4634_v44, %s5097_s20  ;;  %v2872_v46 = vmul.f32 0.5, %v4634_v44 }
0x297a   :  { %v2873_v47 = vadd.f32 0.5, %v2872_v46 }
0x297c   :  { %v2874_v12 = vmul.f32 %v2873_v47, %v5920_v57 }
0x29d2   :  { %v2877_v45 = vpop.permute.xlu2 %2876 }
0x29d3   :  { %v2879_v22 = vmul.f32 %v2877_v45, %v2873_v47  ;;  %v4257_v45 = vsel %vm4256_vm1, %v6070_v36, %v4241_v27 }
0x29d5   :  { %2881 = vrot.lane.b32.xlu0 %v2879_v22, %s5098_s21 }
0x2a47   :  { %v2882_v33 = vpop.permute.xlu0 %2881 }
0x2a48   :  { %v2884_v63 = vadd.f32 %v2882_v33, %v2874_v12 }
0x2a4a   :  { %4635 = vtanh.f32 %v2884_v63 }
0x2a50   :  { %v4636_v18 = vpop.eup %4635 }
0x2a51   :  { %2887 = vrot.lane.b32.xlu1 %v4636_v18, %s5097_s20 }
0x2ac3   :  { %v2888_v3 = vpop.permute.xlu1 %2887 }
0x2ac4   :  { %v2890_v53 = vmul.f32 %v2888_v3, %v2873_v47 }
0x2ac6   :  { %2892 = vrot.lane.b32.xlu2 %v2890_v53, %s5098_s21 }
0x2b20   :  { %v2893_v38 = vpop.permute.xlu2 %2892 }
0x2b21   :  { %4408 = vmatmul.msk.f32.vlgmr.msrb.gmra.mxu0 %vm304_vm0, %v2893_v38 }
0x2b22   :  { %3268 = vmatpush.msrb.mxu0 %v5985_v43 }
0x2b24   :  { %3269 = vmatpush.msrb.mxu0 %v5987_v11 }
0x2b26   :  { %3270 = vmatpush.msrb.mxu0 %v5990_v39 }
0x2b28   :  { %3271 = vmatpush.msrb.mxu0 %v5993_v40 }
0x2b9e   :  { %v2913_v32 = vpop.f32.mrf.mxu0 }
0x2b9f   :  { %v2914_v51 = vadd.f32 %v2913_v32, %v6009_v54 }
0x2ba1   :  { %4637 = vtanh.f32 %v2914_v51 }
0x2ba7   :  { %v4638_v15 = vpop.eup %4637 }
0x2ba8   :  { %2921 = vrot.lane.b32.xlu0 %v4638_v15, %s5097_s20  ;;  %v2917_v14 = vmul.f32 0.5, %v4638_v15 }
0x2baa   :  { %v2918_v48 = vadd.f32 0.5, %v2917_v14 }
0x2bac   :  { %v2919_v49 = vmul.f32 %v2918_v48, %v5975_v52 }
0x2c1a   :  { %v2922_v9 = vpop.permute.xlu0 %2921 }
0x2c1b   :  { %v2924_v10 = vmul.f32 %v2922_v9, %v2918_v48 }
0x2c1d   :  { %2926 = vrot.lane.b32.xlu1 %v2924_v10, %s5098_s21 }
0x2c8f   :  { %v2927_v50 = vpop.permute.xlu1 %2926 }
0x2c90   :  { %v2929_v21 = vadd.f32 %v2927_v50, %v2919_v49 }
0x2c92   :  { %4639 = vtanh.f32 %v2929_v21 }
0x2c98   :  { %v4640_v7 = vpop.eup %4639 }
0x2c99   :  { %2932 = vrot.lane.b32.xlu2 %v4640_v7, %s5097_s20 }
0x2cf3   :  { %v2933_v35 = vpop.permute.xlu2 %2932 }
0x2cf4   :  { %v2935_v56 = vmul.f32 %v2933_v35, %v2918_v48 }
0x2cf6   :  { %2937 = vrot.lane.b32.xlu0 %v2935_v56, %s5098_s21 }
0x2d68   :  { %v2938_v41 = vpop.permute.xlu0 %2937 }
0x2d69   :  { %4409 = vmatmul.msk.f32.vlgmr.msra.gmra.mxu1 %vm304_vm0, %v2938_v41 }
0x2d6a   :  { %3313 = vmatpush.msra.mxu1 %v6025_v24 }
0x2d6c   :  { %3314 = vmatpush.msra.mxu1 %v6027_v59 }
0x2d6e   :  { %3315 = vmatpush.msra.mxu1 %v6030_v62 }
0x2d70   :  { %3316 = vmatpush.msra.mxu1 %v6034_v16 }
0x2de6   :  { %v2958_v28 = vpop.f32.mrf.mxu1 }
0x2de7   :  { %v2959_v29 = vadd.f32 %v2958_v28, %v6047_v0 }
0x2de9   :  { %4641 = vtanh.f32 %v2959_v29 }
0x2def   :  { %v4642_v2 = vpop.eup %4641 }
0x2df0   :  { %2966 = vrot.lane.b32.xlu1 %v4642_v2, %s5097_s20  ;;  %v2962_v13 = vmul.f32 0.5, %v4642_v2 }
0x2df2   :  { %v2963_v30 = vadd.f32 0.5, %v2962_v13 }
0x2df4   :  { %v2964_v20 = vmul.f32 %v2963_v30, %v6017_v34 }
0x2e62   :  { %v2967_v31 = vpop.permute.xlu1 %2966 }
0x2e63   :  { %v2969_v6 = vmul.f32 %v2967_v31, %v2963_v30 }
0x2e65   :  { %2971 = vrot.lane.b32.xlu2 %v2969_v6, %s5098_s21 }
0x2ebf   :  { %v2972_v23 = vpop.permute.xlu2 %2971 }
0x2ec0   :  { %v2974_v60 = vadd.f32 %v2972_v23, %v2964_v20 }
0x2ec2   :  { %4643 = vtanh.f32 %v2974_v60 }
0x2ec8   :  { %v4644_v42 = vpop.eup %4643 }
0x2ec9   :  { %2977 = vrot.lane.b32.xlu0 %v4644_v42, %s5097_s20 }
0x2f3b   :  { %v2978_v44 = vpop.permute.xlu0 %2977 }
0x2f3c   :  { %v2980_v46 = vmul.f32 %v2978_v44, %v2963_v30 }
0x2f3e   :  { %v4243_v47 = vrot.slane %v2980_v46, 4  ;;  %2982 = vrot.lane.b32.xlu1 %v2980_v46, %s5098_s21 }
0x2f40   :  { %v6175_v22 = vsel %vm4258_vm2, %v4257_v45, %v4243_v47 }
0x2fb0   :  { %v2983_v12 = vpop.permute.xlu1 %2982 }
0x2fb1   :  { %4410 = vmatmul.msk.f32.vlgmr.msrb.gmra.mxu2 %vm304_vm0, %v2983_v12 }
0x2fb2   :  { %3358 = vmatpush.msrb.mxu2 %v6054_v1 }
0x2fb4   :  { %3359 = vmatpush.msrb.mxu2 %v6056_v61 }
0x2fb6   :  { %3360 = vmatpush.msrb.mxu2 %v6059_v58 }
0x2fb8   :  { %3361 = vmatpush.msrb.mxu2 %v6062_v19 }
0x3034   :  { %v3003_v55 = vpop.f32.mrf.mxu2 }
0x3035   :  { %v3004_v33 = vadd.f32 %v3003_v55, %v6083_v17 }
0x3037   :  { %4645 = vtanh.f32 %v3004_v33 }
0x303d   :  { %v4646_v63 = vpop.eup %4645 }
0x303e   :  { %3011 = vrot.lane.b32.xlu2 %v4646_v63, %s5097_s20  ;;  %v3007_v36 = vmul.f32 0.5, %v4646_v63 }
0x3040   :  { %v3008_v18 = vadd.f32 0.5, %v3007_v36 }
0x3042   :  { %v3009_v38 = vmul.f32 %v3008_v18, %v5927_v26 }
0x3098   :  { %v3012_v3 = vpop.permute.xlu2 %3011 }
0x3099   :  { %v3014_v53 = vmul.f32 %v3012_v3, %v3008_v18 }
0x309b   :  { %3016 = vrot.lane.b32.xlu0 %v3014_v53, %s5098_s21 }
0x310d   :  { %v3017_v32 = vpop.permute.xlu0 %3016 }
0x310e   :  { %v3019_v51 = vadd.f32 %v3017_v32, %v3009_v38 }
0x3110   :  { %4647 = vtanh.f32 %v3019_v51 }
0x3116   :  { %v4648_v15 = vpop.eup %4647 }
0x3117   :  { %3022 = vrot.lane.b32.xlu1 %v4648_v15, %s5097_s20 }
0x3189   :  { %v3023_v14 = vpop.permute.xlu1 %3022 }
0x318a   :  { %v3025_v48 = vmul.f32 %v3023_v14, %v3008_v18 }
0x318c   :  { %3027 = vrot.lane.b32.xlu2 %v3025_v48, %s5098_s21 }
0x31e6   :  { %v3028_v9 = vpop.permute.xlu2 %3027 }
0x31e7   :  { %4411 = vmatmul.msk.f32.vlgmr.msrb.gmra.mxu3 %vm304_vm0, %v3028_v9 }
0x31e8   :  { %3403 = vmatpush.msrb.mxu3 %v5934_v8 }
0x31ea   :  { %3404 = vmatpush.msrb.mxu3 %v5937_v4 }
0x31ec   :  { %3405 = vmatpush.msrb.mxu3 %v5940_v5 }
0x31ee   :  { %3406 = vmatpush.msrb.mxu3 %v5943_v25 }
0x326a   :  { %v3048_v10 = vpop.f32.mrf.mxu3 }
0x326b   :  { %v3049_v49 = vadd.f32 %v3048_v10, %v5963_v37 }
0x326d   :  { %4649 = vtanh.f32 %v3049_v49 }
0x3273   :  { %v4650_v50 = vpop.eup %4649 }
0x3274   :  { %3056 = vrot.lane.b32.xlu0 %v4650_v50, %s5097_s20  ;;  %v3052_v21 = vmul.f32 0.5, %v4650_v50 }
0x3276   :  { %v3053_v7 = vadd.f32 0.5, %v3052_v21 }
0x3278   :  { %v3054_v8 = vmul.f32 %v3053_v7, %v5920_v57 }
0x32e6   :  { %v3057_v35 = vpop.permute.xlu0 %3056 }
0x32e7   :  { %v3059_v56 = vmul.f32 %v3057_v35, %v3053_v7 }
0x32e9   :  { %3061 = vrot.lane.b32.xlu1 %v3059_v56, %s5098_s21 }
0x335b   :  { %v3062_v4 = vpop.permute.xlu1 %3061 }
0x335c   :  { %v3064_v41 = vadd.f32 %v3062_v4, %v3054_v8 }
0x335e   :  { %4651 = vtanh.f32 %v3064_v41 }
0x3364   :  { %v4652_v5 = vpop.eup %4651 }
0x3365   :  { %3067 = vrot.lane.b32.xlu2 %v4652_v5, %s5097_s20 }
0x33bf   :  { %v3068_v25 = vpop.permute.xlu2 %3067 }
0x33c0   :  { %v3070_v28 = vmul.f32 %v3068_v25, %v3053_v7 }
0x33c2   :  { %3072 = vrot.lane.b32.xlu0 %v3070_v28, %s5098_s21 }
0x3434   :  { %v3073_v29 = vpop.permute.xlu0 %3072 }
0x3435   :  { %4412 = vmatmul.msk.f32.vlgmr.msra.gmra.mxu0 %vm304_vm0, %v3073_v29 }
0x3436   :  { %3448 = vmatpush.msra.mxu0 %v5985_v43 }
0x3438   :  { %3449 = vmatpush.msra.mxu0 %v5987_v11 }
0x343a   :  { %3450 = vmatpush.msra.mxu0 %v5990_v39 }
0x343c   :  { %3451 = vmatpush.msra.mxu0 %v5993_v40 }
0x34b2   :  { %v3093_v2 = vpop.f32.mrf.mxu0 }
0x34b3   :  { %v3094_v13 = vadd.f32 %v3093_v2, %v6009_v54  ;;  %v6237_v2 = vld [vmem:[#allocation11 + $0x38] sm:$0xff] }
0x34b5   :  { %4653 = vtanh.f32 %v3094_v13  ;;  %v6240_v13 = vld [vmem:[#allocation11 + $0x30] sm:$0xff] }
0x34bb   :  { %v4654_v30 = vpop.eup %4653 }
0x34bc   :  { %3101 = vrot.lane.b32.xlu1 %v4654_v30, %s5097_s20  ;;  %v3097_v31 = vmul.f32 0.5, %v4654_v30  ;;  %v6243_v30 = vld [vmem:[#allocation11 + $0x28] sm:$0xff] }
0x34be   :  { %v3098_v6 = vadd.f32 0.5, %v3097_v31  ;;  %v6246_v31 = vld [vmem:[#allocation11 + $0x20] sm:$0xff] }
0x34c0   :  { %v3099_v60 = vmul.f32 %v3098_v6, %v5975_v52 }
0x352e   :  { %v3102_v20 = vpop.permute.xlu1 %3101 }
0x352f   :  { %v3104_v23 = vmul.f32 %v3102_v20, %v3098_v6 }
0x3531   :  { %3106 = vrot.lane.b32.xlu2 %v3104_v23, %s5098_s21 }
0x358b   :  { %v3107_v42 = vpop.permute.xlu2 %3106 }
0x358c   :  { %v3109_v27 = vadd.f32 %v3107_v42, %v3099_v60 }
0x358e   :  { %4655 = vtanh.f32 %v3109_v27 }
0x3594   :  { %v4656_v44 = vpop.eup %4655 }
0x3595   :  { %3112 = vrot.lane.b32.xlu0 %v4656_v44, %s5097_s20 }
0x3607   :  { %v3113_v46 = vpop.permute.xlu0 %3112 }
0x3608   :  { %v3115_v47 = vmul.f32 %v3113_v46, %v3098_v6 }
0x360a   :  { %3117 = vrot.lane.b32.xlu1 %v3115_v47, %s5098_s21 }
0x367c   :  { %v3118_v45 = vpop.permute.xlu1 %3117 }
0x367d   :  { %4413 = vmatmul.msk.f32.vlgmr.msrb.gmra.mxu1 %vm304_vm0, %v3118_v45 }
0x367e   :  { %3493 = vmatpush.msrb.mxu1 %v6025_v24 }
0x3680   :  { %3494 = vmatpush.msrb.mxu1 %v6027_v59 }
0x3682   :  { %3495 = vmatpush.msrb.mxu1 %v6030_v62 }
0x3684   :  { %3496 = vmatpush.msrb.mxu1 %v6034_v16 }
0x36fa   :  { %v3138_v12 = vpop.f32.mrf.mxu1 }
0x36fb   :  { %v3139_v55 = vadd.f32 %v3138_v12, %v6047_v0 }
0x36fd   :  { %4657 = vtanh.f32 %v3139_v55 }
0x3703   :  { %v4658_v33 = vpop.eup %4657 }
0x3704   :  { %3146 = vrot.lane.b32.xlu2 %v4658_v33, %s5097_s20  ;;  %v3142_v63 = vmul.f32 0.5, %v4658_v33 }
0x3706   :  { %v3143_v36 = vadd.f32 0.5, %v3142_v63 }
0x3708   :  { %v3144_v53 = vmul.f32 %v3143_v36, %v6017_v34 }
0x375e   :  { %v3147_v18 = vpop.permute.xlu2 %3146 }
0x375f   :  { %v3149_v3 = vmul.f32 %v3147_v18, %v3143_v36 }
0x3761   :  { %3151 = vrot.lane.b32.xlu0 %v3149_v3, %s5098_s21 }
0x37d3   :  { %v3152_v38 = vpop.permute.xlu0 %3151 }
0x37d4   :  { %v3154_v32 = vadd.f32 %v3152_v38, %v3144_v53 }
0x37d6   :  { %4659 = vtanh.f32 %v3154_v32 }
0x37dc   :  { %v4660_v51 = vpop.eup %4659 }
0x37dd   :  { %3157 = vrot.lane.b32.xlu1 %v4660_v51, %s5097_s20 }
0x384f   :  { %v3158_v15 = vpop.permute.xlu1 %3157 }
0x3850   :  { %v3160_v14 = vmul.f32 %v3158_v15, %v3143_v36 }
0x3852   :  { %v4245_v48 = vrot.slane %v3160_v14, 2  ;;  %3162 = vrot.lane.b32.xlu2 %v3160_v14, %s5098_s21 }
0x3854   :  { %v6223_v9 = vsel %vm4260_vm3, %v6175_v22, %v4245_v48 }
0x38ac   :  { %v3163_v10 = vpop.permute.xlu2 %3162 }
0x38ad   :  { %4414 = vmatmul.msk.f32.vlgmr.msra.gmra.mxu2 %vm304_vm0, %v3163_v10 }
0x38ae   :  { %3538 = vmatpush.msra.mxu2 %v6054_v1 }
0x38b0   :  { %3539 = vmatpush.msra.mxu2 %v6056_v61 }
0x38b2   :  { %3540 = vmatpush.msra.mxu2 %v6059_v58 }
0x38b4   :  { %3541 = vmatpush.msra.mxu2 %v6062_v19 }
0x3930   :  { %v3183_v49 = vpop.f32.mrf.mxu2 }
0x3931   :  { %v3184_v50 = vadd.f32 %v3183_v49, %v6083_v17 }
0x3933   :  { %4661 = vtanh.f32 %v3184_v50 }
0x3939   :  { %v4662_v21 = vpop.eup %4661 }
0x393a   :  { %3191 = vrot.lane.b32.xlu0 %v4662_v21, %s5097_s20  ;;  %v3187_v22 = vmul.f32 0.5, %v4662_v21 }
0x393c   :  { %v3188_v7 = vadd.f32 0.5, %v3187_v22 }
0x393e   :  { %v3189_v8 = vmul.f32 %v3188_v7, %v5927_v26 }
0x39ac   :  { %v3192_v35 = vpop.permute.xlu0 %3191 }
0x39ad   :  { %v3194_v56 = vmul.f32 %v3192_v35, %v3188_v7 }
0x39af   :  { %3196 = vrot.lane.b32.xlu1 %v3194_v56, %s5098_s21 }
0x3a21   :  { %v3197_v4 = vpop.permute.xlu1 %3196 }
0x3a22   :  { %v3199_v41 = vadd.f32 %v3197_v4, %v3189_v8 }
0x3a24   :  { %4663 = vtanh.f32 %v3199_v41 }
0x3a2a   :  { %v4664_v5 = vpop.eup %4663 }
0x3a2b   :  { %3202 = vrot.lane.b32.xlu2 %v4664_v5, %s5097_s20 }
0x3a85   :  { %v3203_v25 = vpop.permute.xlu2 %3202 }
0x3a86   :  { %v3205_v28 = vmul.f32 %v3203_v25, %v3188_v7 }
0x3a88   :  { %3207 = vrot.lane.b32.xlu0 %v3205_v28, %s5098_s21 }
0x3afa   :  { %v3208_v29 = vpop.permute.xlu0 %3207 }
0x3afb   :  { %4415 = vmatmul.msk.f32.vlgmr.msra.gmra.mxu3 %vm304_vm0, %v3208_v29 }
0x3afc   :  { %3583 = vmatpush.msra.mxu3 %v6237_v2 }
0x3afe   :  { %3584 = vmatpush.msra.mxu3 %v6240_v13 }
0x3b00   :  { %3585 = vmatpush.msra.mxu3 %v6243_v30 }
0x3b02   :  { %3586 = vmatpush.msra.mxu3 %v6246_v31 }
0x3b7e   :  { %v3228_v6 = vpop.f32.mrf.mxu3 }
0x3b7f   :  { %v3229_v20 = vadd.f32 %v3228_v6, %v5963_v37 }
0x3b81   :  { %4665 = vtanh.f32 %v3229_v20 }
0x3b87   :  { %v4666_v23 = vpop.eup %4665 }
0x3b88   :  { %3236 = vrot.lane.b32.xlu1 %v4666_v23, %s5097_s20  ;;  %v3232_v60 = vmul.f32 0.5, %v4666_v23 }
0x3b8a   :  { %v3233_v42 = vadd.f32 0.5, %v3232_v60 }
0x3b8c   :  { %v3234_v46 = vmul.f32 %v3233_v42, %v5920_v57 }
0x3bfa   :  { %v3237_v27 = vpop.permute.xlu1 %3236 }
0x3bfb   :  { %v3239_v44 = vmul.f32 %v3237_v27, %v3233_v42 }
0x3bfd   :  { %3241 = vrot.lane.b32.xlu2 %v3239_v44, %s5098_s21 }
0x3c57   :  { %v3242_v47 = vpop.permute.xlu2 %3241 }
0x3c58   :  { %v3244_v45 = vadd.f32 %v3242_v47, %v3234_v46 }
0x3c5a   :  { %4667 = vtanh.f32 %v3244_v45 }
0x3c60   :  { %v4668_v12 = vpop.eup %4667 }
0x3c61   :  { %3247 = vrot.lane.b32.xlu0 %v4668_v12, %s5097_s20 }
0x3cd3   :  { %v3248_v55 = vpop.permute.xlu0 %3247 }
0x3cd4   :  { %v3250_v33 = vmul.f32 %v3248_v55, %v3233_v42 }
0x3cd6   :  { %3252 = vrot.lane.b32.xlu1 %v3250_v33, %s5098_s21 }
0x3d48   :  { %v3253_v63 = vpop.permute.xlu1 %3252 }
0x3d49   :  { %4416 = vmatmul.msk.f32.vlgmr.msrb.gmra.mxu0 %vm304_vm0, %v3253_v63 }
0x3d4a   :  { %3628 = vmatpush.msrb.mxu0 %v5985_v43 }
0x3d4c   :  { %3629 = vmatpush.msrb.mxu0 %v5987_v11 }
0x3d4e   :  { %3630 = vmatpush.msrb.mxu0 %v5990_v39 }
0x3d50   :  { %3631 = vmatpush.msrb.mxu0 %v5993_v40 }
0x3dc6   :  { %v3273_v36 = vpop.f32.mrf.mxu0 }
0x3dc7   :  { %v3274_v18 = vadd.f32 %v3273_v36, %v6009_v54 }
0x3dc9   :  { %4669 = vtanh.f32 %v3274_v18 }
0x3dcf   :  { %v4670_v3 = vpop.eup %4669 }
0x3dd0   :  { %3281 = vrot.lane.b32.xlu2 %v4670_v3, %s5097_s20  ;;  %v3277_v53 = vmul.f32 0.5, %v4670_v3 }
0x3dd2   :  { %v3278_v38 = vadd.f32 0.5, %v3277_v53 }
0x3dd4   :  { %v3279_v43 = vmul.f32 %v3278_v38, %v5975_v52 }
0x3e2a   :  { %v3282_v32 = vpop.permute.xlu2 %3281 }
0x3e2b   :  { %v3284_v51 = vmul.f32 %v3282_v32, %v3278_v38  ;;  %v6303_v32 = vld [vmem:[#allocation11 + $0x58] sm:$0xff] }
0x3e2d   :  { %3286 = vrot.lane.b32.xlu0 %v3284_v51, %s5098_s21  ;;  %v6306_v51 = vld [vmem:[#allocation11 + $0x50] sm:$0xff] }
0x3e9f   :  { %v3287_v11 = vpop.permute.xlu0 %3286 }
0x3ea0   :  { %v3289_v15 = vadd.f32 %v3287_v11, %v3279_v43  ;;  %v6309_v43 = vld [vmem:[#allocation11 + $0x48] sm:$0xff]  ;;  %v6312_v11 = vld [vmem:[#allocation11 + $0x40] sm:$0xff] }
0x3ea2   :  { %4671 = vtanh.f32 %v3289_v15 }
0x3ea8   :  { %v4672_v39 = vpop.eup %4671 }
0x3ea9   :  { %3292 = vrot.lane.b32.xlu1 %v4672_v39, %s5097_s20 }
0x3f1b   :  { %v3293_v40 = vpop.permute.xlu1 %3292 }
0x3f1c   :  { %v3295_v14 = vmul.f32 %v3293_v40, %v3278_v38 }
0x3f1e   :  { %3297 = vrot.lane.b32.xlu2 %v3295_v14, %s5098_s21 }
0x3f78   :  { %v3298_v48 = vpop.permute.xlu2 %3297 }
0x3f79   :  { %4417 = vmatmul.msk.f32.vlgmr.msra.gmra.mxu1 %vm304_vm0, %v3298_v48 }
0x3f7a   :  { %3673 = vmatpush.msra.mxu1 %v6025_v24 }
0x3f7c   :  { %3674 = vmatpush.msra.mxu1 %v6027_v59 }
0x3f7e   :  { %3675 = vmatpush.msra.mxu1 %v6030_v62 }
0x3f80   :  { %3676 = vmatpush.msra.mxu1 %v6034_v16 }
0x3ff6   :  { %v3318_v10 = vpop.f32.mrf.mxu1 }
0x3ff7   :  { %v3319_v49 = vadd.f32 %v3318_v10, %v6047_v0 }
0x3ff9   :  { %4673 = vtanh.f32 %v3319_v49 }
0x3fff   :  { %v4674_v50 = vpop.eup %4673 }
0x4000   :  { %3326 = vrot.lane.b32.xlu0 %v4674_v50, %s5097_s20  ;;  %v3322_v21 = vmul.f32 0.5, %v4674_v50 }
0x4002   :  { %v3323_v22 = vadd.f32 0.5, %v3322_v21 }
0x4004   :  { %v3324_v24 = vmul.f32 %v3323_v22, %v6017_v34 }
0x4072   :  { %v3327_v7 = vpop.permute.xlu0 %3326 }
0x4073   :  { %v3329_v35 = vmul.f32 %v3327_v7, %v3323_v22 }
0x4075   :  { %3331 = vrot.lane.b32.xlu1 %v3329_v35, %s5098_s21 }
0x40e7   :  { %v3332_v59 = vpop.permute.xlu1 %3331 }
0x40e8   :  { %v3334_v56 = vadd.f32 %v3332_v59, %v3324_v24 }
0x40ea   :  { %4675 = vtanh.f32 %v3334_v56  ;;  %v6322_v56 = vld [vmem:[#allocation11 + $0x78] sm:$0xff] }
0x40f0   :  { %v4676_v62 = vpop.eup %4675 }
0x40f1   :  { %3337 = vrot.lane.b32.xlu2 %v4676_v62, %s5097_s20  ;;  %v6325_v62 = vld [vmem:[#allocation11 + $0x70] sm:$0xff] }
0x414b   :  { %v3338_v16 = vpop.permute.xlu2 %3337 }
0x414c   :  { %v6276_v8 = vmul.f32 %v3338_v16, %v3323_v22  ;;  %v6328_v16 = vld [vmem:[#allocation11 + $0x68] sm:$0xff] }
0x414e   :  { %3342 = vrot.lane.b32.xlu0 %v6276_v8, %s5098_s21 }
0x41c0   :  { %v3343_v4 = vpop.permute.xlu0 %3342 }
0x41c1   :  { %4418 = vmatmul.msk.f32.vlgmr.msrb.gmra.mxu2 %vm304_vm0, %v3343_v4  ;;  %v6331_v4 = vld [vmem:[#allocation11 + $0x60] sm:$0xff] }
0x41c2   :  { %3718 = vmatpush.msrb.mxu2 %v6054_v1 }
0x41c4   :  { %3719 = vmatpush.msrb.mxu2 %v6056_v61 }
0x41c6   :  { %3720 = vmatpush.msrb.mxu2 %v6059_v58 }
0x41c8   :  { %3721 = vmatpush.msrb.mxu2 %v6062_v19 }
0x4244   :  { %v3363_v41 = vpop.f32.mrf.mxu2 }
0x4245   :  { %v3364_v5 = vadd.f32 %v3363_v41, %v6083_v17 }
0x4247   :  { %4677 = vtanh.f32 %v3364_v5 }
0x424d   :  { %v4678_v25 = vpop.eup %4677 }
0x424e   :  { %3371 = vrot.lane.b32.xlu1 %v4678_v25, %s5097_s20  ;;  %v3367_v28 = vmul.f32 0.5, %v4678_v25 }
0x4250   :  { %v3368_v29 = vadd.f32 0.5, %v3367_v28 }
0x4252   :  { %v3369_v1 = vmul.f32 %v3368_v29, %v5927_v26 }
0x42c0   :  { %v3372_v6 = vpop.permute.xlu1 %3371 }
0x42c1   :  { %v3374_v20 = vmul.f32 %v3372_v6, %v3368_v29 }
0x42c3   :  { %3376 = vrot.lane.b32.xlu2 %v3374_v20, %s5098_s21 }
0x431d   :  { %v3377_v61 = vpop.permute.xlu2 %3376 }
0x431e   :  { %v3379_v23 = vadd.f32 %v3377_v61, %v3369_v1 }
0x4320   :  { %4679 = vtanh.f32 %v3379_v23 }
0x4326   :  { %v4680_v58 = vpop.eup %4679 }
0x4327   :  { %3382 = vrot.lane.b32.xlu0 %v4680_v58, %s5097_s20 }
0x4399   :  { %v3383_v19 = vpop.permute.xlu0 %3382 }
0x439a   :  { %v3385_v60 = vmul.f32 %v3383_v19, %v3368_v29 }
0x439c   :  { %3387 = vrot.lane.b32.xlu1 %v3385_v60, %s5098_s21 }
0x440e   :  { %v3388_v42 = vpop.permute.xlu1 %3387 }
0x440f   :  { %4419 = vmatmul.msk.f32.vlgmr.msrb.gmra.mxu3 %vm304_vm0, %v3388_v42 }
0x4410   :  { %3763 = vmatpush.msrb.mxu3 %v6237_v2 }
0x4412   :  { %3764 = vmatpush.msrb.mxu3 %v6240_v13 }
0x4414   :  { %3765 = vmatpush.msrb.mxu3 %v6243_v30 }
0x4416   :  { %3766 = vmatpush.msrb.mxu3 %v6246_v31 }
0x4492   :  { %v3408_v27 = vpop.f32.mrf.mxu3 }
0x4493   :  { %v3409_v44 = vadd.f32 %v3408_v27, %v5963_v37  ;;  %v6344_v27 = vld [vmem:[#allocation16 + $0x18] sm:$0xff] }
0x4495   :  { %4681 = vtanh.f32 %v3409_v44  ;;  %v6347_v44 = vld [vmem:[#allocation16 + $0x10] sm:$0xff] }
0x449b   :  { %v4682_v46 = vpop.eup %4681 }
0x449c   :  { %3416 = vrot.lane.b32.xlu2 %v4682_v46, %s5097_s20  ;;  %v3412_v47 = vmul.f32 0.5, %v4682_v46  ;;  %v6350_v46 = vld [vmem:[#allocation16 + $0x8] sm:$0xff] }
0x449e   :  { %v3413_v45 = vadd.f32 0.5, %v3412_v47  ;;  %v6353_v47 = vld [vmem:[#allocation16] sm:$0xff] }
0x44a0   :  { %v3414_v33 = vmul.f32 %v3413_v45, %v5920_v57 }
0x44f6   :  { %v3417_v12 = vpop.permute.xlu2 %3416 }
0x44f7   :  { %v3419_v55 = vmul.f32 %v3417_v12, %v3413_v45 }
0x44f9   :  { %3421 = vrot.lane.b32.xlu0 %v3419_v55, %s5098_s21 }
0x456b   :  { %v3422_v63 = vpop.permute.xlu0 %3421 }
0x456c   :  { %v3424_v36 = vadd.f32 %v3422_v63, %v3414_v33 }
0x456e   :  { %4683 = vtanh.f32 %v3424_v36 }
0x4574   :  { %v4684_v18 = vpop.eup %4683 }
0x4575   :  { %3427 = vrot.lane.b32.xlu1 %v4684_v18, %s5097_s20 }
0x45e7   :  { %v3428_v3 = vpop.permute.xlu1 %3427 }
0x45e8   :  { %v3430_v53 = vmul.f32 %v3428_v3, %v3413_v45 }
0x45ea   :  { %3432 = vrot.lane.b32.xlu2 %v3430_v53, %s5098_s21 }
0x4644   :  { %v3433_v38 = vpop.permute.xlu2 %3432 }
0x4645   :  { %4420 = vmatmul.msk.f32.vlgmr.msra.gmra.mxu0 %vm304_vm0, %v3433_v38 }
0x4646   :  { %3808 = vmatpush.msra.mxu0 %v6303_v32 }
0x4648   :  { %3809 = vmatpush.msra.mxu0 %v6306_v51 }
0x464a   :  { %3810 = vmatpush.msra.mxu0 %v6309_v43 }
0x464c   :  { %3811 = vmatpush.msra.mxu0 %v6312_v11 }
0x46c2   :  { %v3453_v15 = vpop.f32.mrf.mxu0 }
0x46c3   :  { %v3454_v39 = vadd.f32 %v3453_v15, %v6009_v54 }
0x46c5   :  { %4685 = vtanh.f32 %v3454_v39 }
0x46cb   :  { %v4686_v40 = vpop.eup %4685 }
0x46cc   :  { %3461 = vrot.lane.b32.xlu0 %v4686_v40, %s5097_s20  ;;  %v3457_v14 = vmul.f32 0.5, %v4686_v40 }
0x46ce   :  { %v3458_v48 = vadd.f32 0.5, %v3457_v14 }
0x46d0   :  { %v3459_v50 = vmul.f32 %v3458_v48, %v5975_v52 }
0x473e   :  { %v3462_v10 = vpop.permute.xlu0 %3461 }
0x473f   :  { %v3464_v49 = vmul.f32 %v3462_v10, %v3458_v48 }
0x4741   :  { %3466 = vrot.lane.b32.xlu1 %v3464_v49, %s5098_s21 }
0x47b3   :  { %v3467_v21 = vpop.permute.xlu1 %3466 }
0x47b4   :  { %v3469_v22 = vadd.f32 %v3467_v21, %v3459_v50 }
0x47b6   :  { %4687 = vtanh.f32 %v3469_v22 }
0x47bc   :  { %v4688_v7 = vpop.eup %4687 }
0x47bd   :  { %3472 = vrot.lane.b32.xlu2 %v4688_v7, %s5097_s20 }
0x4817   :  { %v3473_v35 = vpop.permute.xlu2 %3472 }
0x4818   :  { %v3475_v24 = vmul.f32 %v3473_v35, %v3458_v48 }
0x481a   :  { %3477 = vrot.lane.b32.xlu0 %v3475_v24, %s5098_s21 }
0x488c   :  { %v3478_v59 = vpop.permute.xlu0 %3477 }
0x488d   :  { %4421 = vmatmul.msk.f32.vlgmr.msrb.gmra.mxu1 %vm304_vm0, %v3478_v59 }
0x488e   :  { %3853 = vmatpush.msrb.mxu1 %v6322_v56 }
0x4890   :  { %3854 = vmatpush.msrb.mxu1 %v6325_v62 }
0x4892   :  { %3855 = vmatpush.msrb.mxu1 %v6328_v16 }
0x4894   :  { %3856 = vmatpush.msrb.mxu1 %v6331_v4 }
0x490a   :  { %v3498_v41 = vpop.f32.mrf.mxu1 }
0x490b   :  { %v3499_v5 = vadd.f32 %v3498_v41, %v6047_v0 }
0x490d   :  { %4689 = vtanh.f32 %v3499_v5 }
0x4913   :  { %v4690_v25 = vpop.eup %4689 }
0x4914   :  { %3506 = vrot.lane.b32.xlu1 %v4690_v25, %s5097_s20  ;;  %v3502_v28 = vmul.f32 0.5, %v4690_v25 }
0x4916   :  { %v3503_v29 = vadd.f32 0.5, %v3502_v28 }
0x4918   :  { %v3504_v1 = vmul.f32 %v3503_v29, %v6017_v34 }
0x4986   :  { %v3507_v6 = vpop.permute.xlu1 %3506 }
0x4987   :  { %v3509_v20 = vmul.f32 %v3507_v6, %v3503_v29 }
0x4989   :  { %3511 = vrot.lane.b32.xlu2 %v3509_v20, %s5098_s21 }
0x49e3   :  { %v3512_v61 = vpop.permute.xlu2 %3511 }
0x49e4   :  { %v3514_v23 = vadd.f32 %v3512_v61, %v3504_v1 }
0x49e6   :  { %4691 = vtanh.f32 %v3514_v23 }
0x49ec   :  { %v4692_v58 = vpop.eup %4691 }
0x49ed   :  { %3517 = vrot.lane.b32.xlu0 %v4692_v58, %s5097_s20 }
0x4a5f   :  { %v3518_v19 = vpop.permute.xlu0 %3517 }
0x4a60   :  { %v6339_v60 = vmul.f32 %v3518_v19, %v3503_v29 }
0x4a62   :  { %3522 = vrot.lane.b32.xlu1 %v6339_v60, %s5098_s21 }
0x4ad4   :  { %v3523_v42 = vpop.permute.xlu1 %3522 }
0x4ad5   :  { %4422 = vmatmul.msk.f32.vlgmr.msra.gmra.mxu2 %vm304_vm0, %v3523_v42 }
0x4ad6   :  { %3898 = vmatpush.msra.mxu2 %v6344_v27 }
0x4ad8   :  { %3899 = vmatpush.msra.mxu2 %v6347_v44 }
0x4ada   :  { %3900 = vmatpush.msra.mxu2 %v6350_v46 }
0x4adc   :  { %3901 = vmatpush.msra.mxu2 %v6353_v47 }
0x4b58   :  { %v3543_v45 = vpop.f32.mrf.mxu2 }
0x4b59   :  { %v3544_v12 = vadd.f32 %v3543_v45, %v6083_v17 }
0x4b5b   :  { %4693 = vtanh.f32 %v3544_v12 }
0x4b61   :  { %v4694_v55 = vpop.eup %4693 }
0x4b62   :  { %3551 = vrot.lane.b32.xlu2 %v4694_v55, %s5097_s20  ;;  %v3547_v33 = vmul.f32 0.5, %v4694_v55 }
0x4b64   :  { %v3548_v63 = vadd.f32 0.5, %v3547_v33 }
0x4b66   :  { %v3549_v3 = vmul.f32 %v3548_v63, %v5927_v26 }
0x4bbc   :  { %v3552_v36 = vpop.permute.xlu2 %3551 }
0x4bbd   :  { %v3554_v18 = vmul.f32 %v3552_v36, %v3548_v63 }
0x4bbf   :  { %3556 = vrot.lane.b32.xlu0 %v3554_v18, %s5098_s21 }
0x4c31   :  { %v3557_v53 = vpop.permute.xlu0 %3556 }
0x4c32   :  { %v3559_v38 = vadd.f32 %v3557_v53, %v3549_v3 }
0x4c34   :  { %4695 = vtanh.f32 %v3559_v38 }
0x4c3a   :  { %v4696_v15 = vpop.eup %4695 }
0x4c3b   :  { %3562 = vrot.lane.b32.xlu1 %v4696_v15, %s5097_s20 }
0x4cad   :  { %v3563_v39 = vpop.permute.xlu1 %3562 }
0x4cae   :  { %v3565_v40 = vmul.f32 %v3563_v39, %v3548_v63 }
0x4cb0   :  { %3567 = vrot.lane.b32.xlu2 %v3565_v40, %s5098_s21 }
0x4d0a   :  { %v3568_v14 = vpop.permute.xlu2 %3567 }
0x4d0b   :  { %4423 = vmatmul.msk.f32.vlgmr.msra.gmra.mxu3 %vm304_vm0, %v3568_v14 }
0x4d0c   :  { %3943 = vmatpush.msra.mxu3 %v6237_v2 }
0x4d0e   :  { %3944 = vmatpush.msra.mxu3 %v6240_v13 }
0x4d10   :  { %3945 = vmatpush.msra.mxu3 %v6243_v30 }
0x4d12   :  { %3946 = vmatpush.msra.mxu3 %v6246_v31 }
0x4d8e   :  { %v3588_v48 = vpop.f32.mrf.mxu3 }
0x4d8f   :  { %v3589_v10 = vadd.f32 %v3588_v48, %v5963_v37 }
0x4d91   :  { %4697 = vtanh.f32 %v3589_v10 }
0x4d97   :  { %v4698_v49 = vpop.eup %4697 }
0x4d98   :  { %3596 = vrot.lane.b32.xlu0 %v4698_v49, %s5097_s20  ;;  %v3592_v50 = vmul.f32 0.5, %v4698_v49  ;;  %v4247_v49 = vrot.slane %v6339_v60, 6 }
0x4d9a   :  { %v3593_v21 = vadd.f32 0.5, %v3592_v50 }
0x4d9c   :  { %v3594_v35 = vmul.f32 %v3593_v21, %v5920_v57 }
0x4e0a   :  { %v3597_v22 = vpop.permute.xlu0 %3596 }
0x4e0b   :  { %v3599_v7 = vmul.f32 %v3597_v22, %v3593_v21 }
0x4e0d   :  { %3601 = vrot.lane.b32.xlu1 %v3599_v7, %s5098_s21  ;;  %v4262_v7 = vsel %vm4256_vm1, %v6276_v8, %v4247_v49 }
0x4e7f   :  { %v3602_v24 = vpop.permute.xlu1 %3601 }
0x4e80   :  { %v3604_v59 = vadd.f32 %v3602_v24, %v3594_v35 }
0x4e82   :  { %4699 = vtanh.f32 %v3604_v59 }
0x4e88   :  { %v4700_v41 = vpop.eup %4699 }
0x4e89   :  { %3607 = vrot.lane.b32.xlu2 %v4700_v41, %s5097_s20 }
0x4ee3   :  { %v3608_v5 = vpop.permute.xlu2 %3607 }
0x4ee4   :  { %v3610_v25 = vmul.f32 %v3608_v5, %v3593_v21 }
0x4ee6   :  { %3612 = vrot.lane.b32.xlu0 %v3610_v25, %s5098_s21 }
0x4f58   :  { %v3613_v28 = vpop.permute.xlu0 %3612 }
0x4f59   :  { %4424 = vmatmul.msk.f32.vlgmr.msrb.gmra.mxu0 %vm304_vm0, %v3613_v28 }
0x4f5a   :  { %3988 = vmatpush.msrb.mxu0 %v6303_v32 }
0x4f5c   :  { %3989 = vmatpush.msrb.mxu0 %v6306_v51 }
0x4f5e   :  { %3990 = vmatpush.msrb.mxu0 %v6309_v43 }
0x4f60   :  { %3991 = vmatpush.msrb.mxu0 %v6312_v11 }
0x4fd6   :  { %v3633_v29 = vpop.f32.mrf.mxu0 }
0x4fd7   :  { %v3634_v6 = vadd.f32 %v3633_v29, %v6009_v54 }
0x4fd9   :  { %4701 = vtanh.f32 %v3634_v6 }
0x4fdf   :  { %v4702_v20 = vpop.eup %4701 }
0x4fe0   :  { %3641 = vrot.lane.b32.xlu1 %v4702_v20, %s5097_s20  ;;  %v3637_v1 = vmul.f32 0.5, %v4702_v20 }
0x4fe2   :  { %v3638_v61 = vadd.f32 0.5, %v3637_v1 }
0x4fe4   :  { %v3639_v19 = vmul.f32 %v3638_v61, %v5975_v52 }
0x5052   :  { %v3642_v23 = vpop.permute.xlu1 %3641 }
0x5053   :  { %v3644_v58 = vmul.f32 %v3642_v23, %v3638_v61 }
0x5055   :  { %3646 = vrot.lane.b32.xlu2 %v3644_v58, %s5098_s21 }
0x50af   :  { %v3647_v42 = vpop.permute.xlu2 %3646 }
0x50b0   :  { %v3649_v45 = vadd.f32 %v3647_v42, %v3639_v19 }
0x50b2   :  { %4703 = vtanh.f32 %v3649_v45 }
0x50b8   :  { %v4704_v12 = vpop.eup %4703 }
0x50b9   :  { %3652 = vrot.lane.b32.xlu0 %v4704_v12, %s5097_s20 }
0x512b   :  { %v3653_v55 = vpop.permute.xlu0 %3652 }
0x512c   :  { %v3655_v33 = vmul.f32 %v3653_v55, %v3638_v61 }
0x512e   :  { %3657 = vrot.lane.b32.xlu1 %v3655_v33, %s5098_s21 }
0x51a0   :  { %v3658_v63 = vpop.permute.xlu1 %3657 }
0x51a1   :  { %4425 = vmatmul.msk.f32.vlgmr.msra.gmra.mxu1 %vm304_vm0, %v3658_v63 }
0x51a2   :  { %4033 = vmatpush.msra.mxu1 %v6322_v56 }
0x51a4   :  { %4034 = vmatpush.msra.mxu1 %v6325_v62 }
0x51a6   :  { %4035 = vmatpush.msra.mxu1 %v6328_v16 }
0x51a8   :  { %4036 = vmatpush.msra.mxu1 %v6331_v4 }
0x521e   :  { %v3678_v36 = vpop.f32.mrf.mxu1 }
0x521f   :  { %v3679_v18 = vadd.f32 %v3678_v36, %v6047_v0 }
0x5221   :  { %4705 = vtanh.f32 %v3679_v18 }
0x5227   :  { %v4706_v3 = vpop.eup %4705 }
0x5228   :  { %3686 = vrot.lane.b32.xlu2 %v4706_v3, %s5097_s20  ;;  %v3682_v53 = vmul.f32 0.5, %v4706_v3 }
0x522a   :  { %v3683_v38 = vadd.f32 0.5, %v3682_v53 }
0x522c   :  { %v3684_v40 = vmul.f32 %v3683_v38, %v6017_v34 }
0x5282   :  { %v3687_v15 = vpop.permute.xlu2 %3686 }
0x5283   :  { %v3689_v39 = vmul.f32 %v3687_v15, %v3683_v38 }
0x5285   :  { %3691 = vrot.lane.b32.xlu0 %v3689_v39, %s5098_s21 }
0x52f7   :  { %v3692_v14 = vpop.permute.xlu0 %3691 }
0x52f8   :  { %v3694_v48 = vadd.f32 %v3692_v14, %v3684_v40 }
0x52fa   :  { %4707 = vtanh.f32 %v3694_v48 }
0x5300   :  { %v4708_v10 = vpop.eup %4707 }
0x5301   :  { %3697 = vrot.lane.b32.xlu1 %v4708_v10, %s5097_s20 }
0x5373   :  { %v3698_v50 = vpop.permute.xlu1 %3697 }
0x5374   :  { %v3700_v21 = vmul.f32 %v3698_v50, %v3683_v38 }
0x5376   :  { %v4249_v22 = vrot.slane %v3700_v21, 4  ;;  %3702 = vrot.lane.b32.xlu2 %v3700_v21, %s5098_s21 }
0x5378   :  { %v6399_v35 = vsel %vm4258_vm2, %v4262_v7, %v4249_v22 }
0x53d0   :  { %v3703_v24 = vpop.permute.xlu2 %3702 }
0x53d1   :  { %4426 = vmatmul.msk.f32.vlgmr.msrb.gmra.mxu2 %vm304_vm0, %v3703_v24 }
0x53d2   :  { %4078 = vmatpush.msrb.mxu2 %v6344_v27 }
0x53d4   :  { %4079 = vmatpush.msrb.mxu2 %v6347_v44 }
0x53d6   :  { %4080 = vmatpush.msrb.mxu2 %v6350_v46 }
0x53d8   :  { %4081 = vmatpush.msrb.mxu2 %v6353_v47 }
0x5454   :  { %v3723_v60 = vpop.f32.mrf.mxu2 }
0x5455   :  { %v3724_v59 = vadd.f32 %v3723_v60, %v6083_v17 }
0x5457   :  { %4709 = vtanh.f32 %v3724_v59 }
0x545d   :  { %v4710_v41 = vpop.eup %4709 }
0x545e   :  { %3731 = vrot.lane.b32.xlu0 %v4710_v41, %s5097_s20  ;;  %v3727_v8 = vmul.f32 0.5, %v4710_v41 }
0x5460   :  { %v3728_v5 = vadd.f32 0.5, %v3727_v8 }
0x5462   :  { %v3729_v27 = vmul.f32 %v3728_v5, %v5927_v26 }
0x54d0   :  { %v3732_v25 = vpop.permute.xlu0 %3731 }
0x54d1   :  { %v3734_v28 = vmul.f32 %v3732_v25, %v3728_v5 }
0x54d3   :  { %3736 = vrot.lane.b32.xlu1 %v3734_v28, %s5098_s21 }
0x5545   :  { %v3737_v44 = vpop.permute.xlu1 %3736 }
0x5546   :  { %v3739_v29 = vadd.f32 %v3737_v44, %v3729_v27 }
0x5548   :  { %4711 = vtanh.f32 %v3739_v29 }
0x554e   :  { %v4712_v46 = vpop.eup %4711 }
0x554f   :  { %3742 = vrot.lane.b32.xlu2 %v4712_v46, %s5097_s20 }
0x55a9   :  { %v3743_v47 = vpop.permute.xlu2 %3742 }
0x55aa   :  { %v3745_v6 = vmul.f32 %v3743_v47, %v3728_v5 }
0x55ac   :  { %3747 = vrot.lane.b32.xlu0 %v3745_v6, %s5098_s21 }
0x561e   :  { %v3748_v20 = vpop.permute.xlu0 %3747 }
0x561f   :  { %4427 = vmatmul.msk.f32.vlgmr.msrb.gmra.mxu3 %vm304_vm0, %v3748_v20 }
0x5620   :  { %4123 = vmatpush.msrb.mxu3 %v6237_v2 }
0x5622   :  { %4124 = vmatpush.msrb.mxu3 %v6240_v13 }
0x5624   :  { %4125 = vmatpush.msrb.mxu3 %v6243_v30 }
0x5626   :  { %4126 = vmatpush.msrb.mxu3 %v6246_v31 }
0x56a2   :  { %v3768_v1 = vpop.f32.mrf.mxu3 }
0x56a3   :  { %v3769_v61 = vadd.f32 %v3768_v1, %v5963_v37 }
0x56a5   :  { %4713 = vtanh.f32 %v3769_v61 }
0x56ab   :  { %v4714_v23 = vpop.eup %4713 }
0x56ac   :  { %3776 = vrot.lane.b32.xlu1 %v4714_v23, %s5097_s20  ;;  %v3772_v58 = vmul.f32 0.5, %v4714_v23 }
0x56ae   :  { %v3773_v19 = vadd.f32 0.5, %v3772_v58 }
0x56b0   :  { %v3774_v2 = vmul.f32 %v3773_v19, %v5920_v57 }
0x571e   :  { %v3777_v42 = vpop.permute.xlu1 %3776 }
0x571f   :  { %v3779_v45 = vmul.f32 %v3777_v42, %v3773_v19 }
0x5721   :  { %3781 = vrot.lane.b32.xlu2 %v3779_v45, %s5098_s21 }
0x577b   :  { %v3782_v13 = vpop.permute.xlu2 %3781 }
0x577c   :  { %v3784_v12 = vadd.f32 %v3782_v13, %v3774_v2 }
0x577e   :  { %4715 = vtanh.f32 %v3784_v12 }
0x5784   :  { %v4716_v30 = vpop.eup %4715 }
0x5785   :  { %3787 = vrot.lane.b32.xlu0 %v4716_v30, %s5097_s20 }
0x57f7   :  { %v3788_v31 = vpop.permute.xlu0 %3787 }
0x57f8   :  { %v3790_v55 = vmul.f32 %v3788_v31, %v3773_v19 }
0x57fa   :  { %3792 = vrot.lane.b32.xlu1 %v3790_v55, %s5098_s21 }
0x586c   :  { %v3793_v33 = vpop.permute.xlu1 %3792 }
0x586d   :  { %4428 = vmatmul.msk.f32.vlgmr.msra.gmra.mxu0 %vm304_vm0, %v3793_v33 }
0x586e   :  { %4168 = vmatpush.msra.mxu0 %v6303_v32 }
0x5870   :  { %4169 = vmatpush.msra.mxu0 %v6306_v51 }
0x5872   :  { %4170 = vmatpush.msra.mxu0 %v6309_v43 }
0x5874   :  { %4171 = vmatpush.msra.mxu0 %v6312_v11 }
0x58ea   :  { %v3813_v63 = vpop.f32.mrf.mxu0 }
0x58eb   :  { %v3814_v36 = vadd.f32 %v3813_v63, %v6009_v54 }
0x58ed   :  { %4717 = vtanh.f32 %v3814_v36 }
0x58f3   :  { %v4718_v18 = vpop.eup %4717 }
0x58f4   :  { %3821 = vrot.lane.b32.xlu2 %v4718_v18, %s5097_s20  ;;  %v3817_v3 = vmul.f32 0.5, %v4718_v18 }
0x58f6   :  { %v3818_v53 = vadd.f32 0.5, %v3817_v3 }
0x58f8   :  { %v3819_v32 = vmul.f32 %v3818_v53, %v5975_v52 }
0x594e   :  { %v3822_v38 = vpop.permute.xlu2 %3821 }
0x594f   :  { %v3824_v15 = vmul.f32 %v3822_v38, %v3818_v53 }
0x5951   :  { %3826 = vrot.lane.b32.xlu0 %v3824_v15, %s5098_s21 }
0x59c3   :  { %v3827_v51 = vpop.permute.xlu0 %3826 }
0x59c4   :  { %v3829_v39 = vadd.f32 %v3827_v51, %v3819_v32 }
0x59c6   :  { %4719 = vtanh.f32 %v3829_v39 }
0x59cc   :  { %v4720_v43 = vpop.eup %4719 }
0x59cd   :  { %3832 = vrot.lane.b32.xlu1 %v4720_v43, %s5097_s20 }
0x5a3f   :  { %v3833_v11 = vpop.permute.xlu1 %3832 }
0x5a40   :  { %v3835_v40 = vmul.f32 %v3833_v11, %v3818_v53 }
0x5a42   :  { %3837 = vrot.lane.b32.xlu2 %v3835_v40, %s5098_s21 }
0x5a9c   :  { %v3838_v14 = vpop.permute.xlu2 %3837 }
0x5a9d   :  { %4429 = vmatmul.msk.f32.vlgmr.msrb.gmra.mxu1 %vm304_vm0, %v3838_v14 }
0x5a9e   :  { %4213 = vmatpush.msrb.mxu1 %v6322_v56 }
0x5aa0   :  { %4214 = vmatpush.msrb.mxu1 %v6325_v62 }
0x5aa2   :  { %4215 = vmatpush.msrb.mxu1 %v6328_v16 }
0x5aa4   :  { %4216 = vmatpush.msrb.mxu1 %v6331_v4 }
0x5b1a   :  { %v3858_v48 = vpop.f32.mrf.mxu1 }
0x5b1b   :  { %v3859_v10 = vadd.f32 %v3858_v48, %v6047_v0 }
0x5b1d   :  { %4721 = vtanh.f32 %v3859_v10 }
0x5b23   :  { %v4722_v49 = vpop.eup %4721 }
0x5b24   :  { %3866 = vrot.lane.b32.xlu0 %v4722_v49, %s5097_s20  ;;  %v3862_v50 = vmul.f32 0.5, %v4722_v49 }
0x5b26   :  { %v3863_v21 = vadd.f32 0.5, %v3862_v50 }
0x5b28   :  { %v3864_v56 = vmul.f32 %v3863_v21, %v6017_v34 }
0x5b96   :  { %v3867_v22 = vpop.permute.xlu0 %3866 }
0x5b97   :  { %v3869_v7 = vmul.f32 %v3867_v22, %v3863_v21 }
0x5b99   :  { %3871 = vrot.lane.b32.xlu1 %v3869_v7, %s5098_s21 }
0x5c0b   :  { %v3872_v62 = vpop.permute.xlu1 %3871 }
0x5c0c   :  { %v3874_v24 = vadd.f32 %v3872_v62, %v3864_v56 }
0x5c0e   :  { %4723 = vtanh.f32 %v3874_v24 }
0x5c14   :  { %v4724_v16 = vpop.eup %4723 }
0x5c15   :  { %3877 = vrot.lane.b32.xlu2 %v4724_v16, %s5097_s20 }
0x5c6f   :  { %v3878_v4 = vpop.permute.xlu2 %3877 }
0x5c70   :  { %v3880_v60 = vmul.f32 %v3878_v4, %v3863_v21 }
0x5c72   :  { %v4251_v59 = vrot.slane %v3880_v60, 2  ;;  %3882 = vrot.lane.b32.xlu0 %v3880_v60, %s5098_s21 }
0x5c74   :  { %v6447_v41 = vsel %vm4260_vm3, %v6399_v35, %v4251_v59 }
0x5ce4   :  { %v3883_v8 = vpop.permute.xlu0 %3882 }
0x5ce5   :  { %4430 = vmatmul.msk.f32.vlgmr.msra.gmra.mxu2 %vm304_vm0, %v3883_v8 }
0x5d68   :  { %v3903_v5 = vpop.f32.mrf.mxu2 }
0x5d69   :  { %v3904_v25 = vadd.f32 %v3903_v5, %v6083_v17 }
0x5d6b   :  { %4725 = vtanh.f32 %v3904_v25 }
0x5d71   :  { %v4726_v28 = vpop.eup %4725 }
0x5d72   :  { %3911 = vrot.lane.b32.xlu1 %v4726_v28, %s5097_s20  ;;  %v3907_v27 = vmul.f32 0.5, %v4726_v28 }
0x5d74   :  { %v3908_v44 = vadd.f32 0.5, %v3907_v27 }
0x5d76   :  { %v3909_v47 = vmul.f32 %v3908_v44, %v5927_v26 }
0x5de4   :  { %v3912_v29 = vpop.permute.xlu1 %3911 }
0x5de5   :  { %v3914_v46 = vmul.f32 %v3912_v29, %v3908_v44 }
0x5de7   :  { %3916 = vrot.lane.b32.xlu2 %v3914_v46, %s5098_s21 }
0x5e41   :  { %v3917_v35 = vpop.permute.xlu2 %3916 }
0x5e42   :  { %v3919_v6 = vadd.f32 %v3917_v35, %v3909_v47 }
0x5e44   :  { %4727 = vtanh.f32 %v3919_v6 }
0x5e4a   :  { %v4728_v20 = vpop.eup %4727 }
0x5e4b   :  { %3922 = vrot.lane.b32.xlu0 %v4728_v20, %s5097_s20 }
0x5ebd   :  { %v3923_v1 = vpop.permute.xlu0 %3922 }
0x5ebe   :  { %v3925_v61 = vmul.f32 %v3923_v1, %v3908_v44 }
0x5ec0   :  { %3927 = vrot.lane.b32.xlu1 %v3925_v61, %s5098_s21 }
0x5f32   :  { %v3928_v23 = vpop.permute.xlu1 %3927 }
0x5f33   :  { %4431 = vmatmul.msk.f32.vlgmr.msra.gmra.mxu3 %vm304_vm0, %v3928_v23 }
0x5fb6   :  { %v3948_v58 = vpop.f32.mrf.mxu3 }
0x5fb7   :  { %v3949_v19 = vadd.f32 %v3948_v58, %v5963_v37 }
0x5fb9   :  { %4729 = vtanh.f32 %v3949_v19 }
0x5fbf   :  { %v4730_v42 = vpop.eup %4729 }
0x5fc0   :  { %3956 = vrot.lane.b32.xlu2 %v4730_v42, %s5097_s20  ;;  %v3952_v45 = vmul.f32 0.5, %v4730_v42 }
0x5fc2   :  { %v3953_v2 = vadd.f32 0.5, %v3952_v45 }
0x5fc4   :  { %v3954_v30 = vmul.f32 %v3953_v2, %v5920_v57 }
0x601a   :  { %v3957_v13 = vpop.permute.xlu2 %3956 }
0x601b   :  { %v3959_v12 = vmul.f32 %v3957_v13, %v3953_v2 }
0x601d   :  { %3961 = vrot.lane.b32.xlu0 %v3959_v12, %s5098_s21 }
0x608f   :  { %v3962_v31 = vpop.permute.xlu0 %3961 }
0x6090   :  { %v3964_v55 = vadd.f32 %v3962_v31, %v3954_v30 }
0x6092   :  { %4731 = vtanh.f32 %v3964_v55 }
0x6098   :  { %v4732_v33 = vpop.eup %4731 }
0x6099   :  { %3967 = vrot.lane.b32.xlu1 %v4732_v33, %s5097_s20 }
0x610b   :  { %v3968_v63 = vpop.permute.xlu1 %3967 }
0x610c   :  { %v3970_v36 = vmul.f32 %v3968_v63, %v3953_v2 }
0x610e   :  { %3972 = vrot.lane.b32.xlu2 %v3970_v36, %s5098_s21 }
0x6168   :  { %v3973_v18 = vpop.permute.xlu2 %3972 }
0x6169   :  { %4432 = vmatmul.msk.f32.vlgmr.msrb.gmra.mxu0 %vm304_vm0, %v3973_v18 }
0x61e6   :  { %v3993_v3 = vpop.f32.mrf.mxu0 }
0x61e7   :  { %v3994_v53 = vadd.f32 %v3993_v3, %v6009_v54 }
0x61e9   :  { %4733 = vtanh.f32 %v3994_v53 }
0x61ef   :  { %v4734_v38 = vpop.eup %4733 }
0x61f0   :  { %4001 = vrot.lane.b32.xlu0 %v4734_v38, %s5097_s20  ;;  %v3997_v15 = vmul.f32 0.5, %v4734_v38 }
0x61f2   :  { %v3998_v32 = vadd.f32 0.5, %v3997_v15 }
0x61f4   :  { %v3999_v43 = vmul.f32 %v3998_v32, %v5975_v52 }
0x6262   :  { %v4002_v51 = vpop.permute.xlu0 %4001 }
0x6263   :  { %v4004_v39 = vmul.f32 %v4002_v51, %v3998_v32 }
0x6265   :  { %4006 = vrot.lane.b32.xlu1 %v4004_v39, %s5098_s21 }
0x62d7   :  { %v4007_v11 = vpop.permute.xlu1 %4006 }
0x62d8   :  { %v4009_v40 = vadd.f32 %v4007_v11, %v3999_v43 }
0x62da   :  { %4735 = vtanh.f32 %v4009_v40 }
0x62e0   :  { %v4736_v14 = vpop.eup %4735 }
0x62e1   :  { %4012 = vrot.lane.b32.xlu2 %v4736_v14, %s5097_s20 }
0x633b   :  { %v4013_v48 = vpop.permute.xlu2 %4012 }
0x633c   :  { %v4015_v10 = vmul.f32 %v4013_v48, %v3998_v32 }
0x633e   :  { %4017 = vrot.lane.b32.xlu0 %v4015_v10, %s5098_s21 }
0x63b0   :  { %v4018_v49 = vpop.permute.xlu0 %4017 }
0x63b1   :  { %4433 = vmatmul.msk.f32.vlgmr.msra.gmra.mxu1 %vm304_vm0, %v4018_v49 }
0x642e   :  { %v4038_v50 = vpop.f32.mrf.mxu1 }
0x642f   :  { %v4039_v21 = vadd.f32 %v4038_v50, %v6047_v0  ;;  %v292_v50 = vld [vmem:[#allocation17 + $0x10] sm:$0xff] }
0x6431   :  { %4737 = vtanh.f32 %v4039_v21  ;;  %v291_v21 = vld [vmem:[#allocation17 + $0x8] sm:$0xff] }
0x6437   :  { %v4738_v22 = vpop.eup %4737 }
0x6438   :  { %4046 = vrot.lane.b32.xlu1 %v4738_v22, %s5097_s20  ;;  %v4042_v7 = vmul.f32 0.5, %v4738_v22  ;;  %v290_v22 = vld [vmem:[#allocation17] sm:$0xff] }
0x643a   :  { %v4043_v56 = vadd.f32 0.5, %v4042_v7 }
0x643c   :  { %v4044_v16 = vmul.f32 %v4043_v56, %v6017_v34 }
0x64aa   :  { %v4047_v62 = vpop.permute.xlu1 %4046 }
0x64ab   :  { %v4049_v24 = vmul.f32 %v4047_v62, %v4043_v56 }
0x64ad   :  { %4051 = vrot.lane.b32.xlu2 %v4049_v24, %s5098_s21 }
0x6507   :  { %v4052_v4 = vpop.permute.xlu2 %4051 }
0x6508   :  { %v4054_v60 = vadd.f32 %v4052_v4, %v4044_v16 }
0x650a   :  { %4739 = vtanh.f32 %v4054_v60 }
0x6510   :  { %v4740_v59 = vpop.eup %4739 }
0x6511   :  { %4057 = vrot.lane.b32.xlu0 %v4740_v59, %s5097_s20 }
0x6583   :  { %v4058_v8 = vpop.permute.xlu0 %4057 }
0x6584   :  { %v6476_v5 = vmul.f32 %v4058_v8, %v4043_v56  ;;  %v4468_v8 = vld [vmem:[%s6538_s12] ss:$0 sm:$0xff] }
0x6586   :  { %4062 = vrot.lane.b32.xlu1 %v6476_v5, %s5098_s21 }
0x65f8   :  { %v4063_v25 = vpop.permute.xlu1 %4062 }
0x65f9   :  { %4434 = vmatmul.msk.f32.vlgmr.msrb.gmra.mxu2 %vm304_vm0, %v4063_v25 }
0x667c   :  { %v4083_v28 = vpop.f32.mrf.mxu2 }
0x667d   :  { %v4084_v27 = vadd.f32 %v4083_v28, %v6083_v17 }
0x667f   :  { %4741 = vtanh.f32 %v4084_v27 }
0x6685   :  { %v4742_v44 = vpop.eup %4741 }
0x6686   :  { %4091 = vrot.lane.b32.xlu2 %v4742_v44, %s5097_s20  ;;  %v4087_v29 = vmul.f32 0.5, %v4742_v44 }
0x6688   :  { %v4088_v46 = vadd.f32 0.5, %v4087_v29 }
0x668a   :  { %v4089_v6 = vmul.f32 %v4088_v46, %v5927_v26 }
0x66e0   :  { %v4092_v47 = vpop.permute.xlu2 %4091 }
0x66e1   :  { %v4094_v35 = vmul.f32 %v4092_v47, %v4088_v46 }
0x66e3   :  { %4096 = vrot.lane.b32.xlu0 %v4094_v35, %s5098_s21 }
0x6755   :  { %v4097_v20 = vpop.permute.xlu0 %4096 }
0x6756   :  { %v4099_v1 = vadd.f32 %v4097_v20, %v4089_v6 }
0x6758   :  { %4743 = vtanh.f32 %v4099_v1 }
0x675e   :  { %v4744_v61 = vpop.eup %4743 }
0x675f   :  { %4102 = vrot.lane.b32.xlu1 %v4744_v61, %s5097_s20 }
0x67d1   :  { %v4103_v23 = vpop.permute.xlu1 %4102 }
0x67d2   :  { %v4105_v17 = vmul.f32 %v4103_v23, %v4088_v46 }
0x67d4   :  { %4107 = vrot.lane.b32.xlu2 %v4105_v17, %s5098_s21 }
0x682e   :  { %v4108_v58 = vpop.permute.xlu2 %4107 }
0x682f   :  { %4435 = vmatmul.msk.f32.vlgmr.msrb.gmra.mxu3 %vm304_vm0, %v4108_v58 }
0x68b2   :  { %v4128_v19 = vpop.f32.mrf.mxu3 }
0x68b3   :  { %v4129_v42 = vadd.f32 %v4128_v19, %v5963_v37 }
0x68b5   :  { %4745 = vtanh.f32 %v4129_v42 }
0x68bb   :  { %v4746_v45 = vpop.eup %4745 }
0x68bc   :  { %4136 = vrot.lane.b32.xlu0 %v4746_v45, %s5097_s20  ;;  %v4132_v26 = vmul.f32 0.5, %v4746_v45 }
0x68be   :  { %v4133_v2 = vadd.f32 0.5, %v4132_v26 }
0x68c0   :  { %v4134_v30 = vmul.f32 %v4133_v2, %v5920_v57 }
0x692e   :  { %v4137_v13 = vpop.permute.xlu0 %4136 }
0x692f   :  { %v4139_v12 = vmul.f32 %v4137_v13, %v4133_v2 }
0x6931   :  { %4141 = vrot.lane.b32.xlu1 %v4139_v12, %s5098_s21 }
0x69a3   :  { %v4142_v31 = vpop.permute.xlu1 %4141 }
0x69a4   :  { %v4144_v55 = vadd.f32 %v4142_v31, %v4134_v30 }
0x69a6   :  { %4747 = vtanh.f32 %v4144_v55 }
0x69ac   :  { %v4748_v33 = vpop.eup %4747 }
0x69ad   :  { %4147 = vrot.lane.b32.xlu2 %v4748_v33, %s5097_s20 }
0x6a07   :  { %v4148_v63 = vpop.permute.xlu2 %4147 }
0x6a08   :  { %v4150_v37 = vmul.f32 %v4148_v63, %v4133_v2 }
0x6a0a   :  { %4152 = vrot.lane.b32.xlu0 %v4150_v37, %s5098_s21 }
0x6a7c   :  { %v4153_v36 = vpop.permute.xlu0 %4152 }
0x6a7d   :  { %4436 = vmatmul.msk.f32.vlgmr.msra.gmra.mxu0 %vm304_vm0, %v4153_v36 }
0x6afa   :  { %v4173_v18 = vpop.f32.mrf.mxu0 }
0x6afb   :  { %v4174_v3 = vadd.f32 %v4173_v18, %v6009_v54 }
0x6afd   :  { %4749 = vtanh.f32 %v4174_v3 }
0x6b03   :  { %v4750_v53 = vpop.eup %4749 }
0x6b04   :  { %4181 = vrot.lane.b32.xlu1 %v4750_v53, %s5097_s20  ;;  %v4177_v57 = vmul.f32 0.5, %v4750_v53 }
0x6b06   :  { %v4178_v38 = vadd.f32 0.5, %v4177_v57 }
0x6b08   :  { %v4179_v51 = vmul.f32 %v4178_v38, %v5975_v52  ;;  %v293_v52 = vld [vmem:[#allocation17 + $0x18] sm:$0xff] }
0x6b09   :  { %4296 = vmatpush.msra.mxu2 %v293_v52 }
0x6b0b   :  { %4297 = vmatpush.msra.mxu2 %v292_v50 }
0x6b0d   :  { %4298 = vmatpush.msra.mxu2 %v291_v21 }
0x6b0f   :  { %4299 = vmatpush.msra.mxu2 %v290_v22 }
0x6b76   :  { %v4182_v15 = vpop.permute.xlu1 %4181 }
0x6b77   :  { %v4184_v32 = vmul.f32 %v4182_v15, %v4178_v38 }
0x6b79   :  { %4186 = vrot.lane.b32.xlu2 %v4184_v32, %s5098_s21 }
0x6bd3   :  { %v4187_v39 = vpop.permute.xlu2 %4186 }
0x6bd4   :  { %v4189_v43 = vadd.f32 %v4187_v39, %v4179_v51 }
0x6bd6   :  { %4751 = vtanh.f32 %v4189_v43 }
0x6bdc   :  { %v4752_v11 = vpop.eup %4751 }
0x6bdd   :  { %4192 = vrot.lane.b32.xlu0 %v4752_v11, %s5097_s20 }
0x6c4f   :  { %v4193_v40 = vpop.permute.xlu0 %4192 }
0x6c50   :  { %v4195_v54 = vmul.f32 %v4193_v40, %v4178_v38 }
0x6c52   :  { %4197 = vrot.lane.b32.xlu1 %v4195_v54, %s5098_s21 }
0x6cc4   :  { %v4198_v14 = vpop.permute.xlu1 %4197 }
0x6cc5   :  { %4437 = vmatmul.msk.f32.vlgmr.msrb.gmra.mxu1 %vm304_vm0, %v4198_v14 }
0x6d42   :  { %v4218_v48 = vpop.f32.mrf.mxu1 }
0x6d43   :  { %v4219_v10 = vadd.f32 %v4218_v48, %v6047_v0 }
0x6d45   :  { %4753 = vtanh.f32 %v4219_v10 }
0x6d4b   :  { %v4754_v49 = vpop.eup %4753 }
0x6d4c   :  { %4226 = vrot.lane.b32.xlu2 %v4754_v49, %s5097_s20  ;;  %v4222_v7 = vmul.f32 0.5, %v4754_v49 }
0x6d4e   :  { %v4223_v56 = vadd.f32 0.5, %v4222_v7 }
0x6d54   :  { %4272 = vrot.lane.b32.xlu2 %v6223_v9, %s5098_s21  ;;  %v4224_v9 = vmul.f32 %v4223_v56, %v6017_v34 }
0x6da6   :  { %v4227_v62 = vpop.permute.xlu2 %4226 }
0x6da7   :  { %v4229_v24 = vmul.f32 %v4227_v62, %v4223_v56 }
0x6da9   :  { %4231 = vrot.lane.b32.xlu0 %v4229_v24, %s5098_s21 }
0x6dae   :  { %v4273_v0 = vpop.permute.xlu2 %4272 }
0x6daf   :  { %4438 = vmatmul.msk.f32.vlgmr.msra.gmra.mxu2 %vm304_vm0, %v4273_v0 }
0x6db1   :  { %4274 = vrot.lane.b32.xlu0 %v6447_v41, %s5098_s21 }
0x6e1b   :  { %v4232_v16 = vpop.permute.xlu0 %4231 }
0x6e1c   :  { %v4234_v4 = vadd.f32 %v4232_v16, %v4224_v9 }
0x6e1e   :  { %4755 = vtanh.f32 %v4234_v4 }
0x6e23   :  { %v4275_v60 = vpop.permute.xlu0 %4274 }
0x6e24   :  { %v4756_v59 = vpop.eup %4755  ;;  %4439 = vmatmul.msk.f32.gmra.mxu2 %vm304_vm0, %v4275_v60 }
0x6e25   :  { %4237 = vrot.lane.b32.xlu1 %v4756_v59, %s5097_s20 }
0x6e32   :  { %v4301_v25 = vpop.f32.mrf.mxu2 }
0x6e33   :  { %v4302_v28 = vadd.f32 %v4468_v8, %v4301_v25 }
0x6e35   :  { %4310 = vst [vmem:[#allocation19] sm:$0xff] %v4302_v28 }
0x6e97   :  { %v4238_v27 = vpop.permute.xlu1 %4237 }
0x6e98   :  { %v4240_v41 = vmul.f32 %v4238_v27, %v4223_v56 }
0x6e9a   :  { %v4254_v44 = vrot.slane %v4240_v41, 6 }
0x6e9c   :  { %v4265_v34 = vsel %vm4256_vm1, %v6476_v5, %v4254_v44 }
0x6e9d   :  { %4276 = vrot.lane.b32.xlu1 %v4265_v34, %s5098_s21 }
0x6ea7   :  { %v4304_v29 = vpop.f32.mrf.mxu2 }
0x6ea8   :  { %v4305_v46 = vadd.f32 %v4468_v8, %v4304_v29 }
0x6eaa   :  { %4311 = vst [vmem:[#allocation19 + $0x8] sm:$0xff] %v4305_v46 }
0x6f0f   :  { %v4277_v47 = vpop.permute.xlu1 %4276 }
0x6f10   :  { %4440 = vmatmul.msk.f32.gmra.mxu2 %vm304_vm0, %v4277_v47 }
0x6f93   :  { %v4307_v35 = vpop.f32.mrf.mxu2 }
0x6f94   :  { %v4308_v6 = vadd.f32 %v4468_v8, %v4307_v35 }
0x6f96   :  { %4312 = vst [vmem:[#allocation19 + $0x10] sm:$0xf] %v4308_v6 }
0x6f97   :  { %4325 = dma.vmem_to_hbm [thread:$0]  %s4318_s30, 384, %s4320_s8, [#allocation4], %s5083_s16, %s5083_s16, %s5084_s17  }
0x6f98   :  { %5080 = dma.done.wait [#allocation4], 384  }
0x6f99   :  { %5081 = vsyncadd [#allocation4], 4294966912 }
0x6f9a   :  { %4330 = vsyncpa [#allocation3], 1 }
0x6f9b   :  { %4331 = vsyncpa [#allocation6], 1 }
0x6f9c   :  { %4332 = vsyncpa [#allocation9], 1 }
0x6f9d   :  { %4333 = vsyncpa [#allocation12], 1 }
0x6f9e   :  { %4334 = vsyncpa [#allocation15], 1 }
0x6f9f   :  { %4335 = vsyncpa [#allocation18], 1 }
0x6fa0   :  { %4336 = vsyncpa [#allocation4], 1 }

</bundles_post_ra>
